<compile_context>
chip_gen: v6e
topology: v6e:2x2x1
jax: 0.10.0
libtpu: 0.0.40
codegen_flags: <defaults>
</compile_context>

<pallas_src>
import math

import jax
import jax.numpy as jnp
from jax.experimental import pallas as pl
from jax.experimental.pallas import tpu as pltpu

# ------------------------- configuration (small, synthetic) ------------------
C_IN = 8              # in_channels of the box head
POOL = 4              # POOLER_RESOLUTION (P)
SPATIAL_SCALE = 0.25  # feature stride 4
SAMPLING_RATIO = 1
REP_SIZE = 128        # MLP_HEAD_DIM (fc6 / fc7 width)
NUM_CLASSES = 8
BOX_DIM = NUM_CLASSES * 4
D_IN = C_IN * POOL * POOL        # 128
HEAD_PAD = 128                   # cls(8) | box(32) padded to one 128-lane slab
QC = POOL * C_IN                 # pooled lanes per row: index q*C + c  (== 32)
ROW_TILE_MAX = 128               # ROI rows per grid step (128 fills v5e's MXU;
                                 # use 256 on v6e/v7x, keep >=2 grid steps on v7x)


def _round_up(x, m):
    return ((x + m - 1) // m) * m


def _nbytes(shape, dtype):
    return math.prod(shape) * jnp.dtype(dtype).itemsize


# -------------------- per-ROI bilinear interpolation weights -----------------
def roi_interp_weights(rois, size_h, size_w, pool, sr, spatial_scale):
    """Small per-ROI separable interpolation matrices (NOT the big one-hot einsum).

    rois: [R, 5] = (batch_idx, x1, y1, x2, y2).
    Returns batch_idx [R] int32, wy [R, pool, H], wx [R, pool, W] (f32).
    """
    b = rois[:, 0].astype(jnp.int32)
    x1 = rois[:, 1] * spatial_scale
    y1 = rois[:, 2] * spatial_scale
    x2 = rois[:, 3] * spatial_scale
    y2 = rois[:, 4] * spatial_scale
    roi_w = jnp.maximum(x2 - x1, 1.0)
    roi_h = jnp.maximum(y2 - y1, 1.0)
    bin_w = roi_w / pool
    bin_h = roi_h / pool

    grid_p = jnp.arange(pool, dtype=jnp.float32)
    grid_s = (jnp.arange(sr, dtype=jnp.float32) + 0.5) / sr
    off = (grid_p[:, None] + grid_s[None, :]).reshape(-1)          # [pool*sr]
    ys = y1[:, None] + off[None, :] * bin_h[:, None]               # [R, pool*sr]
    xs = x1[:, None] + off[None, :] * bin_w[:, None]               # [R, pool*sr]

    def interp(coords, size):
        # Detectron1 rule: samples with coord < -1 or > size contribute zero.
        valid = ((coords >= -1.0) & (coords <= float(size))).astype(jnp.float32)
        c = jnp.clip(coords, 0.0, size - 1.0)
        c0 = jnp.floor(c)
        frac = c - c0
        i0 = c0.astype(jnp.int32)
        i1 = jnp.minimum(i0 + 1, size - 1)
        w = (jax.nn.one_hot(i0, size, dtype=jnp.float32) * (1.0 - frac)[..., None]
             + jax.nn.one_hot(i1, size, dtype=jnp.float32) * frac[..., None])
        return w * valid[..., None]

    wy = interp(ys, size_h).reshape(-1, pool, sr, size_h).mean(axis=2)   # [R,pool,H]
    wx = interp(xs, size_w).reshape(-1, pool, sr, size_w).mean(axis=2)   # [R,pool,W]
    return b, wy, wx


def build_kx(wx, channels):
    """x-interp as kron(wx^T, I_C): kx[r, w*C+c, q*C+c'] = wx[r,q,w] * (c==c')."""
    R, pool, W = wx.shape
    eye = jnp.eye(channels, dtype=wx.dtype)
    kx = wx.transpose(0, 2, 1)[:, :, None, :, None] * eye[None, None, :, None, :]
    return kx.reshape(R, W * channels, pool * channels)             # [R, W*C, P*C]


# ---------------- one-time parameter preparation (hoisted out of forward) ----
def prepare_params(params):
    w6, b6, w7, b7, wc, bc, wb, bb = params
    # fc6 rows permuted from the canonical (c, p, q) flatten order to the
    # kernel's (p, q, c) pooled layout, pre-split along p for 4 partial dots.
    w6p = (w6.reshape(C_IN, POOL, POOL, REP_SIZE)
             .transpose(1, 2, 0, 3)
             .reshape(POOL, QC, REP_SIZE)
             .astype(jnp.bfloat16))
    # cls | box fused into one lane-dense 128-wide predictor head.
    wh = jnp.zeros((REP_SIZE, HEAD_PAD), jnp.float32)
    wh = wh.at[:, :NUM_CLASSES].set(wc)
    wh = wh.at[:, NUM_CLASSES:NUM_CLASSES + BOX_DIM].set(wb)
    bh = jnp.zeros((1, HEAD_PAD), jnp.float32)
    bh = bh.at[:, :NUM_CLASSES].set(bc)
    bh = bh.at[:, NUM_CLASSES:NUM_CLASSES + BOX_DIM].set(bb)
    return (w6p, b6, w7.astype(jnp.bfloat16), b7, wh.astype(jnp.bfloat16), bh)


# ------------------------------ Pallas kernel ---------------------------------
def _box_head_kernel(bidx_sm,                               # scalar prefetch (SMEM): [r_pad] int32
                     wy_ref, kx_ref, feat_hbm,              # inputs
                     w6_ref, b6_ref, w7_ref, b7_ref, wh_ref, bh_ref,
                     feat_out_ref, head_ref,                # outputs
                     fslab, copy_sem, pooled_sc):           # scratch
    tr = wy_ref.shape[0]
    base = pl.program_id(0) * tr

    def start_fetch(r, slot):
        b = bidx_sm[base + r]
        pltpu.make_async_copy(feat_hbm.at[b], fslab.at[slot], copy_sem.at[slot]).start()

    # ---- stage 1: per-ROI ROIAlign (double-buffered DMA gather + 2 matmuls) ----
    start_fetch(0, 0)
    for r in range(tr):                # static unroll (tr <= ROW_TILE_MAX)
        slot = r & 1
        pltpu.make_async_copy(feat_hbm.at[0], fslab.at[slot], copy_sem.at[slot]).wait()
        if r + 1 < tr:
            start_fetch(r + 1, 1 - slot)
        # y interpolation: [P, H] @ [H, W*C] -> [P, W*C]
        tmp = jnp.dot(wy_ref[r], fslab[slot], preferred_element_type=jnp.float32)
        # x interpolation via kron(wx, I_C): [P, W*C] @ [W*C, P*C] -> [P, P*C]
        pooled_sc[r] = jnp.dot(tmp, kx_ref[r], preferred_element_type=jnp.float32)

    # ---- stage 2: batched MLP head over the whole ROI tile (MXU row fill) ----
    pooled_all = pooled_sc[...]                              # [tr, P, QC] f32
    acc = jnp.zeros((tr, REP_SIZE), jnp.float32)
    for p in range(POOL):              # fc6 as 4 partial dots -> no in-kernel flatten/relayout
        xp = pooled_all[:, p, :].astype(jnp.bfloat16)        # [tr, QC]
        acc = acc + jnp.dot(xp, w6_ref[p], preferred_element_type=jnp.float32)
    h = jnp.maximum(acc + b6_ref[...], 0.0)                  # fc6 + ReLU (f32 epilogue; v5e-safe)
    h = jnp.maximum(
        jnp.dot(h.astype(jnp.bfloat16), w7_ref[...],
                preferred_element_type=jnp.float32) + b7_ref[...], 0.0)   # fc7 + ReLU
    feat_out_ref[...] = h              # extractor output (f32; bf16 possible if consumers tolerate)
    head_ref[...] = jnp.dot(h.astype(jnp.bfloat16), wh_ref[...],
                            preferred_element_type=jnp.float32) + bh_ref[...]


# ------------------------------ wrapper ---------------------------------------
def roi_box_head_pallas(feats2, bidx, wy, kx, prepped):
    """feats2: [N, H, W*C] f32 (HBM); bidx: [R] int32; wy: [R,P,H]; kx: [R,W*C,P*C]."""
    w6p, b6, w7b, b7, whb, bh = prepped
    N, H, WC = feats2.shape
    R = bidx.shape[0]

    # Row tiling: pad R only to a multiple of 8 when it fits one tile.
    row_tile = min(ROW_TILE_MAX, _round_up(R, 8))
    r_pad = _round_up(R, row_tile)
    if r_pad != R:
        pad = r_pad - R
        bidx = jnp.pad(bidx, (0, pad))                        # padded ROIs point at image 0
        wy = jnp.pad(wy, ((0, pad), (0, 0), (0, 0)))          # zero interp weights -> bias-only
        kx = jnp.pad(kx, ((0, pad), (0, 0), (0, 0)))          #   rows; caller slices them off
    grid = (r_pad // row_tile,)

    # VMEM budget computed from actual tile / weight bytes (with 2x headroom).
    streamed = 2 * (_nbytes((row_tile,) + wy.shape[1:], wy.dtype)
                    + _nbytes((row_tile,) + kx.shape[1:], kx.dtype)
                    + _nbytes((row_tile, REP_SIZE), jnp.float32)
                    + _nbytes((row_tile, HEAD_PAD), jnp.float32))
    weight_bytes = sum(int(a.size) * a.dtype.itemsize
                       for a in (w6p, b6, w7b, b7, whb, bh))
    scratch_bytes = (_nbytes((2, H, WC), jnp.float32)
                     + _nbytes((row_tile, POOL, QC), jnp.float32))
    vmem_limit = max(2 * (streamed + 2 * weight_bytes + scratch_bytes), 8 * 1024 * 1024)

    flops = 2 * r_pad * (POOL * H * WC + POOL * WC * QC       # ROIAlign matmuls
                         + D_IN * REP_SIZE + REP_SIZE * REP_SIZE
                         + REP_SIZE * HEAD_PAD)
    bytes_accessed = (r_pad * H * WC * 4                      # per-ROI feature slab DMA
                      + int(wy.size) * 4 + int(kx.size) * 4
                      + weight_bytes
                      + r_pad * (REP_SIZE + HEAD_PAD) * 4)
    cost = pl.CostEstimate(flops=flops, transcendentals=0,
                           bytes_accessed=bytes_accessed)

    def run(single_buffer_weights):
        def resident(shape):
            kwargs = {}
            if single_buffer_weights:
                kwargs["pipeline_mode"] = pl.Buffered(1)      # grid-invariant blocks
            return pl.BlockSpec(shape, lambda i, b: tuple(0 for _ in shape), **kwargs)

        grid_spec = pltpu.PrefetchScalarGridSpec(
            num_scalar_prefetch=1,
            grid=grid,
            in_specs=[
                pl.BlockSpec((row_tile,) + wy.shape[1:], lambda i, b: (i, 0, 0)),
                pl.BlockSpec((row_tile,) + kx.shape[1:], lambda i, b: (i, 0, 0)),
                pl.BlockSpec(memory_space=pl.ANY),            # features stay in HBM
                resident(w6p.shape), resident(b6.shape),
                resident(w7b.shape), resident(b7.shape),
                resident(whb.shape), resident(bh.shape),
            ],
            out_specs=[
                pl.BlockSpec((row_tile, REP_SIZE), lambda i, b: (i, 0)),
                pl.BlockSpec((row_tile, HEAD_PAD), lambda i, b: (i, 0)),
            ],
            scratch_shapes=[
                pltpu.VMEM((2, H, WC), jnp.float32),          # double-buffered feature slab
                pltpu.SemaphoreType.DMA((2,)),
                pltpu.VMEM((row_tile, POOL, QC), jnp.float32),  # pooled features for this tile
            ],
        )
        return pl.pallas_call(
            _box_head_kernel,
            grid_spec=grid_spec,
            out_shape=[
                jax.ShapeDtypeStruct((r_pad, REP_SIZE), jnp.float32),
                jax.ShapeDtypeStruct((r_pad, HEAD_PAD), jnp.float32),
            ],
            compiler_params=pltpu.CompilerParams(
                dimension_semantics=("parallel",),            # ROI tiles shard across TCs (v7x)
                vmem_limit_bytes=int(vmem_limit),
            ),
            cost_estimate=cost,
        )(bidx, wy, kx, feats2, w6p, b6, w7b, b7, whb, bh)

    try:
        feat, head = run(single_buffer_weights=True)
    except Exception:   # pipeline_mode=pl.Buffered(1) unsupported -> default double-buffering
        feat, head = run(single_buffer_weights=False)

    feat = feat[:R]
    cls_logits = head[:R, :NUM_CLASSES]
    box_regression = head[:R, NUM_CLASSES:NUM_CLASSES + BOX_DIM]
    return feat, cls_logits, box_regression


def roi_box_head_forward(features, rois, prepped):
    """Inference forward of ROIBoxHead (feature_extractor + predictor)."""
    N, C, H, W = features.shape
    bidx, wy, wx = roi_interp_weights(rois, H, W, POOL, SAMPLING_RATIO, SPATIAL_SCALE)
    kx = build_kx(wx, C)                                              # [R, W*C, P*C]
    feats2 = jnp.transpose(features, (0, 2, 3, 1)).reshape(N, H, W * C)   # [N, H, W*C]
    x, class_logits, box_regression = roi_box_head_pallas(feats2, bidx, wy, kx, prepped)
    # TODO(synk): post_processor (box decoding + per-class NMS) not implemented.
    return x, class_logits, box_regression


# ------------------------- deterministic parameter init -----------------------
def init_params(key):
    ks = jax.random.split(key, 4)
    w6 = jax.random.normal(ks[0], (D_IN, REP_SIZE), jnp.float32) * 0.02
    b6 = jnp.zeros((1, REP_SIZE), jnp.float32)
    w7 = jax.random.normal(ks[1], (REP_SIZE, REP_SIZE), jnp.float32) * 0.02
    b7 = jnp.zeros((1, REP_SIZE), jnp.float32)
    wc = jax.random.normal(ks[2], (REP_SIZE, NUM_CLASSES), jnp.float32) * 0.01
    bc = jnp.zeros((1, NUM_CLASSES), jnp.float32)
    wb = jax.random.normal(ks[3], (REP_SIZE, BOX_DIM), jnp.float32) * 0.001
    bb = jnp.zeros((1, BOX_DIM), jnp.float32)
    return (w6, b6, w7, b7, wc, bc, wb, bb)


if __name__ == "__main__":
    key = jax.random.PRNGKey(0)
    k_feat, k_box, k_par = jax.random.split(key, 3)

    N, H, W = 2, 16, 16
    IMG = int(H / SPATIAL_SCALE)                         # image size 64
    features = jax.random.normal(k_feat, (N, C_IN, H, W), jnp.float32)

    # 8 proposals per image -> R = 16 ROIs, format (batch, x1, y1, x2, y2)
    R_per, R = 8, 16
    kb1, kb2, kb3, kb4 = jax.random.split(k_box, 4)
    x1 = jax.random.uniform(kb1, (R,), minval=0.0, maxval=IMG - 24.0)
    y1 = jax.random.uniform(kb2, (R,), minval=0.0, maxval=IMG - 24.0)
    bw = jax.random.uniform(kb3, (R,), minval=8.0, maxval=20.0)
    bh_ = jax.random.uniform(kb4, (R,), minval=8.0, maxval=20.0)
    batch_idx = jnp.repeat(jnp.arange(N, dtype=jnp.float32), R_per)
    rois = jnp.stack([batch_idx, x1, y1, x1 + bw, y1 + bh_], axis=1)  # [R, 5]

    params = init_params(k_par)
    prepped = prepare_params(params)                      # one-time weight fuse/permute/cast

    x, cls_logits, box_reg = roi_box_head_forward(features, rois, prepped)
    jax.block_until_ready((x, cls_logits, box_reg))

    # ---- silent correctness check vs a pure-JAX reference (canonical layout) ----
    bidx_r, wy_r, wx_r = roi_interp_weights(rois, H, W, POOL, SAMPLING_RATIO, SPATIAL_SCALE)
    feats_r = features[bidx_r]                                            # [R, C, H, W]
    pooled_ref = jnp.einsum('rph,rchw,rqw->rcpq', wy_r, feats_r, wx_r)    # [R, C, P, P]
    pf = pooled_ref.reshape(R, -1)                                        # canonical (c,p,q)
    w6, b6, w7, b7, wc, bc, wb, bb = params

    def mm(a, w):
        return jnp.dot(a.astype(jnp.bfloat16), w.astype(jnp.bfloat16),
                       preferred_element_type=jnp.float32)

    h_ref = jnp.maximum(mm(pf, w6) + b6, 0.0)
    h_ref = jnp.maximum(mm(h_ref, w7) + b7, 0.0)
    cls_ref = mm(h_ref, wc) + bc
    box_ref = mm(h_ref, wb) + bb

    assert x.shape == (R, REP_SIZE)
    assert cls_logits.shape == (R, NUM_CLASSES)
    assert box_reg.shape == (R, BOX_DIM)
    assert jnp.allclose(x, h_ref, atol=2e-2, rtol=2e-2)
    assert jnp.allclose(cls_logits, cls_ref, atol=2e-2, rtol=2e-2)
    assert jnp.allclose(box_reg, box_ref, atol=2e-2, rtol=2e-2)

    print("KERNEL_OK")
</pallas_src>

<mosaic_0001>
module attributes {stable_mosaic.version = 11 : i64} {
  func.func @_box_head_kernel(%arg0: i32, %arg1: memref<16xi32, #tpu.memory_space<smem>>, %arg2: memref<16x4x16xf32, #tpu.memory_space<vmem>>, %arg3: memref<16x128x32xf32, #tpu.memory_space<vmem>>, %arg4: memref<2x16x128xf32, #tpu.memory_space<any>>, %arg5: memref<4x32x128xbf16, #tpu.memory_space<vmem>>, %arg6: memref<1x128xf32, #tpu.memory_space<vmem>>, %arg7: memref<128x128xbf16, #tpu.memory_space<vmem>>, %arg8: memref<1x128xf32, #tpu.memory_space<vmem>>, %arg9: memref<128x128xbf16, #tpu.memory_space<vmem>>, %arg10: memref<1x128xf32, #tpu.memory_space<vmem>>, %arg11: memref<16x128xf32, #tpu.memory_space<vmem>>, %arg12: memref<16x128xf32, #tpu.memory_space<vmem>>, %arg13: memref<2x16x128xf32, #tpu.memory_space<vmem>>, %arg14: memref<2x!tpu.dma_semaphore, #tpu.memory_space<semaphore_mem>>, %arg15: memref<16x4x32xf32, #tpu.memory_space<vmem>>) attributes {dimension_semantics = [#tpu.dimension_semantics<parallel>], iteration_bounds = array<i64: 1>, scalar_prefetch = 1 : i64, scratch_operands = 3 : i64, tpu.core_type = #tpu.core_type<tc>, window_params = [{transform_indices = @transform_0, window_bounds = array<i64: 16, 4, 16>}, {transform_indices = @transform_1, window_bounds = array<i64: 16, 128, 32>}, {}, {pipeline_mode = #tpu.pipeline_mode<synchronous>, transform_indices = @transform_3, window_bounds = array<i64: 4, 32, 128>}, {pipeline_mode = #tpu.pipeline_mode<synchronous>, transform_indices = @transform_4, window_bounds = array<i64: 1, 128>}, {pipeline_mode = #tpu.pipeline_mode<synchronous>, transform_indices = @transform_5, window_bounds = array<i64: 128, 128>}, {pipeline_mode = #tpu.pipeline_mode<synchronous>, transform_indices = @transform_6, window_bounds = array<i64: 1, 128>}, {pipeline_mode = #tpu.pipeline_mode<synchronous>, transform_indices = @transform_7, window_bounds = array<i64: 128, 128>}, {pipeline_mode = #tpu.pipeline_mode<synchronous>, transform_indices = @transform_8, window_bounds = array<i64: 1, 128>}, {transform_indices = @transform_9, window_bounds = array<i64: 16, 128>}, {transform_indices = @transform_10, window_bounds = array<i64: 16, 128>}]} {
    %c16_i32 = arith.constant 16 : i32
    %0 = arith.muli %arg0, %c16_i32 : i32
    %c0_i32 = arith.constant 0 : i32
    %1 = arith.addi %0, %c0_i32 : i32
    %2 = arith.index_cast %1 : i32 to index
    %3 = memref.load %arg1[%2] : memref<16xi32, #tpu.memory_space<smem>>
    %c0_i32_0 = arith.constant 0 : i32
    %c0_i32_1 = arith.constant 0 : i32
    %c0_i32_2 = arith.constant 0 : i32
    %c0_i32_3 = arith.constant 0 : i32
    %4 = tpu.memref_slice %arg4[%3, %c0_i32_2, %c0_i32_3] : memref<2x16x128xf32, #tpu.memory_space<any>> -> memref<1x16x128xf32, #tpu.memory_space<any>>
    %5 = tpu.memref_squeeze %4 : memref<1x16x128xf32, #tpu.memory_space<any>> -> memref<16x128xf32, #tpu.memory_space<any>>
    %c0_i32_4 = arith.constant 0 : i32
    %c0_i32_5 = arith.constant 0 : i32
    %6 = tpu.memref_slice %arg13[%c0_i32_0, %c0_i32_4, %c0_i32_5] : memref<2x16x128xf32, #tpu.memory_space<vmem>> -> memref<1x16x128xf32, #tpu.memory_space<vmem>>
    %7 = tpu.memref_squeeze %6 : memref<1x16x128xf32, #tpu.memory_space<vmem>> -> memref<16x128xf32, #tpu.memory_space<vmem>>
    %8 = tpu.memref_slice %arg14[%c0_i32_1] : memref<2x!tpu.dma_semaphore, #tpu.memory_space<semaphore_mem>> -> memref<1x!tpu.dma_semaphore, #tpu.memory_space<semaphore_mem>>
    %9 = tpu.memref_squeeze %8 : memref<1x!tpu.dma_semaphore, #tpu.memory_space<semaphore_mem>> -> memref<!tpu.dma_semaphore, #tpu.memory_space<semaphore_mem>>
    tpu.enqueue_dma source(%5 : memref<16x128xf32, #tpu.memory_space<any>>) target(%7 : memref<16x128xf32, #tpu.memory_space<vmem>>) target_semaphore(%9 : memref<!tpu.dma_semaphore, #tpu.memory_space<semaphore_mem>>)
    %c0_i32_6 = arith.constant 0 : i32
    %c0_i32_7 = arith.constant 0 : i32
    %c0_i32_8 = arith.constant 0 : i32
    %c0_i32_9 = arith.constant 0 : i32
    %c0_i32_10 = arith.constant 0 : i32
    %10 = tpu.memref_slice %arg4[%c0_i32_6, %c0_i32_9, %c0_i32_10] : memref<2x16x128xf32, #tpu.memory_space<any>> -> memref<1x16x128xf32, #tpu.memory_space<any>>
    %11 = tpu.memref_squeeze %10 : memref<1x16x128xf32, #tpu.memory_space<any>> -> memref<16x128xf32, #tpu.memory_space<any>>
    %c0_i32_11 = arith.constant 0 : i32
    %c0_i32_12 = arith.constant 0 : i32
    %12 = tpu.memref_slice %arg13[%c0_i32_7, %c0_i32_11, %c0_i32_12] : memref<2x16x128xf32, #tpu.memory_space<vmem>> -> memref<1x16x128xf32, #tpu.memory_space<vmem>>
    %13 = tpu.memref_squeeze %12 : memref<1x16x128xf32, #tpu.memory_space<vmem>> -> memref<16x128xf32, #tpu.memory_space<vmem>>
    %14 = tpu.memref_slice %arg14[%c0_i32_8] : memref<2x!tpu.dma_semaphore, #tpu.memory_space<semaphore_mem>> -> memref<1x!tpu.dma_semaphore, #tpu.memory_space<semaphore_mem>>
    %15 = tpu.memref_squeeze %14 : memref<1x!tpu.dma_semaphore, #tpu.memory_space<semaphore_mem>> -> memref<!tpu.dma_semaphore, #tpu.memory_space<semaphore_mem>>
    tpu.wait_dma2 semaphore(%15 : memref<!tpu.dma_semaphore, #tpu.memory_space<semaphore_mem>>) src(%11 : memref<16x128xf32, #tpu.memory_space<any>>) dst(%13 : memref<16x128xf32, #tpu.memory_space<vmem>>)
    %c1_i32 = arith.constant 1 : i32
    %16 = arith.addi %0, %c1_i32 : i32
    %17 = arith.index_cast %16 : i32 to index
    %18 = memref.load %arg1[%17] : memref<16xi32, #tpu.memory_space<smem>>
    %c1_i32_13 = arith.constant 1 : i32
    %c1_i32_14 = arith.constant 1 : i32
    %c0_i32_15 = arith.constant 0 : i32
    %c0_i32_16 = arith.constant 0 : i32
    %19 = tpu.memref_slice %arg4[%18, %c0_i32_15, %c0_i32_16] : memref<2x16x128xf32, #tpu.memory_space<any>> -> memref<1x16x128xf32, #tpu.memory_space<any>>
    %20 = tpu.memref_squeeze %19 : memref<1x16x128xf32, #tpu.memory_space<any>> -> memref<16x128xf32, #tpu.memory_space<any>>
    %c0_i32_17 = arith.constant 0 : i32
    %c0_i32_18 = arith.constant 0 : i32
    %21 = tpu.memref_slice %arg13[%c1_i32_13, %c0_i32_17, %c0_i32_18] : memref<2x16x128xf32, #tpu.memory_space<vmem>> -> memref<1x16x128xf32, #tpu.memory_space<vmem>>
    %22 = tpu.memref_squeeze %21 : memref<1x16x128xf32, #tpu.memory_space<vmem>> -> memref<16x128xf32, #tpu.memory_space<vmem>>
    %23 = tpu.memref_slice %arg14[%c1_i32_14] : memref<2x!tpu.dma_semaphore, #tpu.memory_space<semaphore_mem>> -> memref<1x!tpu.dma_semaphore, #tpu.memory_space<semaphore_mem>>
    %24 = tpu.memref_squeeze %23 : memref<1x!tpu.dma_semaphore, #tpu.memory_space<semaphore_mem>> -> memref<!tpu.dma_semaphore, #tpu.memory_space<semaphore_mem>>
    tpu.enqueue_dma source(%20 : memref<16x128xf32, #tpu.memory_space<any>>) target(%22 : memref<16x128xf32, #tpu.memory_space<vmem>>) target_semaphore(%24 : memref<!tpu.dma_semaphore, #tpu.memory_space<semaphore_mem>>)
    %c0 = arith.constant 0 : index
    %c0_19 = arith.constant 0 : index
    %c0_20 = arith.constant 0 : index
    %25 = vector.load %arg2[%c0, %c0_19, %c0_20] : memref<16x4x16xf32, #tpu.memory_space<vmem>>, vector<1x4x16xf32>
    %26 = vector.shape_cast %25 : vector<1x4x16xf32> to vector<4x16xf32>
    %c0_21 = arith.constant 0 : index
    %c0_22 = arith.constant 0 : index
    %c0_23 = arith.constant 0 : index
    %27 = vector.load %arg13[%c0_21, %c0_22, %c0_23] : memref<2x16x128xf32, #tpu.memory_space<vmem>>, vector<1x16x128xf32>
    %28 = vector.shape_cast %27 : vector<1x16x128xf32> to vector<16x128xf32>
    %cst = arith.constant dense<0.000000e+00> : vector<4x128xf32>
    %29 = tpu.matmul %26, %28, %cst {dimension_numbers = #tpu.dot_dimension_numbers<[1], [0], [0], [1], [0, 0, 1, 1], [], []>} : vector<4x16xf32>, vector<16x128xf32>, vector<4x128xf32> -> vector<4x128xf32>
    %c0_24 = arith.constant 0 : index
    %c0_25 = arith.constant 0 : index
    %c0_26 = arith.constant 0 : index
    %30 = vector.load %arg3[%c0_24, %c0_25, %c0_26] : memref<16x128x32xf32, #tpu.memory_space<vmem>>, vector<1x128x32xf32>
    %31 = vector.shape_cast %30 : vector<1x128x32xf32> to vector<128x32xf32>
    %cst_27 = arith.constant dense<0.000000e+00> : vector<4x32xf32>
    %32 = tpu.matmul %29, %31, %cst_27 {dimension_numbers = #tpu.dot_dimension_numbers<[1], [0], [0], [1], [0, 0, 1, 1], [], []>} : vector<4x128xf32>, vector<128x32xf32>, vector<4x32xf32> -> vector<4x32xf32>
    %c0_28 = arith.constant 0 : index
    %c0_29 = arith.constant 0 : index
    %c0_30 = arith.constant 0 : index
    %33 = vector.load %arg15[%c0_28, %c0_29, %c0_30] : memref<16x4x32xf32, #tpu.memory_space<vmem>>, vector<1x4x32xf32>
    %34 = vector.shape_cast %33 : vector<1x4x32xf32> to vector<4x32xf32>
    %35 = vector.shape_cast %32 : vector<4x32xf32> to vector<1x4x32xf32>
    tpu.vector_store %arg15[%c0_28, %c0_29, %c0_30], %35 {strides = array<i32>} : memref<16x4x32xf32, #tpu.memory_space<vmem>>, vector<1x4x32xf32>,
    %c0_i32_31 = arith.constant 0 : i32
    %c1_i32_32 = arith.constant 1 : i32
    %c1_i32_33 = arith.constant 1 : i32
    %c0_i32_34 = arith.constant 0 : i32
    %c0_i32_35 = arith.constant 0 : i32
    %36 = tpu.memref_slice %arg4[%c0_i32_31, %c0_i32_34, %c0_i32_35] : memref<2x16x128xf32, #tpu.memory_space<any>> -> memref<1x16x128xf32, #tpu.memory_space<any>>
    %37 = tpu.memref_squeeze %36 : memref<1x16x128xf32, #tpu.memory_space<any>> -> memref<16x128xf32, #tpu.memory_space<any>>
    %c0_i32_36 = arith.constant 0 : i32
    %c0_i32_37 = arith.constant 0 : i32
    %38 = tpu.memref_slice %arg13[%c1_i32_32, %c0_i32_36, %c0_i32_37] : memref<2x16x128xf32, #tpu.memory_space<vmem>> -> memref<1x16x128xf32, #tpu.memory_space<vmem>>
    %39 = tpu.memref_squeeze %38 : memref<1x16x128xf32, #tpu.memory_space<vmem>> -> memref<16x128xf32, #tpu.memory_space<vmem>>
    %40 = tpu.memref_slice %arg14[%c1_i32_33] : memref<2x!tpu.dma_semaphore, #tpu.memory_space<semaphore_mem>> -> memref<1x!tpu.dma_semaphore, #tpu.memory_space<semaphore_mem>>
    %41 = tpu.memref_squeeze %40 : memref<1x!tpu.dma_semaphore, #tpu.memory_space<semaphore_mem>> -> memref<!tpu.dma_semaphore, #tpu.memory_space<semaphore_mem>>
    tpu.wait_dma2 semaphore(%41 : memref<!tpu.dma_semaphore, #tpu.memory_space<semaphore_mem>>) src(%37 : memref<16x128xf32, #tpu.memory_space<any>>) dst(%39 : memref<16x128xf32, #tpu.memory_space<vmem>>)
    %c2_i32 = arith.constant 2 : i32
    %42 = arith.addi %0, %c2_i32 : i32
    %43 = arith.index_cast %42 : i32 to index
    %44 = memref.load %arg1[%43] : memref<16xi32, #tpu.memory_space<smem>>
    %c0_i32_38 = arith.constant 0 : i32
    %c0_i32_39 = arith.constant 0 : i32
    %c0_i32_40 = arith.constant 0 : i32
    %c0_i32_41 = arith.constant 0 : i32
    %45 = tpu.memref_slice %arg4[%44, %c0_i32_40, %c0_i32_41] : memref<2x16x128xf32, #tpu.memory_space<any>> -> memref<1x16x128xf32, #tpu.memory_space<any>>
    %46 = tpu.memref_squeeze %45 : memref<1x16x128xf32, #tpu.memory_space<any>> -> memref<16x128xf32, #tpu.memory_space<any>>
    %c0_i32_42 = arith.constant 0 : i32
    %c0_i32_43 = arith.constant 0 : i32
    %47 = tpu.memref_slice %arg13[%c0_i32_38, %c0_i32_42, %c0_i32_43] : memref<2x16x128xf32, #tpu.memory_space<vmem>> -> memref<1x16x128xf32, #tpu.memory_space<vmem>>
    %48 = tpu.memref_squeeze %47 : memref<1x16x128xf32, #tpu.memory_space<vmem>> -> memref<16x128xf32, #tpu.memory_space<vmem>>
    %49 = tpu.memref_slice %arg14[%c0_i32_39] : memref<2x!tpu.dma_semaphore, #tpu.memory_space<semaphore_mem>> -> memref<1x!tpu.dma_semaphore, #tpu.memory_space<semaphore_mem>>
    %50 = tpu.memref_squeeze %49 : memref<1x!tpu.dma_semaphore, #tpu.memory_space<semaphore_mem>> -> memref<!tpu.dma_semaphore, #tpu.memory_space<semaphore_mem>>
    tpu.enqueue_dma source(%46 : memref<16x128xf32, #tpu.memory_space<any>>) target(%48 : memref<16x128xf32, #tpu.memory_space<vmem>>) target_semaphore(%50 : memref<!tpu.dma_semaphore, #tpu.memory_space<semaphore_mem>>)
    %c1 = arith.constant 1 : index
    %c0_44 = arith.constant 0 : index
    %c0_45 = arith.constant 0 : index
    %51 = vector.load %arg2[%c1, %c0_44, %c0_45] : memref<16x4x16xf32, #tpu.memory_space<vmem>>, vector<1x4x16xf32>
    %52 = vector.shape_cast %51 : vector<1x4x16xf32> to vector<4x16xf32>
    %c1_46 = arith.constant 1 : index
    %c0_47 = arith.constant 0 : index
    %c0_48 = arith.constant 0 : index
    %53 = vector.load %arg13[%c1_46, %c0_47, %c0_48] : memref<2x16x128xf32, #tpu.memory_space<vmem>>, vector<1x16x128xf32>
    %54 = vector.shape_cast %53 : vector<1x16x128xf32> to vector<16x128xf32>
    %cst_49 = arith.constant dense<0.000000e+00> : vector<4x128xf32>
    %55 = tpu.matmul %52, %54, %cst_49 {dimension_numbers = #tpu.dot_dimension_numbers<[1], [0], [0], [1], [0, 0, 1, 1], [], []>} : vector<4x16xf32>, vector<16x128xf32>, vector<4x128xf32> -> vector<4x128xf32>
    %c1_50 = arith.constant 1 : index
    %c0_51 = arith.constant 0 : index
    %c0_52 = arith.constant 0 : index
    %56 = vector.load %arg3[%c1_50, %c0_51, %c0_52] : memref<16x128x32xf32, #tpu.memory_space<vmem>>, vector<1x128x32xf32>
    %57 = vector.shape_cast %56 : vector<1x128x32xf32> to vector<128x32xf32>
    %cst_53 = arith.constant dense<0.000000e+00> : vector<4x32xf32>
    %58 = tpu.matmul %55, %57, %cst_53 {dimension_numbers = #tpu.dot_dimension_numbers<[1], [0], [0], [1], [0, 0, 1, 1], [], []>} : vector<4x128xf32>, vector<128x32xf32>, vector<4x32xf32> -> vector<4x32xf32>
    %c1_54 = arith.constant 1 : index
    %c0_55 = arith.constant 0 : index
    %c0_56 = arith.constant 0 : index
    %59 = vector.load %arg15[%c1_54, %c0_55, %c0_56] : memref<16x4x32xf32, #tpu.memory_space<vmem>>, vector<1x4x32xf32>
    %60 = vector.shape_cast %59 : vector<1x4x32xf32> to vector<4x32xf32>
    %61 = vector.shape_cast %58 : vector<4x32xf32> to vector<1x4x32xf32>
    tpu.vector_store %arg15[%c1_54, %c0_55, %c0_56], %61 {strides = array<i32>} : memref<16x4x32xf32, #tpu.memory_space<vmem>>, vector<1x4x32xf32>,
    %c0_i32_57 = arith.constant 0 : i32
    %c0_i32_58 = arith.constant 0 : i32
    %c0_i32_59 = arith.constant 0 : i32
    %c0_i32_60 = arith.constant 0 : i32
    %c0_i32_61 = arith.constant 0 : i32
    %62 = tpu.memref_slice %arg4[%c0_i32_57, %c0_i32_60, %c0_i32_61] : memref<2x16x128xf32, #tpu.memory_space<any>> -> memref<1x16x128xf32, #tpu.memory_space<any>>
    %63 = tpu.memref_squeeze %62 : memref<1x16x128xf32, #tpu.memory_space<any>> -> memref<16x128xf32, #tpu.memory_space<any>>
    %c0_i32_62 = arith.constant 0 : i32
    %c0_i32_63 = arith.constant 0 : i32
    %64 = tpu.memref_slice %arg13[%c0_i32_58, %c0_i32_62, %c0_i32_63] : memref<2x16x128xf32, #tpu.memory_space<vmem>> -> memref<1x16x128xf32, #tpu.memory_space<vmem>>
    %65 = tpu.memref_squeeze %64 : memref<1x16x128xf32, #tpu.memory_space<vmem>> -> memref<16x128xf32, #tpu.memory_space<vmem>>
    %66 = tpu.memref_slice %arg14[%c0_i32_59] : memref<2x!tpu.dma_semaphore, #tpu.memory_space<semaphore_mem>> -> memref<1x!tpu.dma_semaphore, #tpu.memory_space<semaphore_mem>>
    %67 = tpu.memref_squeeze %66 : memref<1x!tpu.dma_semaphore, #tpu.memory_space<semaphore_mem>> -> memref<!tpu.dma_semaphore, #tpu.memory_space<semaphore_mem>>
    tpu.wait_dma2 semaphore(%67 : memref<!tpu.dma_semaphore, #tpu.memory_space<semaphore_mem>>) src(%63 : memref<16x128xf32, #tpu.memory_space<any>>) dst(%65 : memref<16x128xf32, #tpu.memory_space<vmem>>)
    %c3_i32 = arith.constant 3 : i32
    %68 = arith.addi %0, %c3_i32 : i32
    %69 = arith.index_cast %68 : i32 to index
    %70 = memref.load %arg1[%69] : memref<16xi32, #tpu.memory_space<smem>>
    %c1_i32_64 = arith.constant 1 : i32
    %c1_i32_65 = arith.constant 1 : i32
    %c0_i32_66 = arith.constant 0 : i32
    %c0_i32_67 = arith.constant 0 : i32
    %71 = tpu.memref_slice %arg4[%70, %c0_i32_66, %c0_i32_67] : memref<2x16x128xf32, #tpu.memory_space<any>> -> memref<1x16x128xf32, #tpu.memory_space<any>>
    %72 = tpu.memref_squeeze %71 : memref<1x16x128xf32, #tpu.memory_space<any>> -> memref<16x128xf32, #tpu.memory_space<any>>
    %c0_i32_68 = arith.constant 0 : i32
    %c0_i32_69 = arith.constant 0 : i32
    %73 = tpu.memref_slice %arg13[%c1_i32_64, %c0_i32_68, %c0_i32_69] : memref<2x16x128xf32, #tpu.memory_space<vmem>> -> memref<1x16x128xf32, #tpu.memory_space<vmem>>
    %74 = tpu.memref_squeeze %73 : memref<1x16x128xf32, #tpu.memory_space<vmem>> -> memref<16x128xf32, #tpu.memory_space<vmem>>
    %75 = tpu.memref_slice %arg14[%c1_i32_65] : memref<2x!tpu.dma_semaphore, #tpu.memory_space<semaphore_mem>> -> memref<1x!tpu.dma_semaphore, #tpu.memory_space<semaphore_mem>>
    %76 = tpu.memref_squeeze %75 : memref<1x!tpu.dma_semaphore, #tpu.memory_space<semaphore_mem>> -> memref<!tpu.dma_semaphore, #tpu.memory_space<semaphore_mem>>
    tpu.enqueue_dma source(%72 : memref<16x128xf32, #tpu.memory_space<any>>) target(%74 : memref<16x128xf32, #tpu.memory_space<vmem>>) target_semaphore(%76 : memref<!tpu.dma_semaphore, #tpu.memory_space<semaphore_mem>>)
    %c2 = arith.constant 2 : index
    %c0_70 = arith.constant 0 : index
    %c0_71 = arith.constant 0 : index
    %77 = vector.load %arg2[%c2, %c0_70, %c0_71] : memref<16x4x16xf32, #tpu.memory_space<vmem>>, vector<1x4x16xf32>
    %78 = vector.shape_cast %77 : vector<1x4x16xf32> to vector<4x16xf32>
    %c0_72 = arith.constant 0 : index
    %c0_73 = arith.constant 0 : index
    %c0_74 = arith.constant 0 : index
    %79 = vector.load %arg13[%c0_72, %c0_73, %c0_74] : memref<2x16x128xf32, #tpu.memory_space<vmem>>, vector<1x16x128xf32>
    %80 = vector.shape_cast %79 : vector<1x16x128xf32> to vector<16x128xf32>
    %cst_75 = arith.constant dense<0.000000e+00> : vector<4x128xf32>
    %81 = tpu.matmul %78, %80, %cst_75 {dimension_numbers = #tpu.dot_dimension_numbers<[1], [0], [0], [1], [0, 0, 1, 1], [], []>} : vector<4x16xf32>, vector<16x128xf32>, vector<4x128xf32> -> vector<4x128xf32>
    %c2_76 = arith.constant 2 : index
    %c0_77 = arith.constant 0 : index
    %c0_78 = arith.constant 0 : index
    %82 = vector.load %arg3[%c2_76, %c0_77, %c0_78] : memref<16x128x32xf32, #tpu.memory_space<vmem>>, vector<1x128x32xf32>
    %83 = vector.shape_cast %82 : vector<1x128x32xf32> to vector<128x32xf32>
    %cst_79 = arith.constant dense<0.000000e+00> : vector<4x32xf32>
    %84 = tpu.matmul %81, %83, %cst_79 {dimension_numbers = #tpu.dot_dimension_numbers<[1], [0], [0], [1], [0, 0, 1, 1], [], []>} : vector<4x128xf32>, vector<128x32xf32>, vector<4x32xf32> -> vector<4x32xf32>
    %c2_80 = arith.constant 2 : index
    %c0_81 = arith.constant 0 : index
    %c0_82 = arith.constant 0 : index
    %85 = vector.load %arg15[%c2_80, %c0_81, %c0_82] : memref<16x4x32xf32, #tpu.memory_space<vmem>>, vector<1x4x32xf32>
    %86 = vector.shape_cast %85 : vector<1x4x32xf32> to vector<4x32xf32>
    %87 = vector.shape_cast %84 : vector<4x32xf32> to vector<1x4x32xf32>
    tpu.vector_store %arg15[%c2_80, %c0_81, %c0_82], %87 {strides = array<i32>} : memref<16x4x32xf32, #tpu.memory_space<vmem>>, vector<1x4x32xf32>,
    %c0_i32_83 = arith.constant 0 : i32
    %c1_i32_84 = arith.constant 1 : i32
    %c1_i32_85 = arith.constant 1 : i32
    %c0_i32_86 = arith.constant 0 : i32
    %c0_i32_87 = arith.constant 0 : i32
    %88 = tpu.memref_slice %arg4[%c0_i32_83, %c0_i32_86, %c0_i32_87] : memref<2x16x128xf32, #tpu.memory_space<any>> -> memref<1x16x128xf32, #tpu.memory_space<any>>
    %89 = tpu.memref_squeeze %88 : memref<1x16x128xf32, #tpu.memory_space<any>> -> memref<16x128xf32, #tpu.memory_space<any>>
    %c0_i32_88 = arith.constant 0 : i32
    %c0_i32_89 = arith.constant 0 : i32
    %90 = tpu.memref_slice %arg13[%c1_i32_84, %c0_i32_88, %c0_i32_89] : memref<2x16x128xf32, #tpu.memory_space<vmem>> -> memref<1x16x128xf32, #tpu.memory_space<vmem>>
    %91 = tpu.memref_squeeze %90 : memref<1x16x128xf32, #tpu.memory_space<vmem>> -> memref<16x128xf32, #tpu.memory_space<vmem>>
    %92 = tpu.memref_slice %arg14[%c1_i32_85] : memref<2x!tpu.dma_semaphore, #tpu.memory_space<semaphore_mem>> -> memref<1x!tpu.dma_semaphore, #tpu.memory_space<semaphore_mem>>
    %93 = tpu.memref_squeeze %92 : memref<1x!tpu.dma_semaphore, #tpu.memory_space<semaphore_mem>> -> memref<!tpu.dma_semaphore, #tpu.memory_space<semaphore_mem>>
    tpu.wait_dma2 semaphore(%93 : memref<!tpu.dma_semaphore, #tpu.memory_space<semaphore_mem>>) src(%89 : memref<16x128xf32, #tpu.memory_space<any>>) dst(%91 : memref<16x128xf32, #tpu.memory_space<vmem>>)
    %c4_i32 = arith.constant 4 : i32
    %94 = arith.addi %0, %c4_i32 : i32
    %95 = arith.index_cast %94 : i32 to index
    %96 = memref.load %arg1[%95] : memref<16xi32, #tpu.memory_space<smem>>
    %c0_i32_90 = arith.constant 0 : i32
    %c0_i32_91 = arith.constant 0 : i32
    %c0_i32_92 = arith.constant 0 : i32
    %c0_i32_93 = arith.constant 0 : i32
    %97 = tpu.memref_slice %arg4[%96, %c0_i32_92, %c0_i32_93] : memref<2x16x128xf32, #tpu.memory_space<any>> -> memref<1x16x128xf32, #tpu.memory_space<any>>
    %98 = tpu.memref_squeeze %97 : memref<1x16x128xf32, #tpu.memory_space<any>> -> memref<16x128xf32, #tpu.memory_space<any>>
    %c0_i32_94 = arith.constant 0 : i32
    %c0_i32_95 = arith.constant 0 : i32
    %99 = tpu.memref_slice %arg13[%c0_i32_90, %c0_i32_94, %c0_i32_95] : memref<2x16x128xf32, #tpu.memory_space<vmem>> -> memref<1x16x128xf32, #tpu.memory_space<vmem>>
    %100 = tpu.memref_squeeze %99 : memref<1x16x128xf32, #tpu.memory_space<vmem>> -> memref<16x128xf32, #tpu.memory_space<vmem>>
    %101 = tpu.memref_slice %arg14[%c0_i32_91] : memref<2x!tpu.dma_semaphore, #tpu.memory_space<semaphore_mem>> -> memref<1x!tpu.dma_semaphore, #tpu.memory_space<semaphore_mem>>
    %102 = tpu.memref_squeeze %101 : memref<1x!tpu.dma_semaphore, #tpu.memory_space<semaphore_mem>> -> memref<!tpu.dma_semaphore, #tpu.memory_space<semaphore_mem>>
    tpu.enqueue_dma source(%98 : memref<16x128xf32, #tpu.memory_space<any>>) target(%100 : memref<16x128xf32, #tpu.memory_space<vmem>>) target_semaphore(%102 : memref<!tpu.dma_semaphore, #tpu.memory_space<semaphore_mem>>)
    %c3 = arith.constant 3 : index
    %c0_96 = arith.constant 0 : index
    %c0_97 = arith.constant 0 : index
    %103 = vector.load %arg2[%c3, %c0_96, %c0_97] : memref<16x4x16xf32, #tpu.memory_space<vmem>>, vector<1x4x16xf32>
    %104 = vector.shape_cast %103 : vector<1x4x16xf32> to vector<4x16xf32>
    %c1_98 = arith.constant 1 : index
    %c0_99 = arith.constant 0 : index
    %c0_100 = arith.constant 0 : index
    %105 = vector.load %arg13[%c1_98, %c0_99, %c0_100] : memref<2x16x128xf32, #tpu.memory_space<vmem>>, vector<1x16x128xf32>
    %106 = vector.shape_cast %105 : vector<1x16x128xf32> to vector<16x128xf32>
    %cst_101 = arith.constant dense<0.000000e+00> : vector<4x128xf32>
    %107 = tpu.matmul %104, %106, %cst_101 {dimension_numbers = #tpu.dot_dimension_numbers<[1], [0], [0], [1], [0, 0, 1, 1], [], []>} : vector<4x16xf32>, vector<16x128xf32>, vector<4x128xf32> -> vector<4x128xf32>
    %c3_102 = arith.constant 3 : index
    %c0_103 = arith.constant 0 : index
    %c0_104 = arith.constant 0 : index
    %108 = vector.load %arg3[%c3_102, %c0_103, %c0_104] : memref<16x128x32xf32, #tpu.memory_space<vmem>>, vector<1x128x32xf32>
    %109 = vector.shape_cast %108 : vector<1x128x32xf32> to vector<128x32xf32>
    %cst_105 = arith.constant dense<0.000000e+00> : vector<4x32xf32>
    %110 = tpu.matmul %107, %109, %cst_105 {dimension_numbers = #tpu.dot_dimension_numbers<[1], [0], [0], [1], [0, 0, 1, 1], [], []>} : vector<4x128xf32>, vector<128x32xf32>, vector<4x32xf32> -> vector<4x32xf32>
    %c3_106 = arith.constant 3 : index
    %c0_107 = arith.constant 0 : index
    %c0_108 = arith.constant 0 : index
    %111 = vector.load %arg15[%c3_106, %c0_107, %c0_108] : memref<16x4x32xf32, #tpu.memory_space<vmem>>, vector<1x4x32xf32>
    %112 = vector.shape_cast %111 : vector<1x4x32xf32> to vector<4x32xf32>
    %113 = vector.shape_cast %110 : vector<4x32xf32> to vector<1x4x32xf32>
    tpu.vector_store %arg15[%c3_106, %c0_107, %c0_108], %113 {strides = array<i32>} : memref<16x4x32xf32, #tpu.memory_space<vmem>>, vector<1x4x32xf32>,
    %c0_i32_109 = arith.constant 0 : i32
    %c0_i32_110 = arith.constant 0 : i32
    %c0_i32_111 = arith.constant 0 : i32
    %c0_i32_112 = arith.constant 0 : i32
    %c0_i32_113 = arith.constant 0 : i32
    %114 = tpu.memref_slice %arg4[%c0_i32_109, %c0_i32_112, %c0_i32_113] : memref<2x16x128xf32, #tpu.memory_space<any>> -> memref<1x16x128xf32, #tpu.memory_space<any>>
    %115 = tpu.memref_squeeze %114 : memref<1x16x128xf32, #tpu.memory_space<any>> -> memref<16x128xf32, #tpu.memory_space<any>>
    %c0_i32_114 = arith.constant 0 : i32
    %c0_i32_115 = arith.constant 0 : i32
    %116 = tpu.memref_slice %arg13[%c0_i32_110, %c0_i32_114, %c0_i32_115] : memref<2x16x128xf32, #tpu.memory_space<vmem>> -> memref<1x16x128xf32, #tpu.memory_space<vmem>>
    %117 = tpu.memref_squeeze %116 : memref<1x16x128xf32, #tpu.memory_space<vmem>> -> memref<16x128xf32, #tpu.memory_space<vmem>>
    %118 = tpu.memref_slice %arg14[%c0_i32_111] : memref<2x!tpu.dma_semaphore, #tpu.memory_space<semaphore_mem>> -> memref<1x!tpu.dma_semaphore, #tpu.memory_space<semaphore_mem>>
    %119 = tpu.memref_squeeze %118 : memref<1x!tpu.dma_semaphore, #tpu.memory_space<semaphore_mem>> -> memref<!tpu.dma_semaphore, #tpu.memory_space<semaphore_mem>>
    tpu.wait_dma2 semaphore(%119 : memref<!tpu.dma_semaphore, #tpu.memory_space<semaphore_mem>>) src(%115 : memref<16x128xf32, #tpu.memory_space<any>>) dst(%117 : memref<16x128xf32, #tpu.memory_space<vmem>>)
    %c5_i32 = arith.constant 5 : i32
    %120 = arith.addi %0, %c5_i32 : i32
    %121 = arith.index_cast %120 : i32 to index
    %122 = memref.load %arg1[%121] : memref<16xi32, #tpu.memory_space<smem>>
    %c1_i32_116 = arith.constant 1 : i32
    %c1_i32_117 = arith.constant 1 : i32
    %c0_i32_118 = arith.constant 0 : i32
    %c0_i32_119 = arith.constant 0 : i32
    %123 = tpu.memref_slice %arg4[%122, %c0_i32_118, %c0_i32_119] : memref<2x16x128xf32, #tpu.memory_space<any>> -> memref<1x16x128xf32, #tpu.memory_space<any>>
    %124 = tpu.memref_squeeze %123 : memref<1x16x128xf32, #tpu.memory_space<any>> -> memref<16x128xf32, #tpu.memory_space<any>>
    %c0_i32_120 = arith.constant 0 : i32
    %c0_i32_121 = arith.constant 0 : i32
    %125 = tpu.memref_slice %arg13[%c1_i32_116, %c0_i32_120, %c0_i32_121] : memref<2x16x128xf32, #tpu.memory_space<vmem>> -> memref<1x16x128xf32, #tpu.memory_space<vmem>>
    %126 = tpu.memref_squeeze %125 : memref<1x16x128xf32, #tpu.memory_space<vmem>> -> memref<16x128xf32, #tpu.memory_space<vmem>>
    %127 = tpu.memref_slice %arg14[%c1_i32_117] : memref<2x!tpu.dma_semaphore, #tpu.memory_space<semaphore_mem>> -> memref<1x!tpu.dma_semaphore, #tpu.memory_space<semaphore_mem>>
    %128 = tpu.memref_squeeze %127 : memref<1x!tpu.dma_semaphore, #tpu.memory_space<semaphore_mem>> -> memref<!tpu.dma_semaphore, #tpu.memory_space<semaphore_mem>>
    tpu.enqueue_dma source(%124 : memref<16x128xf32, #tpu.memory_space<any>>) target(%126 : memref<16x128xf32, #tpu.memory_space<vmem>>) target_semaphore(%128 : memref<!tpu.dma_semaphore, #tpu.memory_space<semaphore_mem>>)
    %c4 = arith.constant 4 : index
    %c0_122 = arith.constant 0 : index
    %c0_123 = arith.constant 0 : index
    %129 = vector.load %arg2[%c4, %c0_122, %c0_123] : memref<16x4x16xf32, #tpu.memory_space<vmem>>, vector<1x4x16xf32>
    %130 = vector.shape_cast %129 : vector<1x4x16xf32> to vector<4x16xf32>
    %c0_124 = arith.constant 0 : index
    %c0_125 = arith.constant 0 : index
    %c0_126 = arith.constant 0 : index
    %131 = vector.load %arg13[%c0_124, %c0_125, %c0_126] : memref<2x16x128xf32, #tpu.memory_space<vmem>>, vector<1x16x128xf32>
    %132 = vector.shape_cast %131 : vector<1x16x128xf32> to vector<16x128xf32>
    %cst_127 = arith.constant dense<0.000000e+00> : vector<4x128xf32>
    %133 = tpu.matmul %130, %132, %cst_127 {dimension_numbers = #tpu.dot_dimension_numbers<[1], [0], [0], [1], [0, 0, 1, 1], [], []>} : vector<4x16xf32>, vector<16x128xf32>, vector<4x128xf32> -> vector<4x128xf32>
    %c4_128 = arith.constant 4 : index
    %c0_129 = arith.constant 0 : index
    %c0_130 = arith.constant 0 : index
    %134 = vector.load %arg3[%c4_128, %c0_129, %c0_130] : memref<16x128x32xf32, #tpu.memory_space<vmem>>, vector<1x128x32xf32>
    %135 = vector.shape_cast %134 : vector<1x128x32xf32> to vector<128x32xf32>
    %cst_131 = arith.constant dense<0.000000e+00> : vector<4x32xf32>
    %136 = tpu.matmul %133, %135, %cst_131 {dimension_numbers = #tpu.dot_dimension_numbers<[1], [0], [0], [1], [0, 0, 1, 1], [], []>} : vector<4x128xf32>, vector<128x32xf32>, vector<4x32xf32> -> vector<4x32xf32>
    %c4_132 = arith.constant 4 : index
    %c0_133 = arith.constant 0 : index
    %c0_134 = arith.constant 0 : index
    %137 = vector.load %arg15[%c4_132, %c0_133, %c0_134] : memref<16x4x32xf32, #tpu.memory_space<vmem>>, vector<1x4x32xf32>
    %138 = vector.shape_cast %137 : vector<1x4x32xf32> to vector<4x32xf32>
    %139 = vector.shape_cast %136 : vector<4x32xf32> to vector<1x4x32xf32>
    tpu.vector_store %arg15[%c4_132, %c0_133, %c0_134], %139 {strides = array<i32>} : memref<16x4x32xf32, #tpu.memory_space<vmem>>, vector<1x4x32xf32>,
    %c0_i32_135 = arith.constant 0 : i32
    %c1_i32_136 = arith.constant 1 : i32
    %c1_i32_137 = arith.constant 1 : i32
    %c0_i32_138 = arith.constant 0 : i32
    %c0_i32_139 = arith.constant 0 : i32
    %140 = tpu.memref_slice %arg4[%c0_i32_135, %c0_i32_138, %c0_i32_139] : memref<2x16x128xf32, #tpu.memory_space<any>> -> memref<1x16x128xf32, #tpu.memory_space<any>>
    %141 = tpu.memref_squeeze %140 : memref<1x16x128xf32, #tpu.memory_space<any>> -> memref<16x128xf32, #tpu.memory_space<any>>
    %c0_i32_140 = arith.constant 0 : i32
    %c0_i32_141 = arith.constant 0 : i32
    %142 = tpu.memref_slice %arg13[%c1_i32_136, %c0_i32_140, %c0_i32_141] : memref<2x16x128xf32, #tpu.memory_space<vmem>> -> memref<1x16x128xf32, #tpu.memory_space<vmem>>
    %143 = tpu.memref_squeeze %142 : memref<1x16x128xf32, #tpu.memory_space<vmem>> -> memref<16x128xf32, #tpu.memory_space<vmem>>
    %144 = tpu.memref_slice %arg14[%c1_i32_137] : memref<2x!tpu.dma_semaphore, #tpu.memory_space<semaphore_mem>> -> memref<1x!tpu.dma_semaphore, #tpu.memory_space<semaphore_mem>>
    %145 = tpu.memref_squeeze %144 : memref<1x!tpu.dma_semaphore, #tpu.memory_space<semaphore_mem>> -> memref<!tpu.dma_semaphore, #tpu.memory_space<semaphore_mem>>
    tpu.wait_dma2 semaphore(%145 : memref<!tpu.dma_semaphore, #tpu.memory_space<semaphore_mem>>) src(%141 : memref<16x128xf32, #tpu.memory_space<any>>) dst(%143 : memref<16x128xf32, #tpu.memory_space<vmem>>)
    %c6_i32 = arith.constant 6 : i32
    %146 = arith.addi %0, %c6_i32 : i32
    %147 = arith.index_cast %146 : i32 to index
    %148 = memref.load %arg1[%147] : memref<16xi32, #tpu.memory_space<smem>>
    %c0_i32_142 = arith.constant 0 : i32
    %c0_i32_143 = arith.constant 0 : i32
    %c0_i32_144 = arith.constant 0 : i32
    %c0_i32_145 = arith.constant 0 : i32
    %149 = tpu.memref_slice %arg4[%148, %c0_i32_144, %c0_i32_145] : memref<2x16x128xf32, #tpu.memory_space<any>> -> memref<1x16x128xf32, #tpu.memory_space<any>>
    %150 = tpu.memref_squeeze %149 : memref<1x16x128xf32, #tpu.memory_space<any>> -> memref<16x128xf32, #tpu.memory_space<any>>
    %c0_i32_146 = arith.constant 0 : i32
    %c0_i32_147 = arith.constant 0 : i32
    %151 = tpu.memref_slice %arg13[%c0_i32_142, %c0_i32_146, %c0_i32_147] : memref<2x16x128xf32, #tpu.memory_space<vmem>> -> memref<1x16x128xf32, #tpu.memory_space<vmem>>
    %152 = tpu.memref_squeeze %151 : memref<1x16x128xf32, #tpu.memory_space<vmem>> -> memref<16x128xf32, #tpu.memory_space<vmem>>
    %153 = tpu.memref_slice %arg14[%c0_i32_143] : memref<2x!tpu.dma_semaphore, #tpu.memory_space<semaphore_mem>> -> memref<1x!tpu.dma_semaphore, #tpu.memory_space<semaphore_mem>>
    %154 = tpu.memref_squeeze %153 : memref<1x!tpu.dma_semaphore, #tpu.memory_space<semaphore_mem>> -> memref<!tpu.dma_semaphore, #tpu.memory_space<semaphore_mem>>
    tpu.enqueue_dma source(%150 : memref<16x128xf32, #tpu.memory_space<any>>) target(%152 : memref<16x128xf32, #tpu.memory_space<vmem>>) target_semaphore(%154 : memref<!tpu.dma_semaphore, #tpu.memory_space<semaphore_mem>>)
    %c5 = arith.constant 5 : index
    %c0_148 = arith.constant 0 : index
    %c0_149 = arith.constant 0 : index
    %155 = vector.load %arg2[%c5, %c0_148, %c0_149] : memref<16x4x16xf32, #tpu.memory_space<vmem>>, vector<1x4x16xf32>
    %156 = vector.shape_cast %155 : vector<1x4x16xf32> to vector<4x16xf32>
    %c1_150 = arith.constant 1 : index
    %c0_151 = arith.constant 0 : index
    %c0_152 = arith.constant 0 : index
    %157 = vector.load %arg13[%c1_150, %c0_151, %c0_152] : memref<2x16x128xf32, #tpu.memory_space<vmem>>, vector<1x16x128xf32>
    %158 = vector.shape_cast %157 : vector<1x16x128xf32> to vector<16x128xf32>
    %cst_153 = arith.constant dense<0.000000e+00> : vector<4x128xf32>
    %159 = tpu.matmul %156, %158, %cst_153 {dimension_numbers = #tpu.dot_dimension_numbers<[1], [0], [0], [1], [0, 0, 1, 1], [], []>} : vector<4x16xf32>, vector<16x128xf32>, vector<4x128xf32> -> vector<4x128xf32>
    %c5_154 = arith.constant 5 : index
    %c0_155 = arith.constant 0 : index
    %c0_156 = arith.constant 0 : index
    %160 = vector.load %arg3[%c5_154, %c0_155, %c0_156] : memref<16x128x32xf32, #tpu.memory_space<vmem>>, vector<1x128x32xf32>
    %161 = vector.shape_cast %160 : vector<1x128x32xf32> to vector<128x32xf32>
    %cst_157 = arith.constant dense<0.000000e+00> : vector<4x32xf32>
    %162 = tpu.matmul %159, %161, %cst_157 {dimension_numbers = #tpu.dot_dimension_numbers<[1], [0], [0], [1], [0, 0, 1, 1], [], []>} : vector<4x128xf32>, vector<128x32xf32>, vector<4x32xf32> -> vector<4x32xf32>
    %c5_158 = arith.constant 5 : index
    %c0_159 = arith.constant 0 : index
    %c0_160 = arith.constant 0 : index
    %163 = vector.load %arg15[%c5_158, %c0_159, %c0_160] : memref<16x4x32xf32, #tpu.memory_space<vmem>>, vector<1x4x32xf32>
    %164 = vector.shape_cast %163 : vector<1x4x32xf32> to vector<4x32xf32>
    %165 = vector.shape_cast %162 : vector<4x32xf32> to vector<1x4x32xf32>
    tpu.vector_store %arg15[%c5_158, %c0_159, %c0_160], %165 {strides = array<i32>} : memref<16x4x32xf32, #tpu.memory_space<vmem>>, vector<1x4x32xf32>,
    %c0_i32_161 = arith.constant 0 : i32
    %c0_i32_162 = arith.constant 0 : i32
    %c0_i32_163 = arith.constant 0 : i32
    %c0_i32_164 = arith.constant 0 : i32
    %c0_i32_165 = arith.constant 0 : i32
    %166 = tpu.memref_slice %arg4[%c0_i32_161, %c0_i32_164, %c0_i32_165] : memref<2x16x128xf32, #tpu.memory_space<any>> -> memref<1x16x128xf32, #tpu.memory_space<any>>
    %167 = tpu.memref_squeeze %166 : memref<1x16x128xf32, #tpu.memory_space<any>> -> memref<16x128xf32, #tpu.memory_space<any>>
    %c0_i32_166 = arith.constant 0 : i32
    %c0_i32_167 = arith.constant 0 : i32
    %168 = tpu.memref_slice %arg13[%c0_i32_162, %c0_i32_166, %c0_i32_167] : memref<2x16x128xf32, #tpu.memory_space<vmem>> -> memref<1x16x128xf32, #tpu.memory_space<vmem>>
    %169 = tpu.memref_squeeze %168 : memref<1x16x128xf32, #tpu.memory_space<vmem>> -> memref<16x128xf32, #tpu.memory_space<vmem>>
    %170 = tpu.memref_slice %arg14[%c0_i32_163] : memref<2x!tpu.dma_semaphore, #tpu.memory_space<semaphore_mem>> -> memref<1x!tpu.dma_semaphore, #tpu.memory_space<semaphore_mem>>
    %171 = tpu.memref_squeeze %170 : memref<1x!tpu.dma_semaphore, #tpu.memory_space<semaphore_mem>> -> memref<!tpu.dma_semaphore, #tpu.memory_space<semaphore_mem>>
    tpu.wait_dma2 semaphore(%171 : memref<!tpu.dma_semaphore, #tpu.memory_space<semaphore_mem>>) src(%167 : memref<16x128xf32, #tpu.memory_space<any>>) dst(%169 : memref<16x128xf32, #tpu.memory_space<vmem>>)
    %c7_i32 = arith.constant 7 : i32
    %172 = arith.addi %0, %c7_i32 : i32
    %173 = arith.index_cast %172 : i32 to index
    %174 = memref.load %arg1[%173] : memref<16xi32, #tpu.memory_space<smem>>
    %c1_i32_168 = arith.constant 1 : i32
    %c1_i32_169 = arith.constant 1 : i32
    %c0_i32_170 = arith.constant 0 : i32
    %c0_i32_171 = arith.constant 0 : i32
    %175 = tpu.memref_slice %arg4[%174, %c0_i32_170, %c0_i32_171] : memref<2x16x128xf32, #tpu.memory_space<any>> -> memref<1x16x128xf32, #tpu.memory_space<any>>
    %176 = tpu.memref_squeeze %175 : memref<1x16x128xf32, #tpu.memory_space<any>> -> memref<16x128xf32, #tpu.memory_space<any>>
    %c0_i32_172 = arith.constant 0 : i32
    %c0_i32_173 = arith.constant 0 : i32
    %177 = tpu.memref_slice %arg13[%c1_i32_168, %c0_i32_172, %c0_i32_173] : memref<2x16x128xf32, #tpu.memory_space<vmem>> -> memref<1x16x128xf32, #tpu.memory_space<vmem>>
    %178 = tpu.memref_squeeze %177 : memref<1x16x128xf32, #tpu.memory_space<vmem>> -> memref<16x128xf32, #tpu.memory_space<vmem>>
    %179 = tpu.memref_slice %arg14[%c1_i32_169] : memref<2x!tpu.dma_semaphore, #tpu.memory_space<semaphore_mem>> -> memref<1x!tpu.dma_semaphore, #tpu.memory_space<semaphore_mem>>
    %180 = tpu.memref_squeeze %179 : memref<1x!tpu.dma_semaphore, #tpu.memory_space<semaphore_mem>> -> memref<!tpu.dma_semaphore, #tpu.memory_space<semaphore_mem>>
    tpu.enqueue_dma source(%176 : memref<16x128xf32, #tpu.memory_space<any>>) target(%178 : memref<16x128xf32, #tpu.memory_space<vmem>>) target_semaphore(%180 : memref<!tpu.dma_semaphore, #tpu.memory_space<semaphore_mem>>)
    %c6 = arith.constant 6 : index
    %c0_174 = arith.constant 0 : index
    %c0_175 = arith.constant 0 : index
    %181 = vector.load %arg2[%c6, %c0_174, %c0_175] : memref<16x4x16xf32, #tpu.memory_space<vmem>>, vector<1x4x16xf32>
    %182 = vector.shape_cast %181 : vector<1x4x16xf32> to vector<4x16xf32>
    %c0_176 = arith.constant 0 : index
    %c0_177 = arith.constant 0 : index
    %c0_178 = arith.constant 0 : index
    %183 = vector.load %arg13[%c0_176, %c0_177, %c0_178] : memref<2x16x128xf32, #tpu.memory_space<vmem>>, vector<1x16x128xf32>
    %184 = vector.shape_cast %183 : vector<1x16x128xf32> to vector<16x128xf32>
    %cst_179 = arith.constant dense<0.000000e+00> : vector<4x128xf32>
    %185 = tpu.matmul %182, %184, %cst_179 {dimension_numbers = #tpu.dot_dimension_numbers<[1], [0], [0], [1], [0, 0, 1, 1], [], []>} : vector<4x16xf32>, vector<16x128xf32>, vector<4x128xf32> -> vector<4x128xf32>
    %c6_180 = arith.constant 6 : index
    %c0_181 = arith.constant 0 : index
    %c0_182 = arith.constant 0 : index
    %186 = vector.load %arg3[%c6_180, %c0_181, %c0_182] : memref<16x128x32xf32, #tpu.memory_space<vmem>>, vector<1x128x32xf32>
    %187 = vector.shape_cast %186 : vector<1x128x32xf32> to vector<128x32xf32>
    %cst_183 = arith.constant dense<0.000000e+00> : vector<4x32xf32>
    %188 = tpu.matmul %185, %187, %cst_183 {dimension_numbers = #tpu.dot_dimension_numbers<[1], [0], [0], [1], [0, 0, 1, 1], [], []>} : vector<4x128xf32>, vector<128x32xf32>, vector<4x32xf32> -> vector<4x32xf32>
    %c6_184 = arith.constant 6 : index
    %c0_185 = arith.constant 0 : index
    %c0_186 = arith.constant 0 : index
    %189 = vector.load %arg15[%c6_184, %c0_185, %c0_186] : memref<16x4x32xf32, #tpu.memory_space<vmem>>, vector<1x4x32xf32>
    %190 = vector.shape_cast %189 : vector<1x4x32xf32> to vector<4x32xf32>
    %191 = vector.shape_cast %188 : vector<4x32xf32> to vector<1x4x32xf32>
    tpu.vector_store %arg15[%c6_184, %c0_185, %c0_186], %191 {strides = array<i32>} : memref<16x4x32xf32, #tpu.memory_space<vmem>>, vector<1x4x32xf32>,
    %c0_i32_187 = arith.constant 0 : i32
    %c1_i32_188 = arith.constant 1 : i32
    %c1_i32_189 = arith.constant 1 : i32
    %c0_i32_190 = arith.constant 0 : i32
    %c0_i32_191 = arith.constant 0 : i32
    %192 = tpu.memref_slice %arg4[%c0_i32_187, %c0_i32_190, %c0_i32_191] : memref<2x16x128xf32, #tpu.memory_space<any>> -> memref<1x16x128xf32, #tpu.memory_space<any>>
    %193 = tpu.memref_squeeze %192 : memref<1x16x128xf32, #tpu.memory_space<any>> -> memref<16x128xf32, #tpu.memory_space<any>>
    %c0_i32_192 = arith.constant 0 : i32
    %c0_i32_193 = arith.constant 0 : i32
    %194 = tpu.memref_slice %arg13[%c1_i32_188, %c0_i32_192, %c0_i32_193] : memref<2x16x128xf32, #tpu.memory_space<vmem>> -> memref<1x16x128xf32, #tpu.memory_space<vmem>>
    %195 = tpu.memref_squeeze %194 : memref<1x16x128xf32, #tpu.memory_space<vmem>> -> memref<16x128xf32, #tpu.memory_space<vmem>>
    %196 = tpu.memref_slice %arg14[%c1_i32_189] : memref<2x!tpu.dma_semaphore, #tpu.memory_space<semaphore_mem>> -> memref<1x!tpu.dma_semaphore, #tpu.memory_space<semaphore_mem>>
    %197 = tpu.memref_squeeze %196 : memref<1x!tpu.dma_semaphore, #tpu.memory_space<semaphore_mem>> -> memref<!tpu.dma_semaphore, #tpu.memory_space<semaphore_mem>>
    tpu.wait_dma2 semaphore(%197 : memref<!tpu.dma_semaphore, #tpu.memory_space<semaphore_mem>>) src(%193 : memref<16x128xf32, #tpu.memory_space<any>>) dst(%195 : memref<16x128xf32, #tpu.memory_space<vmem>>)
    %c8_i32 = arith.constant 8 : i32
    %198 = arith.addi %0, %c8_i32 : i32
    %199 = arith.index_cast %198 : i32 to index
    %200 = memref.load %arg1[%199] : memref<16xi32, #tpu.memory_space<smem>>
    %c0_i32_194 = arith.constant 0 : i32
    %c0_i32_195 = arith.constant 0 : i32
    %c0_i32_196 = arith.constant 0 : i32
    %c0_i32_197 = arith.constant 0 : i32
    %201 = tpu.memref_slice %arg4[%200, %c0_i32_196, %c0_i32_197] : memref<2x16x128xf32, #tpu.memory_space<any>> -> memref<1x16x128xf32, #tpu.memory_space<any>>
    %202 = tpu.memref_squeeze %201 : memref<1x16x128xf32, #tpu.memory_space<any>> -> memref<16x128xf32, #tpu.memory_space<any>>
    %c0_i32_198 = arith.constant 0 : i32
    %c0_i32_199 = arith.constant 0 : i32
    %203 = tpu.memref_slice %arg13[%c0_i32_194, %c0_i32_198, %c0_i32_199] : memref<2x16x128xf32, #tpu.memory_space<vmem>> -> memref<1x16x128xf32, #tpu.memory_space<vmem>>
    %204 = tpu.memref_squeeze %203 : memref<1x16x128xf32, #tpu.memory_space<vmem>> -> memref<16x128xf32, #tpu.memory_space<vmem>>
    %205 = tpu.memref_slice %arg14[%c0_i32_195] : memref<2x!tpu.dma_semaphore, #tpu.memory_space<semaphore_mem>> -> memref<1x!tpu.dma_semaphore, #tpu.memory_space<semaphore_mem>>
    %206 = tpu.memref_squeeze %205 : memref<1x!tpu.dma_semaphore, #tpu.memory_space<semaphore_mem>> -> memref<!tpu.dma_semaphore, #tpu.memory_space<semaphore_mem>>
    tpu.enqueue_dma source(%202 : memref<16x128xf32, #tpu.memory_space<any>>) target(%204 : memref<16x128xf32, #tpu.memory_space<vmem>>) target_semaphore(%206 : memref<!tpu.dma_semaphore, #tpu.memory_space<semaphore_mem>>)
    %c7 = arith.constant 7 : index
    %c0_200 = arith.constant 0 : index
    %c0_201 = arith.constant 0 : index
    %207 = vector.load %arg2[%c7, %c0_200, %c0_201] : memref<16x4x16xf32, #tpu.memory_space<vmem>>, vector<1x4x16xf32>
    %208 = vector.shape_cast %207 : vector<1x4x16xf32> to vector<4x16xf32>
    %c1_202 = arith.constant 1 : index
    %c0_203 = arith.constant 0 : index
    %c0_204 = arith.constant 0 : index
    %209 = vector.load %arg13[%c1_202, %c0_203, %c0_204] : memref<2x16x128xf32, #tpu.memory_space<vmem>>, vector<1x16x128xf32>
    %210 = vector.shape_cast %209 : vector<1x16x128xf32> to vector<16x128xf32>
    %cst_205 = arith.constant dense<0.000000e+00> : vector<4x128xf32>
    %211 = tpu.matmul %208, %210, %cst_205 {dimension_numbers = #tpu.dot_dimension_numbers<[1], [0], [0], [1], [0, 0, 1, 1], [], []>} : vector<4x16xf32>, vector<16x128xf32>, vector<4x128xf32> -> vector<4x128xf32>
    %c7_206 = arith.constant 7 : index
    %c0_207 = arith.constant 0 : index
    %c0_208 = arith.constant 0 : index
    %212 = vector.load %arg3[%c7_206, %c0_207, %c0_208] : memref<16x128x32xf32, #tpu.memory_space<vmem>>, vector<1x128x32xf32>
    %213 = vector.shape_cast %212 : vector<1x128x32xf32> to vector<128x32xf32>
    %cst_209 = arith.constant dense<0.000000e+00> : vector<4x32xf32>
    %214 = tpu.matmul %211, %213, %cst_209 {dimension_numbers = #tpu.dot_dimension_numbers<[1], [0], [0], [1], [0, 0, 1, 1], [], []>} : vector<4x128xf32>, vector<128x32xf32>, vector<4x32xf32> -> vector<4x32xf32>
    %c7_210 = arith.constant 7 : index
    %c0_211 = arith.constant 0 : index
    %c0_212 = arith.constant 0 : index
    %215 = vector.load %arg15[%c7_210, %c0_211, %c0_212] : memref<16x4x32xf32, #tpu.memory_space<vmem>>, vector<1x4x32xf32>
    %216 = vector.shape_cast %215 : vector<1x4x32xf32> to vector<4x32xf32>
    %217 = vector.shape_cast %214 : vector<4x32xf32> to vector<1x4x32xf32>
    tpu.vector_store %arg15[%c7_210, %c0_211, %c0_212], %217 {strides = array<i32>} : memref<16x4x32xf32, #tpu.memory_space<vmem>>, vector<1x4x32xf32>,
    %c0_i32_213 = arith.constant 0 : i32
    %c0_i32_214 = arith.constant 0 : i32
    %c0_i32_215 = arith.constant 0 : i32
    %c0_i32_216 = arith.constant 0 : i32
    %c0_i32_217 = arith.constant 0 : i32
    %218 = tpu.memref_slice %arg4[%c0_i32_213, %c0_i32_216, %c0_i32_217] : memref<2x16x128xf32, #tpu.memory_space<any>> -> memref<1x16x128xf32, #tpu.memory_space<any>>
    %219 = tpu.memref_squeeze %218 : memref<1x16x128xf32, #tpu.memory_space<any>> -> memref<16x128xf32, #tpu.memory_space<any>>
    %c0_i32_218 = arith.constant 0 : i32
    %c0_i32_219 = arith.constant 0 : i32
    %220 = tpu.memref_slice %arg13[%c0_i32_214, %c0_i32_218, %c0_i32_219] : memref<2x16x128xf32, #tpu.memory_space<vmem>> -> memref<1x16x128xf32, #tpu.memory_space<vmem>>
    %221 = tpu.memref_squeeze %220 : memref<1x16x128xf32, #tpu.memory_space<vmem>> -> memref<16x128xf32, #tpu.memory_space<vmem>>
    %222 = tpu.memref_slice %arg14[%c0_i32_215] : memref<2x!tpu.dma_semaphore, #tpu.memory_space<semaphore_mem>> -> memref<1x!tpu.dma_semaphore, #tpu.memory_space<semaphore_mem>>
    %223 = tpu.memref_squeeze %222 : memref<1x!tpu.dma_semaphore, #tpu.memory_space<semaphore_mem>> -> memref<!tpu.dma_semaphore, #tpu.memory_space<semaphore_mem>>
    tpu.wait_dma2 semaphore(%223 : memref<!tpu.dma_semaphore, #tpu.memory_space<semaphore_mem>>) src(%219 : memref<16x128xf32, #tpu.memory_space<any>>) dst(%221 : memref<16x128xf32, #tpu.memory_space<vmem>>)
    %c9_i32 = arith.constant 9 : i32
    %224 = arith.addi %0, %c9_i32 : i32
    %225 = arith.index_cast %224 : i32 to index
    %226 = memref.load %arg1[%225] : memref<16xi32, #tpu.memory_space<smem>>
    %c1_i32_220 = arith.constant 1 : i32
    %c1_i32_221 = arith.constant 1 : i32
    %c0_i32_222 = arith.constant 0 : i32
    %c0_i32_223 = arith.constant 0 : i32
    %227 = tpu.memref_slice %arg4[%226, %c0_i32_222, %c0_i32_223] : memref<2x16x128xf32, #tpu.memory_space<any>> -> memref<1x16x128xf32, #tpu.memory_space<any>>
    %228 = tpu.memref_squeeze %227 : memref<1x16x128xf32, #tpu.memory_space<any>> -> memref<16x128xf32, #tpu.memory_space<any>>
    %c0_i32_224 = arith.constant 0 : i32
    %c0_i32_225 = arith.constant 0 : i32
    %229 = tpu.memref_slice %arg13[%c1_i32_220, %c0_i32_224, %c0_i32_225] : memref<2x16x128xf32, #tpu.memory_space<vmem>> -> memref<1x16x128xf32, #tpu.memory_space<vmem>>
    %230 = tpu.memref_squeeze %229 : memref<1x16x128xf32, #tpu.memory_space<vmem>> -> memref<16x128xf32, #tpu.memory_space<vmem>>
    %231 = tpu.memref_slice %arg14[%c1_i32_221] : memref<2x!tpu.dma_semaphore, #tpu.memory_space<semaphore_mem>> -> memref<1x!tpu.dma_semaphore, #tpu.memory_space<semaphore_mem>>
    %232 = tpu.memref_squeeze %231 : memref<1x!tpu.dma_semaphore, #tpu.memory_space<semaphore_mem>> -> memref<!tpu.dma_semaphore, #tpu.memory_space<semaphore_mem>>
    tpu.enqueue_dma source(%228 : memref<16x128xf32, #tpu.memory_space<any>>) target(%230 : memref<16x128xf32, #tpu.memory_space<vmem>>) target_semaphore(%232 : memref<!tpu.dma_semaphore, #tpu.memory_space<semaphore_mem>>)
    %c8 = arith.constant 8 : index
    %c0_226 = arith.constant 0 : index
    %c0_227 = arith.constant 0 : index
    %233 = vector.load %arg2[%c8, %c0_226, %c0_227] : memref<16x4x16xf32, #tpu.memory_space<vmem>>, vector<1x4x16xf32>
    %234 = vector.shape_cast %233 : vector<1x4x16xf32> to vector<4x16xf32>
    %c0_228 = arith.constant 0 : index
    %c0_229 = arith.constant 0 : index
    %c0_230 = arith.constant 0 : index
    %235 = vector.load %arg13[%c0_228, %c0_229, %c0_230] : memref<2x16x128xf32, #tpu.memory_space<vmem>>, vector<1x16x128xf32>
    %236 = vector.shape_cast %235 : vector<1x16x128xf32> to vector<16x128xf32>
    %cst_231 = arith.constant dense<0.000000e+00> : vector<4x128xf32>
    %237 = tpu.matmul %234, %236, %cst_231 {dimension_numbers = #tpu.dot_dimension_numbers<[1], [0], [0], [1], [0, 0, 1, 1], [], []>} : vector<4x16xf32>, vector<16x128xf32>, vector<4x128xf32> -> vector<4x128xf32>
    %c8_232 = arith.constant 8 : index
    %c0_233 = arith.constant 0 : index
    %c0_234 = arith.constant 0 : index
    %238 = vector.load %arg3[%c8_232, %c0_233, %c0_234] : memref<16x128x32xf32, #tpu.memory_space<vmem>>, vector<1x128x32xf32>
    %239 = vector.shape_cast %238 : vector<1x128x32xf32> to vector<128x32xf32>
    %cst_235 = arith.constant dense<0.000000e+00> : vector<4x32xf32>
    %240 = tpu.matmul %237, %239, %cst_235 {dimension_numbers = #tpu.dot_dimension_numbers<[1], [0], [0], [1], [0, 0, 1, 1], [], []>} : vector<4x128xf32>, vector<128x32xf32>, vector<4x32xf32> -> vector<4x32xf32>
    %c8_236 = arith.constant 8 : index
    %c0_237 = arith.constant 0 : index
    %c0_238 = arith.constant 0 : index
    %241 = vector.load %arg15[%c8_236, %c0_237, %c0_238] : memref<16x4x32xf32, #tpu.memory_space<vmem>>, vector<1x4x32xf32>
    %242 = vector.shape_cast %241 : vector<1x4x32xf32> to vector<4x32xf32>
    %243 = vector.shape_cast %240 : vector<4x32xf32> to vector<1x4x32xf32>
    tpu.vector_store %arg15[%c8_236, %c0_237, %c0_238], %243 {strides = array<i32>} : memref<16x4x32xf32, #tpu.memory_space<vmem>>, vector<1x4x32xf32>,
    %c0_i32_239 = arith.constant 0 : i32
    %c1_i32_240 = arith.constant 1 : i32
    %c1_i32_241 = arith.constant 1 : i32
    %c0_i32_242 = arith.constant 0 : i32
    %c0_i32_243 = arith.constant 0 : i32
    %244 = tpu.memref_slice %arg4[%c0_i32_239, %c0_i32_242, %c0_i32_243] : memref<2x16x128xf32, #tpu.memory_space<any>> -> memref<1x16x128xf32, #tpu.memory_space<any>>
    %245 = tpu.memref_squeeze %244 : memref<1x16x128xf32, #tpu.memory_space<any>> -> memref<16x128xf32, #tpu.memory_space<any>>
    %c0_i32_244 = arith.constant 0 : i32
    %c0_i32_245 = arith.constant 0 : i32
    %246 = tpu.memref_slice %arg13[%c1_i32_240, %c0_i32_244, %c0_i32_245] : memref<2x16x128xf32, #tpu.memory_space<vmem>> -> memref<1x16x128xf32, #tpu.memory_space<vmem>>
    %247 = tpu.memref_squeeze %246 : memref<1x16x128xf32, #tpu.memory_space<vmem>> -> memref<16x128xf32, #tpu.memory_space<vmem>>
    %248 = tpu.memref_slice %arg14[%c1_i32_241] : memref<2x!tpu.dma_semaphore, #tpu.memory_space<semaphore_mem>> -> memref<1x!tpu.dma_semaphore, #tpu.memory_space<semaphore_mem>>
    %249 = tpu.memref_squeeze %248 : memref<1x!tpu.dma_semaphore, #tpu.memory_space<semaphore_mem>> -> memref<!tpu.dma_semaphore, #tpu.memory_space<semaphore_mem>>
    tpu.wait_dma2 semaphore(%249 : memref<!tpu.dma_semaphore, #tpu.memory_space<semaphore_mem>>) src(%245 : memref<16x128xf32, #tpu.memory_space<any>>) dst(%247 : memref<16x128xf32, #tpu.memory_space<vmem>>)
    %c10_i32 = arith.constant 10 : i32
    %250 = arith.addi %0, %c10_i32 : i32
    %251 = arith.index_cast %250 : i32 to index
    %252 = memref.load %arg1[%251] : memref<16xi32, #tpu.memory_space<smem>>
    %c0_i32_246 = arith.constant 0 : i32
    %c0_i32_247 = arith.constant 0 : i32
    %c0_i32_248 = arith.constant 0 : i32
    %c0_i32_249 = arith.constant 0 : i32
    %253 = tpu.memref_slice %arg4[%252, %c0_i32_248, %c0_i32_249] : memref<2x16x128xf32, #tpu.memory_space<any>> -> memref<1x16x128xf32, #tpu.memory_space<any>>
    %254 = tpu.memref_squeeze %253 : memref<1x16x128xf32, #tpu.memory_space<any>> -> memref<16x128xf32, #tpu.memory_space<any>>
    %c0_i32_250 = arith.constant 0 : i32
    %c0_i32_251 = arith.constant 0 : i32
    %255 = tpu.memref_slice %arg13[%c0_i32_246, %c0_i32_250, %c0_i32_251] : memref<2x16x128xf32, #tpu.memory_space<vmem>> -> memref<1x16x128xf32, #tpu.memory_space<vmem>>
    %256 = tpu.memref_squeeze %255 : memref<1x16x128xf32, #tpu.memory_space<vmem>> -> memref<16x128xf32, #tpu.memory_space<vmem>>
    %257 = tpu.memref_slice %arg14[%c0_i32_247] : memref<2x!tpu.dma_semaphore, #tpu.memory_space<semaphore_mem>> -> memref<1x!tpu.dma_semaphore, #tpu.memory_space<semaphore_mem>>
    %258 = tpu.memref_squeeze %257 : memref<1x!tpu.dma_semaphore, #tpu.memory_space<semaphore_mem>> -> memref<!tpu.dma_semaphore, #tpu.memory_space<semaphore_mem>>
    tpu.enqueue_dma source(%254 : memref<16x128xf32, #tpu.memory_space<any>>) target(%256 : memref<16x128xf32, #tpu.memory_space<vmem>>) target_semaphore(%258 : memref<!tpu.dma_semaphore, #tpu.memory_space<semaphore_mem>>)
    %c9 = arith.constant 9 : index
    %c0_252 = arith.constant 0 : index
    %c0_253 = arith.constant 0 : index
    %259 = vector.load %arg2[%c9, %c0_252, %c0_253] : memref<16x4x16xf32, #tpu.memory_space<vmem>>, vector<1x4x16xf32>
    %260 = vector.shape_cast %259 : vector<1x4x16xf32> to vector<4x16xf32>
    %c1_254 = arith.constant 1 : index
    %c0_255 = arith.constant 0 : index
    %c0_256 = arith.constant 0 : index
    %261 = vector.load %arg13[%c1_254, %c0_255, %c0_256] : memref<2x16x128xf32, #tpu.memory_space<vmem>>, vector<1x16x128xf32>
    %262 = vector.shape_cast %261 : vector<1x16x128xf32> to vector<16x128xf32>
    %cst_257 = arith.constant dense<0.000000e+00> : vector<4x128xf32>
    %263 = tpu.matmul %260, %262, %cst_257 {dimension_numbers = #tpu.dot_dimension_numbers<[1], [0], [0], [1], [0, 0, 1, 1], [], []>} : vector<4x16xf32>, vector<16x128xf32>, vector<4x128xf32> -> vector<4x128xf32>
    %c9_258 = arith.constant 9 : index
    %c0_259 = arith.constant 0 : index
    %c0_260 = arith.constant 0 : index
    %264 = vector.load %arg3[%c9_258, %c0_259, %c0_260] : memref<16x128x32xf32, #tpu.memory_space<vmem>>, vector<1x128x32xf32>
    %265 = vector.shape_cast %264 : vector<1x128x32xf32> to vector<128x32xf32>
    %cst_261 = arith.constant dense<0.000000e+00> : vector<4x32xf32>
    %266 = tpu.matmul %263, %265, %cst_261 {dimension_numbers = #tpu.dot_dimension_numbers<[1], [0], [0], [1], [0, 0, 1, 1], [], []>} : vector<4x128xf32>, vector<128x32xf32>, vector<4x32xf32> -> vector<4x32xf32>
    %c9_262 = arith.constant 9 : index
    %c0_263 = arith.constant 0 : index
    %c0_264 = arith.constant 0 : index
    %267 = vector.load %arg15[%c9_262, %c0_263, %c0_264] : memref<16x4x32xf32, #tpu.memory_space<vmem>>, vector<1x4x32xf32>
    %268 = vector.shape_cast %267 : vector<1x4x32xf32> to vector<4x32xf32>
    %269 = vector.shape_cast %266 : vector<4x32xf32> to vector<1x4x32xf32>
    tpu.vector_store %arg15[%c9_262, %c0_263, %c0_264], %269 {strides = array<i32>} : memref<16x4x32xf32, #tpu.memory_space<vmem>>, vector<1x4x32xf32>,
    %c0_i32_265 = arith.constant 0 : i32
    %c0_i32_266 = arith.constant 0 : i32
    %c0_i32_267 = arith.constant 0 : i32
    %c0_i32_268 = arith.constant 0 : i32
    %c0_i32_269 = arith.constant 0 : i32
    %270 = tpu.memref_slice %arg4[%c0_i32_265, %c0_i32_268, %c0_i32_269] : memref<2x16x128xf32, #tpu.memory_space<any>> -> memref<1x16x128xf32, #tpu.memory_space<any>>
    %271 = tpu.memref_squeeze %270 : memref<1x16x128xf32, #tpu.memory_space<any>> -> memref<16x128xf32, #tpu.memory_space<any>>
    %c0_i32_270 = arith.constant 0 : i32
    %c0_i32_271 = arith.constant 0 : i32
    %272 = tpu.memref_slice %arg13[%c0_i32_266, %c0_i32_270, %c0_i32_271] : memref<2x16x128xf32, #tpu.memory_space<vmem>> -> memref<1x16x128xf32, #tpu.memory_space<vmem>>
    %273 = tpu.memref_squeeze %272 : memref<1x16x128xf32, #tpu.memory_space<vmem>> -> memref<16x128xf32, #tpu.memory_space<vmem>>
    %274 = tpu.memref_slice %arg14[%c0_i32_267] : memref<2x!tpu.dma_semaphore, #tpu.memory_space<semaphore_mem>> -> memref<1x!tpu.dma_semaphore, #tpu.memory_space<semaphore_mem>>
    %275 = tpu.memref_squeeze %274 : memref<1x!tpu.dma_semaphore, #tpu.memory_space<semaphore_mem>> -> memref<!tpu.dma_semaphore, #tpu.memory_space<semaphore_mem>>
    tpu.wait_dma2 semaphore(%275 : memref<!tpu.dma_semaphore, #tpu.memory_space<semaphore_mem>>) src(%271 : memref<16x128xf32, #tpu.memory_space<any>>) dst(%273 : memref<16x128xf32, #tpu.memory_space<vmem>>)
    %c11_i32 = arith.constant 11 : i32
    %276 = arith.addi %0, %c11_i32 : i32
    %277 = arith.index_cast %276 : i32 to index
    %278 = memref.load %arg1[%277] : memref<16xi32, #tpu.memory_space<smem>>
    %c1_i32_272 = arith.constant 1 : i32
    %c1_i32_273 = arith.constant 1 : i32
    %c0_i32_274 = arith.constant 0 : i32
    %c0_i32_275 = arith.constant 0 : i32
    %279 = tpu.memref_slice %arg4[%278, %c0_i32_274, %c0_i32_275] : memref<2x16x128xf32, #tpu.memory_space<any>> -> memref<1x16x128xf32, #tpu.memory_space<any>>
    %280 = tpu.memref_squeeze %279 : memref<1x16x128xf32, #tpu.memory_space<any>> -> memref<16x128xf32, #tpu.memory_space<any>>
    %c0_i32_276 = arith.constant 0 : i32
    %c0_i32_277 = arith.constant 0 : i32
    %281 = tpu.memref_slice %arg13[%c1_i32_272, %c0_i32_276, %c0_i32_277] : memref<2x16x128xf32, #tpu.memory_space<vmem>> -> memref<1x16x128xf32, #tpu.memory_space<vmem>>
    %282 = tpu.memref_squeeze %281 : memref<1x16x128xf32, #tpu.memory_space<vmem>> -> memref<16x128xf32, #tpu.memory_space<vmem>>
    %283 = tpu.memref_slice %arg14[%c1_i32_273] : memref<2x!tpu.dma_semaphore, #tpu.memory_space<semaphore_mem>> -> memref<1x!tpu.dma_semaphore, #tpu.memory_space<semaphore_mem>>
    %284 = tpu.memref_squeeze %283 : memref<1x!tpu.dma_semaphore, #tpu.memory_space<semaphore_mem>> -> memref<!tpu.dma_semaphore, #tpu.memory_space<semaphore_mem>>
    tpu.enqueue_dma source(%280 : memref<16x128xf32, #tpu.memory_space<any>>) target(%282 : memref<16x128xf32, #tpu.memory_space<vmem>>) target_semaphore(%284 : memref<!tpu.dma_semaphore, #tpu.memory_space<semaphore_mem>>)
    %c10 = arith.constant 10 : index
    %c0_278 = arith.constant 0 : index
    %c0_279 = arith.constant 0 : index
    %285 = vector.load %arg2[%c10, %c0_278, %c0_279] : memref<16x4x16xf32, #tpu.memory_space<vmem>>, vector<1x4x16xf32>
    %286 = vector.shape_cast %285 : vector<1x4x16xf32> to vector<4x16xf32>
    %c0_280 = arith.constant 0 : index
    %c0_281 = arith.constant 0 : index
    %c0_282 = arith.constant 0 : index
    %287 = vector.load %arg13[%c0_280, %c0_281, %c0_282] : memref<2x16x128xf32, #tpu.memory_space<vmem>>, vector<1x16x128xf32>
    %288 = vector.shape_cast %287 : vector<1x16x128xf32> to vector<16x128xf32>
    %cst_283 = arith.constant dense<0.000000e+00> : vector<4x128xf32>
    %289 = tpu.matmul %286, %288, %cst_283 {dimension_numbers = #tpu.dot_dimension_numbers<[1], [0], [0], [1], [0, 0, 1, 1], [], []>} : vector<4x16xf32>, vector<16x128xf32>, vector<4x128xf32> -> vector<4x128xf32>
    %c10_284 = arith.constant 10 : index
    %c0_285 = arith.constant 0 : index
    %c0_286 = arith.constant 0 : index
    %290 = vector.load %arg3[%c10_284, %c0_285, %c0_286] : memref<16x128x32xf32, #tpu.memory_space<vmem>>, vector<1x128x32xf32>
    %291 = vector.shape_cast %290 : vector<1x128x32xf32> to vector<128x32xf32>
    %cst_287 = arith.constant dense<0.000000e+00> : vector<4x32xf32>
    %292 = tpu.matmul %289, %291, %cst_287 {dimension_numbers = #tpu.dot_dimension_numbers<[1], [0], [0], [1], [0, 0, 1, 1], [], []>} : vector<4x128xf32>, vector<128x32xf32>, vector<4x32xf32> -> vector<4x32xf32>
    %c10_288 = arith.constant 10 : index
    %c0_289 = arith.constant 0 : index
    %c0_290 = arith.constant 0 : index
    %293 = vector.load %arg15[%c10_288, %c0_289, %c0_290] : memref<16x4x32xf32, #tpu.memory_space<vmem>>, vector<1x4x32xf32>
    %294 = vector.shape_cast %293 : vector<1x4x32xf32> to vector<4x32xf32>
    %295 = vector.shape_cast %292 : vector<4x32xf32> to vector<1x4x32xf32>
    tpu.vector_store %arg15[%c10_288, %c0_289, %c0_290], %295 {strides = array<i32>} : memref<16x4x32xf32, #tpu.memory_space<vmem>>, vector<1x4x32xf32>,
    %c0_i32_291 = arith.constant 0 : i32
    %c1_i32_292 = arith.constant 1 : i32
    %c1_i32_293 = arith.constant 1 : i32
    %c0_i32_294 = arith.constant 0 : i32
    %c0_i32_295 = arith.constant 0 : i32
    %296 = tpu.memref_slice %arg4[%c0_i32_291, %c0_i32_294, %c0_i32_295] : memref<2x16x128xf32, #tpu.memory_space<any>> -> memref<1x16x128xf32, #tpu.memory_space<any>>
    %297 = tpu.memref_squeeze %296 : memref<1x16x128xf32, #tpu.memory_space<any>> -> memref<16x128xf32, #tpu.memory_space<any>>
    %c0_i32_296 = arith.constant 0 : i32
    %c0_i32_297 = arith.constant 0 : i32
    %298 = tpu.memref_slice %arg13[%c1_i32_292, %c0_i32_296, %c0_i32_297] : memref<2x16x128xf32, #tpu.memory_space<vmem>> -> memref<1x16x128xf32, #tpu.memory_space<vmem>>
    %299 = tpu.memref_squeeze %298 : memref<1x16x128xf32, #tpu.memory_space<vmem>> -> memref<16x128xf32, #tpu.memory_space<vmem>>
    %300 = tpu.memref_slice %arg14[%c1_i32_293] : memref<2x!tpu.dma_semaphore, #tpu.memory_space<semaphore_mem>> -> memref<1x!tpu.dma_semaphore, #tpu.memory_space<semaphore_mem>>
    %301 = tpu.memref_squeeze %300 : memref<1x!tpu.dma_semaphore, #tpu.memory_space<semaphore_mem>> -> memref<!tpu.dma_semaphore, #tpu.memory_space<semaphore_mem>>
    tpu.wait_dma2 semaphore(%301 : memref<!tpu.dma_semaphore, #tpu.memory_space<semaphore_mem>>) src(%297 : memref<16x128xf32, #tpu.memory_space<any>>) dst(%299 : memref<16x128xf32, #tpu.memory_space<vmem>>)
    %c12_i32 = arith.constant 12 : i32
    %302 = arith.addi %0, %c12_i32 : i32
    %303 = arith.index_cast %302 : i32 to index
    %304 = memref.load %arg1[%303] : memref<16xi32, #tpu.memory_space<smem>>
    %c0_i32_298 = arith.constant 0 : i32
    %c0_i32_299 = arith.constant 0 : i32
    %c0_i32_300 = arith.constant 0 : i32
    %c0_i32_301 = arith.constant 0 : i32
    %305 = tpu.memref_slice %arg4[%304, %c0_i32_300, %c0_i32_301] : memref<2x16x128xf32, #tpu.memory_space<any>> -> memref<1x16x128xf32, #tpu.memory_space<any>>
    %306 = tpu.memref_squeeze %305 : memref<1x16x128xf32, #tpu.memory_space<any>> -> memref<16x128xf32, #tpu.memory_space<any>>
    %c0_i32_302 = arith.constant 0 : i32
    %c0_i32_303 = arith.constant 0 : i32
    %307 = tpu.memref_slice %arg13[%c0_i32_298, %c0_i32_302, %c0_i32_303] : memref<2x16x128xf32, #tpu.memory_space<vmem>> -> memref<1x16x128xf32, #tpu.memory_space<vmem>>
    %308 = tpu.memref_squeeze %307 : memref<1x16x128xf32, #tpu.memory_space<vmem>> -> memref<16x128xf32, #tpu.memory_space<vmem>>
    %309 = tpu.memref_slice %arg14[%c0_i32_299] : memref<2x!tpu.dma_semaphore, #tpu.memory_space<semaphore_mem>> -> memref<1x!tpu.dma_semaphore, #tpu.memory_space<semaphore_mem>>
    %310 = tpu.memref_squeeze %309 : memref<1x!tpu.dma_semaphore, #tpu.memory_space<semaphore_mem>> -> memref<!tpu.dma_semaphore, #tpu.memory_space<semaphore_mem>>
    tpu.enqueue_dma source(%306 : memref<16x128xf32, #tpu.memory_space<any>>) target(%308 : memref<16x128xf32, #tpu.memory_space<vmem>>) target_semaphore(%310 : memref<!tpu.dma_semaphore, #tpu.memory_space<semaphore_mem>>)
    %c11 = arith.constant 11 : index
    %c0_304 = arith.constant 0 : index
    %c0_305 = arith.constant 0 : index
    %311 = vector.load %arg2[%c11, %c0_304, %c0_305] : memref<16x4x16xf32, #tpu.memory_space<vmem>>, vector<1x4x16xf32>
    %312 = vector.shape_cast %311 : vector<1x4x16xf32> to vector<4x16xf32>
    %c1_306 = arith.constant 1 : index
    %c0_307 = arith.constant 0 : index
    %c0_308 = arith.constant 0 : index
    %313 = vector.load %arg13[%c1_306, %c0_307, %c0_308] : memref<2x16x128xf32, #tpu.memory_space<vmem>>, vector<1x16x128xf32>
    %314 = vector.shape_cast %313 : vector<1x16x128xf32> to vector<16x128xf32>
    %cst_309 = arith.constant dense<0.000000e+00> : vector<4x128xf32>
    %315 = tpu.matmul %312, %314, %cst_309 {dimension_numbers = #tpu.dot_dimension_numbers<[1], [0], [0], [1], [0, 0, 1, 1], [], []>} : vector<4x16xf32>, vector<16x128xf32>, vector<4x128xf32> -> vector<4x128xf32>
    %c11_310 = arith.constant 11 : index
    %c0_311 = arith.constant 0 : index
    %c0_312 = arith.constant 0 : index
    %316 = vector.load %arg3[%c11_310, %c0_311, %c0_312] : memref<16x128x32xf32, #tpu.memory_space<vmem>>, vector<1x128x32xf32>
    %317 = vector.shape_cast %316 : vector<1x128x32xf32> to vector<128x32xf32>
    %cst_313 = arith.constant dense<0.000000e+00> : vector<4x32xf32>
    %318 = tpu.matmul %315, %317, %cst_313 {dimension_numbers = #tpu.dot_dimension_numbers<[1], [0], [0], [1], [0, 0, 1, 1], [], []>} : vector<4x128xf32>, vector<128x32xf32>, vector<4x32xf32> -> vector<4x32xf32>
    %c11_314 = arith.constant 11 : index
    %c0_315 = arith.constant 0 : index
    %c0_316 = arith.constant 0 : index
    %319 = vector.load %arg15[%c11_314, %c0_315, %c0_316] : memref<16x4x32xf32, #tpu.memory_space<vmem>>, vector<1x4x32xf32>
    %320 = vector.shape_cast %319 : vector<1x4x32xf32> to vector<4x32xf32>
    %321 = vector.shape_cast %318 : vector<4x32xf32> to vector<1x4x32xf32>
    tpu.vector_store %arg15[%c11_314, %c0_315, %c0_316], %321 {strides = array<i32>} : memref<16x4x32xf32, #tpu.memory_space<vmem>>, vector<1x4x32xf32>,
    %c0_i32_317 = arith.constant 0 : i32
    %c0_i32_318 = arith.constant 0 : i32
    %c0_i32_319 = arith.constant 0 : i32
    %c0_i32_320 = arith.constant 0 : i32
    %c0_i32_321 = arith.constant 0 : i32
    %322 = tpu.memref_slice %arg4[%c0_i32_317, %c0_i32_320, %c0_i32_321] : memref<2x16x128xf32, #tpu.memory_space<any>> -> memref<1x16x128xf32, #tpu.memory_space<any>>
    %323 = tpu.memref_squeeze %322 : memref<1x16x128xf32, #tpu.memory_space<any>> -> memref<16x128xf32, #tpu.memory_space<any>>
    %c0_i32_322 = arith.constant 0 : i32
    %c0_i32_323 = arith.constant 0 : i32
    %324 = tpu.memref_slice %arg13[%c0_i32_318, %c0_i32_322, %c0_i32_323] : memref<2x16x128xf32, #tpu.memory_space<vmem>> -> memref<1x16x128xf32, #tpu.memory_space<vmem>>
    %325 = tpu.memref_squeeze %324 : memref<1x16x128xf32, #tpu.memory_space<vmem>> -> memref<16x128xf32, #tpu.memory_space<vmem>>
    %326 = tpu.memref_slice %arg14[%c0_i32_319] : memref<2x!tpu.dma_semaphore, #tpu.memory_space<semaphore_mem>> -> memref<1x!tpu.dma_semaphore, #tpu.memory_space<semaphore_mem>>
    %327 = tpu.memref_squeeze %326 : memref<1x!tpu.dma_semaphore, #tpu.memory_space<semaphore_mem>> -> memref<!tpu.dma_semaphore, #tpu.memory_space<semaphore_mem>>
    tpu.wait_dma2 semaphore(%327 : memref<!tpu.dma_semaphore, #tpu.memory_space<semaphore_mem>>) src(%323 : memref<16x128xf32, #tpu.memory_space<any>>) dst(%325 : memref<16x128xf32, #tpu.memory_space<vmem>>)
    %c13_i32 = arith.constant 13 : i32
    %328 = arith.addi %0, %c13_i32 : i32
    %329 = arith.index_cast %328 : i32 to index
    %330 = memref.load %arg1[%329] : memref<16xi32, #tpu.memory_space<smem>>
    %c1_i32_324 = arith.constant 1 : i32
    %c1_i32_325 = arith.constant 1 : i32
    %c0_i32_326 = arith.constant 0 : i32
    %c0_i32_327 = arith.constant 0 : i32
    %331 = tpu.memref_slice %arg4[%330, %c0_i32_326, %c0_i32_327] : memref<2x16x128xf32, #tpu.memory_space<any>> -> memref<1x16x128xf32, #tpu.memory_space<any>>
    %332 = tpu.memref_squeeze %331 : memref<1x16x128xf32, #tpu.memory_space<any>> -> memref<16x128xf32, #tpu.memory_space<any>>
    %c0_i32_328 = arith.constant 0 : i32
    %c0_i32_329 = arith.constant 0 : i32
    %333 = tpu.memref_slice %arg13[%c1_i32_324, %c0_i32_328, %c0_i32_329] : memref<2x16x128xf32, #tpu.memory_space<vmem>> -> memref<1x16x128xf32, #tpu.memory_space<vmem>>
    %334 = tpu.memref_squeeze %333 : memref<1x16x128xf32, #tpu.memory_space<vmem>> -> memref<16x128xf32, #tpu.memory_space<vmem>>
    %335 = tpu.memref_slice %arg14[%c1_i32_325] : memref<2x!tpu.dma_semaphore, #tpu.memory_space<semaphore_mem>> -> memref<1x!tpu.dma_semaphore, #tpu.memory_space<semaphore_mem>>
    %336 = tpu.memref_squeeze %335 : memref<1x!tpu.dma_semaphore, #tpu.memory_space<semaphore_mem>> -> memref<!tpu.dma_semaphore, #tpu.memory_space<semaphore_mem>>
    tpu.enqueue_dma source(%332 : memref<16x128xf32, #tpu.memory_space<any>>) target(%334 : memref<16x128xf32, #tpu.memory_space<vmem>>) target_semaphore(%336 : memref<!tpu.dma_semaphore, #tpu.memory_space<semaphore_mem>>)
    %c12 = arith.constant 12 : index
    %c0_330 = arith.constant 0 : index
    %c0_331 = arith.constant 0 : index
    %337 = vector.load %arg2[%c12, %c0_330, %c0_331] : memref<16x4x16xf32, #tpu.memory_space<vmem>>, vector<1x4x16xf32>
    %338 = vector.shape_cast %337 : vector<1x4x16xf32> to vector<4x16xf32>
    %c0_332 = arith.constant 0 : index
    %c0_333 = arith.constant 0 : index
    %c0_334 = arith.constant 0 : index
    %339 = vector.load %arg13[%c0_332, %c0_333, %c0_334] : memref<2x16x128xf32, #tpu.memory_space<vmem>>, vector<1x16x128xf32>
    %340 = vector.shape_cast %339 : vector<1x16x128xf32> to vector<16x128xf32>
    %cst_335 = arith.constant dense<0.000000e+00> : vector<4x128xf32>
    %341 = tpu.matmul %338, %340, %cst_335 {dimension_numbers = #tpu.dot_dimension_numbers<[1], [0], [0], [1], [0, 0, 1, 1], [], []>} : vector<4x16xf32>, vector<16x128xf32>, vector<4x128xf32> -> vector<4x128xf32>
    %c12_336 = arith.constant 12 : index
    %c0_337 = arith.constant 0 : index
    %c0_338 = arith.constant 0 : index
    %342 = vector.load %arg3[%c12_336, %c0_337, %c0_338] : memref<16x128x32xf32, #tpu.memory_space<vmem>>, vector<1x128x32xf32>
    %343 = vector.shape_cast %342 : vector<1x128x32xf32> to vector<128x32xf32>
    %cst_339 = arith.constant dense<0.000000e+00> : vector<4x32xf32>
    %344 = tpu.matmul %341, %343, %cst_339 {dimension_numbers = #tpu.dot_dimension_numbers<[1], [0], [0], [1], [0, 0, 1, 1], [], []>} : vector<4x128xf32>, vector<128x32xf32>, vector<4x32xf32> -> vector<4x32xf32>
    %c12_340 = arith.constant 12 : index
    %c0_341 = arith.constant 0 : index
    %c0_342 = arith.constant 0 : index
    %345 = vector.load %arg15[%c12_340, %c0_341, %c0_342] : memref<16x4x32xf32, #tpu.memory_space<vmem>>, vector<1x4x32xf32>
    %346 = vector.shape_cast %345 : vector<1x4x32xf32> to vector<4x32xf32>
    %347 = vector.shape_cast %344 : vector<4x32xf32> to vector<1x4x32xf32>
    tpu.vector_store %arg15[%c12_340, %c0_341, %c0_342], %347 {strides = array<i32>} : memref<16x4x32xf32, #tpu.memory_space<vmem>>, vector<1x4x32xf32>,
    %c0_i32_343 = arith.constant 0 : i32
    %c1_i32_344 = arith.constant 1 : i32
    %c1_i32_345 = arith.constant 1 : i32
    %c0_i32_346 = arith.constant 0 : i32
    %c0_i32_347 = arith.constant 0 : i32
    %348 = tpu.memref_slice %arg4[%c0_i32_343, %c0_i32_346, %c0_i32_347] : memref<2x16x128xf32, #tpu.memory_space<any>> -> memref<1x16x128xf32, #tpu.memory_space<any>>
    %349 = tpu.memref_squeeze %348 : memref<1x16x128xf32, #tpu.memory_space<any>> -> memref<16x128xf32, #tpu.memory_space<any>>
    %c0_i32_348 = arith.constant 0 : i32
    %c0_i32_349 = arith.constant 0 : i32
    %350 = tpu.memref_slice %arg13[%c1_i32_344, %c0_i32_348, %c0_i32_349] : memref<2x16x128xf32, #tpu.memory_space<vmem>> -> memref<1x16x128xf32, #tpu.memory_space<vmem>>
    %351 = tpu.memref_squeeze %350 : memref<1x16x128xf32, #tpu.memory_space<vmem>> -> memref<16x128xf32, #tpu.memory_space<vmem>>
    %352 = tpu.memref_slice %arg14[%c1_i32_345] : memref<2x!tpu.dma_semaphore, #tpu.memory_space<semaphore_mem>> -> memref<1x!tpu.dma_semaphore, #tpu.memory_space<semaphore_mem>>
    %353 = tpu.memref_squeeze %352 : memref<1x!tpu.dma_semaphore, #tpu.memory_space<semaphore_mem>> -> memref<!tpu.dma_semaphore, #tpu.memory_space<semaphore_mem>>
    tpu.wait_dma2 semaphore(%353 : memref<!tpu.dma_semaphore, #tpu.memory_space<semaphore_mem>>) src(%349 : memref<16x128xf32, #tpu.memory_space<any>>) dst(%351 : memref<16x128xf32, #tpu.memory_space<vmem>>)
    %c14_i32 = arith.constant 14 : i32
    %354 = arith.addi %0, %c14_i32 : i32
    %355 = arith.index_cast %354 : i32 to index
    %356 = memref.load %arg1[%355] : memref<16xi32, #tpu.memory_space<smem>>
    %c0_i32_350 = arith.constant 0 : i32
    %c0_i32_351 = arith.constant 0 : i32
    %c0_i32_352 = arith.constant 0 : i32
    %c0_i32_353 = arith.constant 0 : i32
    %357 = tpu.memref_slice %arg4[%356, %c0_i32_352, %c0_i32_353] : memref<2x16x128xf32, #tpu.memory_space<any>> -> memref<1x16x128xf32, #tpu.memory_space<any>>
    %358 = tpu.memref_squeeze %357 : memref<1x16x128xf32, #tpu.memory_space<any>> -> memref<16x128xf32, #tpu.memory_space<any>>
    %c0_i32_354 = arith.constant 0 : i32
    %c0_i32_355 = arith.constant 0 : i32
    %359 = tpu.memref_slice %arg13[%c0_i32_350, %c0_i32_354, %c0_i32_355] : memref<2x16x128xf32, #tpu.memory_space<vmem>> -> memref<1x16x128xf32, #tpu.memory_space<vmem>>
    %360 = tpu.memref_squeeze %359 : memref<1x16x128xf32, #tpu.memory_space<vmem>> -> memref<16x128xf32, #tpu.memory_space<vmem>>
    %361 = tpu.memref_slice %arg14[%c0_i32_351] : memref<2x!tpu.dma_semaphore, #tpu.memory_space<semaphore_mem>> -> memref<1x!tpu.dma_semaphore, #tpu.memory_space<semaphore_mem>>
    %362 = tpu.memref_squeeze %361 : memref<1x!tpu.dma_semaphore, #tpu.memory_space<semaphore_mem>> -> memref<!tpu.dma_semaphore, #tpu.memory_space<semaphore_mem>>
    tpu.enqueue_dma source(%358 : memref<16x128xf32, #tpu.memory_space<any>>) target(%360 : memref<16x128xf32, #tpu.memory_space<vmem>>) target_semaphore(%362 : memref<!tpu.dma_semaphore, #tpu.memory_space<semaphore_mem>>)
    %c13 = arith.constant 13 : index
    %c0_356 = arith.constant 0 : index
    %c0_357 = arith.constant 0 : index
    %363 = vector.load %arg2[%c13, %c0_356, %c0_357] : memref<16x4x16xf32, #tpu.memory_space<vmem>>, vector<1x4x16xf32>
    %364 = vector.shape_cast %363 : vector<1x4x16xf32> to vector<4x16xf32>
    %c1_358 = arith.constant 1 : index
    %c0_359 = arith.constant 0 : index
    %c0_360 = arith.constant 0 : index
    %365 = vector.load %arg13[%c1_358, %c0_359, %c0_360] : memref<2x16x128xf32, #tpu.memory_space<vmem>>, vector<1x16x128xf32>
    %366 = vector.shape_cast %365 : vector<1x16x128xf32> to vector<16x128xf32>
    %cst_361 = arith.constant dense<0.000000e+00> : vector<4x128xf32>
    %367 = tpu.matmul %364, %366, %cst_361 {dimension_numbers = #tpu.dot_dimension_numbers<[1], [0], [0], [1], [0, 0, 1, 1], [], []>} : vector<4x16xf32>, vector<16x128xf32>, vector<4x128xf32> -> vector<4x128xf32>
    %c13_362 = arith.constant 13 : index
    %c0_363 = arith.constant 0 : index
    %c0_364 = arith.constant 0 : index
    %368 = vector.load %arg3[%c13_362, %c0_363, %c0_364] : memref<16x128x32xf32, #tpu.memory_space<vmem>>, vector<1x128x32xf32>
    %369 = vector.shape_cast %368 : vector<1x128x32xf32> to vector<128x32xf32>
    %cst_365 = arith.constant dense<0.000000e+00> : vector<4x32xf32>
    %370 = tpu.matmul %367, %369, %cst_365 {dimension_numbers = #tpu.dot_dimension_numbers<[1], [0], [0], [1], [0, 0, 1, 1], [], []>} : vector<4x128xf32>, vector<128x32xf32>, vector<4x32xf32> -> vector<4x32xf32>
    %c13_366 = arith.constant 13 : index
    %c0_367 = arith.constant 0 : index
    %c0_368 = arith.constant 0 : index
    %371 = vector.load %arg15[%c13_366, %c0_367, %c0_368] : memref<16x4x32xf32, #tpu.memory_space<vmem>>, vector<1x4x32xf32>
    %372 = vector.shape_cast %371 : vector<1x4x32xf32> to vector<4x32xf32>
    %373 = vector.shape_cast %370 : vector<4x32xf32> to vector<1x4x32xf32>
    tpu.vector_store %arg15[%c13_366, %c0_367, %c0_368], %373 {strides = array<i32>} : memref<16x4x32xf32, #tpu.memory_space<vmem>>, vector<1x4x32xf32>,
    %c0_i32_369 = arith.constant 0 : i32
    %c0_i32_370 = arith.constant 0 : i32
    %c0_i32_371 = arith.constant 0 : i32
    %c0_i32_372 = arith.constant 0 : i32
    %c0_i32_373 = arith.constant 0 : i32
    %374 = tpu.memref_slice %arg4[%c0_i32_369, %c0_i32_372, %c0_i32_373] : memref<2x16x128xf32, #tpu.memory_space<any>> -> memref<1x16x128xf32, #tpu.memory_space<any>>
    %375 = tpu.memref_squeeze %374 : memref<1x16x128xf32, #tpu.memory_space<any>> -> memref<16x128xf32, #tpu.memory_space<any>>
    %c0_i32_374 = arith.constant 0 : i32
    %c0_i32_375 = arith.constant 0 : i32
    %376 = tpu.memref_slice %arg13[%c0_i32_370, %c0_i32_374, %c0_i32_375] : memref<2x16x128xf32, #tpu.memory_space<vmem>> -> memref<1x16x128xf32, #tpu.memory_space<vmem>>
    %377 = tpu.memref_squeeze %376 : memref<1x16x128xf32, #tpu.memory_space<vmem>> -> memref<16x128xf32, #tpu.memory_space<vmem>>
    %378 = tpu.memref_slice %arg14[%c0_i32_371] : memref<2x!tpu.dma_semaphore, #tpu.memory_space<semaphore_mem>> -> memref<1x!tpu.dma_semaphore, #tpu.memory_space<semaphore_mem>>
    %379 = tpu.memref_squeeze %378 : memref<1x!tpu.dma_semaphore, #tpu.memory_space<semaphore_mem>> -> memref<!tpu.dma_semaphore, #tpu.memory_space<semaphore_mem>>
    tpu.wait_dma2 semaphore(%379 : memref<!tpu.dma_semaphore, #tpu.memory_space<semaphore_mem>>) src(%375 : memref<16x128xf32, #tpu.memory_space<any>>) dst(%377 : memref<16x128xf32, #tpu.memory_space<vmem>>)
    %c15_i32 = arith.constant 15 : i32
    %380 = arith.addi %0, %c15_i32 : i32
    %381 = arith.index_cast %380 : i32 to index
    %382 = memref.load %arg1[%381] : memref<16xi32, #tpu.memory_space<smem>>
    %c1_i32_376 = arith.constant 1 : i32
    %c1_i32_377 = arith.constant 1 : i32
    %c0_i32_378 = arith.constant 0 : i32
    %c0_i32_379 = arith.constant 0 : i32
    %383 = tpu.memref_slice %arg4[%382, %c0_i32_378, %c0_i32_379] : memref<2x16x128xf32, #tpu.memory_space<any>> -> memref<1x16x128xf32, #tpu.memory_space<any>>
    %384 = tpu.memref_squeeze %383 : memref<1x16x128xf32, #tpu.memory_space<any>> -> memref<16x128xf32, #tpu.memory_space<any>>
    %c0_i32_380 = arith.constant 0 : i32
    %c0_i32_381 = arith.constant 0 : i32
    %385 = tpu.memref_slice %arg13[%c1_i32_376, %c0_i32_380, %c0_i32_381] : memref<2x16x128xf32, #tpu.memory_space<vmem>> -> memref<1x16x128xf32, #tpu.memory_space<vmem>>
    %386 = tpu.memref_squeeze %385 : memref<1x16x128xf32, #tpu.memory_space<vmem>> -> memref<16x128xf32, #tpu.memory_space<vmem>>
    %387 = tpu.memref_slice %arg14[%c1_i32_377] : memref<2x!tpu.dma_semaphore, #tpu.memory_space<semaphore_mem>> -> memref<1x!tpu.dma_semaphore, #tpu.memory_space<semaphore_mem>>
    %388 = tpu.memref_squeeze %387 : memref<1x!tpu.dma_semaphore, #tpu.memory_space<semaphore_mem>> -> memref<!tpu.dma_semaphore, #tpu.memory_space<semaphore_mem>>
    tpu.enqueue_dma source(%384 : memref<16x128xf32, #tpu.memory_space<any>>) target(%386 : memref<16x128xf32, #tpu.memory_space<vmem>>) target_semaphore(%388 : memref<!tpu.dma_semaphore, #tpu.memory_space<semaphore_mem>>)
    %c14 = arith.constant 14 : index
    %c0_382 = arith.constant 0 : index
    %c0_383 = arith.constant 0 : index
    %389 = vector.load %arg2[%c14, %c0_382, %c0_383] : memref<16x4x16xf32, #tpu.memory_space<vmem>>, vector<1x4x16xf32>
    %390 = vector.shape_cast %389 : vector<1x4x16xf32> to vector<4x16xf32>
    %c0_384 = arith.constant 0 : index
    %c0_385 = arith.constant 0 : index
    %c0_386 = arith.constant 0 : index
    %391 = vector.load %arg13[%c0_384, %c0_385, %c0_386] : memref<2x16x128xf32, #tpu.memory_space<vmem>>, vector<1x16x128xf32>
    %392 = vector.shape_cast %391 : vector<1x16x128xf32> to vector<16x128xf32>
    %cst_387 = arith.constant dense<0.000000e+00> : vector<4x128xf32>
    %393 = tpu.matmul %390, %392, %cst_387 {dimension_numbers = #tpu.dot_dimension_numbers<[1], [0], [0], [1], [0, 0, 1, 1], [], []>} : vector<4x16xf32>, vector<16x128xf32>, vector<4x128xf32> -> vector<4x128xf32>
    %c14_388 = arith.constant 14 : index
    %c0_389 = arith.constant 0 : index
    %c0_390 = arith.constant 0 : index
    %394 = vector.load %arg3[%c14_388, %c0_389, %c0_390] : memref<16x128x32xf32, #tpu.memory_space<vmem>>, vector<1x128x32xf32>
    %395 = vector.shape_cast %394 : vector<1x128x32xf32> to vector<128x32xf32>
    %cst_391 = arith.constant dense<0.000000e+00> : vector<4x32xf32>
    %396 = tpu.matmul %393, %395, %cst_391 {dimension_numbers = #tpu.dot_dimension_numbers<[1], [0], [0], [1], [0, 0, 1, 1], [], []>} : vector<4x128xf32>, vector<128x32xf32>, vector<4x32xf32> -> vector<4x32xf32>
    %c14_392 = arith.constant 14 : index
    %c0_393 = arith.constant 0 : index
    %c0_394 = arith.constant 0 : index
    %397 = vector.load %arg15[%c14_392, %c0_393, %c0_394] : memref<16x4x32xf32, #tpu.memory_space<vmem>>, vector<1x4x32xf32>
    %398 = vector.shape_cast %397 : vector<1x4x32xf32> to vector<4x32xf32>
    %399 = vector.shape_cast %396 : vector<4x32xf32> to vector<1x4x32xf32>
    tpu.vector_store %arg15[%c14_392, %c0_393, %c0_394], %399 {strides = array<i32>} : memref<16x4x32xf32, #tpu.memory_space<vmem>>, vector<1x4x32xf32>,
    %c0_i32_395 = arith.constant 0 : i32
    %c1_i32_396 = arith.constant 1 : i32
    %c1_i32_397 = arith.constant 1 : i32
    %c0_i32_398 = arith.constant 0 : i32
    %c0_i32_399 = arith.constant 0 : i32
    %400 = tpu.memref_slice %arg4[%c0_i32_395, %c0_i32_398, %c0_i32_399] : memref<2x16x128xf32, #tpu.memory_space<any>> -> memref<1x16x128xf32, #tpu.memory_space<any>>
    %401 = tpu.memref_squeeze %400 : memref<1x16x128xf32, #tpu.memory_space<any>> -> memref<16x128xf32, #tpu.memory_space<any>>
    %c0_i32_400 = arith.constant 0 : i32
    %c0_i32_401 = arith.constant 0 : i32
    %402 = tpu.memref_slice %arg13[%c1_i32_396, %c0_i32_400, %c0_i32_401] : memref<2x16x128xf32, #tpu.memory_space<vmem>> -> memref<1x16x128xf32, #tpu.memory_space<vmem>>
    %403 = tpu.memref_squeeze %402 : memref<1x16x128xf32, #tpu.memory_space<vmem>> -> memref<16x128xf32, #tpu.memory_space<vmem>>
    %404 = tpu.memref_slice %arg14[%c1_i32_397] : memref<2x!tpu.dma_semaphore, #tpu.memory_space<semaphore_mem>> -> memref<1x!tpu.dma_semaphore, #tpu.memory_space<semaphore_mem>>
    %405 = tpu.memref_squeeze %404 : memref<1x!tpu.dma_semaphore, #tpu.memory_space<semaphore_mem>> -> memref<!tpu.dma_semaphore, #tpu.memory_space<semaphore_mem>>
    tpu.wait_dma2 semaphore(%405 : memref<!tpu.dma_semaphore, #tpu.memory_space<semaphore_mem>>) src(%401 : memref<16x128xf32, #tpu.memory_space<any>>) dst(%403 : memref<16x128xf32, #tpu.memory_space<vmem>>)
    %c15 = arith.constant 15 : index
    %c0_402 = arith.constant 0 : index
    %c0_403 = arith.constant 0 : index
    %406 = vector.load %arg2[%c15, %c0_402, %c0_403] : memref<16x4x16xf32, #tpu.memory_space<vmem>>, vector<1x4x16xf32>
    %407 = vector.shape_cast %406 : vector<1x4x16xf32> to vector<4x16xf32>
    %c1_404 = arith.constant 1 : index
    %c0_405 = arith.constant 0 : index
    %c0_406 = arith.constant 0 : index
    %408 = vector.load %arg13[%c1_404, %c0_405, %c0_406] : memref<2x16x128xf32, #tpu.memory_space<vmem>>, vector<1x16x128xf32>
    %409 = vector.shape_cast %408 : vector<1x16x128xf32> to vector<16x128xf32>
    %cst_407 = arith.constant dense<0.000000e+00> : vector<4x128xf32>
    %410 = tpu.matmul %407, %409, %cst_407 {dimension_numbers = #tpu.dot_dimension_numbers<[1], [0], [0], [1], [0, 0, 1, 1], [], []>} : vector<4x16xf32>, vector<16x128xf32>, vector<4x128xf32> -> vector<4x128xf32>
    %c15_408 = arith.constant 15 : index
    %c0_409 = arith.constant 0 : index
    %c0_410 = arith.constant 0 : index
    %411 = vector.load %arg3[%c15_408, %c0_409, %c0_410] : memref<16x128x32xf32, #tpu.memory_space<vmem>>, vector<1x128x32xf32>
    %412 = vector.shape_cast %411 : vector<1x128x32xf32> to vector<128x32xf32>
    %cst_411 = arith.constant dense<0.000000e+00> : vector<4x32xf32>
    %413 = tpu.matmul %410, %412, %cst_411 {dimension_numbers = #tpu.dot_dimension_numbers<[1], [0], [0], [1], [0, 0, 1, 1], [], []>} : vector<4x128xf32>, vector<128x32xf32>, vector<4x32xf32> -> vector<4x32xf32>
    %c15_412 = arith.constant 15 : index
    %c0_413 = arith.constant 0 : index
    %c0_414 = arith.constant 0 : index
    %414 = vector.load %arg15[%c15_412, %c0_413, %c0_414] : memref<16x4x32xf32, #tpu.memory_space<vmem>>, vector<1x4x32xf32>
    %415 = vector.shape_cast %414 : vector<1x4x32xf32> to vector<4x32xf32>
    %416 = vector.shape_cast %413 : vector<4x32xf32> to vector<1x4x32xf32>
    tpu.vector_store %arg15[%c15_412, %c0_413, %c0_414], %416 {strides = array<i32>} : memref<16x4x32xf32, #tpu.memory_space<vmem>>, vector<1x4x32xf32>,
    %c0_415 = arith.constant 0 : index
    %c0_416 = arith.constant 0 : index
    %c0_417 = arith.constant 0 : index
    %417 = vector.load %arg15[%c0_415, %c0_416, %c0_417] : memref<16x4x32xf32, #tpu.memory_space<vmem>>, vector<16x4x32xf32>
    %cst_418 = arith.constant 0.000000e+00 : f32
    %418 = vector.broadcast %cst_418 : f32 to vector<16x128xf32>
    %419 = vector.extract_strided_slice %417 {offsets = [0, 0, 0], sizes = [16, 1, 32], strides = [1, 1, 1]} : vector<16x4x32xf32> to vector<16x1x32xf32>
    %420 = vector.shape_cast %419 : vector<16x1x32xf32> to vector<16x32xf32>
    %421 = arith.truncf %420 : vector<16x32xf32> to vector<16x32xbf16>
    %c0_419 = arith.constant 0 : index
    %c0_420 = arith.constant 0 : index
    %c0_421 = arith.constant 0 : index
    %422 = vector.load %arg5[%c0_419, %c0_420, %c0_421] : memref<4x32x128xbf16, #tpu.memory_space<vmem>>, vector<1x32x128xbf16>
    %423 = vector.shape_cast %422 : vector<1x32x128xbf16> to vector<32x128xbf16>
    %cst_422 = arith.constant dense<0.000000e+00> : vector<16x128xf32>
    %424 = tpu.matmul %421, %423, %cst_422 {dimension_numbers = #tpu.dot_dimension_numbers<[1], [0], [0], [1], [0, 0, 1, 1], [], []>} : vector<16x32xbf16>, vector<32x128xbf16>, vector<16x128xf32> -> vector<16x128xf32>
    %425 = arith.addf %418, %424 : vector<16x128xf32>
    %426 = vector.extract_strided_slice %417 {offsets = [0, 1, 0], sizes = [16, 1, 32], strides = [1, 1, 1]} : vector<16x4x32xf32> to vector<16x1x32xf32>
    %427 = vector.shape_cast %426 : vector<16x1x32xf32> to vector<16x32xf32>
    %428 = arith.truncf %427 : vector<16x32xf32> to vector<16x32xbf16>
    %c1_423 = arith.constant 1 : index
    %c0_424 = arith.constant 0 : index
    %c0_425 = arith.constant 0 : index
    %429 = vector.load %arg5[%c1_423, %c0_424, %c0_425] : memref<4x32x128xbf16, #tpu.memory_space<vmem>>, vector<1x32x128xbf16>
    %430 = vector.shape_cast %429 : vector<1x32x128xbf16> to vector<32x128xbf16>
    %cst_426 = arith.constant dense<0.000000e+00> : vector<16x128xf32>
    %431 = tpu.matmul %428, %430, %cst_426 {dimension_numbers = #tpu.dot_dimension_numbers<[1], [0], [0], [1], [0, 0, 1, 1], [], []>} : vector<16x32xbf16>, vector<32x128xbf16>, vector<16x128xf32> -> vector<16x128xf32>
    %432 = arith.addf %425, %431 : vector<16x128xf32>
    %433 = vector.extract_strided_slice %417 {offsets = [0, 2, 0], sizes = [16, 1, 32], strides = [1, 1, 1]} : vector<16x4x32xf32> to vector<16x1x32xf32>
    %434 = vector.shape_cast %433 : vector<16x1x32xf32> to vector<16x32xf32>
    %435 = arith.truncf %434 : vector<16x32xf32> to vector<16x32xbf16>
    %c2_427 = arith.constant 2 : index
    %c0_428 = arith.constant 0 : index
    %c0_429 = arith.constant 0 : index
    %436 = vector.load %arg5[%c2_427, %c0_428, %c0_429] : memref<4x32x128xbf16, #tpu.memory_space<vmem>>, vector<1x32x128xbf16>
    %437 = vector.shape_cast %436 : vector<1x32x128xbf16> to vector<32x128xbf16>
    %cst_430 = arith.constant dense<0.000000e+00> : vector<16x128xf32>
    %438 = tpu.matmul %435, %437, %cst_430 {dimension_numbers = #tpu.dot_dimension_numbers<[1], [0], [0], [1], [0, 0, 1, 1], [], []>} : vector<16x32xbf16>, vector<32x128xbf16>, vector<16x128xf32> -> vector<16x128xf32>
    %439 = arith.addf %432, %438 : vector<16x128xf32>
    %440 = vector.extract_strided_slice %417 {offsets = [0, 3, 0], sizes = [16, 1, 32], strides = [1, 1, 1]} : vector<16x4x32xf32> to vector<16x1x32xf32>
    %441 = vector.shape_cast %440 : vector<16x1x32xf32> to vector<16x32xf32>
    %442 = arith.truncf %441 : vector<16x32xf32> to vector<16x32xbf16>
    %c3_431 = arith.constant 3 : index
    %c0_432 = arith.constant 0 : index
    %c0_433 = arith.constant 0 : index
    %443 = vector.load %arg5[%c3_431, %c0_432, %c0_433] : memref<4x32x128xbf16, #tpu.memory_space<vmem>>, vector<1x32x128xbf16>
    %444 = vector.shape_cast %443 : vector<1x32x128xbf16> to vector<32x128xbf16>
    %cst_434 = arith.constant dense<0.000000e+00> : vector<16x128xf32>
    %445 = tpu.matmul %442, %444, %cst_434 {dimension_numbers = #tpu.dot_dimension_numbers<[1], [0], [0], [1], [0, 0, 1, 1], [], []>} : vector<16x32xbf16>, vector<32x128xbf16>, vector<16x128xf32> -> vector<16x128xf32>
    %446 = arith.addf %439, %445 : vector<16x128xf32>
    %c0_435 = arith.constant 0 : index
    %c0_436 = arith.constant 0 : index
    %447 = vector.load %arg6[%c0_435, %c0_436] : memref<1x128xf32, #tpu.memory_space<vmem>>, vector<1x128xf32>
    %448 = vector.broadcast %447 : vector<1x128xf32> to vector<16x128xf32>
    %449 = arith.addf %446, %448 : vector<16x128xf32>
    %cst_437 = arith.constant 0.000000e+00 : f32
    %450 = vector.broadcast %cst_437 : f32 to vector<16x128xf32>
    %451 = arith.maximumf %449, %450 : vector<16x128xf32>
    %452 = arith.truncf %451 : vector<16x128xf32> to vector<16x128xbf16>
    %c0_438 = arith.constant 0 : index
    %c0_439 = arith.constant 0 : index
    %453 = vector.load %arg7[%c0_438, %c0_439] : memref<128x128xbf16, #tpu.memory_space<vmem>>, vector<128x128xbf16>
    %cst_440 = arith.constant dense<0.000000e+00> : vector<16x128xf32>
    %454 = tpu.matmul %452, %453, %cst_440 {dimension_numbers = #tpu.dot_dimension_numbers<[1], [0], [0], [1], [0, 0, 1, 1], [], []>} : vector<16x128xbf16>, vector<128x128xbf16>, vector<16x128xf32> -> vector<16x128xf32>
    %c0_441 = arith.constant 0 : index
    %c0_442 = arith.constant 0 : index
    %455 = vector.load %arg8[%c0_441, %c0_442] : memref<1x128xf32, #tpu.memory_space<vmem>>, vector<1x128xf32>
    %456 = vector.broadcast %455 : vector<1x128xf32> to vector<16x128xf32>
    %457 = arith.addf %454, %456 : vector<16x128xf32>
    %cst_443 = arith.constant 0.000000e+00 : f32
    %458 = vector.broadcast %cst_443 : f32 to vector<16x128xf32>
    %459 = arith.maximumf %457, %458 : vector<16x128xf32>
    %c0_444 = arith.constant 0 : index
    %c0_445 = arith.constant 0 : index
    %460 = vector.load %arg11[%c0_444, %c0_445] : memref<16x128xf32, #tpu.memory_space<vmem>>, vector<16x128xf32>
    tpu.vector_store %arg11[%c0_444, %c0_445], %459 {strides = array<i32>} : memref<16x128xf32, #tpu.memory_space<vmem>>, vector<16x128xf32>,
    %461 = arith.truncf %459 : vector<16x128xf32> to vector<16x128xbf16>
    %c0_446 = arith.constant 0 : index
    %c0_447 = arith.constant 0 : index
    %462 = vector.load %arg9[%c0_446, %c0_447] : memref<128x128xbf16, #tpu.memory_space<vmem>>, vector<128x128xbf16>
    %cst_448 = arith.constant dense<0.000000e+00> : vector<16x128xf32>
    %463 = tpu.matmul %461, %462, %cst_448 {dimension_numbers = #tpu.dot_dimension_numbers<[1], [0], [0], [1], [0, 0, 1, 1], [], []>} : vector<16x128xbf16>, vector<128x128xbf16>, vector<16x128xf32> -> vector<16x128xf32>
    %c0_449 = arith.constant 0 : index
    %c0_450 = arith.constant 0 : index
    %464 = vector.load %arg10[%c0_449, %c0_450] : memref<1x128xf32, #tpu.memory_space<vmem>>, vector<1x128xf32>
    %465 = vector.broadcast %464 : vector<1x128xf32> to vector<16x128xf32>
    %466 = arith.addf %463, %465 : vector<16x128xf32>
    %c0_451 = arith.constant 0 : index
    %c0_452 = arith.constant 0 : index
    %467 = vector.load %arg12[%c0_451, %c0_452] : memref<16x128xf32, #tpu.memory_space<vmem>>, vector<16x128xf32>
    tpu.vector_store %arg12[%c0_451, %c0_452], %466 {strides = array<i32>} : memref<16x128xf32, #tpu.memory_space<vmem>>, vector<16x128xf32>,
    return
  }
  func.func @transform_0(%arg0: i32, %arg1: memref<16xi32, #tpu.memory_space<smem>>) -> (i32, i32, i32) {
    %c0_i32 = arith.constant 0 : i32
    %c0_i32_0 = arith.constant 0 : i32
    %c0_i32_1 = arith.constant 0 : i32
    return %arg0, %c0_i32, %c0_i32_0 : i32, i32, i32
  }
  func.func @transform_1(%arg0: i32, %arg1: memref<16xi32, #tpu.memory_space<smem>>) -> (i32, i32, i32) {
    %c0_i32 = arith.constant 0 : i32
    %c0_i32_0 = arith.constant 0 : i32
    %c0_i32_1 = arith.constant 0 : i32
    return %arg0, %c0_i32, %c0_i32_0 : i32, i32, i32
  }
  func.func @transform_3(%arg0: i32, %arg1: memref<16xi32, #tpu.memory_space<smem>>) -> (i32, i32, i32) {
    %c0_i32 = arith.constant 0 : i32
    %c0_i32_0 = arith.constant 0 : i32
    %c0_i32_1 = arith.constant 0 : i32
    %c0_i32_2 = arith.constant 0 : i32
    return %c0_i32, %c0_i32_0, %c0_i32_1 : i32, i32, i32
  }
  func.func @transform_4(%arg0: i32, %arg1: memref<16xi32, #tpu.memory_space<smem>>) -> (i32, i32) {
    %c0_i32 = arith.constant 0 : i32
    %c0_i32_0 = arith.constant 0 : i32
    %c0_i32_1 = arith.constant 0 : i32
    return %c0_i32, %c0_i32_0 : i32, i32
  }
  func.func @transform_5(%arg0: i32, %arg1: memref<16xi32, #tpu.memory_space<smem>>) -> (i32, i32) {
    %c0_i32 = arith.constant 0 : i32
    %c0_i32_0 = arith.constant 0 : i32
    %c0_i32_1 = arith.constant 0 : i32
    return %c0_i32, %c0_i32_0 : i32, i32
  }
  func.func @transform_6(%arg0: i32, %arg1: memref<16xi32, #tpu.memory_space<smem>>) -> (i32, i32) {
    %c0_i32 = arith.constant 0 : i32
    %c0_i32_0 = arith.constant 0 : i32
    %c0_i32_1 = arith.constant 0 : i32
    return %c0_i32, %c0_i32_0 : i32, i32
  }
  func.func @transform_7(%arg0: i32, %arg1: memref<16xi32, #tpu.memory_space<smem>>) -> (i32, i32) {
    %c0_i32 = arith.constant 0 : i32
    %c0_i32_0 = arith.constant 0 : i32
    %c0_i32_1 = arith.constant 0 : i32
    return %c0_i32, %c0_i32_0 : i32, i32
  }
  func.func @transform_8(%arg0: i32, %arg1: memref<16xi32, #tpu.memory_space<smem>>) -> (i32, i32) {
    %c0_i32 = arith.constant 0 : i32
    %c0_i32_0 = arith.constant 0 : i32
    %c0_i32_1 = arith.constant 0 : i32
    return %c0_i32, %c0_i32_0 : i32, i32
  }
  func.func @transform_9(%arg0: i32, %arg1: memref<16xi32, #tpu.memory_space<smem>>) -> (i32, i32) {
    %c0_i32 = arith.constant 0 : i32
    %c0_i32_0 = arith.constant 0 : i32
    return %arg0, %c0_i32 : i32, i32
  }
  func.func @transform_10(%arg0: i32, %arg1: memref<16xi32, #tpu.memory_space<smem>>) -> (i32, i32) {
    %c0_i32 = arith.constant 0 : i32
    %c0_i32_0 = arith.constant 0 : i32
    return %arg0, %c0_i32 : i32, i32
  }
}

module attributes {stable_mosaic.version = 11 : i64} {
  func.func @_box_head_kernel(%arg0: i32, %arg1: memref<16xi32, #tpu.memory_space<smem>>, %arg2: memref<16x4x16xf32, #tpu.memory_space<vmem>>, %arg3: memref<16x128x32xf32, #tpu.memory_space<vmem>>, %arg4: memref<2x16x128xf32, #tpu.memory_space<any>>, %arg5: memref<4x32x128xbf16, #tpu.memory_space<vmem>>, %arg6: memref<1x128xf32, #tpu.memory_space<vmem>>, %arg7: memref<128x128xbf16, #tpu.memory_space<vmem>>, %arg8: memref<1x128xf32, #tpu.memory_space<vmem>>, %arg9: memref<128x128xbf16, #tpu.memory_space<vmem>>, %arg10: memref<1x128xf32, #tpu.memory_space<vmem>>, %arg11: memref<16x128xf32, #tpu.memory_space<vmem>>, %arg12: memref<16x128xf32, #tpu.memory_space<vmem>>, %arg13: memref<2x16x128xf32, #tpu.memory_space<vmem>>, %arg14: memref<2x!tpu.dma_semaphore, #tpu.memory_space<semaphore_mem>>, %arg15: memref<16x4x32xf32, #tpu.memory_space<vmem>>) attributes {dimension_semantics = [#tpu.dimension_semantics<parallel>], iteration_bounds = array<i64: 1>, scalar_prefetch = 1 : i64, scratch_operands = 3 : i64, tpu.core_type = #tpu.core_type<tc>, window_params = [{transform_indices = @transform_0, window_bounds = array<i64: 16, 4, 16>}, {transform_indices = @transform_1, window_bounds = array<i64: 16, 128, 32>}, {}, {pipeline_mode = #tpu.pipeline_mode<synchronous>, transform_indices = @transform_3, window_bounds = array<i64: 4, 32, 128>}, {pipeline_mode = #tpu.pipeline_mode<synchronous>, transform_indices = @transform_4, window_bounds = array<i64: 1, 128>}, {pipeline_mode = #tpu.pipeline_mode<synchronous>, transform_indices = @transform_5, window_bounds = array<i64: 128, 128>}, {pipeline_mode = #tpu.pipeline_mode<synchronous>, transform_indices = @transform_6, window_bounds = array<i64: 1, 128>}, {pipeline_mode = #tpu.pipeline_mode<synchronous>, transform_indices = @transform_7, window_bounds = array<i64: 128, 128>}, {pipeline_mode = #tpu.pipeline_mode<synchronous>, transform_indices = @transform_8, window_bounds = array<i64: 1, 128>}, {transform_indices = @transform_9, window_bounds = array<i64: 16, 128>}, {transform_indices = @transform_10, window_bounds = array<i64: 16, 128>}]} {
    %c16_i32 = arith.constant 16 : i32
    %0 = arith.muli %arg0, %c16_i32 : i32
    %c0_i32 = arith.constant 0 : i32
    %1 = arith.addi %0, %c0_i32 : i32
    %2 = arith.index_cast %1 : i32 to index
    %3 = memref.load %arg1[%2] : memref<16xi32, #tpu.memory_space<smem>>
    %c0_i32_0 = arith.constant 0 : i32
    %c0_i32_1 = arith.constant 0 : i32
    %c0_i32_2 = arith.constant 0 : i32
    %c0_i32_3 = arith.constant 0 : i32
    %4 = tpu.memref_slice %arg4[%3, %c0_i32_2, %c0_i32_3] : memref<2x16x128xf32, #tpu.memory_space<any>> -> memref<1x16x128xf32, #tpu.memory_space<any>>
    %5 = tpu.memref_squeeze %4 : memref<1x16x128xf32, #tpu.memory_space<any>> -> memref<16x128xf32, #tpu.memory_space<any>>
    %c0_i32_4 = arith.constant 0 : i32
    %c0_i32_5 = arith.constant 0 : i32
    %6 = tpu.memref_slice %arg13[%c0_i32_0, %c0_i32_4, %c0_i32_5] : memref<2x16x128xf32, #tpu.memory_space<vmem>> -> memref<1x16x128xf32, #tpu.memory_space<vmem>>
    %7 = tpu.memref_squeeze %6 : memref<1x16x128xf32, #tpu.memory_space<vmem>> -> memref<16x128xf32, #tpu.memory_space<vmem>>
    %8 = tpu.memref_slice %arg14[%c0_i32_1] : memref<2x!tpu.dma_semaphore, #tpu.memory_space<semaphore_mem>> -> memref<1x!tpu.dma_semaphore, #tpu.memory_space<semaphore_mem>>
    %9 = tpu.memref_squeeze %8 : memref<1x!tpu.dma_semaphore, #tpu.memory_space<semaphore_mem>> -> memref<!tpu.dma_semaphore, #tpu.memory_space<semaphore_mem>>
    tpu.enqueue_dma source(%5 : memref<16x128xf32, #tpu.memory_space<any>>) target(%7 : memref<16x128xf32, #tpu.memory_space<vmem>>) target_semaphore(%9 : memref<!tpu.dma_semaphore, #tpu.memory_space<semaphore_mem>>)
    %c0_i32_6 = arith.constant 0 : i32
    %c0_i32_7 = arith.constant 0 : i32
    %c0_i32_8 = arith.constant 0 : i32
    %c0_i32_9 = arith.constant 0 : i32
    %c0_i32_10 = arith.constant 0 : i32
    %10 = tpu.memref_slice %arg4[%c0_i32_6, %c0_i32_9, %c0_i32_10] : memref<2x16x128xf32, #tpu.memory_space<any>> -> memref<1x16x128xf32, #tpu.memory_space<any>>
    %11 = tpu.memref_squeeze %10 : memref<1x16x128xf32, #tpu.memory_space<any>> -> memref<16x128xf32, #tpu.memory_space<any>>
    %c0_i32_11 = arith.constant 0 : i32
    %c0_i32_12 = arith.constant 0 : i32
    %12 = tpu.memref_slice %arg13[%c0_i32_7, %c0_i32_11, %c0_i32_12] : memref<2x16x128xf32, #tpu.memory_space<vmem>> -> memref<1x16x128xf32, #tpu.memory_space<vmem>>
    %13 = tpu.memref_squeeze %12 : memref<1x16x128xf32, #tpu.memory_space<vmem>> -> memref<16x128xf32, #tpu.memory_space<vmem>>
    %14 = tpu.memref_slice %arg14[%c0_i32_8] : memref<2x!tpu.dma_semaphore, #tpu.memory_space<semaphore_mem>> -> memref<1x!tpu.dma_semaphore, #tpu.memory_space<semaphore_mem>>
    %15 = tpu.memref_squeeze %14 : memref<1x!tpu.dma_semaphore, #tpu.memory_space<semaphore_mem>> -> memref<!tpu.dma_semaphore, #tpu.memory_space<semaphore_mem>>
    tpu.wait_dma2 semaphore(%15 : memref<!tpu.dma_semaphore, #tpu.memory_space<semaphore_mem>>) src(%11 : memref<16x128xf32, #tpu.memory_space<any>>) dst(%13 : memref<16x128xf32, #tpu.memory_space<vmem>>)
    %c1_i32 = arith.constant 1 : i32
    %16 = arith.addi %0, %c1_i32 : i32
    %17 = arith.index_cast %16 : i32 to index
    %18 = memref.load %arg1[%17] : memref<16xi32, #tpu.memory_space<smem>>
    %c1_i32_13 = arith.constant 1 : i32
    %c1_i32_14 = arith.constant 1 : i32
    %c0_i32_15 = arith.constant 0 : i32
    %c0_i32_16 = arith.constant 0 : i32
    %19 = tpu.memref_slice %arg4[%18, %c0_i32_15, %c0_i32_16] : memref<2x16x128xf32, #tpu.memory_space<any>> -> memref<1x16x128xf32, #tpu.memory_space<any>>
    %20 = tpu.memref_squeeze %19 : memref<1x16x128xf32, #tpu.memory_space<any>> -> memref<16x128xf32, #tpu.memory_space<any>>
    %c0_i32_17 = arith.constant 0 : i32
    %c0_i32_18 = arith.constant 0 : i32
    %21 = tpu.memref_slice %arg13[%c1_i32_13, %c0_i32_17, %c0_i32_18] : memref<2x16x128xf32, #tpu.memory_space<vmem>> -> memref<1x16x128xf32, #tpu.memory_space<vmem>>
    %22 = tpu.memref_squeeze %21 : memref<1x16x128xf32, #tpu.memory_space<vmem>> -> memref<16x128xf32, #tpu.memory_space<vmem>>
    %23 = tpu.memref_slice %arg14[%c1_i32_14] : memref<2x!tpu.dma_semaphore, #tpu.memory_space<semaphore_mem>> -> memref<1x!tpu.dma_semaphore, #tpu.memory_space<semaphore_mem>>
    %24 = tpu.memref_squeeze %23 : memref<1x!tpu.dma_semaphore, #tpu.memory_space<semaphore_mem>> -> memref<!tpu.dma_semaphore, #tpu.memory_space<semaphore_mem>>
    tpu.enqueue_dma source(%20 : memref<16x128xf32, #tpu.memory_space<any>>) target(%22 : memref<16x128xf32, #tpu.memory_space<vmem>>) target_semaphore(%24 : memref<!tpu.dma_semaphore, #tpu.memory_space<semaphore_mem>>)
    %c0 = arith.constant 0 : index
    %c0_19 = arith.constant 0 : index
    %c0_20 = arith.constant 0 : index
    %25 = vector.load %arg2[%c0, %c0_19, %c0_20] : memref<16x4x16xf32, #tpu.memory_space<vmem>>, vector<1x4x16xf32>
    %26 = vector.shape_cast %25 : vector<1x4x16xf32> to vector<4x16xf32>
    %c0_21 = arith.constant 0 : index
    %c0_22 = arith.constant 0 : index
    %c0_23 = arith.constant 0 : index
    %27 = vector.load %arg13[%c0_21, %c0_22, %c0_23] : memref<2x16x128xf32, #tpu.memory_space<vmem>>, vector<1x16x128xf32>
    %28 = vector.shape_cast %27 : vector<1x16x128xf32> to vector<16x128xf32>
    %cst = arith.constant dense<0.000000e+00> : vector<4x128xf32>
    %29 = tpu.matmul %26, %28, %cst {dimension_numbers = #tpu.dot_dimension_numbers<[1], [0], [0], [1], [0, 0, 1, 1], [], []>} : vector<4x16xf32>, vector<16x128xf32>, vector<4x128xf32> -> vector<4x128xf32>
    %c0_24 = arith.constant 0 : index
    %c0_25 = arith.constant 0 : index
    %c0_26 = arith.constant 0 : index
    %30 = vector.load %arg3[%c0_24, %c0_25, %c0_26] : memref<16x128x32xf32, #tpu.memory_space<vmem>>, vector<1x128x32xf32>
    %31 = vector.shape_cast %30 : vector<1x128x32xf32> to vector<128x32xf32>
    %cst_27 = arith.constant dense<0.000000e+00> : vector<4x32xf32>
    %32 = tpu.matmul %29, %31, %cst_27 {dimension_numbers = #tpu.dot_dimension_numbers<[1], [0], [0], [1], [0, 0, 1, 1], [], []>} : vector<4x128xf32>, vector<128x32xf32>, vector<4x32xf32> -> vector<4x32xf32>
    %c0_28 = arith.constant 0 : index
    %c0_29 = arith.constant 0 : index
    %c0_30 = arith.constant 0 : index
    %33 = vector.load %arg15[%c0_28, %c0_29, %c0_30] : memref<16x4x32xf32, #tpu.memory_space<vmem>>, vector<1x4x32xf32>
    %34 = vector.shape_cast %33 : vector<1x4x32xf32> to vector<4x32xf32>
    %35 = vector.shape_cast %32 : vector<4x32xf32> to vector<1x4x32xf32>
    tpu.vector_store %arg15[%c0_28, %c0_29, %c0_30], %35 {strides = array<i32>} : memref<16x4x32xf32, #tpu.memory_space<vmem>>, vector<1x4x32xf32>,
    %c0_i32_31 = arith.constant 0 : i32
    %c1_i32_32 = arith.constant 1 : i32
    %c1_i32_33 = arith.constant 1 : i32
    %c0_i32_34 = arith.constant 0 : i32
    %c0_i32_35 = arith.constant 0 : i32
    %36 = tpu.memref_slice %arg4[%c0_i32_31, %c0_i32_34, %c0_i32_35] : memref<2x16x128xf32, #tpu.memory_space<any>> -> memref<1x16x128xf32, #tpu.memory_space<any>>
    %37 = tpu.memref_squeeze %36 : memref<1x16x128xf32, #tpu.memory_space<any>> -> memref<16x128xf32, #tpu.memory_space<any>>
    %c0_i32_36 = arith.constant 0 : i32
    %c0_i32_37 = arith.constant 0 : i32
    %38 = tpu.memref_slice %arg13[%c1_i32_32, %c0_i32_36, %c0_i32_37] : memref<2x16x128xf32, #tpu.memory_space<vmem>> -> memref<1x16x128xf32, #tpu.memory_space<vmem>>
    %39 = tpu.memref_squeeze %38 : memref<1x16x128xf32, #tpu.memory_space<vmem>> -> memref<16x128xf32, #tpu.memory_space<vmem>>
    %40 = tpu.memref_slice %arg14[%c1_i32_33] : memref<2x!tpu.dma_semaphore, #tpu.memory_space<semaphore_mem>> -> memref<1x!tpu.dma_semaphore, #tpu.memory_space<semaphore_mem>>
    %41 = tpu.memref_squeeze %40 : memref<1x!tpu.dma_semaphore, #tpu.memory_space<semaphore_mem>> -> memref<!tpu.dma_semaphore, #tpu.memory_space<semaphore_mem>>
    tpu.wait_dma2 semaphore(%41 : memref<!tpu.dma_semaphore, #tpu.memory_space<semaphore_mem>>) src(%37 : memref<16x128xf32, #tpu.memory_space<any>>) dst(%39 : memref<16x128xf32, #tpu.memory_space<vmem>>)
    %c2_i32 = arith.constant 2 : i32
    %42 = arith.addi %0, %c2_i32 : i32
    %43 = arith.index_cast %42 : i32 to index
    %44 = memref.load %arg1[%43] : memref<16xi32, #tpu.memory_space<smem>>
    %c0_i32_38 = arith.constant 0 : i32
    %c0_i32_39 = arith.constant 0 : i32
    %c0_i32_40 = arith.constant 0 : i32
    %c0_i32_41 = arith.constant 0 : i32
    %45 = tpu.memref_slice %arg4[%44, %c0_i32_40, %c0_i32_41] : memref<2x16x128xf32, #tpu.memory_space<any>> -> memref<1x16x128xf32, #tpu.memory_space<any>>
    %46 = tpu.memref_squeeze %45 : memref<1x16x128xf32, #tpu.memory_space<any>> -> memref<16x128xf32, #tpu.memory_space<any>>
    %c0_i32_42 = arith.constant 0 : i32
    %c0_i32_43 = arith.constant 0 : i32
    %47 = tpu.memref_slice %arg13[%c0_i32_38, %c0_i32_42, %c0_i32_43] : memref<2x16x128xf32, #tpu.memory_space<vmem>> -> memref<1x16x128xf32, #tpu.memory_space<vmem>>
    %48 = tpu.memref_squeeze %47 : memref<1x16x128xf32, #tpu.memory_space<vmem>> -> memref<16x128xf32, #tpu.memory_space<vmem>>
    %49 = tpu.memref_slice %arg14[%c0_i32_39] : memref<2x!tpu.dma_semaphore, #tpu.memory_space<semaphore_mem>> -> memref<1x!tpu.dma_semaphore, #tpu.memory_space<semaphore_mem>>
    %50 = tpu.memref_squeeze %49 : memref<1x!tpu.dma_semaphore, #tpu.memory_space<semaphore_mem>> -> memref<!tpu.dma_semaphore, #tpu.memory_space<semaphore_mem>>
    tpu.enqueue_dma source(%46 : memref<16x128xf32, #tpu.memory_space<any>>) target(%48 : memref<16x128xf32, #tpu.memory_space<vmem>>) target_semaphore(%50 : memref<!tpu.dma_semaphore, #tpu.memory_space<semaphore_mem>>)
    %c1 = arith.constant 1 : index
    %c0_44 = arith.constant 0 : index
    %c0_45 = arith.constant 0 : index
    %51 = vector.load %arg2[%c1, %c0_44, %c0_45] : memref<16x4x16xf32, #tpu.memory_space<vmem>>, vector<1x4x16xf32>
    %52 = vector.shape_cast %51 : vector<1x4x16xf32> to vector<4x16xf32>
    %c1_46 = arith.constant 1 : index
    %c0_47 = arith.constant 0 : index
    %c0_48 = arith.constant 0 : index
    %53 = vector.load %arg13[%c1_46, %c0_47, %c0_48] : memref<2x16x128xf32, #tpu.memory_space<vmem>>, vector<1x16x128xf32>
    %54 = vector.shape_cast %53 : vector<1x16x128xf32> to vector<16x128xf32>
    %cst_49 = arith.constant dense<0.000000e+00> : vector<4x128xf32>
    %55 = tpu.matmul %52, %54, %cst_49 {dimension_numbers = #tpu.dot_dimension_numbers<[1], [0], [0], [1], [0, 0, 1, 1], [], []>} : vector<4x16xf32>, vector<16x128xf32>, vector<4x128xf32> -> vector<4x128xf32>
    %c1_50 = arith.constant 1 : index
    %c0_51 = arith.constant 0 : index
    %c0_52 = arith.constant 0 : index
    %56 = vector.load %arg3[%c1_50, %c0_51, %c0_52] : memref<16x128x32xf32, #tpu.memory_space<vmem>>, vector<1x128x32xf32>
    %57 = vector.shape_cast %56 : vector<1x128x32xf32> to vector<128x32xf32>
    %cst_53 = arith.constant dense<0.000000e+00> : vector<4x32xf32>
    %58 = tpu.matmul %55, %57, %cst_53 {dimension_numbers = #tpu.dot_dimension_numbers<[1], [0], [0], [1], [0, 0, 1, 1], [], []>} : vector<4x128xf32>, vector<128x32xf32>, vector<4x32xf32> -> vector<4x32xf32>
    %c1_54 = arith.constant 1 : index
    %c0_55 = arith.constant 0 : index
    %c0_56 = arith.constant 0 : index
    %59 = vector.load %arg15[%c1_54, %c0_55, %c0_56] : memref<16x4x32xf32, #tpu.memory_space<vmem>>, vector<1x4x32xf32>
    %60 = vector.shape_cast %59 : vector<1x4x32xf32> to vector<4x32xf32>
    %61 = vector.shape_cast %58 : vector<4x32xf32> to vector<1x4x32xf32>
    tpu.vector_store %arg15[%c1_54, %c0_55, %c0_56], %61 {strides = array<i32>} : memref<16x4x32xf32, #tpu.memory_space<vmem>>, vector<1x4x32xf32>,
    %c0_i32_57 = arith.constant 0 : i32
    %c0_i32_58 = arith.constant 0 : i32
    %c0_i32_59 = arith.constant 0 : i32
    %c0_i32_60 = arith.constant 0 : i32
    %c0_i32_61 = arith.constant 0 : i32
    %62 = tpu.memref_slice %arg4[%c0_i32_57, %c0_i32_60, %c0_i32_61] : memref<2x16x128xf32, #tpu.memory_space<any>> -> memref<1x16x128xf32, #tpu.memory_space<any>>
    %63 = tpu.memref_squeeze %62 : memref<1x16x128xf32, #tpu.memory_space<any>> -> memref<16x128xf32, #tpu.memory_space<any>>
    %c0_i32_62 = arith.constant 0 : i32
    %c0_i32_63 = arith.constant 0 : i32
    %64 = tpu.memref_slice %arg13[%c0_i32_58, %c0_i32_62, %c0_i32_63] : memref<2x16x128xf32, #tpu.memory_space<vmem>> -> memref<1x16x128xf32, #tpu.memory_space<vmem>>
    %65 = tpu.memref_squeeze %64 : memref<1x16x128xf32, #tpu.memory_space<vmem>> -> memref<16x128xf32, #tpu.memory_space<vmem>>
    %66 = tpu.memref_slice %arg14[%c0_i32_59] : memref<2x!tpu.dma_semaphore, #tpu.memory_space<semaphore_mem>> -> memref<1x!tpu.dma_semaphore, #tpu.memory_space<semaphore_mem>>
    %67 = tpu.memref_squeeze %66 : memref<1x!tpu.dma_semaphore, #tpu.memory_space<semaphore_mem>> -> memref<!tpu.dma_semaphore, #tpu.memory_space<semaphore_mem>>
    tpu.wait_dma2 semaphore(%67 : memref<!tpu.dma_semaphore, #tpu.memory_space<semaphore_mem>>) src(%63 : memref<16x128xf32, #tpu.memory_space<any>>) dst(%65 : memref<16x128xf32, #tpu.memory_space<vmem>>)
    %c3_i32 = arith.constant 3 : i32
    %68 = arith.addi %0, %c3_i32 : i32
    %69 = arith.index_cast %68 : i32 to index
    %70 = memref.load %arg1[%69] : memref<16xi32, #tpu.memory_space<smem>>
    %c1_i32_64 = arith.constant 1 : i32
    %c1_i32_65 = arith.constant 1 : i32
    %c0_i32_66 = arith.constant 0 : i32
    %c0_i32_67 = arith.constant 0 : i32
    %71 = tpu.memref_slice %arg4[%70, %c0_i32_66, %c0_i32_67] : memref<2x16x128xf32, #tpu.memory_space<any>> -> memref<1x16x128xf32, #tpu.memory_space<any>>
    %72 = tpu.memref_squeeze %71 : memref<1x16x128xf32, #tpu.memory_space<any>> -> memref<16x128xf32, #tpu.memory_space<any>>
    %c0_i32_68 = arith.constant 0 : i32
    %c0_i32_69 = arith.constant 0 : i32
    %73 = tpu.memref_slice %arg13[%c1_i32_64, %c0_i32_68, %c0_i32_69] : memref<2x16x128xf32, #tpu.memory_space<vmem>> -> memref<1x16x128xf32, #tpu.memory_space<vmem>>
    %74 = tpu.memref_squeeze %73 : memref<1x16x128xf32, #tpu.memory_space<vmem>> -> memref<16x128xf32, #tpu.memory_space<vmem>>
    %75 = tpu.memref_slice %arg14[%c1_i32_65] : memref<2x!tpu.dma_semaphore, #tpu.memory_space<semaphore_mem>> -> memref<1x!tpu.dma_semaphore, #tpu.memory_space<semaphore_mem>>
    %76 = tpu.memref_squeeze %75 : memref<1x!tpu.dma_semaphore, #tpu.memory_space<semaphore_mem>> -> memref<!tpu.dma_semaphore, #tpu.memory_space<semaphore_mem>>
    tpu.enqueue_dma source(%72 : memref<16x128xf32, #tpu.memory_space<any>>) target(%74 : memref<16x128xf32, #tpu.memory_space<vmem>>) target_semaphore(%76 : memref<!tpu.dma_semaphore, #tpu.memory_space<semaphore_mem>>)
    %c2 = arith.constant 2 : index
    %c0_70 = arith.constant 0 : index
    %c0_71 = arith.constant 0 : index
    %77 = vector.load %arg2[%c2, %c0_70, %c0_71] : memref<16x4x16xf32, #tpu.memory_space<vmem>>, vector<1x4x16xf32>
    %78 = vector.shape_cast %77 : vector<1x4x16xf32> to vector<4x16xf32>
    %c0_72 = arith.constant 0 : index
    %c0_73 = arith.constant 0 : index
    %c0_74 = arith.constant 0 : index
    %79 = vector.load %arg13[%c0_72, %c0_73, %c0_74] : memref<2x16x128xf32, #tpu.memory_space<vmem>>, vector<1x16x128xf32>
    %80 = vector.shape_cast %79 : vector<1x16x128xf32> to vector<16x128xf32>
    %cst_75 = arith.constant dense<0.000000e+00> : vector<4x128xf32>
    %81 = tpu.matmul %78, %80, %cst_75 {dimension_numbers = #tpu.dot_dimension_numbers<[1], [0], [0], [1], [0, 0, 1, 1], [], []>} : vector<4x16xf32>, vector<16x128xf32>, vector<4x128xf32> -> vector<4x128xf32>
    %c2_76 = arith.constant 2 : index
    %c0_77 = arith.constant 0 : index
    %c0_78 = arith.constant 0 : index
    %82 = vector.load %arg3[%c2_76, %c0_77, %c0_78] : memref<16x128x32xf32, #tpu.memory_space<vmem>>, vector<1x128x32xf32>
    %83 = vector.shape_cast %82 : vector<1x128x32xf32> to vector<128x32xf32>
    %cst_79 = arith.constant dense<0.000000e+00> : vector<4x32xf32>
    %84 = tpu.matmul %81, %83, %cst_79 {dimension_numbers = #tpu.dot_dimension_numbers<[1], [0], [0], [1], [0, 0, 1, 1], [], []>} : vector<4x128xf32>, vector<128x32xf32>, vector<4x32xf32> -> vector<4x32xf32>
    %c2_80 = arith.constant 2 : index
    %c0_81 = arith.constant 0 : index
    %c0_82 = arith.constant 0 : index
    %85 = vector.load %arg15[%c2_80, %c0_81, %c0_82] : memref<16x4x32xf32, #tpu.memory_space<vmem>>, vector<1x4x32xf32>
    %86 = vector.shape_cast %85 : vector<1x4x32xf32> to vector<4x32xf32>
    %87 = vector.shape_cast %84 : vector<4x32xf32> to vector<1x4x32xf32>
    tpu.vector_store %arg15[%c2_80, %c0_81, %c0_82], %87 {strides = array<i32>} : memref<16x4x32xf32, #tpu.memory_space<vmem>>, vector<1x4x32xf32>,
    %c0_i32_83 = arith.constant 0 : i32
    %c1_i32_84 = arith.constant 1 : i32
    %c1_i32_85 = arith.constant 1 : i32
    %c0_i32_86 = arith.constant 0 : i32
    %c0_i32_87 = arith.constant 0 : i32
    %88 = tpu.memref_slice %arg4[%c0_i32_83, %c0_i32_86, %c0_i32_87] : memref<2x16x128xf32, #tpu.memory_space<any>> -> memref<1x16x128xf32, #tpu.memory_space<any>>
    %89 = tpu.memref_squeeze %88 : memref<1x16x128xf32, #tpu.memory_space<any>> -> memref<16x128xf32, #tpu.memory_space<any>>
    %c0_i32_88 = arith.constant 0 : i32
    %c0_i32_89 = arith.constant 0 : i32
    %90 = tpu.memref_slice %arg13[%c1_i32_84, %c0_i32_88, %c0_i32_89] : memref<2x16x128xf32, #tpu.memory_space<vmem>> -> memref<1x16x128xf32, #tpu.memory_space<vmem>>
    %91 = tpu.memref_squeeze %90 : memref<1x16x128xf32, #tpu.memory_space<vmem>> -> memref<16x128xf32, #tpu.memory_space<vmem>>
    %92 = tpu.memref_slice %arg14[%c1_i32_85] : memref<2x!tpu.dma_semaphore, #tpu.memory_space<semaphore_mem>> -> memref<1x!tpu.dma_semaphore, #tpu.memory_space<semaphore_mem>>
    %93 = tpu.memref_squeeze %92 : memref<1x!tpu.dma_semaphore, #tpu.memory_space<semaphore_mem>> -> memref<!tpu.dma_semaphore, #tpu.memory_space<semaphore_mem>>
    tpu.wait_dma2 semaphore(%93 : memref<!tpu.dma_semaphore, #tpu.memory_space<semaphore_mem>>) src(%89 : memref<16x128xf32, #tpu.memory_space<any>>) dst(%91 : memref<16x128xf32, #tpu.memory_space<vmem>>)
    %c4_i32 = arith.constant 4 : i32
    %94 = arith.addi %0, %c4_i32 : i32
    %95 = arith.index_cast %94 : i32 to index
    %96 = memref.load %arg1[%95] : memref<16xi32, #tpu.memory_space<smem>>
    %c0_i32_90 = arith.constant 0 : i32
    %c0_i32_91 = arith.constant 0 : i32
    %c0_i32_92 = arith.constant 0 : i32
    %c0_i32_93 = arith.constant 0 : i32
    %97 = tpu.memref_slice %arg4[%96, %c0_i32_92, %c0_i32_93] : memref<2x16x128xf32, #tpu.memory_space<any>> -> memref<1x16x128xf32, #tpu.memory_space<any>>
    %98 = tpu.memref_squeeze %97 : memref<1x16x128xf32, #tpu.memory_space<any>> -> memref<16x128xf32, #tpu.memory_space<any>>
    %c0_i32_94 = arith.constant 0 : i32
    %c0_i32_95 = arith.constant 0 : i32
    %99 = tpu.memref_slice %arg13[%c0_i32_90, %c0_i32_94, %c0_i32_95] : memref<2x16x128xf32, #tpu.memory_space<vmem>> -> memref<1x16x128xf32, #tpu.memory_space<vmem>>
    %100 = tpu.memref_squeeze %99 : memref<1x16x128xf32, #tpu.memory_space<vmem>> -> memref<16x128xf32, #tpu.memory_space<vmem>>
    %101 = tpu.memref_slice %arg14[%c0_i32_91] : memref<2x!tpu.dma_semaphore, #tpu.memory_space<semaphore_mem>> -> memref<1x!tpu.dma_semaphore, #tpu.memory_space<semaphore_mem>>
    %102 = tpu.memref_squeeze %101 : memref<1x!tpu.dma_semaphore, #tpu.memory_space<semaphore_mem>> -> memref<!tpu.dma_semaphore, #tpu.memory_space<semaphore_mem>>
    tpu.enqueue_dma source(%98 : memref<16x128xf32, #tpu.memory_space<any>>) target(%100 : memref<16x128xf32, #tpu.memory_space<vmem>>) target_semaphore(%102 : memref<!tpu.dma_semaphore, #tpu.memory_space<semaphore_mem>>)
    %c3 = arith.constant 3 : index
    %c0_96 = arith.constant 0 : index
    %c0_97 = arith.constant 0 : index
    %103 = vector.load %arg2[%c3, %c0_96, %c0_97] : memref<16x4x16xf32, #tpu.memory_space<vmem>>, vector<1x4x16xf32>
    %104 = vector.shape_cast %103 : vector<1x4x16xf32> to vector<4x16xf32>
    %c1_98 = arith.constant 1 : index
    %c0_99 = arith.constant 0 : index
    %c0_100 = arith.constant 0 : index
    %105 = vector.load %arg13[%c1_98, %c0_99, %c0_100] : memref<2x16x128xf32, #tpu.memory_space<vmem>>, vector<1x16x128xf32>
    %106 = vector.shape_cast %105 : vector<1x16x128xf32> to vector<16x128xf32>
    %cst_101 = arith.constant dense<0.000000e+00> : vector<4x128xf32>
    %107 = tpu.matmul %104, %106, %cst_101 {dimension_numbers = #tpu.dot_dimension_numbers<[1], [0], [0], [1], [0, 0, 1, 1], [], []>} : vector<4x16xf32>, vector<16x128xf32>, vector<4x128xf32> -> vector<4x128xf32>
    %c3_102 = arith.constant 3 : index
    %c0_103 = arith.constant 0 : index
    %c0_104 = arith.constant 0 : index
    %108 = vector.load %arg3[%c3_102, %c0_103, %c0_104] : memref<16x128x32xf32, #tpu.memory_space<vmem>>, vector<1x128x32xf32>
    %109 = vector.shape_cast %108 : vector<1x128x32xf32> to vector<128x32xf32>
    %cst_105 = arith.constant dense<0.000000e+00> : vector<4x32xf32>
    %110 = tpu.matmul %107, %109, %cst_105 {dimension_numbers = #tpu.dot_dimension_numbers<[1], [0], [0], [1], [0, 0, 1, 1], [], []>} : vector<4x128xf32>, vector<128x32xf32>, vector<4x32xf32> -> vector<4x32xf32>
    %c3_106 = arith.constant 3 : index
    %c0_107 = arith.constant 0 : index
    %c0_108 = arith.constant 0 : index
    %111 = vector.load %arg15[%c3_106, %c0_107, %c0_108] : memref<16x4x32xf32, #tpu.memory_space<vmem>>, vector<1x4x32xf32>
    %112 = vector.shape_cast %111 : vector<1x4x32xf32> to vector<4x32xf32>
    %113 = vector.shape_cast %110 : vector<4x32xf32> to vector<1x4x32xf32>
    tpu.vector_store %arg15[%c3_106, %c0_107, %c0_108], %113 {strides = array<i32>} : memref<16x4x32xf32, #tpu.memory_space<vmem>>, vector<1x4x32xf32>,
    %c0_i32_109 = arith.constant 0 : i32
    %c0_i32_110 = arith.constant 0 : i32
    %c0_i32_111 = arith.constant 0 : i32
    %c0_i32_112 = arith.constant 0 : i32
    %c0_i32_113 = arith.constant 0 : i32
    %114 = tpu.memref_slice %arg4[%c0_i32_109, %c0_i32_112, %c0_i32_113] : memref<2x16x128xf32, #tpu.memory_space<any>> -> memref<1x16x128xf32, #tpu.memory_space<any>>
    %115 = tpu.memref_squeeze %114 : memref<1x16x128xf32, #tpu.memory_space<any>> -> memref<16x128xf32, #tpu.memory_space<any>>
    %c0_i32_114 = arith.constant 0 : i32
    %c0_i32_115 = arith.constant 0 : i32
    %116 = tpu.memref_slice %arg13[%c0_i32_110, %c0_i32_114, %c0_i32_115] : memref<2x16x128xf32, #tpu.memory_space<vmem>> -> memref<1x16x128xf32, #tpu.memory_space<vmem>>
    %117 = tpu.memref_squeeze %116 : memref<1x16x128xf32, #tpu.memory_space<vmem>> -> memref<16x128xf32, #tpu.memory_space<vmem>>
    %118 = tpu.memref_slice %arg14[%c0_i32_111] : memref<2x!tpu.dma_semaphore, #tpu.memory_space<semaphore_mem>> -> memref<1x!tpu.dma_semaphore, #tpu.memory_space<semaphore_mem>>
    %119 = tpu.memref_squeeze %118 : memref<1x!tpu.dma_semaphore, #tpu.memory_space<semaphore_mem>> -> memref<!tpu.dma_semaphore, #tpu.memory_space<semaphore_mem>>
    tpu.wait_dma2 semaphore(%119 : memref<!tpu.dma_semaphore, #tpu.memory_space<semaphore_mem>>) src(%115 : memref<16x128xf32, #tpu.memory_space<any>>) dst(%117 : memref<16x128xf32, #tpu.memory_space<vmem>>)
    %c5_i32 = arith.constant 5 : i32
    %120 = arith.addi %0, %c5_i32 : i32
    %121 = arith.index_cast %120 : i32 to index
    %122 = memref.load %arg1[%121] : memref<16xi32, #tpu.memory_space<smem>>
    %c1_i32_116 = arith.constant 1 : i32
    %c1_i32_117 = arith.constant 1 : i32
    %c0_i32_118 = arith.constant 0 : i32
    %c0_i32_119 = arith.constant 0 : i32
    %123 = tpu.memref_slice %arg4[%122, %c0_i32_118, %c0_i32_119] : memref<2x16x128xf32, #tpu.memory_space<any>> -> memref<1x16x128xf32, #tpu.memory_space<any>>
    %124 = tpu.memref_squeeze %123 : memref<1x16x128xf32, #tpu.memory_space<any>> -> memref<16x128xf32, #tpu.memory_space<any>>
    %c0_i32_120 = arith.constant 0 : i32
    %c0_i32_121 = arith.constant 0 : i32
    %125 = tpu.memref_slice %arg13[%c1_i32_116, %c0_i32_120, %c0_i32_121] : memref<2x16x128xf32, #tpu.memory_space<vmem>> -> memref<1x16x128xf32, #tpu.memory_space<vmem>>
    %126 = tpu.memref_squeeze %125 : memref<1x16x128xf32, #tpu.memory_space<vmem>> -> memref<16x128xf32, #tpu.memory_space<vmem>>
    %127 = tpu.memref_slice %arg14[%c1_i32_117] : memref<2x!tpu.dma_semaphore, #tpu.memory_space<semaphore_mem>> -> memref<1x!tpu.dma_semaphore, #tpu.memory_space<semaphore_mem>>
    %128 = tpu.memref_squeeze %127 : memref<1x!tpu.dma_semaphore, #tpu.memory_space<semaphore_mem>> -> memref<!tpu.dma_semaphore, #tpu.memory_space<semaphore_mem>>
    tpu.enqueue_dma source(%124 : memref<16x128xf32, #tpu.memory_space<any>>) target(%126 : memref<16x128xf32, #tpu.memory_space<vmem>>) target_semaphore(%128 : memref<!tpu.dma_semaphore, #tpu.memory_space<semaphore_mem>>)
    %c4 = arith.constant 4 : index
    %c0_122 = arith.constant 0 : index
    %c0_123 = arith.constant 0 : index
    %129 = vector.load %arg2[%c4, %c0_122, %c0_123] : memref<16x4x16xf32, #tpu.memory_space<vmem>>, vector<1x4x16xf32>
    %130 = vector.shape_cast %129 : vector<1x4x16xf32> to vector<4x16xf32>
    %c0_124 = arith.constant 0 : index
    %c0_125 = arith.constant 0 : index
    %c0_126 = arith.constant 0 : index
    %131 = vector.load %arg13[%c0_124, %c0_125, %c0_126] : memref<2x16x128xf32, #tpu.memory_space<vmem>>, vector<1x16x128xf32>
    %132 = vector.shape_cast %131 : vector<1x16x128xf32> to vector<16x128xf32>
    %cst_127 = arith.constant dense<0.000000e+00> : vector<4x128xf32>
    %133 = tpu.matmul %130, %132, %cst_127 {dimension_numbers = #tpu.dot_dimension_numbers<[1], [0], [0], [1], [0, 0, 1, 1], [], []>} : vector<4x16xf32>, vector<16x128xf32>, vector<4x128xf32> -> vector<4x128xf32>
    %c4_128 = arith.constant 4 : index
    %c0_129 = arith.constant 0 : index
    %c0_130 = arith.constant 0 : index
    %134 = vector.load %arg3[%c4_128, %c0_129, %c0_130] : memref<16x128x32xf32, #tpu.memory_space<vmem>>, vector<1x128x32xf32>
    %135 = vector.shape_cast %134 : vector<1x128x32xf32> to vector<128x32xf32>
    %cst_131 = arith.constant dense<0.000000e+00> : vector<4x32xf32>
    %136 = tpu.matmul %133, %135, %cst_131 {dimension_numbers = #tpu.dot_dimension_numbers<[1], [0], [0], [1], [0, 0, 1, 1], [], []>} : vector<4x128xf32>, vector<128x32xf32>, vector<4x32xf32> -> vector<4x32xf32>
    %c4_132 = arith.constant 4 : index
    %c0_133 = arith.constant 0 : index
    %c0_134 = arith.constant 0 : index
    %137 = vector.load %arg15[%c4_132, %c0_133, %c0_134] : memref<16x4x32xf32, #tpu.memory_space<vmem>>, vector<1x4x32xf32>
    %138 = vector.shape_cast %137 : vector<1x4x32xf32> to vector<4x32xf32>
    %139 = vector.shape_cast %136 : vector<4x32xf32> to vector<1x4x32xf32>
    tpu.vector_store %arg15[%c4_132, %c0_133, %c0_134], %139 {strides = array<i32>} : memref<16x4x32xf32, #tpu.memory_space<vmem>>, vector<1x4x32xf32>,
    %c0_i32_135 = arith.constant 0 : i32
    %c1_i32_136 = arith.constant 1 : i32
    %c1_i32_137 = arith.constant 1 : i32
    %c0_i32_138 = arith.constant 0 : i32
    %c0_i32_139 = arith.constant 0 : i32
    %140 = tpu.memref_slice %arg4[%c0_i32_135, %c0_i32_138, %c0_i32_139] : memref<2x16x128xf32, #tpu.memory_space<any>> -> memref<1x16x128xf32, #tpu.memory_space<any>>
    %141 = tpu.memref_squeeze %140 : memref<1x16x128xf32, #tpu.memory_space<any>> -> memref<16x128xf32, #tpu.memory_space<any>>
    %c0_i32_140 = arith.constant 0 : i32
    %c0_i32_141 = arith.constant 0 : i32
    %142 = tpu.memref_slice %arg13[%c1_i32_136, %c0_i32_140, %c0_i32_141] : memref<2x16x128xf32, #tpu.memory_space<vmem>> -> memref<1x16x128xf32, #tpu.memory_space<vmem>>
    %143 = tpu.memref_squeeze %142 : memref<1x16x128xf32, #tpu.memory_space<vmem>> -> memref<16x128xf32, #tpu.memory_space<vmem>>
    %144 = tpu.memref_slice %arg14[%c1_i32_137] : memref<2x!tpu.dma_semaphore, #tpu.memory_space<semaphore_mem>> -> memref<1x!tpu.dma_semaphore, #tpu.memory_space<semaphore_mem>>
    %145 = tpu.memref_squeeze %144 : memref<1x!tpu.dma_semaphore, #tpu.memory_space<semaphore_mem>> -> memref<!tpu.dma_semaphore, #tpu.memory_space<semaphore_mem>>
    tpu.wait_dma2 semaphore(%145 : memref<!tpu.dma_semaphore, #tpu.memory_space<semaphore_mem>>) src(%141 : memref<16x128xf32, #tpu.memory_space<any>>) dst(%143 : memref<16x128xf32, #tpu.memory_space<vmem>>)
    %c6_i32 = arith.constant 6 : i32
    %146 = arith.addi %0, %c6_i32 : i32
    %147 = arith.index_cast %146 : i32 to index
    %148 = memref.load %arg1[%147] : memref<16xi32, #tpu.memory_space<smem>>
    %c0_i32_142 = arith.constant 0 : i32
    %c0_i32_143 = arith.constant 0 : i32
    %c0_i32_144 = arith.constant 0 : i32
    %c0_i32_145 = arith.constant 0 : i32
    %149 = tpu.memref_slice %arg4[%148, %c0_i32_144, %c0_i32_145] : memref<2x16x128xf32, #tpu.memory_space<any>> -> memref<1x16x128xf32, #tpu.memory_space<any>>
    %150 = tpu.memref_squeeze %149 : memref<1x16x128xf32, #tpu.memory_space<any>> -> memref<16x128xf32, #tpu.memory_space<any>>
    %c0_i32_146 = arith.constant 0 : i32
    %c0_i32_147 = arith.constant 0 : i32
    %151 = tpu.memref_slice %arg13[%c0_i32_142, %c0_i32_146, %c0_i32_147] : memref<2x16x128xf32, #tpu.memory_space<vmem>> -> memref<1x16x128xf32, #tpu.memory_space<vmem>>
    %152 = tpu.memref_squeeze %151 : memref<1x16x128xf32, #tpu.memory_space<vmem>> -> memref<16x128xf32, #tpu.memory_space<vmem>>
    %153 = tpu.memref_slice %arg14[%c0_i32_143] : memref<2x!tpu.dma_semaphore, #tpu.memory_space<semaphore_mem>> -> memref<1x!tpu.dma_semaphore, #tpu.memory_space<semaphore_mem>>
    %154 = tpu.memref_squeeze %153 : memref<1x!tpu.dma_semaphore, #tpu.memory_space<semaphore_mem>> -> memref<!tpu.dma_semaphore, #tpu.memory_space<semaphore_mem>>
    tpu.enqueue_dma source(%150 : memref<16x128xf32, #tpu.memory_space<any>>) target(%152 : memref<16x128xf32, #tpu.memory_space<vmem>>) target_semaphore(%154 : memref<!tpu.dma_semaphore, #tpu.memory_space<semaphore_mem>>)
    %c5 = arith.constant 5 : index
    %c0_148 = arith.constant 0 : index
    %c0_149 = arith.constant 0 : index
    %155 = vector.load %arg2[%c5, %c0_148, %c0_149] : memref<16x4x16xf32, #tpu.memory_space<vmem>>, vector<1x4x16xf32>
    %156 = vector.shape_cast %155 : vector<1x4x16xf32> to vector<4x16xf32>
    %c1_150 = arith.constant 1 : index
    %c0_151 = arith.constant 0 : index
    %c0_152 = arith.constant 0 : index
    %157 = vector.load %arg13[%c1_150, %c0_151, %c0_152] : memref<2x16x128xf32, #tpu.memory_space<vmem>>, vector<1x16x128xf32>
    %158 = vector.shape_cast %157 : vector<1x16x128xf32> to vector<16x128xf32>
    %cst_153 = arith.constant dense<0.000000e+00> : vector<4x128xf32>
    %159 = tpu.matmul %156, %158, %cst_153 {dimension_numbers = #tpu.dot_dimension_numbers<[1], [0], [0], [1], [0, 0, 1, 1], [], []>} : vector<4x16xf32>, vector<16x128xf32>, vector<4x128xf32> -> vector<4x128xf32>
    %c5_154 = arith.constant 5 : index
    %c0_155 = arith.constant 0 : index
    %c0_156 = arith.constant 0 : index
    %160 = vector.load %arg3[%c5_154, %c0_155, %c0_156] : memref<16x128x32xf32, #tpu.memory_space<vmem>>, vector<1x128x32xf32>
    %161 = vector.shape_cast %160 : vector<1x128x32xf32> to vector<128x32xf32>
    %cst_157 = arith.constant dense<0.000000e+00> : vector<4x32xf32>
    %162 = tpu.matmul %159, %161, %cst_157 {dimension_numbers = #tpu.dot_dimension_numbers<[1], [0], [0], [1], [0, 0, 1, 1], [], []>} : vector<4x128xf32>, vector<128x32xf32>, vector<4x32xf32> -> vector<4x32xf32>
    %c5_158 = arith.constant 5 : index
    %c0_159 = arith.constant 0 : index
    %c0_160 = arith.constant 0 : index
    %163 = vector.load %arg15[%c5_158, %c0_159, %c0_160] : memref<16x4x32xf32, #tpu.memory_space<vmem>>, vector<1x4x32xf32>
    %164 = vector.shape_cast %163 : vector<1x4x32xf32> to vector<4x32xf32>
    %165 = vector.shape_cast %162 : vector<4x32xf32> to vector<1x4x32xf32>
    tpu.vector_store %arg15[%c5_158, %c0_159, %c0_160], %165 {strides = array<i32>} : memref<16x4x32xf32, #tpu.memory_space<vmem>>, vector<1x4x32xf32>,
    %c0_i32_161 = arith.constant 0 : i32
    %c0_i32_162 = arith.constant 0 : i32
    %c0_i32_163 = arith.constant 0 : i32
    %c0_i32_164 = arith.constant 0 : i32
    %c0_i32_165 = arith.constant 0 : i32
    %166 = tpu.memref_slice %arg4[%c0_i32_161, %c0_i32_164, %c0_i32_165] : memref<2x16x128xf32, #tpu.memory_space<any>> -> memref<1x16x128xf32, #tpu.memory_space<any>>
    %167 = tpu.memref_squeeze %166 : memref<1x16x128xf32, #tpu.memory_space<any>> -> memref<16x128xf32, #tpu.memory_space<any>>
    %c0_i32_166 = arith.constant 0 : i32
    %c0_i32_167 = arith.constant 0 : i32
    %168 = tpu.memref_slice %arg13[%c0_i32_162, %c0_i32_166, %c0_i32_167] : memref<2x16x128xf32, #tpu.memory_space<vmem>> -> memref<1x16x128xf32, #tpu.memory_space<vmem>>
    %169 = tpu.memref_squeeze %168 : memref<1x16x128xf32, #tpu.memory_space<vmem>> -> memref<16x128xf32, #tpu.memory_space<vmem>>
    %170 = tpu.memref_slice %arg14[%c0_i32_163] : memref<2x!tpu.dma_semaphore, #tpu.memory_space<semaphore_mem>> -> memref<1x!tpu.dma_semaphore, #tpu.memory_space<semaphore_mem>>
    %171 = tpu.memref_squeeze %170 : memref<1x!tpu.dma_semaphore, #tpu.memory_space<semaphore_mem>> -> memref<!tpu.dma_semaphore, #tpu.memory_space<semaphore_mem>>
    tpu.wait_dma2 semaphore(%171 : memref<!tpu.dma_semaphore, #tpu.memory_space<semaphore_mem>>) src(%167 : memref<16x128xf32, #tpu.memory_space<any>>) dst(%169 : memref<16x128xf32, #tpu.memory_space<vmem>>)
    %c7_i32 = arith.constant 7 : i32
    %172 = arith.addi %0, %c7_i32 : i32
    %173 = arith.index_cast %172 : i32 to index
    %174 = memref.load %arg1[%173] : memref<16xi32, #tpu.memory_space<smem>>
    %c1_i32_168 = arith.constant 1 : i32
    %c1_i32_169 = arith.constant 1 : i32
    %c0_i32_170 = arith.constant 0 : i32
    %c0_i32_171 = arith.constant 0 : i32
    %175 = tpu.memref_slice %arg4[%174, %c0_i32_170, %c0_i32_171] : memref<2x16x128xf32, #tpu.memory_space<any>> -> memref<1x16x128xf32, #tpu.memory_space<any>>
    %176 = tpu.memref_squeeze %175 : memref<1x16x128xf32, #tpu.memory_space<any>> -> memref<16x128xf32, #tpu.memory_space<any>>
    %c0_i32_172 = arith.constant 0 : i32
    %c0_i32_173 = arith.constant 0 : i32
    %177 = tpu.memref_slice %arg13[%c1_i32_168, %c0_i32_172, %c0_i32_173] : memref<2x16x128xf32, #tpu.memory_space<vmem>> -> memref<1x16x128xf32, #tpu.memory_space<vmem>>
    %178 = tpu.memref_squeeze %177 : memref<1x16x128xf32, #tpu.memory_space<vmem>> -> memref<16x128xf32, #tpu.memory_space<vmem>>
    %179 = tpu.memref_slice %arg14[%c1_i32_169] : memref<2x!tpu.dma_semaphore, #tpu.memory_space<semaphore_mem>> -> memref<1x!tpu.dma_semaphore, #tpu.memory_space<semaphore_mem>>
    %180 = tpu.memref_squeeze %179 : memref<1x!tpu.dma_semaphore, #tpu.memory_space<semaphore_mem>> -> memref<!tpu.dma_semaphore, #tpu.memory_space<semaphore_mem>>
    tpu.enqueue_dma source(%176 : memref<16x128xf32, #tpu.memory_space<any>>) target(%178 : memref<16x128xf32, #tpu.memory_space<vmem>>) target_semaphore(%180 : memref<!tpu.dma_semaphore, #tpu.memory_space<semaphore_mem>>)
    %c6 = arith.constant 6 : index
    %c0_174 = arith.constant 0 : index
    %c0_175 = arith.constant 0 : index
    %181 = vector.load %arg2[%c6, %c0_174, %c0_175] : memref<16x4x16xf32, #tpu.memory_space<vmem>>, vector<1x4x16xf32>
    %182 = vector.shape_cast %181 : vector<1x4x16xf32> to vector<4x16xf32>
    %c0_176 = arith.constant 0 : index
    %c0_177 = arith.constant 0 : index
    %c0_178 = arith.constant 0 : index
    %183 = vector.load %arg13[%c0_176, %c0_177, %c0_178] : memref<2x16x128xf32, #tpu.memory_space<vmem>>, vector<1x16x128xf32>
    %184 = vector.shape_cast %183 : vector<1x16x128xf32> to vector<16x128xf32>
    %cst_179 = arith.constant dense<0.000000e+00> : vector<4x128xf32>
    %185 = tpu.matmul %182, %184, %cst_179 {dimension_numbers = #tpu.dot_dimension_numbers<[1], [0], [0], [1], [0, 0, 1, 1], [], []>} : vector<4x16xf32>, vector<16x128xf32>, vector<4x128xf32> -> vector<4x128xf32>
    %c6_180 = arith.constant 6 : index
    %c0_181 = arith.constant 0 : index
    %c0_182 = arith.constant 0 : index
    %186 = vector.load %arg3[%c6_180, %c0_181, %c0_182] : memref<16x128x32xf32, #tpu.memory_space<vmem>>, vector<1x128x32xf32>
    %187 = vector.shape_cast %186 : vector<1x128x32xf32> to vector<128x32xf32>
    %cst_183 = arith.constant dense<0.000000e+00> : vector<4x32xf32>
    %188 = tpu.matmul %185, %187, %cst_183 {dimension_numbers = #tpu.dot_dimension_numbers<[1], [0], [0], [1], [0, 0, 1, 1], [], []>} : vector<4x128xf32>, vector<128x32xf32>, vector<4x32xf32> -> vector<4x32xf32>
    %c6_184 = arith.constant 6 : index
    %c0_185 = arith.constant 0 : index
    %c0_186 = arith.constant 0 : index
    %189 = vector.load %arg15[%c6_184, %c0_185, %c0_186] : memref<16x4x32xf32, #tpu.memory_space<vmem>>, vector<1x4x32xf32>
    %190 = vector.shape_cast %189 : vector<1x4x32xf32> to vector<4x32xf32>
    %191 = vector.shape_cast %188 : vector<4x32xf32> to vector<1x4x32xf32>
    tpu.vector_store %arg15[%c6_184, %c0_185, %c0_186], %191 {strides = array<i32>} : memref<16x4x32xf32, #tpu.memory_space<vmem>>, vector<1x4x32xf32>,
    %c0_i32_187 = arith.constant 0 : i32
    %c1_i32_188 = arith.constant 1 : i32
    %c1_i32_189 = arith.constant 1 : i32
    %c0_i32_190 = arith.constant 0 : i32
    %c0_i32_191 = arith.constant 0 : i32
    %192 = tpu.memref_slice %arg4[%c0_i32_187, %c0_i32_190, %c0_i32_191] : memref<2x16x128xf32, #tpu.memory_space<any>> -> memref<1x16x128xf32, #tpu.memory_space<any>>
    %193 = tpu.memref_squeeze %192 : memref<1x16x128xf32, #tpu.memory_space<any>> -> memref<16x128xf32, #tpu.memory_space<any>>
    %c0_i32_192 = arith.constant 0 : i32
    %c0_i32_193 = arith.constant 0 : i32
    %194 = tpu.memref_slice %arg13[%c1_i32_188, %c0_i32_192, %c0_i32_193] : memref<2x16x128xf32, #tpu.memory_space<vmem>> -> memref<1x16x128xf32, #tpu.memory_space<vmem>>
    %195 = tpu.memref_squeeze %194 : memref<1x16x128xf32, #tpu.memory_space<vmem>> -> memref<16x128xf32, #tpu.memory_space<vmem>>
    %196 = tpu.memref_slice %arg14[%c1_i32_189] : memref<2x!tpu.dma_semaphore, #tpu.memory_space<semaphore_mem>> -> memref<1x!tpu.dma_semaphore, #tpu.memory_space<semaphore_mem>>
    %197 = tpu.memref_squeeze %196 : memref<1x!tpu.dma_semaphore, #tpu.memory_space<semaphore_mem>> -> memref<!tpu.dma_semaphore, #tpu.memory_space<semaphore_mem>>
    tpu.wait_dma2 semaphore(%197 : memref<!tpu.dma_semaphore, #tpu.memory_space<semaphore_mem>>) src(%193 : memref<16x128xf32, #tpu.memory_space<any>>) dst(%195 : memref<16x128xf32, #tpu.memory_space<vmem>>)
    %c8_i32 = arith.constant 8 : i32
    %198 = arith.addi %0, %c8_i32 : i32
    %199 = arith.index_cast %198 : i32 to index
    %200 = memref.load %arg1[%199] : memref<16xi32, #tpu.memory_space<smem>>
    %c0_i32_194 = arith.constant 0 : i32
    %c0_i32_195 = arith.constant 0 : i32
    %c0_i32_196 = arith.constant 0 : i32
    %c0_i32_197 = arith.constant 0 : i32
    %201 = tpu.memref_slice %arg4[%200, %c0_i32_196, %c0_i32_197] : memref<2x16x128xf32, #tpu.memory_space<any>> -> memref<1x16x128xf32, #tpu.memory_space<any>>
    %202 = tpu.memref_squeeze %201 : memref<1x16x128xf32, #tpu.memory_space<any>> -> memref<16x128xf32, #tpu.memory_space<any>>
    %c0_i32_198 = arith.constant 0 : i32
    %c0_i32_199 = arith.constant 0 : i32
    %203 = tpu.memref_slice %arg13[%c0_i32_194, %c0_i32_198, %c0_i32_199] : memref<2x16x128xf32, #tpu.memory_space<vmem>> -> memref<1x16x128xf32, #tpu.memory_space<vmem>>
    %204 = tpu.memref_squeeze %203 : memref<1x16x128xf32, #tpu.memory_space<vmem>> -> memref<16x128xf32, #tpu.memory_space<vmem>>
    %205 = tpu.memref_slice %arg14[%c0_i32_195] : memref<2x!tpu.dma_semaphore, #tpu.memory_space<semaphore_mem>> -> memref<1x!tpu.dma_semaphore, #tpu.memory_space<semaphore_mem>>
    %206 = tpu.memref_squeeze %205 : memref<1x!tpu.dma_semaphore, #tpu.memory_space<semaphore_mem>> -> memref<!tpu.dma_semaphore, #tpu.memory_space<semaphore_mem>>
    tpu.enqueue_dma source(%202 : memref<16x128xf32, #tpu.memory_space<any>>) target(%204 : memref<16x128xf32, #tpu.memory_space<vmem>>) target_semaphore(%206 : memref<!tpu.dma_semaphore, #tpu.memory_space<semaphore_mem>>)
    %c7 = arith.constant 7 : index
    %c0_200 = arith.constant 0 : index
    %c0_201 = arith.constant 0 : index
    %207 = vector.load %arg2[%c7, %c0_200, %c0_201] : memref<16x4x16xf32, #tpu.memory_space<vmem>>, vector<1x4x16xf32>
    %208 = vector.shape_cast %207 : vector<1x4x16xf32> to vector<4x16xf32>
    %c1_202 = arith.constant 1 : index
    %c0_203 = arith.constant 0 : index
    %c0_204 = arith.constant 0 : index
    %209 = vector.load %arg13[%c1_202, %c0_203, %c0_204] : memref<2x16x128xf32, #tpu.memory_space<vmem>>, vector<1x16x128xf32>
    %210 = vector.shape_cast %209 : vector<1x16x128xf32> to vector<16x128xf32>
    %cst_205 = arith.constant dense<0.000000e+00> : vector<4x128xf32>
    %211 = tpu.matmul %208, %210, %cst_205 {dimension_numbers = #tpu.dot_dimension_numbers<[1], [0], [0], [1], [0, 0, 1, 1], [], []>} : vector<4x16xf32>, vector<16x128xf32>, vector<4x128xf32> -> vector<4x128xf32>
    %c7_206 = arith.constant 7 : index
    %c0_207 = arith.constant 0 : index
    %c0_208 = arith.constant 0 : index
    %212 = vector.load %arg3[%c7_206, %c0_207, %c0_208] : memref<16x128x32xf32, #tpu.memory_space<vmem>>, vector<1x128x32xf32>
    %213 = vector.shape_cast %212 : vector<1x128x32xf32> to vector<128x32xf32>
    %cst_209 = arith.constant dense<0.000000e+00> : vector<4x32xf32>
    %214 = tpu.matmul %211, %213, %cst_209 {dimension_numbers = #tpu.dot_dimension_numbers<[1], [0], [0], [1], [0, 0, 1, 1], [], []>} : vector<4x128xf32>, vector<128x32xf32>, vector<4x32xf32> -> vector<4x32xf32>
    %c7_210 = arith.constant 7 : index
    %c0_211 = arith.constant 0 : index
    %c0_212 = arith.constant 0 : index
    %215 = vector.load %arg15[%c7_210, %c0_211, %c0_212] : memref<16x4x32xf32, #tpu.memory_space<vmem>>, vector<1x4x32xf32>
    %216 = vector.shape_cast %215 : vector<1x4x32xf32> to vector<4x32xf32>
    %217 = vector.shape_cast %214 : vector<4x32xf32> to vector<1x4x32xf32>
    tpu.vector_store %arg15[%c7_210, %c0_211, %c0_212], %217 {strides = array<i32>} : memref<16x4x32xf32, #tpu.memory_space<vmem>>, vector<1x4x32xf32>,
    %c0_i32_213 = arith.constant 0 : i32
    %c0_i32_214 = arith.constant 0 : i32
    %c0_i32_215 = arith.constant 0 : i32
    %c0_i32_216 = arith.constant 0 : i32
    %c0_i32_217 = arith.constant 0 : i32
    %218 = tpu.memref_slice %arg4[%c0_i32_213, %c0_i32_216, %c0_i32_217] : memref<2x16x128xf32, #tpu.memory_space<any>> -> memref<1x16x128xf32, #tpu.memory_space<any>>
    %219 = tpu.memref_squeeze %218 : memref<1x16x128xf32, #tpu.memory_space<any>> -> memref<16x128xf32, #tpu.memory_space<any>>
    %c0_i32_218 = arith.constant 0 : i32
    %c0_i32_219 = arith.constant 0 : i32
    %220 = tpu.memref_slice %arg13[%c0_i32_214, %c0_i32_218, %c0_i32_219] : memref<2x16x128xf32, #tpu.memory_space<vmem>> -> memref<1x16x128xf32, #tpu.memory_space<vmem>>
    %221 = tpu.memref_squeeze %220 : memref<1x16x128xf32, #tpu.memory_space<vmem>> -> memref<16x128xf32, #tpu.memory_space<vmem>>
    %222 = tpu.memref_slice %arg14[%c0_i32_215] : memref<2x!tpu.dma_semaphore, #tpu.memory_space<semaphore_mem>> -> memref<1x!tpu.dma_semaphore, #tpu.memory_space<semaphore_mem>>
    %223 = tpu.memref_squeeze %222 : memref<1x!tpu.dma_semaphore, #tpu.memory_space<semaphore_mem>> -> memref<!tpu.dma_semaphore, #tpu.memory_space<semaphore_mem>>
    tpu.wait_dma2 semaphore(%223 : memref<!tpu.dma_semaphore, #tpu.memory_space<semaphore_mem>>) src(%219 : memref<16x128xf32, #tpu.memory_space<any>>) dst(%221 : memref<16x128xf32, #tpu.memory_space<vmem>>)
    %c9_i32 = arith.constant 9 : i32
    %224 = arith.addi %0, %c9_i32 : i32
    %225 = arith.index_cast %224 : i32 to index
    %226 = memref.load %arg1[%225] : memref<16xi32, #tpu.memory_space<smem>>
    %c1_i32_220 = arith.constant 1 : i32
    %c1_i32_221 = arith.constant 1 : i32
    %c0_i32_222 = arith.constant 0 : i32
    %c0_i32_223 = arith.constant 0 : i32
    %227 = tpu.memref_slice %arg4[%226, %c0_i32_222, %c0_i32_223] : memref<2x16x128xf32, #tpu.memory_space<any>> -> memref<1x16x128xf32, #tpu.memory_space<any>>
    %228 = tpu.memref_squeeze %227 : memref<1x16x128xf32, #tpu.memory_space<any>> -> memref<16x128xf32, #tpu.memory_space<any>>
    %c0_i32_224 = arith.constant 0 : i32
    %c0_i32_225 = arith.constant 0 : i32
    %229 = tpu.memref_slice %arg13[%c1_i32_220, %c0_i32_224, %c0_i32_225] : memref<2x16x128xf32, #tpu.memory_space<vmem>> -> memref<1x16x128xf32, #tpu.memory_space<vmem>>
    %230 = tpu.memref_squeeze %229 : memref<1x16x128xf32, #tpu.memory_space<vmem>> -> memref<16x128xf32, #tpu.memory_space<vmem>>
    %231 = tpu.memref_slice %arg14[%c1_i32_221] : memref<2x!tpu.dma_semaphore, #tpu.memory_space<semaphore_mem>> -> memref<1x!tpu.dma_semaphore, #tpu.memory_space<semaphore_mem>>
    %232 = tpu.memref_squeeze %231 : memref<1x!tpu.dma_semaphore, #tpu.memory_space<semaphore_mem>> -> memref<!tpu.dma_semaphore, #tpu.memory_space<semaphore_mem>>
    tpu.enqueue_dma source(%228 : memref<16x128xf32, #tpu.memory_space<any>>) target(%230 : memref<16x128xf32, #tpu.memory_space<vmem>>) target_semaphore(%232 : memref<!tpu.dma_semaphore, #tpu.memory_space<semaphore_mem>>)
    %c8 = arith.constant 8 : index
    %c0_226 = arith.constant 0 : index
    %c0_227 = arith.constant 0 : index
    %233 = vector.load %arg2[%c8, %c0_226, %c0_227] : memref<16x4x16xf32, #tpu.memory_space<vmem>>, vector<1x4x16xf32>
    %234 = vector.shape_cast %233 : vector<1x4x16xf32> to vector<4x16xf32>
    %c0_228 = arith.constant 0 : index
    %c0_229 = arith.constant 0 : index
    %c0_230 = arith.constant 0 : index
    %235 = vector.load %arg13[%c0_228, %c0_229, %c0_230] : memref<2x16x128xf32, #tpu.memory_space<vmem>>, vector<1x16x128xf32>
    %236 = vector.shape_cast %235 : vector<1x16x128xf32> to vector<16x128xf32>
    %cst_231 = arith.constant dense<0.000000e+00> : vector<4x128xf32>
    %237 = tpu.matmul %234, %236, %cst_231 {dimension_numbers = #tpu.dot_dimension_numbers<[1], [0], [0], [1], [0, 0, 1, 1], [], []>} : vector<4x16xf32>, vector<16x128xf32>, vector<4x128xf32> -> vector<4x128xf32>
    %c8_232 = arith.constant 8 : index
    %c0_233 = arith.constant 0 : index
    %c0_234 = arith.constant 0 : index
    %238 = vector.load %arg3[%c8_232, %c0_233, %c0_234] : memref<16x128x32xf32, #tpu.memory_space<vmem>>, vector<1x128x32xf32>
    %239 = vector.shape_cast %238 : vector<1x128x32xf32> to vector<128x32xf32>
    %cst_235 = arith.constant dense<0.000000e+00> : vector<4x32xf32>
    %240 = tpu.matmul %237, %239, %cst_235 {dimension_numbers = #tpu.dot_dimension_numbers<[1], [0], [0], [1], [0, 0, 1, 1], [], []>} : vector<4x128xf32>, vector<128x32xf32>, vector<4x32xf32> -> vector<4x32xf32>
    %c8_236 = arith.constant 8 : index
    %c0_237 = arith.constant 0 : index
    %c0_238 = arith.constant 0 : index
    %241 = vector.load %arg15[%c8_236, %c0_237, %c0_238] : memref<16x4x32xf32, #tpu.memory_space<vmem>>, vector<1x4x32xf32>
    %242 = vector.shape_cast %241 : vector<1x4x32xf32> to vector<4x32xf32>
    %243 = vector.shape_cast %240 : vector<4x32xf32> to vector<1x4x32xf32>
    tpu.vector_store %arg15[%c8_236, %c0_237, %c0_238], %243 {strides = array<i32>} : memref<16x4x32xf32, #tpu.memory_space<vmem>>, vector<1x4x32xf32>,
    %c0_i32_239 = arith.constant 0 : i32
    %c1_i32_240 = arith.constant 1 : i32
    %c1_i32_241 = arith.constant 1 : i32
    %c0_i32_242 = arith.constant 0 : i32
    %c0_i32_243 = arith.constant 0 : i32
    %244 = tpu.memref_slice %arg4[%c0_i32_239, %c0_i32_242, %c0_i32_243] : memref<2x16x128xf32, #tpu.memory_space<any>> -> memref<1x16x128xf32, #tpu.memory_space<any>>
    %245 = tpu.memref_squeeze %244 : memref<1x16x128xf32, #tpu.memory_space<any>> -> memref<16x128xf32, #tpu.memory_space<any>>
    %c0_i32_244 = arith.constant 0 : i32
    %c0_i32_245 = arith.constant 0 : i32
    %246 = tpu.memref_slice %arg13[%c1_i32_240, %c0_i32_244, %c0_i32_245] : memref<2x16x128xf32, #tpu.memory_space<vmem>> -> memref<1x16x128xf32, #tpu.memory_space<vmem>>
    %247 = tpu.memref_squeeze %246 : memref<1x16x128xf32, #tpu.memory_space<vmem>> -> memref<16x128xf32, #tpu.memory_space<vmem>>
    %248 = tpu.memref_slice %arg14[%c1_i32_241] : memref<2x!tpu.dma_semaphore, #tpu.memory_space<semaphore_mem>> -> memref<1x!tpu.dma_semaphore, #tpu.memory_space<semaphore_mem>>
    %249 = tpu.memref_squeeze %248 : memref<1x!tpu.dma_semaphore, #tpu.memory_space<semaphore_mem>> -> memref<!tpu.dma_semaphore, #tpu.memory_space<semaphore_mem>>
    tpu.wait_dma2 semaphore(%249 : memref<!tpu.dma_semaphore, #tpu.memory_space<semaphore_mem>>) src(%245 : memref<16x128xf32, #tpu.memory_space<any>>) dst(%247 : memref<16x128xf32, #tpu.memory_space<vmem>>)
    %c10_i32 = arith.constant 10 : i32
    %250 = arith.addi %0, %c10_i32 : i32
    %251 = arith.index_cast %250 : i32 to index
    %252 = memref.load %arg1[%251] : memref<16xi32, #tpu.memory_space<smem>>
    %c0_i32_246 = arith.constant 0 : i32
    %c0_i32_247 = arith.constant 0 : i32
    %c0_i32_248 = arith.constant 0 : i32
    %c0_i32_249 = arith.constant 0 : i32
    %253 = tpu.memref_slice %arg4[%252, %c0_i32_248, %c0_i32_249] : memref<2x16x128xf32, #tpu.memory_space<any>> -> memref<1x16x128xf32, #tpu.memory_space<any>>
    %254 = tpu.memref_squeeze %253 : memref<1x16x128xf32, #tpu.memory_space<any>> -> memref<16x128xf32, #tpu.memory_space<any>>
    %c0_i32_250 = arith.constant 0 : i32
    %c0_i32_251 = arith.constant 0 : i32
    %255 = tpu.memref_slice %arg13[%c0_i32_246, %c0_i32_250, %c0_i32_251] : memref<2x16x128xf32, #tpu.memory_space<vmem>> -> memref<1x16x128xf32, #tpu.memory_space<vmem>>
    %256 = tpu.memref_squeeze %255 : memref<1x16x128xf32, #tpu.memory_space<vmem>> -> memref<16x128xf32, #tpu.memory_space<vmem>>
    %257 = tpu.memref_slice %arg14[%c0_i32_247] : memref<2x!tpu.dma_semaphore, #tpu.memory_space<semaphore_mem>> -> memref<1x!tpu.dma_semaphore, #tpu.memory_space<semaphore_mem>>
    %258 = tpu.memref_squeeze %257 : memref<1x!tpu.dma_semaphore, #tpu.memory_space<semaphore_mem>> -> memref<!tpu.dma_semaphore, #tpu.memory_space<semaphore_mem>>
    tpu.enqueue_dma source(%254 : memref<16x128xf32, #tpu.memory_space<any>>) target(%256 : memref<16x128xf32, #tpu.memory_space<vmem>>) target_semaphore(%258 : memref<!tpu.dma_semaphore, #tpu.memory_space<semaphore_mem>>)
    %c9 = arith.constant 9 : index
    %c0_252 = arith.constant 0 : index
    %c0_253 = arith.constant 0 : index
    %259 = vector.load %arg2[%c9, %c0_252, %c0_253] : memref<16x4x16xf32, #tpu.memory_space<vmem>>, vector<1x4x16xf32>
    %260 = vector.shape_cast %259 : vector<1x4x16xf32> to vector<4x16xf32>
    %c1_254 = arith.constant 1 : index
    %c0_255 = arith.constant 0 : index
    %c0_256 = arith.constant 0 : index
    %261 = vector.load %arg13[%c1_254, %c0_255, %c0_256] : memref<2x16x128xf32, #tpu.memory_space<vmem>>, vector<1x16x128xf32>
    %262 = vector.shape_cast %261 : vector<1x16x128xf32> to vector<16x128xf32>
    %cst_257 = arith.constant dense<0.000000e+00> : vector<4x128xf32>
    %263 = tpu.matmul %260, %262, %cst_257 {dimension_numbers = #tpu.dot_dimension_numbers<[1], [0], [0], [1], [0, 0, 1, 1], [], []>} : vector<4x16xf32>, vector<16x128xf32>, vector<4x128xf32> -> vector<4x128xf32>
    %c9_258 = arith.constant 9 : index
    %c0_259 = arith.constant 0 : index
    %c0_260 = arith.constant 0 : index
    %264 = vector.load %arg3[%c9_258, %c0_259, %c0_260] : memref<16x128x32xf32, #tpu.memory_space<vmem>>, vector<1x128x32xf32>
    %265 = vector.shape_cast %264 : vector<1x128x32xf32> to vector<128x32xf32>
    %cst_261 = arith.constant dense<0.000000e+00> : vector<4x32xf32>
    %266 = tpu.matmul %263, %265, %cst_261 {dimension_numbers = #tpu.dot_dimension_numbers<[1], [0], [0], [1], [0, 0, 1, 1], [], []>} : vector<4x128xf32>, vector<128x32xf32>, vector<4x32xf32> -> vector<4x32xf32>
    %c9_262 = arith.constant 9 : index
    %c0_263 = arith.constant 0 : index
    %c0_264 = arith.constant 0 : index
    %267 = vector.load %arg15[%c9_262, %c0_263, %c0_264] : memref<16x4x32xf32, #tpu.memory_space<vmem>>, vector<1x4x32xf32>
    %268 = vector.shape_cast %267 : vector<1x4x32xf32> to vector<4x32xf32>
    %269 = vector.shape_cast %266 : vector<4x32xf32> to vector<1x4x32xf32>
    tpu.vector_store %arg15[%c9_262, %c0_263, %c0_264], %269 {strides = array<i32>} : memref<16x4x32xf32, #tpu.memory_space<vmem>>, vector<1x4x32xf32>,
    %c0_i32_265 = arith.constant 0 : i32
    %c0_i32_266 = arith.constant 0 : i32
    %c0_i32_267 = arith.constant 0 : i32
    %c0_i32_268 = arith.constant 0 : i32
    %c0_i32_269 = arith.constant 0 : i32
    %270 = tpu.memref_slice %arg4[%c0_i32_265, %c0_i32_268, %c0_i32_269] : memref<2x16x128xf32, #tpu.memory_space<any>> -> memref<1x16x128xf32, #tpu.memory_space<any>>
    %271 = tpu.memref_squeeze %270 : memref<1x16x128xf32, #tpu.memory_space<any>> -> memref<16x128xf32, #tpu.memory_space<any>>
    %c0_i32_270 = arith.constant 0 : i32
    %c0_i32_271 = arith.constant 0 : i32
    %272 = tpu.memref_slice %arg13[%c0_i32_266, %c0_i32_270, %c0_i32_271] : memref<2x16x128xf32, #tpu.memory_space<vmem>> -> memref<1x16x128xf32, #tpu.memory_space<vmem>>
    %273 = tpu.memref_squeeze %272 : memref<1x16x128xf32, #tpu.memory_space<vmem>> -> memref<16x128xf32, #tpu.memory_space<vmem>>
    %274 = tpu.memref_slice %arg14[%c0_i32_267] : memref<2x!tpu.dma_semaphore, #tpu.memory_space<semaphore_mem>> -> memref<1x!tpu.dma_semaphore, #tpu.memory_space<semaphore_mem>>
    %275 = tpu.memref_squeeze %274 : memref<1x!tpu.dma_semaphore, #tpu.memory_space<semaphore_mem>> -> memref<!tpu.dma_semaphore, #tpu.memory_space<semaphore_mem>>
    tpu.wait_dma2 semaphore(%275 : memref<!tpu.dma_semaphore, #tpu.memory_space<semaphore_mem>>) src(%271 : memref<16x128xf32, #tpu.memory_space<any>>) dst(%273 : memref<16x128xf32, #tpu.memory_space<vmem>>)
    %c11_i32 = arith.constant 11 : i32
    %276 = arith.addi %0, %c11_i32 : i32
    %277 = arith.index_cast %276 : i32 to index
    %278 = memref.load %arg1[%277] : memref<16xi32, #tpu.memory_space<smem>>
    %c1_i32_272 = arith.constant 1 : i32
    %c1_i32_273 = arith.constant 1 : i32
    %c0_i32_274 = arith.constant 0 : i32
    %c0_i32_275 = arith.constant 0 : i32
    %279 = tpu.memref_slice %arg4[%278, %c0_i32_274, %c0_i32_275] : memref<2x16x128xf32, #tpu.memory_space<any>> -> memref<1x16x128xf32, #tpu.memory_space<any>>
    %280 = tpu.memref_squeeze %279 : memref<1x16x128xf32, #tpu.memory_space<any>> -> memref<16x128xf32, #tpu.memory_space<any>>
    %c0_i32_276 = arith.constant 0 : i32
    %c0_i32_277 = arith.constant 0 : i32
    %281 = tpu.memref_slice %arg13[%c1_i32_272, %c0_i32_276, %c0_i32_277] : memref<2x16x128xf32, #tpu.memory_space<vmem>> -> memref<1x16x128xf32, #tpu.memory_space<vmem>>
    %282 = tpu.memref_squeeze %281 : memref<1x16x128xf32, #tpu.memory_space<vmem>> -> memref<16x128xf32, #tpu.memory_space<vmem>>
    %283 = tpu.memref_slice %arg14[%c1_i32_273] : memref<2x!tpu.dma_semaphore, #tpu.memory_space<semaphore_mem>> -> memref<1x!tpu.dma_semaphore, #tpu.memory_space<semaphore_mem>>
    %284 = tpu.memref_squeeze %283 : memref<1x!tpu.dma_semaphore, #tpu.memory_space<semaphore_mem>> -> memref<!tpu.dma_semaphore, #tpu.memory_space<semaphore_mem>>
    tpu.enqueue_dma source(%280 : memref<16x128xf32, #tpu.memory_space<any>>) target(%282 : memref<16x128xf32, #tpu.memory_space<vmem>>) target_semaphore(%284 : memref<!tpu.dma_semaphore, #tpu.memory_space<semaphore_mem>>)
    %c10 = arith.constant 10 : index
    %c0_278 = arith.constant 0 : index
    %c0_279 = arith.constant 0 : index
    %285 = vector.load %arg2[%c10, %c0_278, %c0_279] : memref<16x4x16xf32, #tpu.memory_space<vmem>>, vector<1x4x16xf32>
    %286 = vector.shape_cast %285 : vector<1x4x16xf32> to vector<4x16xf32>
    %c0_280 = arith.constant 0 : index
    %c0_281 = arith.constant 0 : index
    %c0_282 = arith.constant 0 : index
    %287 = vector.load %arg13[%c0_280, %c0_281, %c0_282] : memref<2x16x128xf32, #tpu.memory_space<vmem>>, vector<1x16x128xf32>
    %288 = vector.shape_cast %287 : vector<1x16x128xf32> to vector<16x128xf32>
    %cst_283 = arith.constant dense<0.000000e+00> : vector<4x128xf32>
    %289 = tpu.matmul %286, %288, %cst_283 {dimension_numbers = #tpu.dot_dimension_numbers<[1], [0], [0], [1], [0, 0, 1, 1], [], []>} : vector<4x16xf32>, vector<16x128xf32>, vector<4x128xf32> -> vector<4x128xf32>
    %c10_284 = arith.constant 10 : index
    %c0_285 = arith.constant 0 : index
    %c0_286 = arith.constant 0 : index
    %290 = vector.load %arg3[%c10_284, %c0_285, %c0_286] : memref<16x128x32xf32, #tpu.memory_space<vmem>>, vector<1x128x32xf32>
    %291 = vector.shape_cast %290 : vector<1x128x32xf32> to vector<128x32xf32>
    %cst_287 = arith.constant dense<0.000000e+00> : vector<4x32xf32>
    %292 = tpu.matmul %289, %291, %cst_287 {dimension_numbers = #tpu.dot_dimension_numbers<[1], [0], [0], [1], [0, 0, 1, 1], [], []>} : vector<4x128xf32>, vector<128x32xf32>, vector<4x32xf32> -> vector<4x32xf32>
    %c10_288 = arith.constant 10 : index
    %c0_289 = arith.constant 0 : index
    %c0_290 = arith.constant 0 : index
    %293 = vector.load %arg15[%c10_288, %c0_289, %c0_290] : memref<16x4x32xf32, #tpu.memory_space<vmem>>, vector<1x4x32xf32>
    %294 = vector.shape_cast %293 : vector<1x4x32xf32> to vector<4x32xf32>
    %295 = vector.shape_cast %292 : vector<4x32xf32> to vector<1x4x32xf32>
    tpu.vector_store %arg15[%c10_288, %c0_289, %c0_290], %295 {strides = array<i32>} : memref<16x4x32xf32, #tpu.memory_space<vmem>>, vector<1x4x32xf32>,
    %c0_i32_291 = arith.constant 0 : i32
    %c1_i32_292 = arith.constant 1 : i32
    %c1_i32_293 = arith.constant 1 : i32
    %c0_i32_294 = arith.constant 0 : i32
    %c0_i32_295 = arith.constant 0 : i32
    %296 = tpu.memref_slice %arg4[%c0_i32_291, %c0_i32_294, %c0_i32_295] : memref<2x16x128xf32, #tpu.memory_space<any>> -> memref<1x16x128xf32, #tpu.memory_space<any>>
    %297 = tpu.memref_squeeze %296 : memref<1x16x128xf32, #tpu.memory_space<any>> -> memref<16x128xf32, #tpu.memory_space<any>>
    %c0_i32_296 = arith.constant 0 : i32
    %c0_i32_297 = arith.constant 0 : i32
    %298 = tpu.memref_slice %arg13[%c1_i32_292, %c0_i32_296, %c0_i32_297] : memref<2x16x128xf32, #tpu.memory_space<vmem>> -> memref<1x16x128xf32, #tpu.memory_space<vmem>>
    %299 = tpu.memref_squeeze %298 : memref<1x16x128xf32, #tpu.memory_space<vmem>> -> memref<16x128xf32, #tpu.memory_space<vmem>>
    %300 = tpu.memref_slice %arg14[%c1_i32_293] : memref<2x!tpu.dma_semaphore, #tpu.memory_space<semaphore_mem>> -> memref<1x!tpu.dma_semaphore, #tpu.memory_space<semaphore_mem>>
    %301 = tpu.memref_squeeze %300 : memref<1x!tpu.dma_semaphore, #tpu.memory_space<semaphore_mem>> -> memref<!tpu.dma_semaphore, #tpu.memory_space<semaphore_mem>>
    tpu.wait_dma2 semaphore(%301 : memref<!tpu.dma_semaphore, #tpu.memory_space<semaphore_mem>>) src(%297 : memref<16x128xf32, #tpu.memory_space<any>>) dst(%299 : memref<16x128xf32, #tpu.memory_space<vmem>>)
    %c12_i32 = arith.constant 12 : i32
    %302 = arith.addi %0, %c12_i32 : i32
    %303 = arith.index_cast %302 : i32 to index
    %304 = memref.load %arg1[%303] : memref<16xi32, #tpu.memory_space<smem>>
    %c0_i32_298 = arith.constant 0 : i32
    %c0_i32_299 = arith.constant 0 : i32
    %c0_i32_300 = arith.constant 0 : i32
    %c0_i32_301 = arith.constant 0 : i32
    %305 = tpu.memref_slice %arg4[%304, %c0_i32_300, %c0_i32_301] : memref<2x16x128xf32, #tpu.memory_space<any>> -> memref<1x16x128xf32, #tpu.memory_space<any>>
    %306 = tpu.memref_squeeze %305 : memref<1x16x128xf32, #tpu.memory_space<any>> -> memref<16x128xf32, #tpu.memory_space<any>>
    %c0_i32_302 = arith.constant 0 : i32
    %c0_i32_303 = arith.constant 0 : i32
    %307 = tpu.memref_slice %arg13[%c0_i32_298, %c0_i32_302, %c0_i32_303] : memref<2x16x128xf32, #tpu.memory_space<vmem>> -> memref<1x16x128xf32, #tpu.memory_space<vmem>>
    %308 = tpu.memref_squeeze %307 : memref<1x16x128xf32, #tpu.memory_space<vmem>> -> memref<16x128xf32, #tpu.memory_space<vmem>>
    %309 = tpu.memref_slice %arg14[%c0_i32_299] : memref<2x!tpu.dma_semaphore, #tpu.memory_space<semaphore_mem>> -> memref<1x!tpu.dma_semaphore, #tpu.memory_space<semaphore_mem>>
    %310 = tpu.memref_squeeze %309 : memref<1x!tpu.dma_semaphore, #tpu.memory_space<semaphore_mem>> -> memref<!tpu.dma_semaphore, #tpu.memory_space<semaphore_mem>>
    tpu.enqueue_dma source(%306 : memref<16x128xf32, #tpu.memory_space<any>>) target(%308 : memref<16x128xf32, #tpu.memory_space<vmem>>) target_semaphore(%310 : memref<!tpu.dma_semaphore, #tpu.memory_space<semaphore_mem>>)
    %c11 = arith.constant 11 : index
    %c0_304 = arith.constant 0 : index
    %c0_305 = arith.constant 0 : index
    %311 = vector.load %arg2[%c11, %c0_304, %c0_305] : memref<16x4x16xf32, #tpu.memory_space<vmem>>, vector<1x4x16xf32>
    %312 = vector.shape_cast %311 : vector<1x4x16xf32> to vector<4x16xf32>
    %c1_306 = arith.constant 1 : index
    %c0_307 = arith.constant 0 : index
    %c0_308 = arith.constant 0 : index
    %313 = vector.load %arg13[%c1_306, %c0_307, %c0_308] : memref<2x16x128xf32, #tpu.memory_space<vmem>>, vector<1x16x128xf32>
    %314 = vector.shape_cast %313 : vector<1x16x128xf32> to vector<16x128xf32>
    %cst_309 = arith.constant dense<0.000000e+00> : vector<4x128xf32>
    %315 = tpu.matmul %312, %314, %cst_309 {dimension_numbers = #tpu.dot_dimension_numbers<[1], [0], [0], [1], [0, 0, 1, 1], [], []>} : vector<4x16xf32>, vector<16x128xf32>, vector<4x128xf32> -> vector<4x128xf32>
    %c11_310 = arith.constant 11 : index
    %c0_311 = arith.constant 0 : index
    %c0_312 = arith.constant 0 : index
    %316 = vector.load %arg3[%c11_310, %c0_311, %c0_312] : memref<16x128x32xf32, #tpu.memory_space<vmem>>, vector<1x128x32xf32>
    %317 = vector.shape_cast %316 : vector<1x128x32xf32> to vector<128x32xf32>
    %cst_313 = arith.constant dense<0.000000e+00> : vector<4x32xf32>
    %318 = tpu.matmul %315, %317, %cst_313 {dimension_numbers = #tpu.dot_dimension_numbers<[1], [0], [0], [1], [0, 0, 1, 1], [], []>} : vector<4x128xf32>, vector<128x32xf32>, vector<4x32xf32> -> vector<4x32xf32>
    %c11_314 = arith.constant 11 : index
    %c0_315 = arith.constant 0 : index
    %c0_316 = arith.constant 0 : index
    %319 = vector.load %arg15[%c11_314, %c0_315, %c0_316] : memref<16x4x32xf32, #tpu.memory_space<vmem>>, vector<1x4x32xf32>
    %320 = vector.shape_cast %319 : vector<1x4x32xf32> to vector<4x32xf32>
    %321 = vector.shape_cast %318 : vector<4x32xf32> to vector<1x4x32xf32>
    tpu.vector_store %arg15[%c11_314, %c0_315, %c0_316], %321 {strides = array<i32>} : memref<16x4x32xf32, #tpu.memory_space<vmem>>, vector<1x4x32xf32>,
    %c0_i32_317 = arith.constant 0 : i32
    %c0_i32_318 = arith.constant 0 : i32
    %c0_i32_319 = arith.constant 0 : i32
    %c0_i32_320 = arith.constant 0 : i32
    %c0_i32_321 = arith.constant 0 : i32
    %322 = tpu.memref_slice %arg4[%c0_i32_317, %c0_i32_320, %c0_i32_321] : memref<2x16x128xf32, #tpu.memory_space<any>> -> memref<1x16x128xf32, #tpu.memory_space<any>>
    %323 = tpu.memref_squeeze %322 : memref<1x16x128xf32, #tpu.memory_space<any>> -> memref<16x128xf32, #tpu.memory_space<any>>
    %c0_i32_322 = arith.constant 0 : i32
    %c0_i32_323 = arith.constant 0 : i32
    %324 = tpu.memref_slice %arg13[%c0_i32_318, %c0_i32_322, %c0_i32_323] : memref<2x16x128xf32, #tpu.memory_space<vmem>> -> memref<1x16x128xf32, #tpu.memory_space<vmem>>
    %325 = tpu.memref_squeeze %324 : memref<1x16x128xf32, #tpu.memory_space<vmem>> -> memref<16x128xf32, #tpu.memory_space<vmem>>
    %326 = tpu.memref_slice %arg14[%c0_i32_319] : memref<2x!tpu.dma_semaphore, #tpu.memory_space<semaphore_mem>> -> memref<1x!tpu.dma_semaphore, #tpu.memory_space<semaphore_mem>>
    %327 = tpu.memref_squeeze %326 : memref<1x!tpu.dma_semaphore, #tpu.memory_space<semaphore_mem>> -> memref<!tpu.dma_semaphore, #tpu.memory_space<semaphore_mem>>
    tpu.wait_dma2 semaphore(%327 : memref<!tpu.dma_semaphore, #tpu.memory_space<semaphore_mem>>) src(%323 : memref<16x128xf32, #tpu.memory_space<any>>) dst(%325 : memref<16x128xf32, #tpu.memory_space<vmem>>)
    %c13_i32 = arith.constant 13 : i32
    %328 = arith.addi %0, %c13_i32 : i32
    %329 = arith.index_cast %328 : i32 to index
    %330 = memref.load %arg1[%329] : memref<16xi32, #tpu.memory_space<smem>>
    %c1_i32_324 = arith.constant 1 : i32
    %c1_i32_325 = arith.constant 1 : i32
    %c0_i32_326 = arith.constant 0 : i32
    %c0_i32_327 = arith.constant 0 : i32
    %331 = tpu.memref_slice %arg4[%330, %c0_i32_326, %c0_i32_327] : memref<2x16x128xf32, #tpu.memory_space<any>> -> memref<1x16x128xf32, #tpu.memory_space<any>>
    %332 = tpu.memref_squeeze %331 : memref<1x16x128xf32, #tpu.memory_space<any>> -> memref<16x128xf32, #tpu.memory_space<any>>
    %c0_i32_328 = arith.constant 0 : i32
    %c0_i32_329 = arith.constant 0 : i32
    %333 = tpu.memref_slice %arg13[%c1_i32_324, %c0_i32_328, %c0_i32_329] : memref<2x16x128xf32, #tpu.memory_space<vmem>> -> memref<1x16x128xf32, #tpu.memory_space<vmem>>
    %334 = tpu.memref_squeeze %333 : memref<1x16x128xf32, #tpu.memory_space<vmem>> -> memref<16x128xf32, #tpu.memory_space<vmem>>
    %335 = tpu.memref_slice %arg14[%c1_i32_325] : memref<2x!tpu.dma_semaphore, #tpu.memory_space<semaphore_mem>> -> memref<1x!tpu.dma_semaphore, #tpu.memory_space<semaphore_mem>>
    %336 = tpu.memref_squeeze %335 : memref<1x!tpu.dma_semaphore, #tpu.memory_space<semaphore_mem>> -> memref<!tpu.dma_semaphore, #tpu.memory_space<semaphore_mem>>
    tpu.enqueue_dma source(%332 : memref<16x128xf32, #tpu.memory_space<any>>) target(%334 : memref<16x128xf32, #tpu.memory_space<vmem>>) target_semaphore(%336 : memref<!tpu.dma_semaphore, #tpu.memory_space<semaphore_mem>>)
    %c12 = arith.constant 12 : index
    %c0_330 = arith.constant 0 : index
    %c0_331 = arith.constant 0 : index
    %337 = vector.load %arg2[%c12, %c0_330, %c0_331] : memref<16x4x16xf32, #tpu.memory_space<vmem>>, vector<1x4x16xf32>
    %338 = vector.shape_cast %337 : vector<1x4x16xf32> to vector<4x16xf32>
    %c0_332 = arith.constant 0 : index
    %c0_333 = arith.constant 0 : index
    %c0_334 = arith.constant 0 : index
    %339 = vector.load %arg13[%c0_332, %c0_333, %c0_334] : memref<2x16x128xf32, #tpu.memory_space<vmem>>, vector<1x16x128xf32>
    %340 = vector.shape_cast %339 : vector<1x16x128xf32> to vector<16x128xf32>
    %cst_335 = arith.constant dense<0.000000e+00> : vector<4x128xf32>
    %341 = tpu.matmul %338, %340, %cst_335 {dimension_numbers = #tpu.dot_dimension_numbers<[1], [0], [0], [1], [0, 0, 1, 1], [], []>} : vector<4x16xf32>, vector<16x128xf32>, vector<4x128xf32> -> vector<4x128xf32>
    %c12_336 = arith.constant 12 : index
    %c0_337 = arith.constant 0 : index
    %c0_338 = arith.constant 0 : index
    %342 = vector.load %arg3[%c12_336, %c0_337, %c0_338] : memref<16x128x32xf32, #tpu.memory_space<vmem>>, vector<1x128x32xf32>
    %343 = vector.shape_cast %342 : vector<1x128x32xf32> to vector<128x32xf32>
    %cst_339 = arith.constant dense<0.000000e+00> : vector<4x32xf32>
    %344 = tpu.matmul %341, %343, %cst_339 {dimension_numbers = #tpu.dot_dimension_numbers<[1], [0], [0], [1], [0, 0, 1, 1], [], []>} : vector<4x128xf32>, vector<128x32xf32>, vector<4x32xf32> -> vector<4x32xf32>
    %c12_340 = arith.constant 12 : index
    %c0_341 = arith.constant 0 : index
    %c0_342 = arith.constant 0 : index
    %345 = vector.load %arg15[%c12_340, %c0_341, %c0_342] : memref<16x4x32xf32, #tpu.memory_space<vmem>>, vector<1x4x32xf32>
    %346 = vector.shape_cast %345 : vector<1x4x32xf32> to vector<4x32xf32>
    %347 = vector.shape_cast %344 : vector<4x32xf32> to vector<1x4x32xf32>
    tpu.vector_store %arg15[%c12_340, %c0_341, %c0_342], %347 {strides = array<i32>} : memref<16x4x32xf32, #tpu.memory_space<vmem>>, vector<1x4x32xf32>,
    %c0_i32_343 = arith.constant 0 : i32
    %c1_i32_344 = arith.constant 1 : i32
    %c1_i32_345 = arith.constant 1 : i32
    %c0_i32_346 = arith.constant 0 : i32
    %c0_i32_347 = arith.constant 0 : i32
    %348 = tpu.memref_slice %arg4[%c0_i32_343, %c0_i32_346, %c0_i32_347] : memref<2x16x128xf32, #tpu.memory_space<any>> -> memref<1x16x128xf32, #tpu.memory_space<any>>
    %349 = tpu.memref_squeeze %348 : memref<1x16x128xf32, #tpu.memory_space<any>> -> memref<16x128xf32, #tpu.memory_space<any>>
    %c0_i32_348 = arith.constant 0 : i32
    %c0_i32_349 = arith.constant 0 : i32
    %350 = tpu.memref_slice %arg13[%c1_i32_344, %c0_i32_348, %c0_i32_349] : memref<2x16x128xf32, #tpu.memory_space<vmem>> -> memref<1x16x128xf32, #tpu.memory_space<vmem>>
    %351 = tpu.memref_squeeze %350 : memref<1x16x128xf32, #tpu.memory_space<vmem>> -> memref<16x128xf32, #tpu.memory_space<vmem>>
    %352 = tpu.memref_slice %arg14[%c1_i32_345] : memref<2x!tpu.dma_semaphore, #tpu.memory_space<semaphore_mem>> -> memref<1x!tpu.dma_semaphore, #tpu.memory_space<semaphore_mem>>
    %353 = tpu.memref_squeeze %352 : memref<1x!tpu.dma_semaphore, #tpu.memory_space<semaphore_mem>> -> memref<!tpu.dma_semaphore, #tpu.memory_space<semaphore_mem>>
    tpu.wait_dma2 semaphore(%353 : memref<!tpu.dma_semaphore, #tpu.memory_space<semaphore_mem>>) src(%349 : memref<16x128xf32, #tpu.memory_space<any>>) dst(%351 : memref<16x128xf32, #tpu.memory_space<vmem>>)
    %c14_i32 = arith.constant 14 : i32
    %354 = arith.addi %0, %c14_i32 : i32
    %355 = arith.index_cast %354 : i32 to index
    %356 = memref.load %arg1[%355] : memref<16xi32, #tpu.memory_space<smem>>
    %c0_i32_350 = arith.constant 0 : i32
    %c0_i32_351 = arith.constant 0 : i32
    %c0_i32_352 = arith.constant 0 : i32
    %c0_i32_353 = arith.constant 0 : i32
    %357 = tpu.memref_slice %arg4[%356, %c0_i32_352, %c0_i32_353] : memref<2x16x128xf32, #tpu.memory_space<any>> -> memref<1x16x128xf32, #tpu.memory_space<any>>
    %358 = tpu.memref_squeeze %357 : memref<1x16x128xf32, #tpu.memory_space<any>> -> memref<16x128xf32, #tpu.memory_space<any>>
    %c0_i32_354 = arith.constant 0 : i32
    %c0_i32_355 = arith.constant 0 : i32
    %359 = tpu.memref_slice %arg13[%c0_i32_350, %c0_i32_354, %c0_i32_355] : memref<2x16x128xf32, #tpu.memory_space<vmem>> -> memref<1x16x128xf32, #tpu.memory_space<vmem>>
    %360 = tpu.memref_squeeze %359 : memref<1x16x128xf32, #tpu.memory_space<vmem>> -> memref<16x128xf32, #tpu.memory_space<vmem>>
    %361 = tpu.memref_slice %arg14[%c0_i32_351] : memref<2x!tpu.dma_semaphore, #tpu.memory_space<semaphore_mem>> -> memref<1x!tpu.dma_semaphore, #tpu.memory_space<semaphore_mem>>
    %362 = tpu.memref_squeeze %361 : memref<1x!tpu.dma_semaphore, #tpu.memory_space<semaphore_mem>> -> memref<!tpu.dma_semaphore, #tpu.memory_space<semaphore_mem>>
    tpu.enqueue_dma source(%358 : memref<16x128xf32, #tpu.memory_space<any>>) target(%360 : memref<16x128xf32, #tpu.memory_space<vmem>>) target_semaphore(%362 : memref<!tpu.dma_semaphore, #tpu.memory_space<semaphore_mem>>)
    %c13 = arith.constant 13 : index
    %c0_356 = arith.constant 0 : index
    %c0_357 = arith.constant 0 : index
    %363 = vector.load %arg2[%c13, %c0_356, %c0_357] : memref<16x4x16xf32, #tpu.memory_space<vmem>>, vector<1x4x16xf32>
    %364 = vector.shape_cast %363 : vector<1x4x16xf32> to vector<4x16xf32>
    %c1_358 = arith.constant 1 : index
    %c0_359 = arith.constant 0 : index
    %c0_360 = arith.constant 0 : index
    %365 = vector.load %arg13[%c1_358, %c0_359, %c0_360] : memref<2x16x128xf32, #tpu.memory_space<vmem>>, vector<1x16x128xf32>
    %366 = vector.shape_cast %365 : vector<1x16x128xf32> to vector<16x128xf32>
    %cst_361 = arith.constant dense<0.000000e+00> : vector<4x128xf32>
    %367 = tpu.matmul %364, %366, %cst_361 {dimension_numbers = #tpu.dot_dimension_numbers<[1], [0], [0], [1], [0, 0, 1, 1], [], []>} : vector<4x16xf32>, vector<16x128xf32>, vector<4x128xf32> -> vector<4x128xf32>
    %c13_362 = arith.constant 13 : index
    %c0_363 = arith.constant 0 : index
    %c0_364 = arith.constant 0 : index
    %368 = vector.load %arg3[%c13_362, %c0_363, %c0_364] : memref<16x128x32xf32, #tpu.memory_space<vmem>>, vector<1x128x32xf32>
    %369 = vector.shape_cast %368 : vector<1x128x32xf32> to vector<128x32xf32>
    %cst_365 = arith.constant dense<0.000000e+00> : vector<4x32xf32>
    %370 = tpu.matmul %367, %369, %cst_365 {dimension_numbers = #tpu.dot_dimension_numbers<[1], [0], [0], [1], [0, 0, 1, 1], [], []>} : vector<4x128xf32>, vector<128x32xf32>, vector<4x32xf32> -> vector<4x32xf32>
    %c13_366 = arith.constant 13 : index
    %c0_367 = arith.constant 0 : index
    %c0_368 = arith.constant 0 : index
    %371 = vector.load %arg15[%c13_366, %c0_367, %c0_368] : memref<16x4x32xf32, #tpu.memory_space<vmem>>, vector<1x4x32xf32>
    %372 = vector.shape_cast %371 : vector<1x4x32xf32> to vector<4x32xf32>
    %373 = vector.shape_cast %370 : vector<4x32xf32> to vector<1x4x32xf32>
    tpu.vector_store %arg15[%c13_366, %c0_367, %c0_368], %373 {strides = array<i32>} : memref<16x4x32xf32, #tpu.memory_space<vmem>>, vector<1x4x32xf32>,
    %c0_i32_369 = arith.constant 0 : i32
    %c0_i32_370 = arith.constant 0 : i32
    %c0_i32_371 = arith.constant 0 : i32
    %c0_i32_372 = arith.constant 0 : i32
    %c0_i32_373 = arith.constant 0 : i32
    %374 = tpu.memref_slice %arg4[%c0_i32_369, %c0_i32_372, %c0_i32_373] : memref<2x16x128xf32, #tpu.memory_space<any>> -> memref<1x16x128xf32, #tpu.memory_space<any>>
    %375 = tpu.memref_squeeze %374 : memref<1x16x128xf32, #tpu.memory_space<any>> -> memref<16x128xf32, #tpu.memory_space<any>>
    %c0_i32_374 = arith.constant 0 : i32
    %c0_i32_375 = arith.constant 0 : i32
    %376 = tpu.memref_slice %arg13[%c0_i32_370, %c0_i32_374, %c0_i32_375] : memref<2x16x128xf32, #tpu.memory_space<vmem>> -> memref<1x16x128xf32, #tpu.memory_space<vmem>>
    %377 = tpu.memref_squeeze %376 : memref<1x16x128xf32, #tpu.memory_space<vmem>> -> memref<16x128xf32, #tpu.memory_space<vmem>>
    %378 = tpu.memref_slice %arg14[%c0_i32_371] : memref<2x!tpu.dma_semaphore, #tpu.memory_space<semaphore_mem>> -> memref<1x!tpu.dma_semaphore, #tpu.memory_space<semaphore_mem>>
    %379 = tpu.memref_squeeze %378 : memref<1x!tpu.dma_semaphore, #tpu.memory_space<semaphore_mem>> -> memref<!tpu.dma_semaphore, #tpu.memory_space<semaphore_mem>>
    tpu.wait_dma2 semaphore(%379 : memref<!tpu.dma_semaphore, #tpu.memory_space<semaphore_mem>>) src(%375 : memref<16x128xf32, #tpu.memory_space<any>>) dst(%377 : memref<16x128xf32, #tpu.memory_space<vmem>>)
    %c15_i32 = arith.constant 15 : i32
    %380 = arith.addi %0, %c15_i32 : i32
    %381 = arith.index_cast %380 : i32 to index
    %382 = memref.load %arg1[%381] : memref<16xi32, #tpu.memory_space<smem>>
    %c1_i32_376 = arith.constant 1 : i32
    %c1_i32_377 = arith.constant 1 : i32
    %c0_i32_378 = arith.constant 0 : i32
    %c0_i32_379 = arith.constant 0 : i32
    %383 = tpu.memref_slice %arg4[%382, %c0_i32_378, %c0_i32_379] : memref<2x16x128xf32, #tpu.memory_space<any>> -> memref<1x16x128xf32, #tpu.memory_space<any>>
    %384 = tpu.memref_squeeze %383 : memref<1x16x128xf32, #tpu.memory_space<any>> -> memref<16x128xf32, #tpu.memory_space<any>>
    %c0_i32_380 = arith.constant 0 : i32
    %c0_i32_381 = arith.constant 0 : i32
    %385 = tpu.memref_slice %arg13[%c1_i32_376, %c0_i32_380, %c0_i32_381] : memref<2x16x128xf32, #tpu.memory_space<vmem>> -> memref<1x16x128xf32, #tpu.memory_space<vmem>>
    %386 = tpu.memref_squeeze %385 : memref<1x16x128xf32, #tpu.memory_space<vmem>> -> memref<16x128xf32, #tpu.memory_space<vmem>>
    %387 = tpu.memref_slice %arg14[%c1_i32_377] : memref<2x!tpu.dma_semaphore, #tpu.memory_space<semaphore_mem>> -> memref<1x!tpu.dma_semaphore, #tpu.memory_space<semaphore_mem>>
    %388 = tpu.memref_squeeze %387 : memref<1x!tpu.dma_semaphore, #tpu.memory_space<semaphore_mem>> -> memref<!tpu.dma_semaphore, #tpu.memory_space<semaphore_mem>>
    tpu.enqueue_dma source(%384 : memref<16x128xf32, #tpu.memory_space<any>>) target(%386 : memref<16x128xf32, #tpu.memory_space<vmem>>) target_semaphore(%388 : memref<!tpu.dma_semaphore, #tpu.memory_space<semaphore_mem>>)
    %c14 = arith.constant 14 : index
    %c0_382 = arith.constant 0 : index
    %c0_383 = arith.constant 0 : index
    %389 = vector.load %arg2[%c14, %c0_382, %c0_383] : memref<16x4x16xf32, #tpu.memory_space<vmem>>, vector<1x4x16xf32>
    %390 = vector.shape_cast %389 : vector<1x4x16xf32> to vector<4x16xf32>
    %c0_384 = arith.constant 0 : index
    %c0_385 = arith.constant 0 : index
    %c0_386 = arith.constant 0 : index
    %391 = vector.load %arg13[%c0_384, %c0_385, %c0_386] : memref<2x16x128xf32, #tpu.memory_space<vmem>>, vector<1x16x128xf32>
    %392 = vector.shape_cast %391 : vector<1x16x128xf32> to vector<16x128xf32>
    %cst_387 = arith.constant dense<0.000000e+00> : vector<4x128xf32>
    %393 = tpu.matmul %390, %392, %cst_387 {dimension_numbers = #tpu.dot_dimension_numbers<[1], [0], [0], [1], [0, 0, 1, 1], [], []>} : vector<4x16xf32>, vector<16x128xf32>, vector<4x128xf32> -> vector<4x128xf32>
    %c14_388 = arith.constant 14 : index
    %c0_389 = arith.constant 0 : index
    %c0_390 = arith.constant 0 : index
    %394 = vector.load %arg3[%c14_388, %c0_389, %c0_390] : memref<16x128x32xf32, #tpu.memory_space<vmem>>, vector<1x128x32xf32>
    %395 = vector.shape_cast %394 : vector<1x128x32xf32> to vector<128x32xf32>
    %cst_391 = arith.constant dense<0.000000e+00> : vector<4x32xf32>
    %396 = tpu.matmul %393, %395, %cst_391 {dimension_numbers = #tpu.dot_dimension_numbers<[1], [0], [0], [1], [0, 0, 1, 1], [], []>} : vector<4x128xf32>, vector<128x32xf32>, vector<4x32xf32> -> vector<4x32xf32>
    %c14_392 = arith.constant 14 : index
    %c0_393 = arith.constant 0 : index
    %c0_394 = arith.constant 0 : index
    %397 = vector.load %arg15[%c14_392, %c0_393, %c0_394] : memref<16x4x32xf32, #tpu.memory_space<vmem>>, vector<1x4x32xf32>
    %398 = vector.shape_cast %397 : vector<1x4x32xf32> to vector<4x32xf32>
    %399 = vector.shape_cast %396 : vector<4x32xf32> to vector<1x4x32xf32>
    tpu.vector_store %arg15[%c14_392, %c0_393, %c0_394], %399 {strides = array<i32>} : memref<16x4x32xf32, #tpu.memory_space<vmem>>, vector<1x4x32xf32>,
    %c0_i32_395 = arith.constant 0 : i32
    %c1_i32_396 = arith.constant 1 : i32
    %c1_i32_397 = arith.constant 1 : i32
    %c0_i32_398 = arith.constant 0 : i32
    %c0_i32_399 = arith.constant 0 : i32
    %400 = tpu.memref_slice %arg4[%c0_i32_395, %c0_i32_398, %c0_i32_399] : memref<2x16x128xf32, #tpu.memory_space<any>> -> memref<1x16x128xf32, #tpu.memory_space<any>>
    %401 = tpu.memref_squeeze %400 : memref<1x16x128xf32, #tpu.memory_space<any>> -> memref<16x128xf32, #tpu.memory_space<any>>
    %c0_i32_400 = arith.constant 0 : i32
    %c0_i32_401 = arith.constant 0 : i32
    %402 = tpu.memref_slice %arg13[%c1_i32_396, %c0_i32_400, %c0_i32_401] : memref<2x16x128xf32, #tpu.memory_space<vmem>> -> memref<1x16x128xf32, #tpu.memory_space<vmem>>
    %403 = tpu.memref_squeeze %402 : memref<1x16x128xf32, #tpu.memory_space<vmem>> -> memref<16x128xf32, #tpu.memory_space<vmem>>
    %404 = tpu.memref_slice %arg14[%c1_i32_397] : memref<2x!tpu.dma_semaphore, #tpu.memory_space<semaphore_mem>> -> memref<1x!tpu.dma_semaphore, #tpu.memory_space<semaphore_mem>>
    %405 = tpu.memref_squeeze %404 : memref<1x!tpu.dma_semaphore, #tpu.memory_space<semaphore_mem>> -> memref<!tpu.dma_semaphore, #tpu.memory_space<semaphore_mem>>
    tpu.wait_dma2 semaphore(%405 : memref<!tpu.dma_semaphore, #tpu.memory_space<semaphore_mem>>) src(%401 : memref<16x128xf32, #tpu.memory_space<any>>) dst(%403 : memref<16x128xf32, #tpu.memory_space<vmem>>)
    %c15 = arith.constant 15 : index
    %c0_402 = arith.constant 0 : index
    %c0_403 = arith.constant 0 : index
    %406 = vector.load %arg2[%c15, %c0_402, %c0_403] : memref<16x4x16xf32, #tpu.memory_space<vmem>>, vector<1x4x16xf32>
    %407 = vector.shape_cast %406 : vector<1x4x16xf32> to vector<4x16xf32>
    %c1_404 = arith.constant 1 : index
    %c0_405 = arith.constant 0 : index
    %c0_406 = arith.constant 0 : index
    %408 = vector.load %arg13[%c1_404, %c0_405, %c0_406] : memref<2x16x128xf32, #tpu.memory_space<vmem>>, vector<1x16x128xf32>
    %409 = vector.shape_cast %408 : vector<1x16x128xf32> to vector<16x128xf32>
    %cst_407 = arith.constant dense<0.000000e+00> : vector<4x128xf32>
    %410 = tpu.matmul %407, %409, %cst_407 {dimension_numbers = #tpu.dot_dimension_numbers<[1], [0], [0], [1], [0, 0, 1, 1], [], []>} : vector<4x16xf32>, vector<16x128xf32>, vector<4x128xf32> -> vector<4x128xf32>
    %c15_408 = arith.constant 15 : index
    %c0_409 = arith.constant 0 : index
    %c0_410 = arith.constant 0 : index
    %411 = vector.load %arg3[%c15_408, %c0_409, %c0_410] : memref<16x128x32xf32, #tpu.memory_space<vmem>>, vector<1x128x32xf32>
    %412 = vector.shape_cast %411 : vector<1x128x32xf32> to vector<128x32xf32>
    %cst_411 = arith.constant dense<0.000000e+00> : vector<4x32xf32>
    %413 = tpu.matmul %410, %412, %cst_411 {dimension_numbers = #tpu.dot_dimension_numbers<[1], [0], [0], [1], [0, 0, 1, 1], [], []>} : vector<4x128xf32>, vector<128x32xf32>, vector<4x32xf32> -> vector<4x32xf32>
    %c15_412 = arith.constant 15 : index
    %c0_413 = arith.constant 0 : index
    %c0_414 = arith.constant 0 : index
    %414 = vector.load %arg15[%c15_412, %c0_413, %c0_414] : memref<16x4x32xf32, #tpu.memory_space<vmem>>, vector<1x4x32xf32>
    %415 = vector.shape_cast %414 : vector<1x4x32xf32> to vector<4x32xf32>
    %416 = vector.shape_cast %413 : vector<4x32xf32> to vector<1x4x32xf32>
    tpu.vector_store %arg15[%c15_412, %c0_413, %c0_414], %416 {strides = array<i32>} : memref<16x4x32xf32, #tpu.memory_space<vmem>>, vector<1x4x32xf32>,
    %c0_415 = arith.constant 0 : index
    %c0_416 = arith.constant 0 : index
    %c0_417 = arith.constant 0 : index
    %417 = vector.load %arg15[%c0_415, %c0_416, %c0_417] : memref<16x4x32xf32, #tpu.memory_space<vmem>>, vector<16x4x32xf32>
    %cst_418 = arith.constant 0.000000e+00 : f32
    %418 = vector.broadcast %cst_418 : f32 to vector<16x128xf32>
    %419 = vector.extract_strided_slice %417 {offsets = [0, 0, 0], sizes = [16, 1, 32], strides = [1, 1, 1]} : vector<16x4x32xf32> to vector<16x1x32xf32>
    %420 = vector.shape_cast %419 : vector<16x1x32xf32> to vector<16x32xf32>
    %421 = arith.truncf %420 : vector<16x32xf32> to vector<16x32xbf16>
    %c0_419 = arith.constant 0 : index
    %c0_420 = arith.constant 0 : index
    %c0_421 = arith.constant 0 : index
    %422 = vector.load %arg5[%c0_419, %c0_420, %c0_421] : memref<4x32x128xbf16, #tpu.memory_space<vmem>>, vector<1x32x128xbf16>
    %423 = vector.shape_cast %422 : vector<1x32x128xbf16> to vector<32x128xbf16>
    %cst_422 = arith.constant dense<0.000000e+00> : vector<16x128xf32>
    %424 = tpu.matmul %421, %423, %cst_422 {dimension_numbers = #tpu.dot_dimension_numbers<[1], [0], [0], [1], [0, 0, 1, 1], [], []>} : vector<16x32xbf16>, vector<32x128xbf16>, vector<16x128xf32> -> vector<16x128xf32>
    %425 = arith.addf %418, %424 : vector<16x128xf32>
    %426 = vector.extract_strided_slice %417 {offsets = [0, 1, 0], sizes = [16, 1, 32], strides = [1, 1, 1]} : vector<16x4x32xf32> to vector<16x1x32xf32>
    %427 = vector.shape_cast %426 : vector<16x1x32xf32> to vector<16x32xf32>
    %428 = arith.truncf %427 : vector<16x32xf32> to vector<16x32xbf16>
    %c1_423 = arith.constant 1 : index
    %c0_424 = arith.constant 0 : index
    %c0_425 = arith.constant 0 : index
    %429 = vector.load %arg5[%c1_423, %c0_424, %c0_425] : memref<4x32x128xbf16, #tpu.memory_space<vmem>>, vector<1x32x128xbf16>
    %430 = vector.shape_cast %429 : vector<1x32x128xbf16> to vector<32x128xbf16>
    %cst_426 = arith.constant dense<0.000000e+00> : vector<16x128xf32>
    %431 = tpu.matmul %428, %430, %cst_426 {dimension_numbers = #tpu.dot_dimension_numbers<[1], [0], [0], [1], [0, 0, 1, 1], [], []>} : vector<16x32xbf16>, vector<32x128xbf16>, vector<16x128xf32> -> vector<16x128xf32>
    %432 = arith.addf %425, %431 : vector<16x128xf32>
    %433 = vector.extract_strided_slice %417 {offsets = [0, 2, 0], sizes = [16, 1, 32], strides = [1, 1, 1]} : vector<16x4x32xf32> to vector<16x1x32xf32>
    %434 = vector.shape_cast %433 : vector<16x1x32xf32> to vector<16x32xf32>
    %435 = arith.truncf %434 : vector<16x32xf32> to vector<16x32xbf16>
    %c2_427 = arith.constant 2 : index
    %c0_428 = arith.constant 0 : index
    %c0_429 = arith.constant 0 : index
    %436 = vector.load %arg5[%c2_427, %c0_428, %c0_429] : memref<4x32x128xbf16, #tpu.memory_space<vmem>>, vector<1x32x128xbf16>
    %437 = vector.shape_cast %436 : vector<1x32x128xbf16> to vector<32x128xbf16>
    %cst_430 = arith.constant dense<0.000000e+00> : vector<16x128xf32>
    %438 = tpu.matmul %435, %437, %cst_430 {dimension_numbers = #tpu.dot_dimension_numbers<[1], [0], [0], [1], [0, 0, 1, 1], [], []>} : vector<16x32xbf16>, vector<32x128xbf16>, vector<16x128xf32> -> vector<16x128xf32>
    %439 = arith.addf %432, %438 : vector<16x128xf32>
    %440 = vector.extract_strided_slice %417 {offsets = [0, 3, 0], sizes = [16, 1, 32], strides = [1, 1, 1]} : vector<16x4x32xf32> to vector<16x1x32xf32>
    %441 = vector.shape_cast %440 : vector<16x1x32xf32> to vector<16x32xf32>
    %442 = arith.truncf %441 : vector<16x32xf32> to vector<16x32xbf16>
    %c3_431 = arith.constant 3 : index
    %c0_432 = arith.constant 0 : index
    %c0_433 = arith.constant 0 : index
    %443 = vector.load %arg5[%c3_431, %c0_432, %c0_433] : memref<4x32x128xbf16, #tpu.memory_space<vmem>>, vector<1x32x128xbf16>
    %444 = vector.shape_cast %443 : vector<1x32x128xbf16> to vector<32x128xbf16>
    %cst_434 = arith.constant dense<0.000000e+00> : vector<16x128xf32>
    %445 = tpu.matmul %442, %444, %cst_434 {dimension_numbers = #tpu.dot_dimension_numbers<[1], [0], [0], [1], [0, 0, 1, 1], [], []>} : vector<16x32xbf16>, vector<32x128xbf16>, vector<16x128xf32> -> vector<16x128xf32>
    %446 = arith.addf %439, %445 : vector<16x128xf32>
    %c0_435 = arith.constant 0 : index
    %c0_436 = arith.constant 0 : index
    %447 = vector.load %arg6[%c0_435, %c0_436] : memref<1x128xf32, #tpu.memory_space<vmem>>, vector<1x128xf32>
    %448 = vector.broadcast %447 : vector<1x128xf32> to vector<16x128xf32>
    %449 = arith.addf %446, %448 : vector<16x128xf32>
    %cst_437 = arith.constant 0.000000e+00 : f32
    %450 = vector.broadcast %cst_437 : f32 to vector<16x128xf32>
    %451 = arith.maximumf %449, %450 : vector<16x128xf32>
    %452 = arith.truncf %451 : vector<16x128xf32> to vector<16x128xbf16>
    %c0_438 = arith.constant 0 : index
    %c0_439 = arith.constant 0 : index
    %453 = vector.load %arg7[%c0_438, %c0_439] : memref<128x128xbf16, #tpu.memory_space<vmem>>, vector<128x128xbf16>
    %cst_440 = arith.constant dense<0.000000e+00> : vector<16x128xf32>
    %454 = tpu.matmul %452, %453, %cst_440 {dimension_numbers = #tpu.dot_dimension_numbers<[1], [0], [0], [1], [0, 0, 1, 1], [], []>} : vector<16x128xbf16>, vector<128x128xbf16>, vector<16x128xf32> -> vector<16x128xf32>
    %c0_441 = arith.constant 0 : index
    %c0_442 = arith.constant 0 : index
    %455 = vector.load %arg8[%c0_441, %c0_442] : memref<1x128xf32, #tpu.memory_space<vmem>>, vector<1x128xf32>
    %456 = vector.broadcast %455 : vector<1x128xf32> to vector<16x128xf32>
    %457 = arith.addf %454, %456 : vector<16x128xf32>
    %cst_443 = arith.constant 0.000000e+00 : f32
    %458 = vector.broadcast %cst_443 : f32 to vector<16x128xf32>
    %459 = arith.maximumf %457, %458 : vector<16x128xf32>
    %c0_444 = arith.constant 0 : index
    %c0_445 = arith.constant 0 : index
    %460 = vector.load %arg11[%c0_444, %c0_445] : memref<16x128xf32, #tpu.memory_space<vmem>>, vector<16x128xf32>
    tpu.vector_store %arg11[%c0_444, %c0_445], %459 {strides = array<i32>} : memref<16x128xf32, #tpu.memory_space<vmem>>, vector<16x128xf32>,
    %461 = arith.truncf %459 : vector<16x128xf32> to vector<16x128xbf16>
    %c0_446 = arith.constant 0 : index
    %c0_447 = arith.constant 0 : index
    %462 = vector.load %arg9[%c0_446, %c0_447] : memref<128x128xbf16, #tpu.memory_space<vmem>>, vector<128x128xbf16>
    %cst_448 = arith.constant dense<0.000000e+00> : vector<16x128xf32>
    %463 = tpu.matmul %461, %462, %cst_448 {dimension_numbers = #tpu.dot_dimension_numbers<[1], [0], [0], [1], [0, 0, 1, 1], [], []>} : vector<16x128xbf16>, vector<128x128xbf16>, vector<16x128xf32> -> vector<16x128xf32>
    %c0_449 = arith.constant 0 : index
    %c0_450 = arith.constant 0 : index
    %464 = vector.load %arg10[%c0_449, %c0_450] : memref<1x128xf32, #tpu.memory_space<vmem>>, vector<1x128xf32>
    %465 = vector.broadcast %464 : vector<1x128xf32> to vector<16x128xf32>
    %466 = arith.addf %463, %465 : vector<16x128xf32>
    %c0_451 = arith.constant 0 : index
    %c0_452 = arith.constant 0 : index
    %467 = vector.load %arg12[%c0_451, %c0_452] : memref<16x128xf32, #tpu.memory_space<vmem>>, vector<16x128xf32>
    tpu.vector_store %arg12[%c0_451, %c0_452], %466 {strides = array<i32>} : memref<16x128xf32, #tpu.memory_space<vmem>>, vector<16x128xf32>,
    return
  }
  func.func @transform_0(%arg0: i32, %arg1: memref<16xi32, #tpu.memory_space<smem>>) -> (i32, i32, i32) {
    %c0_i32 = arith.constant 0 : i32
    %c0_i32_0 = arith.constant 0 : i32
    %c0_i32_1 = arith.constant 0 : i32
    return %arg0, %c0_i32, %c0_i32_0 : i32, i32, i32
  }
  func.func @transform_1(%arg0: i32, %arg1: memref<16xi32, #tpu.memory_space<smem>>) -> (i32, i32, i32) {
    %c0_i32 = arith.constant 0 : i32
    %c0_i32_0 = arith.constant 0 : i32
    %c0_i32_1 = arith.constant 0 : i32
    return %arg0, %c0_i32, %c0_i32_0 : i32, i32, i32
  }
  func.func @transform_3(%arg0: i32, %arg1: memref<16xi32, #tpu.memory_space<smem>>) -> (i32, i32, i32) {
    %c0_i32 = arith.constant 0 : i32
    %c0_i32_0 = arith.constant 0 : i32
    %c0_i32_1 = arith.constant 0 : i32
    %c0_i32_2 = arith.constant 0 : i32
    return %c0_i32, %c0_i32_0, %c0_i32_1 : i32, i32, i32
  }
  func.func @transform_4(%arg0: i32, %arg1: memref<16xi32, #tpu.memory_space<smem>>) -> (i32, i32) {
    %c0_i32 = arith.constant 0 : i32
    %c0_i32_0 = arith.constant 0 : i32
    %c0_i32_1 = arith.constant 0 : i32
    return %c0_i32, %c0_i32_0 : i32, i32
  }
  func.func @transform_5(%arg0: i32, %arg1: memref<16xi32, #tpu.memory_space<smem>>) -> (i32, i32) {
    %c0_i32 = arith.constant 0 : i32
    %c0_i32_0 = arith.constant 0 : i32
    %c0_i32_1 = arith.constant 0 : i32
    return %c0_i32, %c0_i32_0 : i32, i32
  }
  func.func @transform_6(%arg0: i32, %arg1: memref<16xi32, #tpu.memory_space<smem>>) -> (i32, i32) {
    %c0_i32 = arith.constant 0 : i32
    %c0_i32_0 = arith.constant 0 : i32
    %c0_i32_1 = arith.constant 0 : i32
    return %c0_i32, %c0_i32_0 : i32, i32
  }
  func.func @transform_7(%arg0: i32, %arg1: memref<16xi32, #tpu.memory_space<smem>>) -> (i32, i32) {
    %c0_i32 = arith.constant 0 : i32
    %c0_i32_0 = arith.constant 0 : i32
    %c0_i32_1 = arith.constant 0 : i32
    return %c0_i32, %c0_i32_0 : i32, i32
  }
  func.func @transform_8(%arg0: i32, %arg1: memref<16xi32, #tpu.memory_space<smem>>) -> (i32, i32) {
    %c0_i32 = arith.constant 0 : i32
    %c0_i32_0 = arith.constant 0 : i32
    %c0_i32_1 = arith.constant 0 : i32
    return %c0_i32, %c0_i32_0 : i32, i32
  }
  func.func @transform_9(%arg0: i32, %arg1: memref<16xi32, #tpu.memory_space<smem>>) -> (i32, i32) {
    %c0_i32 = arith.constant 0 : i32
    %c0_i32_0 = arith.constant 0 : i32
    return %arg0, %c0_i32 : i32, i32
  }
  func.func @transform_10(%arg0: i32, %arg1: memref<16xi32, #tpu.memory_space<smem>>) -> (i32, i32) {
    %c0_i32 = arith.constant 0 : i32
    %c0_i32_0 = arith.constant 0 : i32
    return %arg0, %c0_i32 : i32, i32
  }
}

</mosaic_0001>

<bundles_post_ra>
// kernel: tpu_custom_call.1
= control target key start
LH: loop header
LB: loop body
LE: loop exit
PB: predicated region body
PF: predicated region fallthrough
CT: control target
= control target key end

     0   :  { %s7639_s0 = inlined_call_operand.vmem [shape: s32[16], index: 0, kind: input, shape index: {}]   ;;  %s7640_s1 = inlined_call_operand.vmem [shape: f32[16,4,16], index: 1, kind: input, shape index: {}]   ;;  %s7641_s2 = inlined_call_operand.vmem [shape: f32[16,128,32], index: 2, kind: input, shape index: {}]   ;;  %s7642_s3 = inlined_call_operand.vmem [shape: f32[2,16,128], index: 3, kind: input, shape index: {}]   ;;  %s7643_s4 = inlined_call_operand.vmem [shape: bf16[4,32,128], index: 4, kind: input, shape index: {}]   ;;  %s7644_s5 = inlined_call_operand.vmem [shape: f32[1,128], index: 5, kind: input, shape index: {}]   ;;  %s7645_s6 = inlined_call_operand.vmem [shape: bf16[128,128], index: 6, kind: input, shape index: {}]   ;;  %s7646_s7 = inlined_call_operand.vmem [shape: f32[1,128], index: 7, kind: input, shape index: {}]   ;;  %s7647_s8 = inlined_call_operand.vmem [shape: bf16[128,128], index: 8, kind: input, shape index: {}]   ;;  %s7648_s9 = inlined_call_operand.vmem [shape: f32[1,128], index: 9, kind: input, shape index: {}]   ;;  %s7649_s10 = inlined_call_operand.hbm [shape: f32[16,128], index: 10, kind: output, shape index: {0}]   ;;  %s7650_s11 = inlined_call_operand.hbm [shape: f32[16,128], index: 11, kind: output, shape index: {1}]  }
   0x1   :  { %s17_s19 = sshll.u32 %s7639_s0, 4  ;;  %s18_s19 = int_to_ptr.vmem [resolvable:$true] %s17_s19 }
   0x2   :  { %s5871_s20 = scalar_lea.vmem %s18_s19, 16  ;;  %p5876_p1 = scmp.lt.s32.totalorder %s18_s19, %s18_s19 }
   0x3   :  { %p5872_p0 = scmp.ne.s32.totalorder %s18_s19, %s5871_s20  ;;  %p5877_p2 = scmp.lt.s32.totalorder %s5871_s20, %s5871_s20 }
   0x5   :  { %p5878_p3 = por %p5877_p2, %p5876_p1 }
   0x7   :  { %p5879_p4 = pnand %p5878_p3, %p5872_p0 }
   0x9   :  { %5882 = shalt.err (!%p5879_p4)  }
   0xa   :  { %s5961_s21 = smov [#allocation6]  }
   0xb   :  { %20 = dma.vmem_to_smem %s18_s19, 16, %s5961_s21, [#allocation5] }
   0xc   :  { %5923 = dma.done.wait [#allocation5], 16 }
   0xd   :  { %5924 = vsyncadd [#allocation5], 4294967280 }
   0xe   :  { %22 = sfence }
   0xf   :  { %23 = vsyncpa [#allocation8], 0 }
  0x10   :  { %24 = vsyncpa [#allocation10], 0  ;;  %s43_s22 = sld [smem:[#allocation6]] }
  0x16   :  { %s4399_s23 = sshll.u32 %s43_s22, 4 }
  0x17   :  { %s45_s0 = scalar_lea.vmem %s7642_s3, %s4399_s23 }
  0x18   :  { %v79_v0 = vld [vmem:[%s45_s0] sm:$0xff]  ;;  %v81_v1 = vld [vmem:[%s45_s0 + $0x8] sm:$0xff] }
  0x19   :  { %90 = vsyncadd [#allocation3], 256 }
  0x1a   :  { %5925 = dma.done.wait [#allocation3], 256 }
  0x1b   :  { %5926 = vsyncadd [#allocation3], 4294967040  ;;  %s4400_s26 = sld [smem:[#allocation6 + $0x1]] }
  0x21   :  { %s4401_s27 = sshll.u32 %s4400_s26, 4 }
  0x22   :  { %s97_s30 = scalar_lea.vmem %s7642_s3, %s4401_s27 }
  0x23   :  { %v6037_v2 = vld [vmem:[%s97_s30] sm:$0xff]  ;;  %v6039_v3 = vld [vmem:[%s97_s30 + $0x8] sm:$0xff] }
  0x24   :  { %144 = vsyncadd [#allocation3 + $0x1], 256  ;;  %v5962_v4 = vmov 0.0   ;;  %vm5963_vm0 = vmmov 0   ;;  %v145_v5 = vld [vmem:[%s7640_s1] sm:$0xf] }
  0x25   :  { %5096 = vmatprep.subr.mxu1 %v5962_v4  ;;  %5100 = vmatprep.mubr.msk.f32.mxu1 %vm5963_vm0, %v5962_v4  ;;  %vm148_vm1 = vcmask 130048   ;;  %v237_v6 = vld [vmem:[%s7641_s2 + $0x78] sm:$0xff]  ;;  %v236_v7 = vld [vmem:[%s7641_s2 + $0x70] sm:$0xff]  ;;  %v235_v8 = vld [vmem:[%s7641_s2 + $0x68] sm:$0xff]  ;;  %vm308_vm2 = vcmask 257024  }
  0x26   :  { %5097 = vmatpush3.msra.mxu1 %v81_v1  ;;  %v234_v9 = vld [vmem:[%s7641_s2 + $0x60] sm:$0xff]  ;;  %v233_v10 = vld [vmem:[%s7641_s2 + $0x58] sm:$0xff]  ;;  %v232_v11 = vld [vmem:[%s7641_s2 + $0x50] sm:$0xff] }
  0x27   :  { %5098 = vmatprep.subr.mxu1 %v5962_v4  ;;  %v231_v12 = vld [vmem:[%s7641_s2 + $0x48] sm:$0xff]  ;;  %v230_v13 = vld [vmem:[%s7641_s2 + $0x40] sm:$0xff]  ;;  %v229_v14 = vld [vmem:[%s7641_s2 + $0x38] sm:$0xff] }
  0x28   :  { %5099 = vmatpush3.msra.mxu1 %v79_v0  ;;  %v228_v15 = vld [vmem:[%s7641_s2 + $0x30] sm:$0xff]  ;;  %v227_v16 = vld [vmem:[%s7641_s2 + $0x28] sm:$0xff]  ;;  %v226_v17 = vld [vmem:[%s7641_s2 + $0x20] sm:$0xff] }
  0x29   :  { %5101 = vmatmul.mubr.msk.f32.vlgmr.msra.gmra.mxu1 %vm148_vm1, %v145_v5  ;;  %5103 = vmatprep.subr.mxu1 %v5962_v4  ;;  %v225_v18 = vld [vmem:[%s7641_s2 + $0x18] sm:$0xff]  ;;  %v224_v19 = vld [vmem:[%s7641_s2 + $0x10] sm:$0xff]  ;;  %v223_v20 = vld [vmem:[%s7641_s2 + $0x8] sm:$0xff] }
  0x2a   :  { %5104 = vmatpush3.msra.mxu1 %v237_v6  ;;  %5135 = vmatprep.mubr.msk.f32.mxu1 %vm5963_vm0, %v5962_v4  ;;  %v222_v21 = vld [vmem:[%s7641_s2] sm:$0xff] }
  0x2b   :  { %5105 = vmatprep.subr.mxu1 %v5962_v4 }
  0x2c   :  { %5106 = vmatpush3.msra.mxu1 %v236_v7 }
  0x2d   :  { %5107 = vmatprep.subr.mxu1 %v5962_v4 }
  0x2e   :  { %5108 = vmatpush3.msra.mxu1 %v235_v8 }
  0x2f   :  { %5109 = vmatprep.subr.mxu1 %v5962_v4 }
  0x30   :  { %5110 = vmatpush3.msra.mxu1 %v234_v9 }
  0x31   :  { %5111 = vmatprep.subr.mxu1 %v5962_v4 }
  0x32   :  { %5112 = vmatpush3.msra.mxu1 %v233_v10 }
  0x33   :  { %5113 = vmatprep.subr.mxu1 %v5962_v4 }
  0x34   :  { %5114 = vmatpush3.msra.mxu1 %v232_v11 }
  0x35   :  { %5115 = vmatprep.subr.mxu1 %v5962_v4 }
  0x36   :  { %5116 = vmatpush3.msra.mxu1 %v231_v12 }
  0x37   :  { %5117 = vmatprep.subr.mxu1 %v5962_v4 }
  0x38   :  { %5118 = vmatpush3.msra.mxu1 %v230_v13 }
  0x39   :  { %5119 = vmatprep.subr.mxu1 %v5962_v4 }
  0x3a   :  { %5120 = vmatpush3.msra.mxu1 %v229_v14 }
  0x3b   :  { %5121 = vmatprep.subr.mxu1 %v5962_v4 }
  0x3c   :  { %5122 = vmatpush3.msra.mxu1 %v228_v15 }
  0x3d   :  { %5123 = vmatprep.subr.mxu1 %v5962_v4 }
  0x3e   :  { %5124 = vmatpush3.msra.mxu1 %v227_v16 }
  0x3f   :  { %5125 = vmatprep.subr.mxu1 %v5962_v4 }
  0x40   :  { %5126 = vmatpush3.msra.mxu1 %v226_v17 }
  0x41   :  { %5127 = vmatprep.subr.mxu1 %v5962_v4 }
  0x42   :  { %5128 = vmatpush3.msra.mxu1 %v225_v18 }
  0x43   :  { %5129 = vmatprep.subr.mxu1 %v5962_v4 }
  0x44   :  { %5130 = vmatpush3.msra.mxu1 %v224_v19 }
  0x45   :  { %5131 = vmatprep.subr.mxu1 %v5962_v4 }
  0x46   :  { %5132 = vmatpush3.msra.mxu1 %v223_v20 }
  0x47   :  { %5133 = vmatprep.subr.mxu1 %v5962_v4 }
  0x48   :  { %5134 = vmatpush3.msra.mxu1 %v222_v21 }
  0xe9   :  { %v218_v22 = vpop.f32.mrf.mxu1 }
  0xea   :  { %5136 = vmatmul.mubr.f32.vlgmr.msra.gmra.mxu1 %v218_v22 }
  0xeb   :  { %v5102_v23 = vpop.f32.mrf.mxu1 }
 0x1aa   :  { %v304_v24 = vpop.f32.mrf.mxu1 }
 0x1ab   :  { %309 = vst.msk [vmem:[#allocation4] sm:$0xf] %vm308_vm2, %v304_v24 }
 0x1ac   :  { %v5137_v25 = vpop.f32.mrf.mxu1 }
 0x1ad   :  { %5927 = dma.done.wait [#allocation3 + $0x1], 256 }
 0x1ae   :  { %5928 = vsyncadd [#allocation3 + $0x1], 4294967040  ;;  %s4403_s0 = sld [smem:[#allocation6 + $0x2]] }
 0x1b4   :  { %s4404_s26 = sshll.u32 %s4403_s0, 4 }
 0x1b5   :  { %s315_s29 = scalar_lea.vmem %s7642_s3, %s4404_s26 }
 0x1b6   :  { %v6119_v26 = vld [vmem:[%s315_s29] sm:$0xff]  ;;  %v6121_v27 = vld [vmem:[%s315_s29 + $0x8] sm:$0xff] }
 0x1b7   :  { %360 = vsyncadd [#allocation3], 256  ;;  %5138 = vmatprep.subr.mxu0 %v5962_v4  ;;  %5142 = vmatprep.mubr.msk.f32.mxu0 %vm5963_vm0, %v5962_v4  ;;  %v4405_v28 = vld [vmem:[%s7640_s1 + $0x4] sm:$0xf]  ;;  %v4422_v29 = vld [vmem:[%s7641_s2 + $0xf8] sm:$0xff] }
 0x1b8   :  { %5139 = vmatpush3.msra.mxu0 %v6039_v3  ;;  %v4421_v30 = vld [vmem:[%s7641_s2 + $0xf0] sm:$0xff]  ;;  %v4420_v31 = vld [vmem:[%s7641_s2 + $0xe8] sm:$0xff]  ;;  %v4419_v32 = vld [vmem:[%s7641_s2 + $0xe0] sm:$0xff] }
 0x1b9   :  { %5140 = vmatprep.subr.mxu0 %v5962_v4  ;;  %v4418_v33 = vld [vmem:[%s7641_s2 + $0xd8] sm:$0xff]  ;;  %v4417_v34 = vld [vmem:[%s7641_s2 + $0xd0] sm:$0xff]  ;;  %v4416_v35 = vld [vmem:[%s7641_s2 + $0xc8] sm:$0xff] }
 0x1ba   :  { %5141 = vmatpush3.msra.mxu0 %v6037_v2  ;;  %v4415_v36 = vld [vmem:[%s7641_s2 + $0xc0] sm:$0xff]  ;;  %v4414_v37 = vld [vmem:[%s7641_s2 + $0xb8] sm:$0xff]  ;;  %v4413_v38 = vld [vmem:[%s7641_s2 + $0xb0] sm:$0xff] }
 0x1bb   :  { %5143 = vmatmul.mubr.msk.f32.vlgmr.msra.gmra.mxu0 %vm148_vm1, %v4405_v28  ;;  %5145 = vmatprep.subr.mxu0 %v5962_v4  ;;  %v4412_v39 = vld [vmem:[%s7641_s2 + $0xa8] sm:$0xff]  ;;  %v4411_v40 = vld [vmem:[%s7641_s2 + $0xa0] sm:$0xff]  ;;  %v4410_v41 = vld [vmem:[%s7641_s2 + $0x98] sm:$0xff] }
 0x1bc   :  { %5146 = vmatpush3.msra.mxu0 %v4422_v29  ;;  %5177 = vmatprep.mubr.msk.f32.mxu0 %vm5963_vm0, %v5962_v4  ;;  %v4409_v42 = vld [vmem:[%s7641_s2 + $0x90] sm:$0xff]  ;;  %v4408_v43 = vld [vmem:[%s7641_s2 + $0x88] sm:$0xff]  ;;  %v4407_v44 = vld [vmem:[%s7641_s2 + $0x80] sm:$0xff] }
 0x1bd   :  { %5147 = vmatprep.subr.mxu0 %v5962_v4 }
 0x1be   :  { %5148 = vmatpush3.msra.mxu0 %v4421_v30 }
 0x1bf   :  { %5149 = vmatprep.subr.mxu0 %v5962_v4 }
 0x1c0   :  { %5150 = vmatpush3.msra.mxu0 %v4420_v31 }
 0x1c1   :  { %5151 = vmatprep.subr.mxu0 %v5962_v4 }
 0x1c2   :  { %5152 = vmatpush3.msra.mxu0 %v4419_v32 }
 0x1c3   :  { %5153 = vmatprep.subr.mxu0 %v5962_v4 }
 0x1c4   :  { %5154 = vmatpush3.msra.mxu0 %v4418_v33 }
 0x1c5   :  { %5155 = vmatprep.subr.mxu0 %v5962_v4 }
 0x1c6   :  { %5156 = vmatpush3.msra.mxu0 %v4417_v34 }
 0x1c7   :  { %5157 = vmatprep.subr.mxu0 %v5962_v4 }
 0x1c8   :  { %5158 = vmatpush3.msra.mxu0 %v4416_v35 }
 0x1c9   :  { %5159 = vmatprep.subr.mxu0 %v5962_v4 }
 0x1ca   :  { %5160 = vmatpush3.msra.mxu0 %v4415_v36 }
 0x1cb   :  { %5161 = vmatprep.subr.mxu0 %v5962_v4 }
 0x1cc   :  { %5162 = vmatpush3.msra.mxu0 %v4414_v37 }
 0x1cd   :  { %5163 = vmatprep.subr.mxu0 %v5962_v4 }
 0x1ce   :  { %5164 = vmatpush3.msra.mxu0 %v4413_v38 }
 0x1cf   :  { %5165 = vmatprep.subr.mxu0 %v5962_v4 }
 0x1d0   :  { %5166 = vmatpush3.msra.mxu0 %v4412_v39 }
 0x1d1   :  { %5167 = vmatprep.subr.mxu0 %v5962_v4 }
 0x1d2   :  { %5168 = vmatpush3.msra.mxu0 %v4411_v40 }
 0x1d3   :  { %5169 = vmatprep.subr.mxu0 %v5962_v4 }
 0x1d4   :  { %5170 = vmatpush3.msra.mxu0 %v4410_v41 }
 0x1d5   :  { %5171 = vmatprep.subr.mxu0 %v5962_v4 }
 0x1d6   :  { %5172 = vmatpush3.msra.mxu0 %v4409_v42 }
 0x1d7   :  { %5173 = vmatprep.subr.mxu0 %v5962_v4 }
 0x1d8   :  { %5174 = vmatpush3.msra.mxu0 %v4408_v43 }
 0x1d9   :  { %5175 = vmatprep.subr.mxu0 %v5962_v4 }
 0x1da   :  { %5176 = vmatpush3.msra.mxu0 %v4407_v44 }
 0x27b   :  { %v434_v45 = vpop.f32.mrf.mxu0 }
 0x27c   :  { %5178 = vmatmul.mubr.f32.vlgmr.msra.gmra.mxu0 %v434_v45 }
 0x27d   :  { %v5144_v46 = vpop.f32.mrf.mxu0 }
 0x33c   :  { %v521_v47 = vpop.f32.mrf.mxu0 }
 0x33d   :  { %526 = vst.msk [vmem:[#allocation4 + $0x4] sm:$0xf] %vm308_vm2, %v521_v47 }
 0x33e   :  { %v5179_v48 = vpop.f32.mrf.mxu0 }
 0x33f   :  { %5929 = dma.done.wait [#allocation3], 256 }
 0x340   :  { %5930 = vsyncadd [#allocation3], 4294967040  ;;  %s4423_s25 = sld [smem:[#allocation6 + $0x3]] }
 0x346   :  { %s4424_s0 = sshll.u32 %s4423_s25, 4 }
 0x347   :  { %s532_s28 = scalar_lea.vmem %s7642_s3, %s4424_s0 }
 0x348   :  { %v6203_v49 = vld [vmem:[%s532_s28] sm:$0xff]  ;;  %v6205_v50 = vld [vmem:[%s532_s28 + $0x8] sm:$0xff] }
 0x349   :  { %577 = vsyncadd [#allocation3 + $0x1], 256  ;;  %5180 = vmatprep.subr.mxu1 %v5962_v4  ;;  %5184 = vmatprep.mubr.msk.f32.mxu1 %vm5963_vm0, %v5962_v4  ;;  %v4425_v51 = vld [vmem:[%s7640_s1 + $0x8] sm:$0xf]  ;;  %v4442_v52 = vld [vmem:[%s7641_s2 + $0x178] sm:$0xff] }
 0x34a   :  { %5181 = vmatpush3.msra.mxu1 %v6121_v27  ;;  %v4441_v53 = vld [vmem:[%s7641_s2 + $0x170] sm:$0xff]  ;;  %v4440_v54 = vld [vmem:[%s7641_s2 + $0x168] sm:$0xff]  ;;  %v4439_v55 = vld [vmem:[%s7641_s2 + $0x160] sm:$0xff] }
 0x34b   :  { %5182 = vmatprep.subr.mxu1 %v5962_v4  ;;  %v4438_v56 = vld [vmem:[%s7641_s2 + $0x158] sm:$0xff]  ;;  %v4437_v57 = vld [vmem:[%s7641_s2 + $0x150] sm:$0xff]  ;;  %v4436_v58 = vld [vmem:[%s7641_s2 + $0x148] sm:$0xff] }
 0x34c   :  { %5183 = vmatpush3.msra.mxu1 %v6119_v26  ;;  %v4435_v59 = vld [vmem:[%s7641_s2 + $0x140] sm:$0xff]  ;;  %v4434_v60 = vld [vmem:[%s7641_s2 + $0x138] sm:$0xff]  ;;  %v4433_v61 = vld [vmem:[%s7641_s2 + $0x130] sm:$0xff] }
 0x34d   :  { %5185 = vmatmul.mubr.msk.f32.vlgmr.msra.gmra.mxu1 %vm148_vm1, %v4425_v51  ;;  %5187 = vmatprep.subr.mxu1 %v5962_v4  ;;  %v4432_v62 = vld [vmem:[%s7641_s2 + $0x128] sm:$0xff]  ;;  %v4431_v63 = vld [vmem:[%s7641_s2 + $0x120] sm:$0xff]  ;;  %v4430_v0 = vld [vmem:[%s7641_s2 + $0x118] sm:$0xff] }
 0x34e   :  { %5188 = vmatpush3.msra.mxu1 %v4442_v52  ;;  %5219 = vmatprep.mubr.msk.f32.mxu1 %vm5963_vm0, %v5962_v4  ;;  %v4429_v1 = vld [vmem:[%s7641_s2 + $0x110] sm:$0xff]  ;;  %v4428_v2 = vld [vmem:[%s7641_s2 + $0x108] sm:$0xff]  ;;  %v4427_v3 = vld [vmem:[%s7641_s2 + $0x100] sm:$0xff] }
 0x34f   :  { %5189 = vmatprep.subr.mxu1 %v5962_v4 }
 0x350   :  { %5190 = vmatpush3.msra.mxu1 %v4441_v53 }
 0x351   :  { %5191 = vmatprep.subr.mxu1 %v5962_v4 }
 0x352   :  { %5192 = vmatpush3.msra.mxu1 %v4440_v54 }
 0x353   :  { %5193 = vmatprep.subr.mxu1 %v5962_v4 }
 0x354   :  { %5194 = vmatpush3.msra.mxu1 %v4439_v55 }
 0x355   :  { %5195 = vmatprep.subr.mxu1 %v5962_v4 }
 0x356   :  { %5196 = vmatpush3.msra.mxu1 %v4438_v56 }
 0x357   :  { %5197 = vmatprep.subr.mxu1 %v5962_v4 }
 0x358   :  { %5198 = vmatpush3.msra.mxu1 %v4437_v57 }
 0x359   :  { %5199 = vmatprep.subr.mxu1 %v5962_v4 }
 0x35a   :  { %5200 = vmatpush3.msra.mxu1 %v4436_v58 }
 0x35b   :  { %5201 = vmatprep.subr.mxu1 %v5962_v4 }
 0x35c   :  { %5202 = vmatpush3.msra.mxu1 %v4435_v59 }
 0x35d   :  { %5203 = vmatprep.subr.mxu1 %v5962_v4 }
 0x35e   :  { %5204 = vmatpush3.msra.mxu1 %v4434_v60 }
 0x35f   :  { %5205 = vmatprep.subr.mxu1 %v5962_v4 }
 0x360   :  { %5206 = vmatpush3.msra.mxu1 %v4433_v61 }
 0x361   :  { %5207 = vmatprep.subr.mxu1 %v5962_v4 }
 0x362   :  { %5208 = vmatpush3.msra.mxu1 %v4432_v62 }
 0x363   :  { %5209 = vmatprep.subr.mxu1 %v5962_v4 }
 0x364   :  { %5210 = vmatpush3.msra.mxu1 %v4431_v63 }
 0x365   :  { %5211 = vmatprep.subr.mxu1 %v5962_v4 }
 0x366   :  { %5212 = vmatpush3.msra.mxu1 %v4430_v0 }
 0x367   :  { %5213 = vmatprep.subr.mxu1 %v5962_v4 }
 0x368   :  { %5214 = vmatpush3.msra.mxu1 %v4429_v1 }
 0x369   :  { %5215 = vmatprep.subr.mxu1 %v5962_v4 }
 0x36a   :  { %5216 = vmatpush3.msra.mxu1 %v4428_v2 }
 0x36b   :  { %5217 = vmatprep.subr.mxu1 %v5962_v4 }
 0x36c   :  { %5218 = vmatpush3.msra.mxu1 %v4427_v3 }
 0x40d   :  { %v651_v5 = vpop.f32.mrf.mxu1 }
 0x40e   :  { %5220 = vmatmul.mubr.f32.vlgmr.msra.gmra.mxu1 %v651_v5 }
 0x40f   :  { %v5186_v6 = vpop.f32.mrf.mxu1 }
 0x4ce   :  { %v738_v7 = vpop.f32.mrf.mxu1 }
 0x4cf   :  { %743 = vst.msk [vmem:[#allocation4 + $0x8] sm:$0xf] %vm308_vm2, %v738_v7 }
 0x4d0   :  { %v5221_v8 = vpop.f32.mrf.mxu1 }
 0x4d1   :  { %5931 = dma.done.wait [#allocation3 + $0x1], 256 }
 0x4d2   :  { %5932 = vsyncadd [#allocation3 + $0x1], 4294967040  ;;  %s4443_s24 = sld [smem:[#allocation6 + $0x4]] }
 0x4d8   :  { %s4444_s25 = sshll.u32 %s4443_s24, 4 }
 0x4d9   :  { %s749_s27 = scalar_lea.vmem %s7642_s3, %s4444_s25 }
 0x4da   :  { %v6287_v9 = vld [vmem:[%s749_s27] sm:$0xff]  ;;  %v6289_v10 = vld [vmem:[%s749_s27 + $0x8] sm:$0xff] }
 0x4db   :  { %794 = vsyncadd [#allocation3], 256  ;;  %5222 = vmatprep.subr.mxu0 %v5962_v4  ;;  %5226 = vmatprep.mubr.msk.f32.mxu0 %vm5963_vm0, %v5962_v4  ;;  %v4445_v11 = vld [vmem:[%s7640_s1 + $0xc] sm:$0xf]  ;;  %v4462_v12 = vld [vmem:[%s7641_s2 + $0x1f8] sm:$0xff] }
 0x4dc   :  { %5223 = vmatpush3.msra.mxu0 %v6205_v50  ;;  %v4461_v13 = vld [vmem:[%s7641_s2 + $0x1f0] sm:$0xff]  ;;  %v4460_v14 = vld [vmem:[%s7641_s2 + $0x1e8] sm:$0xff]  ;;  %v4459_v15 = vld [vmem:[%s7641_s2 + $0x1e0] sm:$0xff] }
 0x4dd   :  { %5224 = vmatprep.subr.mxu0 %v5962_v4  ;;  %v4458_v16 = vld [vmem:[%s7641_s2 + $0x1d8] sm:$0xff]  ;;  %v4457_v17 = vld [vmem:[%s7641_s2 + $0x1d0] sm:$0xff]  ;;  %v4456_v18 = vld [vmem:[%s7641_s2 + $0x1c8] sm:$0xff] }
 0x4de   :  { %5225 = vmatpush3.msra.mxu0 %v6203_v49  ;;  %v4455_v19 = vld [vmem:[%s7641_s2 + $0x1c0] sm:$0xff]  ;;  %v4454_v20 = vld [vmem:[%s7641_s2 + $0x1b8] sm:$0xff]  ;;  %v4453_v21 = vld [vmem:[%s7641_s2 + $0x1b0] sm:$0xff] }
 0x4df   :  { %5227 = vmatmul.mubr.msk.f32.vlgmr.msra.gmra.mxu0 %vm148_vm1, %v4445_v11  ;;  %5229 = vmatprep.subr.mxu0 %v5962_v4  ;;  %v4452_v22 = vld [vmem:[%s7641_s2 + $0x1a8] sm:$0xff]  ;;  %v4451_v23 = vld [vmem:[%s7641_s2 + $0x1a0] sm:$0xff]  ;;  %v4450_v24 = vld [vmem:[%s7641_s2 + $0x198] sm:$0xff] }
 0x4e0   :  { %5230 = vmatpush3.msra.mxu0 %v4462_v12  ;;  %5261 = vmatprep.mubr.msk.f32.mxu0 %vm5963_vm0, %v5962_v4  ;;  %v4449_v25 = vld [vmem:[%s7641_s2 + $0x190] sm:$0xff]  ;;  %v4448_v26 = vld [vmem:[%s7641_s2 + $0x188] sm:$0xff]  ;;  %v4447_v27 = vld [vmem:[%s7641_s2 + $0x180] sm:$0xff] }
 0x4e1   :  { %5231 = vmatprep.subr.mxu0 %v5962_v4 }
 0x4e2   :  { %5232 = vmatpush3.msra.mxu0 %v4461_v13 }
 0x4e3   :  { %5233 = vmatprep.subr.mxu0 %v5962_v4 }
 0x4e4   :  { %5234 = vmatpush3.msra.mxu0 %v4460_v14 }
 0x4e5   :  { %5235 = vmatprep.subr.mxu0 %v5962_v4 }
 0x4e6   :  { %5236 = vmatpush3.msra.mxu0 %v4459_v15 }
 0x4e7   :  { %5237 = vmatprep.subr.mxu0 %v5962_v4 }
 0x4e8   :  { %5238 = vmatpush3.msra.mxu0 %v4458_v16 }
 0x4e9   :  { %5239 = vmatprep.subr.mxu0 %v5962_v4 }
 0x4ea   :  { %5240 = vmatpush3.msra.mxu0 %v4457_v17 }
 0x4eb   :  { %5241 = vmatprep.subr.mxu0 %v5962_v4 }
 0x4ec   :  { %5242 = vmatpush3.msra.mxu0 %v4456_v18 }
 0x4ed   :  { %5243 = vmatprep.subr.mxu0 %v5962_v4 }
 0x4ee   :  { %5244 = vmatpush3.msra.mxu0 %v4455_v19 }
 0x4ef   :  { %5245 = vmatprep.subr.mxu0 %v5962_v4 }
 0x4f0   :  { %5246 = vmatpush3.msra.mxu0 %v4454_v20 }
 0x4f1   :  { %5247 = vmatprep.subr.mxu0 %v5962_v4 }
 0x4f2   :  { %5248 = vmatpush3.msra.mxu0 %v4453_v21 }
 0x4f3   :  { %5249 = vmatprep.subr.mxu0 %v5962_v4 }
 0x4f4   :  { %5250 = vmatpush3.msra.mxu0 %v4452_v22 }
 0x4f5   :  { %5251 = vmatprep.subr.mxu0 %v5962_v4 }
 0x4f6   :  { %5252 = vmatpush3.msra.mxu0 %v4451_v23 }
 0x4f7   :  { %5253 = vmatprep.subr.mxu0 %v5962_v4 }
 0x4f8   :  { %5254 = vmatpush3.msra.mxu0 %v4450_v24 }
 0x4f9   :  { %5255 = vmatprep.subr.mxu0 %v5962_v4 }
 0x4fa   :  { %5256 = vmatpush3.msra.mxu0 %v4449_v25 }
 0x4fb   :  { %5257 = vmatprep.subr.mxu0 %v5962_v4 }
 0x4fc   :  { %5258 = vmatpush3.msra.mxu0 %v4448_v26 }
 0x4fd   :  { %5259 = vmatprep.subr.mxu0 %v5962_v4 }
 0x4fe   :  { %5260 = vmatpush3.msra.mxu0 %v4447_v27 }
 0x59f   :  { %v868_v28 = vpop.f32.mrf.mxu0 }
 0x5a0   :  { %5262 = vmatmul.mubr.f32.vlgmr.msra.gmra.mxu0 %v868_v28 }
 0x5a1   :  { %v5228_v29 = vpop.f32.mrf.mxu0 }
 0x660   :  { %v955_v30 = vpop.f32.mrf.mxu0 }
 0x661   :  { %960 = vst.msk [vmem:[#allocation4 + $0xc] sm:$0xf] %vm308_vm2, %v955_v30 }
 0x662   :  { %v5263_v31 = vpop.f32.mrf.mxu0 }
 0x663   :  { %5933 = dma.done.wait [#allocation3], 256 }
 0x664   :  { %5934 = vsyncadd [#allocation3], 4294967040  ;;  %s4463_s23 = sld [smem:[#allocation6 + $0x5]] }
 0x66a   :  { %s4464_s24 = sshll.u32 %s4463_s23, 4 }
 0x66b   :  { %s966_s26 = scalar_lea.vmem %s7642_s3, %s4464_s24 }
 0x66c   :  { %v6371_v32 = vld [vmem:[%s966_s26] sm:$0xff]  ;;  %v6373_v33 = vld [vmem:[%s966_s26 + $0x8] sm:$0xff] }
 0x66d   :  { %1011 = vsyncadd [#allocation3 + $0x1], 256  ;;  %5264 = vmatprep.subr.mxu1 %v5962_v4  ;;  %5268 = vmatprep.mubr.msk.f32.mxu1 %vm5963_vm0, %v5962_v4  ;;  %v4465_v34 = vld [vmem:[%s7640_s1 + $0x10] sm:$0xf]  ;;  %v4482_v35 = vld [vmem:[%s7641_s2 + $0x278] sm:$0xff] }
 0x66e   :  { %5265 = vmatpush3.msra.mxu1 %v6289_v10  ;;  %v4481_v36 = vld [vmem:[%s7641_s2 + $0x270] sm:$0xff]  ;;  %v4480_v37 = vld [vmem:[%s7641_s2 + $0x268] sm:$0xff]  ;;  %v4479_v38 = vld [vmem:[%s7641_s2 + $0x260] sm:$0xff] }
 0x66f   :  { %5266 = vmatprep.subr.mxu1 %v5962_v4  ;;  %v4478_v39 = vld [vmem:[%s7641_s2 + $0x258] sm:$0xff]  ;;  %v4477_v40 = vld [vmem:[%s7641_s2 + $0x250] sm:$0xff]  ;;  %v4476_v41 = vld [vmem:[%s7641_s2 + $0x248] sm:$0xff] }
 0x670   :  { %5267 = vmatpush3.msra.mxu1 %v6287_v9  ;;  %v4475_v42 = vld [vmem:[%s7641_s2 + $0x240] sm:$0xff]  ;;  %v4474_v43 = vld [vmem:[%s7641_s2 + $0x238] sm:$0xff]  ;;  %v4473_v44 = vld [vmem:[%s7641_s2 + $0x230] sm:$0xff] }
 0x671   :  { %5269 = vmatmul.mubr.msk.f32.vlgmr.msra.gmra.mxu1 %vm148_vm1, %v4465_v34  ;;  %5271 = vmatprep.subr.mxu1 %v5962_v4  ;;  %v4472_v45 = vld [vmem:[%s7641_s2 + $0x228] sm:$0xff]  ;;  %v4471_v46 = vld [vmem:[%s7641_s2 + $0x220] sm:$0xff]  ;;  %v4470_v47 = vld [vmem:[%s7641_s2 + $0x218] sm:$0xff] }
 0x672   :  { %5272 = vmatpush3.msra.mxu1 %v4482_v35  ;;  %5303 = vmatprep.mubr.msk.f32.mxu1 %vm5963_vm0, %v5962_v4  ;;  %v4469_v48 = vld [vmem:[%s7641_s2 + $0x210] sm:$0xff]  ;;  %v4468_v49 = vld [vmem:[%s7641_s2 + $0x208] sm:$0xff]  ;;  %v4467_v50 = vld [vmem:[%s7641_s2 + $0x200] sm:$0xff] }
 0x673   :  { %5273 = vmatprep.subr.mxu1 %v5962_v4 }
 0x674   :  { %5274 = vmatpush3.msra.mxu1 %v4481_v36 }
 0x675   :  { %5275 = vmatprep.subr.mxu1 %v5962_v4 }
 0x676   :  { %5276 = vmatpush3.msra.mxu1 %v4480_v37 }
 0x677   :  { %5277 = vmatprep.subr.mxu1 %v5962_v4 }
 0x678   :  { %5278 = vmatpush3.msra.mxu1 %v4479_v38 }
 0x679   :  { %5279 = vmatprep.subr.mxu1 %v5962_v4 }
 0x67a   :  { %5280 = vmatpush3.msra.mxu1 %v4478_v39 }
 0x67b   :  { %5281 = vmatprep.subr.mxu1 %v5962_v4 }
 0x67c   :  { %5282 = vmatpush3.msra.mxu1 %v4477_v40 }
 0x67d   :  { %5283 = vmatprep.subr.mxu1 %v5962_v4 }
 0x67e   :  { %5284 = vmatpush3.msra.mxu1 %v4476_v41 }
 0x67f   :  { %5285 = vmatprep.subr.mxu1 %v5962_v4 }
 0x680   :  { %5286 = vmatpush3.msra.mxu1 %v4475_v42 }
 0x681   :  { %5287 = vmatprep.subr.mxu1 %v5962_v4 }
 0x682   :  { %5288 = vmatpush3.msra.mxu1 %v4474_v43 }
 0x683   :  { %5289 = vmatprep.subr.mxu1 %v5962_v4 }
 0x684   :  { %5290 = vmatpush3.msra.mxu1 %v4473_v44 }
 0x685   :  { %5291 = vmatprep.subr.mxu1 %v5962_v4 }
 0x686   :  { %5292 = vmatpush3.msra.mxu1 %v4472_v45 }
 0x687   :  { %5293 = vmatprep.subr.mxu1 %v5962_v4 }
 0x688   :  { %5294 = vmatpush3.msra.mxu1 %v4471_v46 }
 0x689   :  { %5295 = vmatprep.subr.mxu1 %v5962_v4 }
 0x68a   :  { %5296 = vmatpush3.msra.mxu1 %v4470_v47 }
 0x68b   :  { %5297 = vmatprep.subr.mxu1 %v5962_v4 }
 0x68c   :  { %5298 = vmatpush3.msra.mxu1 %v4469_v48 }
 0x68d   :  { %5299 = vmatprep.subr.mxu1 %v5962_v4 }
 0x68e   :  { %5300 = vmatpush3.msra.mxu1 %v4468_v49 }
 0x68f   :  { %5301 = vmatprep.subr.mxu1 %v5962_v4 }
 0x690   :  { %5302 = vmatpush3.msra.mxu1 %v4467_v50 }
 0x731   :  { %v1085_v51 = vpop.f32.mrf.mxu1 }
 0x732   :  { %5304 = vmatmul.mubr.f32.vlgmr.msra.gmra.mxu1 %v1085_v51 }
 0x733   :  { %v5270_v52 = vpop.f32.mrf.mxu1 }
 0x7f2   :  { %v1172_v53 = vpop.f32.mrf.mxu1 }
 0x7f3   :  { %1177 = vst.msk [vmem:[#allocation4 + $0x10] sm:$0xf] %vm308_vm2, %v1172_v53 }
 0x7f4   :  { %v5305_v54 = vpop.f32.mrf.mxu1 }
 0x7f5   :  { %5935 = dma.done.wait [#allocation3 + $0x1], 256 }
 0x7f6   :  { %5936 = vsyncadd [#allocation3 + $0x1], 4294967040  ;;  %s4483_s22 = sld [smem:[#allocation6 + $0x6]] }
 0x7fc   :  { %s4484_s23 = sshll.u32 %s4483_s22, 4 }
 0x7fd   :  { %s1183_s0 = scalar_lea.vmem %s7642_s3, %s4484_s23 }
 0x7fe   :  { %v6455_v55 = vld [vmem:[%s1183_s0] sm:$0xff]  ;;  %v6457_v56 = vld [vmem:[%s1183_s0 + $0x8] sm:$0xff] }
 0x7ff   :  { %1228 = vsyncadd [#allocation3], 256  ;;  %5306 = vmatprep.subr.mxu0 %v5962_v4  ;;  %5310 = vmatprep.mubr.msk.f32.mxu0 %vm5963_vm0, %v5962_v4  ;;  %v4485_v57 = vld [vmem:[%s7640_s1 + $0x14] sm:$0xf]  ;;  %v4502_v58 = vld [vmem:[%s7641_s2 + $0x2f8] sm:$0xff] }
 0x800   :  { %5307 = vmatpush3.msra.mxu0 %v6373_v33  ;;  %v4501_v59 = vld [vmem:[%s7641_s2 + $0x2f0] sm:$0xff]  ;;  %v4500_v60 = vld [vmem:[%s7641_s2 + $0x2e8] sm:$0xff]  ;;  %v4499_v61 = vld [vmem:[%s7641_s2 + $0x2e0] sm:$0xff] }
 0x801   :  { %5308 = vmatprep.subr.mxu0 %v5962_v4  ;;  %v4498_v62 = vld [vmem:[%s7641_s2 + $0x2d8] sm:$0xff]  ;;  %v4497_v63 = vld [vmem:[%s7641_s2 + $0x2d0] sm:$0xff]  ;;  %v4496_v0 = vld [vmem:[%s7641_s2 + $0x2c8] sm:$0xff] }
 0x802   :  { %5309 = vmatpush3.msra.mxu0 %v6371_v32  ;;  %v4495_v1 = vld [vmem:[%s7641_s2 + $0x2c0] sm:$0xff]  ;;  %v4494_v2 = vld [vmem:[%s7641_s2 + $0x2b8] sm:$0xff]  ;;  %v4493_v3 = vld [vmem:[%s7641_s2 + $0x2b0] sm:$0xff] }
 0x803   :  { %5311 = vmatmul.mubr.msk.f32.vlgmr.msra.gmra.mxu0 %vm148_vm1, %v4485_v57  ;;  %5313 = vmatprep.subr.mxu0 %v5962_v4  ;;  %v4492_v5 = vld [vmem:[%s7641_s2 + $0x2a8] sm:$0xff]  ;;  %v4491_v6 = vld [vmem:[%s7641_s2 + $0x2a0] sm:$0xff]  ;;  %v4490_v7 = vld [vmem:[%s7641_s2 + $0x298] sm:$0xff] }
 0x804   :  { %5314 = vmatpush3.msra.mxu0 %v4502_v58  ;;  %5345 = vmatprep.mubr.msk.f32.mxu0 %vm5963_vm0, %v5962_v4  ;;  %v4489_v8 = vld [vmem:[%s7641_s2 + $0x290] sm:$0xff]  ;;  %v4488_v9 = vld [vmem:[%s7641_s2 + $0x288] sm:$0xff]  ;;  %v4487_v10 = vld [vmem:[%s7641_s2 + $0x280] sm:$0xff] }
 0x805   :  { %5315 = vmatprep.subr.mxu0 %v5962_v4 }
 0x806   :  { %5316 = vmatpush3.msra.mxu0 %v4501_v59 }
 0x807   :  { %5317 = vmatprep.subr.mxu0 %v5962_v4 }
 0x808   :  { %5318 = vmatpush3.msra.mxu0 %v4500_v60 }
 0x809   :  { %5319 = vmatprep.subr.mxu0 %v5962_v4 }
 0x80a   :  { %5320 = vmatpush3.msra.mxu0 %v4499_v61 }
 0x80b   :  { %5321 = vmatprep.subr.mxu0 %v5962_v4 }
 0x80c   :  { %5322 = vmatpush3.msra.mxu0 %v4498_v62 }
 0x80d   :  { %5323 = vmatprep.subr.mxu0 %v5962_v4 }
 0x80e   :  { %5324 = vmatpush3.msra.mxu0 %v4497_v63 }
 0x80f   :  { %5325 = vmatprep.subr.mxu0 %v5962_v4 }
 0x810   :  { %5326 = vmatpush3.msra.mxu0 %v4496_v0 }
 0x811   :  { %5327 = vmatprep.subr.mxu0 %v5962_v4 }
 0x812   :  { %5328 = vmatpush3.msra.mxu0 %v4495_v1 }
 0x813   :  { %5329 = vmatprep.subr.mxu0 %v5962_v4 }
 0x814   :  { %5330 = vmatpush3.msra.mxu0 %v4494_v2 }
 0x815   :  { %5331 = vmatprep.subr.mxu0 %v5962_v4 }
 0x816   :  { %5332 = vmatpush3.msra.mxu0 %v4493_v3 }
 0x817   :  { %5333 = vmatprep.subr.mxu0 %v5962_v4 }
 0x818   :  { %5334 = vmatpush3.msra.mxu0 %v4492_v5 }
 0x819   :  { %5335 = vmatprep.subr.mxu0 %v5962_v4 }
 0x81a   :  { %5336 = vmatpush3.msra.mxu0 %v4491_v6 }
 0x81b   :  { %5337 = vmatprep.subr.mxu0 %v5962_v4 }
 0x81c   :  { %5338 = vmatpush3.msra.mxu0 %v4490_v7 }
 0x81d   :  { %5339 = vmatprep.subr.mxu0 %v5962_v4 }
 0x81e   :  { %5340 = vmatpush3.msra.mxu0 %v4489_v8 }
 0x81f   :  { %5341 = vmatprep.subr.mxu0 %v5962_v4 }
 0x820   :  { %5342 = vmatpush3.msra.mxu0 %v4488_v9 }
 0x821   :  { %5343 = vmatprep.subr.mxu0 %v5962_v4 }
 0x822   :  { %5344 = vmatpush3.msra.mxu0 %v4487_v10 }
 0x8c3   :  { %v1302_v11 = vpop.f32.mrf.mxu0 }
 0x8c4   :  { %5346 = vmatmul.mubr.f32.vlgmr.msra.gmra.mxu0 %v1302_v11 }
 0x8c5   :  { %v5312_v12 = vpop.f32.mrf.mxu0 }
 0x984   :  { %v1389_v13 = vpop.f32.mrf.mxu0 }
 0x985   :  { %1394 = vst.msk [vmem:[#allocation4 + $0x14] sm:$0xf] %vm308_vm2, %v1389_v13 }
 0x986   :  { %v5347_v14 = vpop.f32.mrf.mxu0 }
 0x987   :  { %5937 = dma.done.wait [#allocation3], 256 }
 0x988   :  { %5938 = vsyncadd [#allocation3], 4294967040  ;;  %s4503_s21 = sld [smem:[#allocation6 + $0x7]] }
 0x98e   :  { %s4504_s22 = sshll.u32 %s4503_s21, 4 }
 0x98f   :  { %s1400_s25 = scalar_lea.vmem %s7642_s3, %s4504_s22 }
 0x990   :  { %v6539_v15 = vld [vmem:[%s1400_s25] sm:$0xff]  ;;  %v6541_v16 = vld [vmem:[%s1400_s25 + $0x8] sm:$0xff] }
 0x991   :  { %1445 = vsyncadd [#allocation3 + $0x1], 256  ;;  %5348 = vmatprep.subr.mxu1 %v5962_v4  ;;  %5352 = vmatprep.mubr.msk.f32.mxu1 %vm5963_vm0, %v5962_v4  ;;  %v4505_v17 = vld [vmem:[%s7640_s1 + $0x18] sm:$0xf]  ;;  %v4521_v19 = vld [vmem:[%s7641_s2 + $0x370] sm:$0xff] }
 0x992   :  { %5349 = vmatpush3.msra.mxu1 %v6457_v56  ;;  %v4522_v18 = vld [vmem:[%s7641_s2 + $0x378] sm:$0xff]  ;;  %v4520_v20 = vld [vmem:[%s7641_s2 + $0x368] sm:$0xff]  ;;  %v4519_v21 = vld [vmem:[%s7641_s2 + $0x360] sm:$0xff] }
 0x993   :  { %5350 = vmatprep.subr.mxu1 %v5962_v4  ;;  %v4518_v22 = vld [vmem:[%s7641_s2 + $0x358] sm:$0xff]  ;;  %v4517_v23 = vld [vmem:[%s7641_s2 + $0x350] sm:$0xff]  ;;  %v4516_v24 = vld [vmem:[%s7641_s2 + $0x348] sm:$0xff] }
 0x994   :  { %5351 = vmatpush3.msra.mxu1 %v6455_v55  ;;  %v4515_v25 = vld [vmem:[%s7641_s2 + $0x340] sm:$0xff]  ;;  %v4514_v26 = vld [vmem:[%s7641_s2 + $0x338] sm:$0xff]  ;;  %v4513_v27 = vld [vmem:[%s7641_s2 + $0x330] sm:$0xff] }
 0x995   :  { %5353 = vmatmul.mubr.msk.f32.vlgmr.msra.gmra.mxu1 %vm148_vm1, %v4505_v17  ;;  %5355 = vmatprep.subr.mxu1 %v5962_v4  ;;  %v4512_v28 = vld [vmem:[%s7641_s2 + $0x328] sm:$0xff]  ;;  %v4511_v29 = vld [vmem:[%s7641_s2 + $0x320] sm:$0xff]  ;;  %v4510_v30 = vld [vmem:[%s7641_s2 + $0x318] sm:$0xff] }
 0x996   :  { %5356 = vmatpush3.msra.mxu1 %v4522_v18  ;;  %5387 = vmatprep.mubr.msk.f32.mxu1 %vm5963_vm0, %v5962_v4  ;;  %v4509_v31 = vld [vmem:[%s7641_s2 + $0x310] sm:$0xff]  ;;  %v4508_v32 = vld [vmem:[%s7641_s2 + $0x308] sm:$0xff]  ;;  %v4507_v33 = vld [vmem:[%s7641_s2 + $0x300] sm:$0xff] }
 0x997   :  { %5357 = vmatprep.subr.mxu1 %v5962_v4 }
 0x998   :  { %5358 = vmatpush3.msra.mxu1 %v4521_v19 }
 0x999   :  { %5359 = vmatprep.subr.mxu1 %v5962_v4 }
 0x99a   :  { %5360 = vmatpush3.msra.mxu1 %v4520_v20 }
 0x99b   :  { %5361 = vmatprep.subr.mxu1 %v5962_v4 }
 0x99c   :  { %5362 = vmatpush3.msra.mxu1 %v4519_v21 }
 0x99d   :  { %5363 = vmatprep.subr.mxu1 %v5962_v4 }
 0x99e   :  { %5364 = vmatpush3.msra.mxu1 %v4518_v22 }
 0x99f   :  { %5365 = vmatprep.subr.mxu1 %v5962_v4 }
 0x9a0   :  { %5366 = vmatpush3.msra.mxu1 %v4517_v23 }
 0x9a1   :  { %5367 = vmatprep.subr.mxu1 %v5962_v4 }
 0x9a2   :  { %5368 = vmatpush3.msra.mxu1 %v4516_v24 }
 0x9a3   :  { %5369 = vmatprep.subr.mxu1 %v5962_v4 }
 0x9a4   :  { %5370 = vmatpush3.msra.mxu1 %v4515_v25 }
 0x9a5   :  { %5371 = vmatprep.subr.mxu1 %v5962_v4 }
 0x9a6   :  { %5372 = vmatpush3.msra.mxu1 %v4514_v26 }
 0x9a7   :  { %5373 = vmatprep.subr.mxu1 %v5962_v4 }
 0x9a8   :  { %5374 = vmatpush3.msra.mxu1 %v4513_v27 }
 0x9a9   :  { %5375 = vmatprep.subr.mxu1 %v5962_v4 }
 0x9aa   :  { %5376 = vmatpush3.msra.mxu1 %v4512_v28 }
 0x9ab   :  { %5377 = vmatprep.subr.mxu1 %v5962_v4 }
 0x9ac   :  { %5378 = vmatpush3.msra.mxu1 %v4511_v29 }
 0x9ad   :  { %5379 = vmatprep.subr.mxu1 %v5962_v4 }
 0x9ae   :  { %5380 = vmatpush3.msra.mxu1 %v4510_v30 }
 0x9af   :  { %5381 = vmatprep.subr.mxu1 %v5962_v4 }
 0x9b0   :  { %5382 = vmatpush3.msra.mxu1 %v4509_v31 }
 0x9b1   :  { %5383 = vmatprep.subr.mxu1 %v5962_v4 }
 0x9b2   :  { %5384 = vmatpush3.msra.mxu1 %v4508_v32 }
 0x9b3   :  { %5385 = vmatprep.subr.mxu1 %v5962_v4 }
 0x9b4   :  { %5386 = vmatpush3.msra.mxu1 %v4507_v33 }
 0xa55   :  { %v1519_v34 = vpop.f32.mrf.mxu1 }
 0xa56   :  { %5388 = vmatmul.mubr.f32.vlgmr.msra.gmra.mxu1 %v1519_v34 }
 0xa57   :  { %v5354_v35 = vpop.f32.mrf.mxu1 }
 0xb16   :  { %v1606_v36 = vpop.f32.mrf.mxu1 }
 0xb17   :  { %1611 = vst.msk [vmem:[#allocation4 + $0x18] sm:$0xf] %vm308_vm2, %v1606_v36 }
 0xb18   :  { %v5389_v37 = vpop.f32.mrf.mxu1 }
 0xb19   :  { %5939 = dma.done.wait [#allocation3 + $0x1], 256 }
 0xb1a   :  { %5940 = vsyncadd [#allocation3 + $0x1], 4294967040  ;;  %s4523_s20 = sld [smem:[#allocation6 + $0x8]] }
 0xb20   :  { %s4524_s21 = sshll.u32 %s4523_s20, 4 }
 0xb21   :  { %s1617_s24 = scalar_lea.vmem %s7642_s3, %s4524_s21 }
 0xb22   :  { %v6623_v38 = vld [vmem:[%s1617_s24] sm:$0xff]  ;;  %v6625_v39 = vld [vmem:[%s1617_s24 + $0x8] sm:$0xff] }
 0xb23   :  { %1662 = vsyncadd [#allocation3], 256  ;;  %5390 = vmatprep.subr.mxu0 %v5962_v4  ;;  %5394 = vmatprep.mubr.msk.f32.mxu0 %vm5963_vm0, %v5962_v4  ;;  %v4525_v40 = vld [vmem:[%s7640_s1 + $0x1c] sm:$0xf]  ;;  %v4541_v42 = vld [vmem:[%s7641_s2 + $0x3f0] sm:$0xff] }
 0xb24   :  { %5391 = vmatpush3.msra.mxu0 %v6541_v16  ;;  %v4542_v41 = vld [vmem:[%s7641_s2 + $0x3f8] sm:$0xff]  ;;  %v4540_v43 = vld [vmem:[%s7641_s2 + $0x3e8] sm:$0xff]  ;;  %v4539_v44 = vld [vmem:[%s7641_s2 + $0x3e0] sm:$0xff] }
 0xb25   :  { %5392 = vmatprep.subr.mxu0 %v5962_v4  ;;  %v4538_v45 = vld [vmem:[%s7641_s2 + $0x3d8] sm:$0xff]  ;;  %v4537_v46 = vld [vmem:[%s7641_s2 + $0x3d0] sm:$0xff]  ;;  %v4536_v47 = vld [vmem:[%s7641_s2 + $0x3c8] sm:$0xff] }
 0xb26   :  { %5393 = vmatpush3.msra.mxu0 %v6539_v15  ;;  %v4535_v48 = vld [vmem:[%s7641_s2 + $0x3c0] sm:$0xff]  ;;  %v4534_v49 = vld [vmem:[%s7641_s2 + $0x3b8] sm:$0xff]  ;;  %v4533_v50 = vld [vmem:[%s7641_s2 + $0x3b0] sm:$0xff] }
 0xb27   :  { %5395 = vmatmul.mubr.msk.f32.vlgmr.msra.gmra.mxu0 %vm148_vm1, %v4525_v40  ;;  %5397 = vmatprep.subr.mxu0 %v5962_v4  ;;  %v4532_v51 = vld [vmem:[%s7641_s2 + $0x3a8] sm:$0xff]  ;;  %v4531_v52 = vld [vmem:[%s7641_s2 + $0x3a0] sm:$0xff]  ;;  %v4530_v53 = vld [vmem:[%s7641_s2 + $0x398] sm:$0xff] }
 0xb28   :  { %5398 = vmatpush3.msra.mxu0 %v4542_v41  ;;  %5429 = vmatprep.mubr.msk.f32.mxu0 %vm5963_vm0, %v5962_v4  ;;  %v4529_v54 = vld [vmem:[%s7641_s2 + $0x390] sm:$0xff]  ;;  %v4528_v55 = vld [vmem:[%s7641_s2 + $0x388] sm:$0xff]  ;;  %v4527_v56 = vld [vmem:[%s7641_s2 + $0x380] sm:$0xff] }
 0xb29   :  { %5399 = vmatprep.subr.mxu0 %v5962_v4 }
 0xb2a   :  { %5400 = vmatpush3.msra.mxu0 %v4541_v42 }
 0xb2b   :  { %5401 = vmatprep.subr.mxu0 %v5962_v4 }
 0xb2c   :  { %5402 = vmatpush3.msra.mxu0 %v4540_v43 }
 0xb2d   :  { %5403 = vmatprep.subr.mxu0 %v5962_v4 }
 0xb2e   :  { %5404 = vmatpush3.msra.mxu0 %v4539_v44 }
 0xb2f   :  { %5405 = vmatprep.subr.mxu0 %v5962_v4 }
 0xb30   :  { %5406 = vmatpush3.msra.mxu0 %v4538_v45 }
 0xb31   :  { %5407 = vmatprep.subr.mxu0 %v5962_v4 }
 0xb32   :  { %5408 = vmatpush3.msra.mxu0 %v4537_v46 }
 0xb33   :  { %5409 = vmatprep.subr.mxu0 %v5962_v4 }
 0xb34   :  { %5410 = vmatpush3.msra.mxu0 %v4536_v47 }
 0xb35   :  { %5411 = vmatprep.subr.mxu0 %v5962_v4 }
 0xb36   :  { %5412 = vmatpush3.msra.mxu0 %v4535_v48 }
 0xb37   :  { %5413 = vmatprep.subr.mxu0 %v5962_v4 }
 0xb38   :  { %5414 = vmatpush3.msra.mxu0 %v4534_v49 }
 0xb39   :  { %5415 = vmatprep.subr.mxu0 %v5962_v4 }
 0xb3a   :  { %5416 = vmatpush3.msra.mxu0 %v4533_v50 }
 0xb3b   :  { %5417 = vmatprep.subr.mxu0 %v5962_v4 }
 0xb3c   :  { %5418 = vmatpush3.msra.mxu0 %v4532_v51 }
 0xb3d   :  { %5419 = vmatprep.subr.mxu0 %v5962_v4 }
 0xb3e   :  { %5420 = vmatpush3.msra.mxu0 %v4531_v52 }
 0xb3f   :  { %5421 = vmatprep.subr.mxu0 %v5962_v4 }
 0xb40   :  { %5422 = vmatpush3.msra.mxu0 %v4530_v53 }
 0xb41   :  { %5423 = vmatprep.subr.mxu0 %v5962_v4 }
 0xb42   :  { %5424 = vmatpush3.msra.mxu0 %v4529_v54 }
 0xb43   :  { %5425 = vmatprep.subr.mxu0 %v5962_v4 }
 0xb44   :  { %5426 = vmatpush3.msra.mxu0 %v4528_v55 }
 0xb45   :  { %5427 = vmatprep.subr.mxu0 %v5962_v4 }
 0xb46   :  { %5428 = vmatpush3.msra.mxu0 %v4527_v56 }
 0xbe7   :  { %v1736_v57 = vpop.f32.mrf.mxu0 }
 0xbe8   :  { %5430 = vmatmul.mubr.f32.vlgmr.msra.gmra.mxu0 %v1736_v57 }
 0xbe9   :  { %v5396_v58 = vpop.f32.mrf.mxu0 }
 0xca8   :  { %v1823_v59 = vpop.f32.mrf.mxu0 }
 0xca9   :  { %1828 = vst.msk [vmem:[#allocation4 + $0x1c] sm:$0xf] %vm308_vm2, %v1823_v59 }
 0xcaa   :  { %v5431_v60 = vpop.f32.mrf.mxu0 }
 0xcab   :  { %5941 = dma.done.wait [#allocation3], 256 }
 0xcac   :  { %5942 = vsyncadd [#allocation3], 4294967040  ;;  %s4543_s19 = sld [smem:[#allocation6 + $0x9]] }
 0xcb2   :  { %s4544_s20 = sshll.u32 %s4543_s19, 4 }
 0xcb3   :  { %s1834_s23 = scalar_lea.vmem %s7642_s3, %s4544_s20 }
 0xcb4   :  { %v6707_v61 = vld [vmem:[%s1834_s23] sm:$0xff]  ;;  %v6709_v62 = vld [vmem:[%s1834_s23 + $0x8] sm:$0xff] }
 0xcb5   :  { %1879 = vsyncadd [#allocation3 + $0x1], 256  ;;  %5432 = vmatprep.subr.mxu1 %v5962_v4  ;;  %5436 = vmatprep.mubr.msk.f32.mxu1 %vm5963_vm0, %v5962_v4  ;;  %v4545_v63 = vld [vmem:[%s7640_s1 + $0x20] sm:$0xf]  ;;  %v4562_v0 = vld [vmem:[%s7641_s2 + $0x478] sm:$0xff] }
 0xcb6   :  { %5433 = vmatpush3.msra.mxu1 %v6625_v39  ;;  %v4561_v1 = vld [vmem:[%s7641_s2 + $0x470] sm:$0xff]  ;;  %v4560_v2 = vld [vmem:[%s7641_s2 + $0x468] sm:$0xff]  ;;  %v4559_v3 = vld [vmem:[%s7641_s2 + $0x460] sm:$0xff] }
 0xcb7   :  { %5434 = vmatprep.subr.mxu1 %v5962_v4  ;;  %v4558_v5 = vld [vmem:[%s7641_s2 + $0x458] sm:$0xff]  ;;  %v4557_v6 = vld [vmem:[%s7641_s2 + $0x450] sm:$0xff]  ;;  %v4556_v7 = vld [vmem:[%s7641_s2 + $0x448] sm:$0xff] }
 0xcb8   :  { %5435 = vmatpush3.msra.mxu1 %v6623_v38  ;;  %v4555_v8 = vld [vmem:[%s7641_s2 + $0x440] sm:$0xff]  ;;  %v4554_v9 = vld [vmem:[%s7641_s2 + $0x438] sm:$0xff]  ;;  %v4553_v10 = vld [vmem:[%s7641_s2 + $0x430] sm:$0xff] }
 0xcb9   :  { %5437 = vmatmul.mubr.msk.f32.vlgmr.msra.gmra.mxu1 %vm148_vm1, %v4545_v63  ;;  %5439 = vmatprep.subr.mxu1 %v5962_v4  ;;  %v4552_v11 = vld [vmem:[%s7641_s2 + $0x428] sm:$0xff]  ;;  %v4551_v12 = vld [vmem:[%s7641_s2 + $0x420] sm:$0xff]  ;;  %v4550_v13 = vld [vmem:[%s7641_s2 + $0x418] sm:$0xff] }
 0xcba   :  { %5440 = vmatpush3.msra.mxu1 %v4562_v0  ;;  %5471 = vmatprep.mubr.msk.f32.mxu1 %vm5963_vm0, %v5962_v4  ;;  %v4549_v14 = vld [vmem:[%s7641_s2 + $0x410] sm:$0xff]  ;;  %v4548_v15 = vld [vmem:[%s7641_s2 + $0x408] sm:$0xff]  ;;  %v4547_v16 = vld [vmem:[%s7641_s2 + $0x400] sm:$0xff] }
 0xcbb   :  { %5441 = vmatprep.subr.mxu1 %v5962_v4 }
 0xcbc   :  { %5442 = vmatpush3.msra.mxu1 %v4561_v1 }
 0xcbd   :  { %5443 = vmatprep.subr.mxu1 %v5962_v4 }
 0xcbe   :  { %5444 = vmatpush3.msra.mxu1 %v4560_v2 }
 0xcbf   :  { %5445 = vmatprep.subr.mxu1 %v5962_v4 }
 0xcc0   :  { %5446 = vmatpush3.msra.mxu1 %v4559_v3 }
 0xcc1   :  { %5447 = vmatprep.subr.mxu1 %v5962_v4 }
 0xcc2   :  { %5448 = vmatpush3.msra.mxu1 %v4558_v5 }
 0xcc3   :  { %5449 = vmatprep.subr.mxu1 %v5962_v4 }
 0xcc4   :  { %5450 = vmatpush3.msra.mxu1 %v4557_v6 }
 0xcc5   :  { %5451 = vmatprep.subr.mxu1 %v5962_v4 }
 0xcc6   :  { %5452 = vmatpush3.msra.mxu1 %v4556_v7 }
 0xcc7   :  { %5453 = vmatprep.subr.mxu1 %v5962_v4 }
 0xcc8   :  { %5454 = vmatpush3.msra.mxu1 %v4555_v8 }
 0xcc9   :  { %5455 = vmatprep.subr.mxu1 %v5962_v4 }
 0xcca   :  { %5456 = vmatpush3.msra.mxu1 %v4554_v9 }
 0xccb   :  { %5457 = vmatprep.subr.mxu1 %v5962_v4 }
 0xccc   :  { %5458 = vmatpush3.msra.mxu1 %v4553_v10 }
 0xccd   :  { %5459 = vmatprep.subr.mxu1 %v5962_v4 }
 0xcce   :  { %5460 = vmatpush3.msra.mxu1 %v4552_v11 }
 0xccf   :  { %5461 = vmatprep.subr.mxu1 %v5962_v4 }
 0xcd0   :  { %5462 = vmatpush3.msra.mxu1 %v4551_v12 }
 0xcd1   :  { %5463 = vmatprep.subr.mxu1 %v5962_v4 }
 0xcd2   :  { %5464 = vmatpush3.msra.mxu1 %v4550_v13 }
 0xcd3   :  { %5465 = vmatprep.subr.mxu1 %v5962_v4 }
 0xcd4   :  { %5466 = vmatpush3.msra.mxu1 %v4549_v14 }
 0xcd5   :  { %5467 = vmatprep.subr.mxu1 %v5962_v4 }
 0xcd6   :  { %5468 = vmatpush3.msra.mxu1 %v4548_v15 }
 0xcd7   :  { %5469 = vmatprep.subr.mxu1 %v5962_v4 }
 0xcd8   :  { %5470 = vmatpush3.msra.mxu1 %v4547_v16 }
 0xd79   :  { %v1953_v17 = vpop.f32.mrf.mxu1 }
 0xd7a   :  { %5472 = vmatmul.mubr.f32.vlgmr.msra.gmra.mxu1 %v1953_v17 }
 0xd7b   :  { %v5438_v18 = vpop.f32.mrf.mxu1 }
 0xe3a   :  { %v2040_v19 = vpop.f32.mrf.mxu1 }
 0xe3b   :  { %2045 = vst.msk [vmem:[#allocation4 + $0x20] sm:$0xf] %vm308_vm2, %v2040_v19 }
 0xe3c   :  { %v5473_v20 = vpop.f32.mrf.mxu1 }
 0xe3d   :  { %5943 = dma.done.wait [#allocation3 + $0x1], 256 }
 0xe3e   :  { %5944 = vsyncadd [#allocation3 + $0x1], 4294967040  ;;  %s4563_s18 = sld [smem:[#allocation6 + $0xa]] }
 0xe44   :  { %s4564_s19 = sshll.u32 %s4563_s18, 4 }
 0xe45   :  { %s2051_s22 = scalar_lea.vmem %s7642_s3, %s4564_s19 }
 0xe46   :  { %v6791_v21 = vld [vmem:[%s2051_s22] sm:$0xff]  ;;  %v6793_v22 = vld [vmem:[%s2051_s22 + $0x8] sm:$0xff] }
 0xe47   :  { %2096 = vsyncadd [#allocation3], 256  ;;  %5474 = vmatprep.subr.mxu0 %v5962_v4  ;;  %5478 = vmatprep.mubr.msk.f32.mxu0 %vm5963_vm0, %v5962_v4  ;;  %v4565_v23 = vld [vmem:[%s7640_s1 + $0x24] sm:$0xf]  ;;  %v4582_v24 = vld [vmem:[%s7641_s2 + $0x4f8] sm:$0xff] }
 0xe48   :  { %5475 = vmatpush3.msra.mxu0 %v6709_v62  ;;  %v4581_v25 = vld [vmem:[%s7641_s2 + $0x4f0] sm:$0xff]  ;;  %v4580_v26 = vld [vmem:[%s7641_s2 + $0x4e8] sm:$0xff]  ;;  %v4579_v27 = vld [vmem:[%s7641_s2 + $0x4e0] sm:$0xff] }
 0xe49   :  { %5476 = vmatprep.subr.mxu0 %v5962_v4  ;;  %v4578_v28 = vld [vmem:[%s7641_s2 + $0x4d8] sm:$0xff]  ;;  %v4577_v29 = vld [vmem:[%s7641_s2 + $0x4d0] sm:$0xff]  ;;  %v4576_v30 = vld [vmem:[%s7641_s2 + $0x4c8] sm:$0xff] }
 0xe4a   :  { %5477 = vmatpush3.msra.mxu0 %v6707_v61  ;;  %v4575_v31 = vld [vmem:[%s7641_s2 + $0x4c0] sm:$0xff]  ;;  %v4574_v32 = vld [vmem:[%s7641_s2 + $0x4b8] sm:$0xff]  ;;  %v4573_v33 = vld [vmem:[%s7641_s2 + $0x4b0] sm:$0xff] }
 0xe4b   :  { %5479 = vmatmul.mubr.msk.f32.vlgmr.msra.gmra.mxu0 %vm148_vm1, %v4565_v23  ;;  %5481 = vmatprep.subr.mxu0 %v5962_v4  ;;  %v4572_v34 = vld [vmem:[%s7641_s2 + $0x4a8] sm:$0xff]  ;;  %v4571_v35 = vld [vmem:[%s7641_s2 + $0x4a0] sm:$0xff]  ;;  %v4570_v36 = vld [vmem:[%s7641_s2 + $0x498] sm:$0xff] }
 0xe4c   :  { %5482 = vmatpush3.msra.mxu0 %v4582_v24  ;;  %5513 = vmatprep.mubr.msk.f32.mxu0 %vm5963_vm0, %v5962_v4  ;;  %v4569_v37 = vld [vmem:[%s7641_s2 + $0x490] sm:$0xff]  ;;  %v4568_v38 = vld [vmem:[%s7641_s2 + $0x488] sm:$0xff]  ;;  %v4567_v39 = vld [vmem:[%s7641_s2 + $0x480] sm:$0xff] }
 0xe4d   :  { %5483 = vmatprep.subr.mxu0 %v5962_v4 }
 0xe4e   :  { %5484 = vmatpush3.msra.mxu0 %v4581_v25 }
 0xe4f   :  { %5485 = vmatprep.subr.mxu0 %v5962_v4 }
 0xe50   :  { %5486 = vmatpush3.msra.mxu0 %v4580_v26 }
 0xe51   :  { %5487 = vmatprep.subr.mxu0 %v5962_v4 }
 0xe52   :  { %5488 = vmatpush3.msra.mxu0 %v4579_v27 }
 0xe53   :  { %5489 = vmatprep.subr.mxu0 %v5962_v4 }
 0xe54   :  { %5490 = vmatpush3.msra.mxu0 %v4578_v28 }
 0xe55   :  { %5491 = vmatprep.subr.mxu0 %v5962_v4 }
 0xe56   :  { %5492 = vmatpush3.msra.mxu0 %v4577_v29 }
 0xe57   :  { %5493 = vmatprep.subr.mxu0 %v5962_v4 }
 0xe58   :  { %5494 = vmatpush3.msra.mxu0 %v4576_v30 }
 0xe59   :  { %5495 = vmatprep.subr.mxu0 %v5962_v4 }
 0xe5a   :  { %5496 = vmatpush3.msra.mxu0 %v4575_v31 }
 0xe5b   :  { %5497 = vmatprep.subr.mxu0 %v5962_v4 }
 0xe5c   :  { %5498 = vmatpush3.msra.mxu0 %v4574_v32 }
 0xe5d   :  { %5499 = vmatprep.subr.mxu0 %v5962_v4 }
 0xe5e   :  { %5500 = vmatpush3.msra.mxu0 %v4573_v33 }
 0xe5f   :  { %5501 = vmatprep.subr.mxu0 %v5962_v4 }
 0xe60   :  { %5502 = vmatpush3.msra.mxu0 %v4572_v34 }
 0xe61   :  { %5503 = vmatprep.subr.mxu0 %v5962_v4 }
 0xe62   :  { %5504 = vmatpush3.msra.mxu0 %v4571_v35 }
 0xe63   :  { %5505 = vmatprep.subr.mxu0 %v5962_v4 }
 0xe64   :  { %5506 = vmatpush3.msra.mxu0 %v4570_v36 }
 0xe65   :  { %5507 = vmatprep.subr.mxu0 %v5962_v4 }
 0xe66   :  { %5508 = vmatpush3.msra.mxu0 %v4569_v37 }
 0xe67   :  { %5509 = vmatprep.subr.mxu0 %v5962_v4 }
 0xe68   :  { %5510 = vmatpush3.msra.mxu0 %v4568_v38 }
 0xe69   :  { %5511 = vmatprep.subr.mxu0 %v5962_v4 }
 0xe6a   :  { %5512 = vmatpush3.msra.mxu0 %v4567_v39 }
 0xf0b   :  { %v2170_v40 = vpop.f32.mrf.mxu0 }
 0xf0c   :  { %5514 = vmatmul.mubr.f32.vlgmr.msra.gmra.mxu0 %v2170_v40 }
 0xf0d   :  { %v5480_v41 = vpop.f32.mrf.mxu0 }
 0xfcc   :  { %v2257_v42 = vpop.f32.mrf.mxu0 }
 0xfcd   :  { %2262 = vst.msk [vmem:[#allocation4 + $0x24] sm:$0xf] %vm308_vm2, %v2257_v42 }
 0xfce   :  { %v5515_v43 = vpop.f32.mrf.mxu0 }
 0xfcf   :  { %5945 = dma.done.wait [#allocation3], 256 }
 0xfd0   :  { %5946 = vsyncadd [#allocation3], 4294967040  ;;  %s4583_s17 = sld [smem:[#allocation6 + $0xb]] }
 0xfd6   :  { %s4584_s18 = sshll.u32 %s4583_s17, 4 }
 0xfd7   :  { %s2268_s21 = scalar_lea.vmem %s7642_s3, %s4584_s18 }
 0xfd8   :  { %v6875_v44 = vld [vmem:[%s2268_s21] sm:$0xff]  ;;  %v6877_v45 = vld [vmem:[%s2268_s21 + $0x8] sm:$0xff] }
 0xfd9   :  { %2313 = vsyncadd [#allocation3 + $0x1], 256  ;;  %5516 = vmatprep.subr.mxu1 %v5962_v4  ;;  %5520 = vmatprep.mubr.msk.f32.mxu1 %vm5963_vm0, %v5962_v4  ;;  %v4585_v46 = vld [vmem:[%s7640_s1 + $0x28] sm:$0xf]  ;;  %v4602_v47 = vld [vmem:[%s7641_s2 + $0x578] sm:$0xff] }
 0xfda   :  { %5517 = vmatpush3.msra.mxu1 %v6793_v22  ;;  %v4601_v48 = vld [vmem:[%s7641_s2 + $0x570] sm:$0xff]  ;;  %v4600_v49 = vld [vmem:[%s7641_s2 + $0x568] sm:$0xff]  ;;  %v4599_v50 = vld [vmem:[%s7641_s2 + $0x560] sm:$0xff] }
 0xfdb   :  { %5518 = vmatprep.subr.mxu1 %v5962_v4  ;;  %v4598_v51 = vld [vmem:[%s7641_s2 + $0x558] sm:$0xff]  ;;  %v4597_v52 = vld [vmem:[%s7641_s2 + $0x550] sm:$0xff]  ;;  %v4596_v53 = vld [vmem:[%s7641_s2 + $0x548] sm:$0xff] }
 0xfdc   :  { %5519 = vmatpush3.msra.mxu1 %v6791_v21  ;;  %v4595_v54 = vld [vmem:[%s7641_s2 + $0x540] sm:$0xff]  ;;  %v4594_v55 = vld [vmem:[%s7641_s2 + $0x538] sm:$0xff]  ;;  %v4593_v56 = vld [vmem:[%s7641_s2 + $0x530] sm:$0xff] }
 0xfdd   :  { %5521 = vmatmul.mubr.msk.f32.vlgmr.msra.gmra.mxu1 %vm148_vm1, %v4585_v46  ;;  %5523 = vmatprep.subr.mxu1 %v5962_v4  ;;  %v4592_v57 = vld [vmem:[%s7641_s2 + $0x528] sm:$0xff]  ;;  %v4591_v58 = vld [vmem:[%s7641_s2 + $0x520] sm:$0xff]  ;;  %v4590_v59 = vld [vmem:[%s7641_s2 + $0x518] sm:$0xff] }
 0xfde   :  { %5524 = vmatpush3.msra.mxu1 %v4602_v47  ;;  %5555 = vmatprep.mubr.msk.f32.mxu1 %vm5963_vm0, %v5962_v4  ;;  %v4589_v60 = vld [vmem:[%s7641_s2 + $0x510] sm:$0xff]  ;;  %v4588_v61 = vld [vmem:[%s7641_s2 + $0x508] sm:$0xff]  ;;  %v4587_v62 = vld [vmem:[%s7641_s2 + $0x500] sm:$0xff] }
 0xfdf   :  { %5525 = vmatprep.subr.mxu1 %v5962_v4 }
 0xfe0   :  { %5526 = vmatpush3.msra.mxu1 %v4601_v48 }
 0xfe1   :  { %5527 = vmatprep.subr.mxu1 %v5962_v4 }
 0xfe2   :  { %5528 = vmatpush3.msra.mxu1 %v4600_v49 }
 0xfe3   :  { %5529 = vmatprep.subr.mxu1 %v5962_v4 }
 0xfe4   :  { %5530 = vmatpush3.msra.mxu1 %v4599_v50 }
 0xfe5   :  { %5531 = vmatprep.subr.mxu1 %v5962_v4 }
 0xfe6   :  { %5532 = vmatpush3.msra.mxu1 %v4598_v51 }
 0xfe7   :  { %5533 = vmatprep.subr.mxu1 %v5962_v4 }
 0xfe8   :  { %5534 = vmatpush3.msra.mxu1 %v4597_v52 }
 0xfe9   :  { %5535 = vmatprep.subr.mxu1 %v5962_v4 }
 0xfea   :  { %5536 = vmatpush3.msra.mxu1 %v4596_v53 }
 0xfeb   :  { %5537 = vmatprep.subr.mxu1 %v5962_v4 }
 0xfec   :  { %5538 = vmatpush3.msra.mxu1 %v4595_v54 }
 0xfed   :  { %5539 = vmatprep.subr.mxu1 %v5962_v4 }
 0xfee   :  { %5540 = vmatpush3.msra.mxu1 %v4594_v55 }
 0xfef   :  { %5541 = vmatprep.subr.mxu1 %v5962_v4 }
 0xff0   :  { %5542 = vmatpush3.msra.mxu1 %v4593_v56 }
 0xff1   :  { %5543 = vmatprep.subr.mxu1 %v5962_v4 }
 0xff2   :  { %5544 = vmatpush3.msra.mxu1 %v4592_v57 }
 0xff3   :  { %5545 = vmatprep.subr.mxu1 %v5962_v4 }
 0xff4   :  { %5546 = vmatpush3.msra.mxu1 %v4591_v58 }
 0xff5   :  { %5547 = vmatprep.subr.mxu1 %v5962_v4 }
 0xff6   :  { %5548 = vmatpush3.msra.mxu1 %v4590_v59 }
 0xff7   :  { %5549 = vmatprep.subr.mxu1 %v5962_v4 }
 0xff8   :  { %5550 = vmatpush3.msra.mxu1 %v4589_v60 }
 0xff9   :  { %5551 = vmatprep.subr.mxu1 %v5962_v4 }
 0xffa   :  { %5552 = vmatpush3.msra.mxu1 %v4588_v61 }
 0xffb   :  { %5553 = vmatprep.subr.mxu1 %v5962_v4 }
 0xffc   :  { %5554 = vmatpush3.msra.mxu1 %v4587_v62 }
0x109d   :  { %v2387_v63 = vpop.f32.mrf.mxu1 }
0x109e   :  { %5556 = vmatmul.mubr.f32.vlgmr.msra.gmra.mxu1 %v2387_v63 }
0x109f   :  { %v5522_v0 = vpop.f32.mrf.mxu1 }
0x115e   :  { %v2474_v1 = vpop.f32.mrf.mxu1 }
0x115f   :  { %2479 = vst.msk [vmem:[#allocation4 + $0x28] sm:$0xf] %vm308_vm2, %v2474_v1 }
0x1160   :  { %v5557_v2 = vpop.f32.mrf.mxu1 }
0x1161   :  { %5947 = dma.done.wait [#allocation3 + $0x1], 256 }
0x1162   :  { %5948 = vsyncadd [#allocation3 + $0x1], 4294967040  ;;  %s4603_s16 = sld [smem:[#allocation6 + $0xc]] }
0x1168   :  { %s4604_s17 = sshll.u32 %s4603_s16, 4 }
0x1169   :  { %s2485_s20 = scalar_lea.vmem %s7642_s3, %s4604_s17 }
0x116a   :  { %v6959_v3 = vld [vmem:[%s2485_s20] sm:$0xff]  ;;  %v6961_v5 = vld [vmem:[%s2485_s20 + $0x8] sm:$0xff] }
0x116b   :  { %2530 = vsyncadd [#allocation3], 256  ;;  %5558 = vmatprep.subr.mxu0 %v5962_v4  ;;  %5562 = vmatprep.mubr.msk.f32.mxu0 %vm5963_vm0, %v5962_v4  ;;  %v4605_v6 = vld [vmem:[%s7640_s1 + $0x2c] sm:$0xf]  ;;  %v4622_v7 = vld [vmem:[%s7641_s2 + $0x5f8] sm:$0xff] }
0x116c   :  { %5559 = vmatpush3.msra.mxu0 %v6877_v45  ;;  %v4621_v8 = vld [vmem:[%s7641_s2 + $0x5f0] sm:$0xff]  ;;  %v4620_v9 = vld [vmem:[%s7641_s2 + $0x5e8] sm:$0xff]  ;;  %v4619_v10 = vld [vmem:[%s7641_s2 + $0x5e0] sm:$0xff] }
0x116d   :  { %5560 = vmatprep.subr.mxu0 %v5962_v4  ;;  %v4618_v11 = vld [vmem:[%s7641_s2 + $0x5d8] sm:$0xff]  ;;  %v4617_v12 = vld [vmem:[%s7641_s2 + $0x5d0] sm:$0xff]  ;;  %v4616_v13 = vld [vmem:[%s7641_s2 + $0x5c8] sm:$0xff] }
0x116e   :  { %5561 = vmatpush3.msra.mxu0 %v6875_v44  ;;  %v4615_v14 = vld [vmem:[%s7641_s2 + $0x5c0] sm:$0xff]  ;;  %v4614_v15 = vld [vmem:[%s7641_s2 + $0x5b8] sm:$0xff]  ;;  %v4613_v16 = vld [vmem:[%s7641_s2 + $0x5b0] sm:$0xff] }
0x116f   :  { %5563 = vmatmul.mubr.msk.f32.vlgmr.msra.gmra.mxu0 %vm148_vm1, %v4605_v6  ;;  %5565 = vmatprep.subr.mxu0 %v5962_v4  ;;  %v4612_v17 = vld [vmem:[%s7641_s2 + $0x5a8] sm:$0xff]  ;;  %v4611_v18 = vld [vmem:[%s7641_s2 + $0x5a0] sm:$0xff]  ;;  %v4610_v19 = vld [vmem:[%s7641_s2 + $0x598] sm:$0xff] }
0x1170   :  { %5566 = vmatpush3.msra.mxu0 %v4622_v7  ;;  %5597 = vmatprep.mubr.msk.f32.mxu0 %vm5963_vm0, %v5962_v4  ;;  %v4609_v20 = vld [vmem:[%s7641_s2 + $0x590] sm:$0xff]  ;;  %v4608_v21 = vld [vmem:[%s7641_s2 + $0x588] sm:$0xff]  ;;  %v4607_v22 = vld [vmem:[%s7641_s2 + $0x580] sm:$0xff] }
0x1171   :  { %5567 = vmatprep.subr.mxu0 %v5962_v4 }
0x1172   :  { %5568 = vmatpush3.msra.mxu0 %v4621_v8 }
0x1173   :  { %5569 = vmatprep.subr.mxu0 %v5962_v4 }
0x1174   :  { %5570 = vmatpush3.msra.mxu0 %v4620_v9 }
0x1175   :  { %5571 = vmatprep.subr.mxu0 %v5962_v4 }
0x1176   :  { %5572 = vmatpush3.msra.mxu0 %v4619_v10 }
0x1177   :  { %5573 = vmatprep.subr.mxu0 %v5962_v4 }
0x1178   :  { %5574 = vmatpush3.msra.mxu0 %v4618_v11 }
0x1179   :  { %5575 = vmatprep.subr.mxu0 %v5962_v4 }
0x117a   :  { %5576 = vmatpush3.msra.mxu0 %v4617_v12 }
0x117b   :  { %5577 = vmatprep.subr.mxu0 %v5962_v4 }
0x117c   :  { %5578 = vmatpush3.msra.mxu0 %v4616_v13 }
0x117d   :  { %5579 = vmatprep.subr.mxu0 %v5962_v4 }
0x117e   :  { %5580 = vmatpush3.msra.mxu0 %v4615_v14 }
0x117f   :  { %5581 = vmatprep.subr.mxu0 %v5962_v4 }
0x1180   :  { %5582 = vmatpush3.msra.mxu0 %v4614_v15 }
0x1181   :  { %5583 = vmatprep.subr.mxu0 %v5962_v4 }
0x1182   :  { %5584 = vmatpush3.msra.mxu0 %v4613_v16 }
0x1183   :  { %5585 = vmatprep.subr.mxu0 %v5962_v4 }
0x1184   :  { %5586 = vmatpush3.msra.mxu0 %v4612_v17 }
0x1185   :  { %5587 = vmatprep.subr.mxu0 %v5962_v4 }
0x1186   :  { %5588 = vmatpush3.msra.mxu0 %v4611_v18 }
0x1187   :  { %5589 = vmatprep.subr.mxu0 %v5962_v4 }
0x1188   :  { %5590 = vmatpush3.msra.mxu0 %v4610_v19 }
0x1189   :  { %5591 = vmatprep.subr.mxu0 %v5962_v4 }
0x118a   :  { %5592 = vmatpush3.msra.mxu0 %v4609_v20 }
0x118b   :  { %5593 = vmatprep.subr.mxu0 %v5962_v4 }
0x118c   :  { %5594 = vmatpush3.msra.mxu0 %v4608_v21 }
0x118d   :  { %5595 = vmatprep.subr.mxu0 %v5962_v4 }
0x118e   :  { %5596 = vmatpush3.msra.mxu0 %v4607_v22 }
0x122f   :  { %v2604_v23 = vpop.f32.mrf.mxu0 }
0x1230   :  { %5598 = vmatmul.mubr.f32.vlgmr.msra.gmra.mxu0 %v2604_v23 }
0x1231   :  { %v5564_v24 = vpop.f32.mrf.mxu0 }
0x12f0   :  { %v2691_v25 = vpop.f32.mrf.mxu0 }
0x12f1   :  { %2696 = vst.msk [vmem:[#allocation4 + $0x2c] sm:$0xf] %vm308_vm2, %v2691_v25 }
0x12f2   :  { %v5599_v26 = vpop.f32.mrf.mxu0 }
0x12f3   :  { %5949 = dma.done.wait [#allocation3], 256 }
0x12f4   :  { %5950 = vsyncadd [#allocation3], 4294967040  ;;  %s4623_s15 = sld [smem:[#allocation6 + $0xd]] }
0x12fa   :  { %s4624_s16 = sshll.u32 %s4623_s15, 4 }
0x12fb   :  { %s2702_s19 = scalar_lea.vmem %s7642_s3, %s4624_s16 }
0x12fc   :  { %v7043_v27 = vld [vmem:[%s2702_s19] sm:$0xff]  ;;  %v7045_v28 = vld [vmem:[%s2702_s19 + $0x8] sm:$0xff] }
0x12fd   :  { %2747 = vsyncadd [#allocation3 + $0x1], 256  ;;  %5600 = vmatprep.subr.mxu1 %v5962_v4  ;;  %5604 = vmatprep.mubr.msk.f32.mxu1 %vm5963_vm0, %v5962_v4  ;;  %v4625_v29 = vld [vmem:[%s7640_s1 + $0x30] sm:$0xf]  ;;  %v4642_v30 = vld [vmem:[%s7641_s2 + $0x678] sm:$0xff] }
0x12fe   :  { %5601 = vmatpush3.msra.mxu1 %v6961_v5  ;;  %v4641_v31 = vld [vmem:[%s7641_s2 + $0x670] sm:$0xff]  ;;  %v4640_v32 = vld [vmem:[%s7641_s2 + $0x668] sm:$0xff]  ;;  %v4639_v33 = vld [vmem:[%s7641_s2 + $0x660] sm:$0xff] }
0x12ff   :  { %5602 = vmatprep.subr.mxu1 %v5962_v4  ;;  %v4638_v34 = vld [vmem:[%s7641_s2 + $0x658] sm:$0xff]  ;;  %v4637_v35 = vld [vmem:[%s7641_s2 + $0x650] sm:$0xff]  ;;  %v4636_v36 = vld [vmem:[%s7641_s2 + $0x648] sm:$0xff] }
0x1300   :  { %5603 = vmatpush3.msra.mxu1 %v6959_v3  ;;  %v4635_v37 = vld [vmem:[%s7641_s2 + $0x640] sm:$0xff]  ;;  %v4634_v38 = vld [vmem:[%s7641_s2 + $0x638] sm:$0xff]  ;;  %v4633_v39 = vld [vmem:[%s7641_s2 + $0x630] sm:$0xff] }
0x1301   :  { %5605 = vmatmul.mubr.msk.f32.vlgmr.msra.gmra.mxu1 %vm148_vm1, %v4625_v29  ;;  %5607 = vmatprep.subr.mxu1 %v5962_v4  ;;  %v4632_v40 = vld [vmem:[%s7641_s2 + $0x628] sm:$0xff]  ;;  %v4631_v41 = vld [vmem:[%s7641_s2 + $0x620] sm:$0xff]  ;;  %v4630_v42 = vld [vmem:[%s7641_s2 + $0x618] sm:$0xff] }
0x1302   :  { %5608 = vmatpush3.msra.mxu1 %v4642_v30  ;;  %5639 = vmatprep.mubr.msk.f32.mxu1 %vm5963_vm0, %v5962_v4  ;;  %v4629_v43 = vld [vmem:[%s7641_s2 + $0x610] sm:$0xff]  ;;  %v4628_v44 = vld [vmem:[%s7641_s2 + $0x608] sm:$0xff]  ;;  %v4627_v45 = vld [vmem:[%s7641_s2 + $0x600] sm:$0xff] }
0x1303   :  { %5609 = vmatprep.subr.mxu1 %v5962_v4 }
0x1304   :  { %5610 = vmatpush3.msra.mxu1 %v4641_v31 }
0x1305   :  { %5611 = vmatprep.subr.mxu1 %v5962_v4 }
0x1306   :  { %5612 = vmatpush3.msra.mxu1 %v4640_v32 }
0x1307   :  { %5613 = vmatprep.subr.mxu1 %v5962_v4 }
0x1308   :  { %5614 = vmatpush3.msra.mxu1 %v4639_v33 }
0x1309   :  { %5615 = vmatprep.subr.mxu1 %v5962_v4 }
0x130a   :  { %5616 = vmatpush3.msra.mxu1 %v4638_v34 }
0x130b   :  { %5617 = vmatprep.subr.mxu1 %v5962_v4 }
0x130c   :  { %5618 = vmatpush3.msra.mxu1 %v4637_v35 }
0x130d   :  { %5619 = vmatprep.subr.mxu1 %v5962_v4 }
0x130e   :  { %5620 = vmatpush3.msra.mxu1 %v4636_v36 }
0x130f   :  { %5621 = vmatprep.subr.mxu1 %v5962_v4 }
0x1310   :  { %5622 = vmatpush3.msra.mxu1 %v4635_v37 }
0x1311   :  { %5623 = vmatprep.subr.mxu1 %v5962_v4 }
0x1312   :  { %5624 = vmatpush3.msra.mxu1 %v4634_v38 }
0x1313   :  { %5625 = vmatprep.subr.mxu1 %v5962_v4 }
0x1314   :  { %5626 = vmatpush3.msra.mxu1 %v4633_v39 }
0x1315   :  { %5627 = vmatprep.subr.mxu1 %v5962_v4 }
0x1316   :  { %5628 = vmatpush3.msra.mxu1 %v4632_v40 }
0x1317   :  { %5629 = vmatprep.subr.mxu1 %v5962_v4 }
0x1318   :  { %5630 = vmatpush3.msra.mxu1 %v4631_v41 }
0x1319   :  { %5631 = vmatprep.subr.mxu1 %v5962_v4 }
0x131a   :  { %5632 = vmatpush3.msra.mxu1 %v4630_v42 }
0x131b   :  { %5633 = vmatprep.subr.mxu1 %v5962_v4 }
0x131c   :  { %5634 = vmatpush3.msra.mxu1 %v4629_v43 }
0x131d   :  { %5635 = vmatprep.subr.mxu1 %v5962_v4 }
0x131e   :  { %5636 = vmatpush3.msra.mxu1 %v4628_v44 }
0x131f   :  { %5637 = vmatprep.subr.mxu1 %v5962_v4 }
0x1320   :  { %5638 = vmatpush3.msra.mxu1 %v4627_v45 }
0x13c1   :  { %v2821_v46 = vpop.f32.mrf.mxu1 }
0x13c2   :  { %5640 = vmatmul.mubr.f32.vlgmr.msra.gmra.mxu1 %v2821_v46 }
0x13c3   :  { %v5606_v47 = vpop.f32.mrf.mxu1 }
0x1482   :  { %v2908_v48 = vpop.f32.mrf.mxu1 }
0x1483   :  { %2913 = vst.msk [vmem:[#allocation4 + $0x30] sm:$0xf] %vm308_vm2, %v2908_v48 }
0x1484   :  { %v5641_v49 = vpop.f32.mrf.mxu1 }
0x1485   :  { %5951 = dma.done.wait [#allocation3 + $0x1], 256 }
0x1486   :  { %5952 = vsyncadd [#allocation3 + $0x1], 4294967040  ;;  %s4643_s14 = sld [smem:[#allocation6 + $0xe]] }
0x148c   :  { %s4644_s15 = sshll.u32 %s4643_s14, 4 }
0x148d   :  { %s2919_s18 = scalar_lea.vmem %s7642_s3, %s4644_s15 }
0x148e   :  { %v7127_v50 = vld [vmem:[%s2919_s18] sm:$0xff]  ;;  %v7129_v51 = vld [vmem:[%s2919_s18 + $0x8] sm:$0xff] }
0x148f   :  { %2964 = vsyncadd [#allocation3], 256  ;;  %5642 = vmatprep.subr.mxu0 %v5962_v4  ;;  %5646 = vmatprep.mubr.msk.f32.mxu0 %vm5963_vm0, %v5962_v4  ;;  %v4645_v52 = vld [vmem:[%s7640_s1 + $0x34] sm:$0xf]  ;;  %v4662_v53 = vld [vmem:[%s7641_s2 + $0x6f8] sm:$0xff] }
0x1490   :  { %5643 = vmatpush3.msra.mxu0 %v7045_v28  ;;  %v4661_v54 = vld [vmem:[%s7641_s2 + $0x6f0] sm:$0xff]  ;;  %v4660_v55 = vld [vmem:[%s7641_s2 + $0x6e8] sm:$0xff]  ;;  %v4659_v56 = vld [vmem:[%s7641_s2 + $0x6e0] sm:$0xff] }
0x1491   :  { %5644 = vmatprep.subr.mxu0 %v5962_v4  ;;  %v4658_v57 = vld [vmem:[%s7641_s2 + $0x6d8] sm:$0xff]  ;;  %v4657_v58 = vld [vmem:[%s7641_s2 + $0x6d0] sm:$0xff]  ;;  %v4656_v59 = vld [vmem:[%s7641_s2 + $0x6c8] sm:$0xff] }
0x1492   :  { %5645 = vmatpush3.msra.mxu0 %v7043_v27  ;;  %v4655_v60 = vld [vmem:[%s7641_s2 + $0x6c0] sm:$0xff]  ;;  %v4654_v61 = vld [vmem:[%s7641_s2 + $0x6b8] sm:$0xff]  ;;  %v4653_v62 = vld [vmem:[%s7641_s2 + $0x6b0] sm:$0xff] }
0x1493   :  { %5647 = vmatmul.mubr.msk.f32.vlgmr.msra.gmra.mxu0 %vm148_vm1, %v4645_v52  ;;  %5649 = vmatprep.subr.mxu0 %v5962_v4  ;;  %v4652_v63 = vld [vmem:[%s7641_s2 + $0x6a8] sm:$0xff]  ;;  %v4651_v0 = vld [vmem:[%s7641_s2 + $0x6a0] sm:$0xff]  ;;  %v4650_v1 = vld [vmem:[%s7641_s2 + $0x698] sm:$0xff] }
0x1494   :  { %5650 = vmatpush3.msra.mxu0 %v4662_v53  ;;  %5681 = vmatprep.mubr.msk.f32.mxu0 %vm5963_vm0, %v5962_v4  ;;  %v4649_v2 = vld [vmem:[%s7641_s2 + $0x690] sm:$0xff]  ;;  %v4648_v3 = vld [vmem:[%s7641_s2 + $0x688] sm:$0xff]  ;;  %v4647_v5 = vld [vmem:[%s7641_s2 + $0x680] sm:$0xff] }
0x1495   :  { %5651 = vmatprep.subr.mxu0 %v5962_v4 }
0x1496   :  { %5652 = vmatpush3.msra.mxu0 %v4661_v54 }
0x1497   :  { %5653 = vmatprep.subr.mxu0 %v5962_v4 }
0x1498   :  { %5654 = vmatpush3.msra.mxu0 %v4660_v55 }
0x1499   :  { %5655 = vmatprep.subr.mxu0 %v5962_v4 }
0x149a   :  { %5656 = vmatpush3.msra.mxu0 %v4659_v56 }
0x149b   :  { %5657 = vmatprep.subr.mxu0 %v5962_v4 }
0x149c   :  { %5658 = vmatpush3.msra.mxu0 %v4658_v57 }
0x149d   :  { %5659 = vmatprep.subr.mxu0 %v5962_v4 }
0x149e   :  { %5660 = vmatpush3.msra.mxu0 %v4657_v58 }
0x149f   :  { %5661 = vmatprep.subr.mxu0 %v5962_v4 }
0x14a0   :  { %5662 = vmatpush3.msra.mxu0 %v4656_v59 }
0x14a1   :  { %5663 = vmatprep.subr.mxu0 %v5962_v4 }
0x14a2   :  { %5664 = vmatpush3.msra.mxu0 %v4655_v60 }
0x14a3   :  { %5665 = vmatprep.subr.mxu0 %v5962_v4 }
0x14a4   :  { %5666 = vmatpush3.msra.mxu0 %v4654_v61 }
0x14a5   :  { %5667 = vmatprep.subr.mxu0 %v5962_v4 }
0x14a6   :  { %5668 = vmatpush3.msra.mxu0 %v4653_v62 }
0x14a7   :  { %5669 = vmatprep.subr.mxu0 %v5962_v4 }
0x14a8   :  { %5670 = vmatpush3.msra.mxu0 %v4652_v63 }
0x14a9   :  { %5671 = vmatprep.subr.mxu0 %v5962_v4 }
0x14aa   :  { %5672 = vmatpush3.msra.mxu0 %v4651_v0 }
0x14ab   :  { %5673 = vmatprep.subr.mxu0 %v5962_v4 }
0x14ac   :  { %5674 = vmatpush3.msra.mxu0 %v4650_v1 }
0x14ad   :  { %5675 = vmatprep.subr.mxu0 %v5962_v4 }
0x14ae   :  { %5676 = vmatpush3.msra.mxu0 %v4649_v2 }
0x14af   :  { %5677 = vmatprep.subr.mxu0 %v5962_v4 }
0x14b0   :  { %5678 = vmatpush3.msra.mxu0 %v4648_v3 }
0x14b1   :  { %5679 = vmatprep.subr.mxu0 %v5962_v4 }
0x14b2   :  { %5680 = vmatpush3.msra.mxu0 %v4647_v5 }
0x1553   :  { %v3038_v6 = vpop.f32.mrf.mxu0 }
0x1554   :  { %5682 = vmatmul.mubr.f32.vlgmr.msra.gmra.mxu0 %v3038_v6 }
0x1555   :  { %v5648_v7 = vpop.f32.mrf.mxu0 }
0x1614   :  { %v3125_v8 = vpop.f32.mrf.mxu0 }
0x1615   :  { %3130 = vst.msk [vmem:[#allocation4 + $0x34] sm:$0xf] %vm308_vm2, %v3125_v8 }
0x1616   :  { %v5683_v9 = vpop.f32.mrf.mxu0 }
0x1617   :  { %5953 = dma.done.wait [#allocation3], 256 }
0x1618   :  { %5954 = vsyncadd [#allocation3], 4294967040  ;;  %s4663_s13 = sld [smem:[#allocation6 + $0xf]] }
0x161e   :  { %s4664_s14 = sshll.u32 %s4663_s13, 4 }
0x161f   :  { %s3136_s17 = scalar_lea.vmem %s7642_s3, %s4664_s14 }
0x1620   :  { %v7211_v10 = vld [vmem:[%s3136_s17] sm:$0xff]  ;;  %v7213_v11 = vld [vmem:[%s3136_s17 + $0x8] sm:$0xff] }
0x1621   :  { %3181 = vsyncadd [#allocation3 + $0x1], 256  ;;  %5684 = vmatprep.subr.mxu1 %v5962_v4  ;;  %5688 = vmatprep.mubr.msk.f32.mxu1 %vm5963_vm0, %v5962_v4  ;;  %v4665_v12 = vld [vmem:[%s7640_s1 + $0x38] sm:$0xf]  ;;  %v4681_v14 = vld [vmem:[%s7641_s2 + $0x770] sm:$0xff] }
0x1622   :  { %5685 = vmatpush3.msra.mxu1 %v7129_v51  ;;  %v4682_v13 = vld [vmem:[%s7641_s2 + $0x778] sm:$0xff]  ;;  %v4680_v15 = vld [vmem:[%s7641_s2 + $0x768] sm:$0xff]  ;;  %v4679_v16 = vld [vmem:[%s7641_s2 + $0x760] sm:$0xff] }
0x1623   :  { %5686 = vmatprep.subr.mxu1 %v5962_v4  ;;  %v4678_v17 = vld [vmem:[%s7641_s2 + $0x758] sm:$0xff]  ;;  %v4677_v18 = vld [vmem:[%s7641_s2 + $0x750] sm:$0xff]  ;;  %v4676_v19 = vld [vmem:[%s7641_s2 + $0x748] sm:$0xff] }
0x1624   :  { %5687 = vmatpush3.msra.mxu1 %v7127_v50  ;;  %v4675_v20 = vld [vmem:[%s7641_s2 + $0x740] sm:$0xff]  ;;  %v4674_v21 = vld [vmem:[%s7641_s2 + $0x738] sm:$0xff]  ;;  %v4673_v22 = vld [vmem:[%s7641_s2 + $0x730] sm:$0xff] }
0x1625   :  { %5689 = vmatmul.mubr.msk.f32.vlgmr.msra.gmra.mxu1 %vm148_vm1, %v4665_v12  ;;  %5691 = vmatprep.subr.mxu1 %v5962_v4  ;;  %v4672_v23 = vld [vmem:[%s7641_s2 + $0x728] sm:$0xff]  ;;  %v4671_v24 = vld [vmem:[%s7641_s2 + $0x720] sm:$0xff]  ;;  %v4670_v25 = vld [vmem:[%s7641_s2 + $0x718] sm:$0xff] }
0x1626   :  { %5692 = vmatpush3.msra.mxu1 %v4682_v13  ;;  %5723 = vmatprep.mubr.msk.f32.mxu1 %vm5963_vm0, %v5962_v4  ;;  %v4669_v26 = vld [vmem:[%s7641_s2 + $0x710] sm:$0xff]  ;;  %v4668_v27 = vld [vmem:[%s7641_s2 + $0x708] sm:$0xff]  ;;  %v4667_v28 = vld [vmem:[%s7641_s2 + $0x700] sm:$0xff] }
0x1627   :  { %5693 = vmatprep.subr.mxu1 %v5962_v4 }
0x1628   :  { %5694 = vmatpush3.msra.mxu1 %v4681_v14 }
0x1629   :  { %5695 = vmatprep.subr.mxu1 %v5962_v4 }
0x162a   :  { %5696 = vmatpush3.msra.mxu1 %v4680_v15 }
0x162b   :  { %5697 = vmatprep.subr.mxu1 %v5962_v4 }
0x162c   :  { %5698 = vmatpush3.msra.mxu1 %v4679_v16 }
0x162d   :  { %5699 = vmatprep.subr.mxu1 %v5962_v4 }
0x162e   :  { %5700 = vmatpush3.msra.mxu1 %v4678_v17 }
0x162f   :  { %5701 = vmatprep.subr.mxu1 %v5962_v4 }
0x1630   :  { %5702 = vmatpush3.msra.mxu1 %v4677_v18 }
0x1631   :  { %5703 = vmatprep.subr.mxu1 %v5962_v4 }
0x1632   :  { %5704 = vmatpush3.msra.mxu1 %v4676_v19 }
0x1633   :  { %5705 = vmatprep.subr.mxu1 %v5962_v4 }
0x1634   :  { %5706 = vmatpush3.msra.mxu1 %v4675_v20 }
0x1635   :  { %5707 = vmatprep.subr.mxu1 %v5962_v4 }
0x1636   :  { %5708 = vmatpush3.msra.mxu1 %v4674_v21 }
0x1637   :  { %5709 = vmatprep.subr.mxu1 %v5962_v4 }
0x1638   :  { %5710 = vmatpush3.msra.mxu1 %v4673_v22 }
0x1639   :  { %5711 = vmatprep.subr.mxu1 %v5962_v4 }
0x163a   :  { %5712 = vmatpush3.msra.mxu1 %v4672_v23 }
0x163b   :  { %5713 = vmatprep.subr.mxu1 %v5962_v4 }
0x163c   :  { %5714 = vmatpush3.msra.mxu1 %v4671_v24 }
0x163d   :  { %5715 = vmatprep.subr.mxu1 %v5962_v4 }
0x163e   :  { %5716 = vmatpush3.msra.mxu1 %v4670_v25 }
0x163f   :  { %5717 = vmatprep.subr.mxu1 %v5962_v4 }
0x1640   :  { %5718 = vmatpush3.msra.mxu1 %v4669_v26 }
0x1641   :  { %5719 = vmatprep.subr.mxu1 %v5962_v4 }
0x1642   :  { %5720 = vmatpush3.msra.mxu1 %v4668_v27 }
0x1643   :  { %5721 = vmatprep.subr.mxu1 %v5962_v4 }
0x1644   :  { %5722 = vmatpush3.msra.mxu1 %v4667_v28 }
0x16e5   :  { %v3255_v29 = vpop.f32.mrf.mxu1 }
0x16e6   :  { %5724 = vmatmul.mubr.f32.vlgmr.msra.gmra.mxu1 %v3255_v29 }
0x16e7   :  { %v5690_v30 = vpop.f32.mrf.mxu1 }
0x17a6   :  { %v3342_v31 = vpop.f32.mrf.mxu1 }
0x17a7   :  { %3347 = vst.msk [vmem:[#allocation4 + $0x38] sm:$0xf] %vm308_vm2, %v3342_v31 }
0x17a8   :  { %v5725_v32 = vpop.f32.mrf.mxu1 }
0x17a9   :  { %5955 = dma.done.wait [#allocation3 + $0x1], 256 }
0x17aa   :  { %5956 = vsyncadd [#allocation3 + $0x1], 4294967040  ;;  %5726 = vmatprep.subr.mxu0 %v5962_v4  ;;  %5730 = vmatprep.mubr.msk.f32.mxu0 %vm5963_vm0, %v5962_v4  ;;  %v4683_v33 = vld [vmem:[%s7640_s1 + $0x3c] sm:$0xf]  ;;  %v4699_v35 = vld [vmem:[%s7641_s2 + $0x7f0] sm:$0xff]  ;;  %vm3590_vm3 = vcmask 1041409  }
0x17ab   :  { %5727 = vmatpush3.msra.mxu0 %v7213_v11  ;;  %5768 = vmatprep.subr.bf16.mxu1 %v5962_v4  ;;  %v4700_v34 = vld [vmem:[%s7641_s2 + $0x7f8] sm:$0xff]  ;;  %v4698_v36 = vld [vmem:[%s7641_s2 + $0x7e8] sm:$0xff]  ;;  %v4697_v37 = vld [vmem:[%s7641_s2 + $0x7e0] sm:$0xff]  ;;  %vm3593_vm4 = vcmask 1042434   ;;  %vm3596_vm5 = vcmask 1043459   ;;  %vm3599_vm6 = vcmask 1044484  }
0x17ac   :  { %5728 = vmatprep.subr.mxu0 %v5962_v4  ;;  %5772 = vmatprep.mubr.msk.bf16.mxu1 %vm5963_vm0, %v5962_v4  ;;  %v4696_v38 = vld [vmem:[%s7641_s2 + $0x7d8] sm:$0xff]  ;;  %v4695_v39 = vld [vmem:[%s7641_s2 + $0x7d0] sm:$0xff]  ;;  %v4694_v40 = vld [vmem:[%s7641_s2 + $0x7c8] sm:$0xff]  ;;  %vm3602_vm7 = vcmask 1045509   ;;  %vm3605_vm8 = vcmask 1046534   ;;  %vm3608_vm9 = vcmask 1047559  }
0x17ad   :  { %5729 = vmatpush3.msra.mxu0 %v7211_v10  ;;  %v4693_v41 = vld [vmem:[%s7641_s2 + $0x7c0] sm:$0xff]  ;;  %v4692_v42 = vld [vmem:[%s7641_s2 + $0x7b8] sm:$0xff]  ;;  %v4691_v43 = vld [vmem:[%s7641_s2 + $0x7b0] sm:$0xff]  ;;  %vm3637_vm10 = vcmask 261120   ;;  %s5964_s22 = smov [#allocation7]  }
0x17ae   :  { %5733 = vmatprep.subr.mxu0 %v5962_v4  ;;  %5731 = vmatmul.mubr.msk.f32.vlgmr.msra.gmra.mxu0 %vm148_vm1, %v4683_v33  ;;  %v4690_v44 = vld [vmem:[%s7641_s2 + $0x7a8] sm:$0xff]  ;;  %v4689_v45 = vld [vmem:[%s7641_s2 + $0x7a0] sm:$0xff]  ;;  %v4688_v46 = vld [vmem:[%s7641_s2 + $0x798] sm:$0xff]  ;;  %s4199_s23 = sshll.u32 %s5964_s22, 4  ;;  %s4200_s23 = int_to_ptr.vmem [resolvable:$true] %s4199_s23 }
0x17af   :  { %5734 = vmatpush3.msra.mxu0 %v4700_v34  ;;  %5765 = vmatprep.mubr.msk.f32.mxu0 %vm5963_vm0, %v5962_v4  ;;  %v4687_v47 = vld [vmem:[%s7641_s2 + $0x790] sm:$0xff]  ;;  %v4686_v48 = vld [vmem:[%s7641_s2 + $0x788] sm:$0xff]  ;;  %v4685_v49 = vld [vmem:[%s7641_s2 + $0x780] sm:$0xff]  ;;  %p5888_p6 = scmp.lt.s32.totalorder %s4200_s23, %s4200_s23 }
0x17b0   :  { %5735 = vmatprep.subr.mxu0 %v5962_v4  ;;  %v5847_v52 = vld [vmem:[%s7643_s4 + $0x18] sm:$0xff]   ;;  %v5848_v53 = vld [vmem:[%s7643_s4 + $0x8] sm:$0xff]   ;;  %v5849_v54 = vld [vmem:[%s7643_s4 + $0x10] sm:$0xff]  }
0x17b1   :  { %5736 = vmatpush3.msra.mxu0 %v4699_v35  ;;  %5769 = vmatpush3.bf16.msra.mxu1 %v5847_v52  ;;  %v5850_v55 = vld [vmem:[%s7643_s4] sm:$0xff]   ;;  %v3518_v57 = vld [vmem:[#allocation4 + $0x8] sm:$0xf]  ;;  %v3519_v60 = vld [vmem:[#allocation4 + $0xc] sm:$0xf] }
0x17b2   :  { %5737 = vmatprep.subr.mxu0 %v5962_v4  ;;  %5770 = vmatprep.subr.bf16.mxu1 %v5962_v4  ;;  %v3516_v56 = vld [vmem:[#allocation4] sm:$0xf]  ;;  %v3517_v59 = vld [vmem:[#allocation4 + $0x4] sm:$0xf]  ;;  %v3534_v61 = vpack.c.bf16 %v3518_v57, %v3518_v57  ;;  %v3520_v63 = vld [vmem:[#allocation4 + $0x10] sm:$0xf]  ;;  %v3535_v1 = vpack.c.bf16 %v3519_v60, %v3519_v60 }
0x17b3   :  { %5738 = vmatpush3.msra.mxu0 %v4698_v36  ;;  %v3532_v58 = vpack.c.bf16 %v3516_v56, %v3516_v56  ;;  %v3533_v0 = vpack.c.bf16 %v3517_v59, %v3517_v59  ;;  %v3521_v5 = vld [vmem:[#allocation4 + $0x14] sm:$0xf]  ;;  %v3524_v6 = vld [vmem:[#allocation4 + $0x20] sm:$0xf]  ;;  %v3536_v7 = vpack.c.bf16 %v3520_v63, %v3520_v63  ;;  %v3522_v11 = vld [vmem:[#allocation4 + $0x18] sm:$0xf] }
0x17b4   :  { %5739 = vmatprep.subr.mxu0 %v5962_v4  ;;  %v7392_v2 = vunpack.c.l.b16 %v3534_v61  ;;  %v7397_v9 = vunpack.c.l.b16 %v3535_v1  ;;  %v3526_v12 = vld [vmem:[#allocation4 + $0x28] sm:$0xf]  ;;  %v3537_v13 = vpack.c.bf16 %v3521_v5, %v3521_v5  ;;  %v3540_v14 = vpack.c.bf16 %v3524_v6, %v3524_v6  ;;  %v3525_v16 = vld [vmem:[#allocation4 + $0x24] sm:$0xf]  ;;  %v3523_v19 = vld [vmem:[#allocation4 + $0x1c] sm:$0xf] }
0x17b5   :  { %5740 = vmatpush3.msra.mxu0 %v4697_v37  ;;  %5771 = vmatpush3.bf16.msra.mxu1 %v5849_v54  ;;  %v7390_v62 = vunpack.c.l.b16 %v3532_v58  ;;  %v7395_v8 = vunpack.c.l.b16 %v3533_v0  ;;  %v7402_v17 = vunpack.c.l.b16 %v3536_v7  ;;  %v3527_v20 = vld [vmem:[#allocation4 + $0x2c] sm:$0xf]  ;;  %v3538_v21 = vpack.c.bf16 %v3522_v11, %v3522_v11  ;;  %v3528_v24 = vld [vmem:[#allocation4 + $0x30] sm:$0xf]  ;;  %v3529_v29 = vld [vmem:[#allocation4 + $0x34] sm:$0xf] }
0x17b6   :  { %5741 = vmatprep.subr.mxu0 %v5962_v4  ;;  %5784 = vmatprep.subr.bf16.mxu1 %v5962_v4  ;;  %v3592_v10 = vrot.slane %v7392_v2, 7  ;;  %v3595_v18 = vrot.slane %v7397_v9, 6  ;;  %v3542_v22 = vpack.c.bf16 %v3526_v12, %v3526_v12  ;;  %v3541_v25 = vpack.c.bf16 %v3525_v16, %v3525_v16  ;;  %v3530_v30 = vld [vmem:[#allocation4 + $0x38] sm:$0xf] }
0x17b7   :  { %5742 = vmatpush3.msra.mxu0 %v4696_v38  ;;  %v3589_v3 = vrot.slane %v7390_v62, 1  ;;  %v7406_v26 = vunpack.c.l.b16 %v3537_v13  ;;  %v7408_v27 = vunpack.c.l.b16 %v3540_v14  ;;  %v3598_v28 = vrot.slane %v7402_v17, 5 }
0x17b8   :  { %5743 = vmatprep.subr.mxu0 %v5962_v4  ;;  %v3539_v31 = vpack.c.bf16 %v3523_v19, %v3523_v19  ;;  %v3543_v32 = vpack.c.bf16 %v3527_v20, %v3527_v20  ;;  %v3544_v34 = vpack.c.bf16 %v3528_v24, %v3528_v24  ;;  %v7412_v35 = vunpack.c.l.b16 %v3538_v21 }
0x17b9   :  { %5744 = vmatpush3.msra.mxu0 %v4695_v39  ;;  %v3591_v15 = vsel %vm3590_vm3, %v7395_v8, %v3589_v3  ;;  %v7414_v36 = vunpack.c.l.b16 %v3542_v22  ;;  %v3682_v37 = vrot.slane %v7395_v8, 7  ;;  %v3582_v38 = vunpack.c.l.b16 %v3541_v25 }
0x17ba   :  { %5745 = vmatprep.subr.mxu0 %v5962_v4  ;;  %v3594_v23 = vsel %vm3593_vm4, %v3592_v10, %v3591_v15  ;;  %v3601_v39 = vrot.slane %v7406_v26, 4  ;;  %v3686_v56 = vrot.slane %v7397_v9, 5  ;;  %v3688_v1 = vrot.slane %v7402_v17, 4 }
0x17bb   :  { %5746 = vmatpush3.msra.mxu0 %v4694_v40  ;;  %v3597_v33 = vsel %vm3596_vm5, %v3595_v18, %v3594_v23  ;;  %v3610_v40 = vrot.slane %v7408_v27, 1  ;;  %v3698_v0 = vrot.slane %v7414_v36, 6  ;;  %v3772_v5 = vrot.slane %v7390_v62, 2 }
0x17bc   :  { %5747 = vmatprep.subr.mxu0 %v5962_v4  ;;  %v3773_v6 = vrot.slane %v7395_v8, 1  ;;  %v3786_v11 = vrot.slane %v7408_v27, 2  ;;  %v3787_v12 = vrot.slane %v3582_v38, 1  ;;  %v3864_v13 = vrot.slane %v7390_v62, 3 }
0x17bd   :  { %5748 = vmatpush3.msra.mxu0 %v4693_v41  ;;  %v3545_v41 = vpack.c.bf16 %v3529_v29, %v3529_v29  ;;  %v3611_v52 = vsel %vm3590_vm3, %v3582_v38, %v3610_v40  ;;  %v3865_v14 = vrot.slane %v7395_v8, 2  ;;  %v3878_v15 = vrot.slane %v7408_v27, 3 }
0x17be   :  { %5749 = vmatprep.subr.mxu0 %v5962_v4  ;;  %v3879_v16 = vrot.slane %v3582_v38, 2  ;;  %v3690_v8 = vrot.slane %v7406_v26, 3  ;;  %v3774_v24 = vsel %vm3590_vm3, %v3773_v6, %v3772_v5  ;;  %v3867_v29 = vrot.slane %v7392_v2, 1 }
0x17bf   :  { %5750 = vmatpush3.msra.mxu0 %v4692_v42  ;;  %v3546_v42 = vpack.c.bf16 %v3530_v30, %v3530_v30  ;;  %v7433_v54 = vunpack.c.l.b16 %v3545_v41  ;;  %v3881_v30 = vrot.slane %v7414_v36, 1  ;;  %v3780_v6 = vrot.slane %v7406_v26, 5 }
0x17c0   :  { %5751 = vmatprep.subr.mxu0 %v5962_v4 }
0x17c1   :  { %5752 = vmatpush3.msra.mxu0 %v4691_v43  ;;  %v3600_v43 = vsel %vm3599_vm6, %v3598_v28, %v3597_v33  ;;  %v3618_v20 = vrot.slane %v7433_v54, 4  ;;  %v3788_v28 = vsel %vm3590_vm3, %v3787_v12, %v3786_v11  ;;  %v3866_v33 = vsel %vm3590_vm3, %v3865_v14, %v3864_v13 }
0x17c2   :  { %5753 = vmatprep.subr.mxu0 %v5962_v4  ;;  %v3886_v11 = vrot.slane %v7433_v54, 6 }
0x17c3   :  { %5754 = vmatpush3.msra.mxu0 %v4690_v44  ;;  %v7420_v44 = vunpack.c.l.b16 %v3539_v31 }
0x17c4   :  { %5755 = vmatprep.subr.mxu0 %v5962_v4 }
0x17c5   :  { %5756 = vmatpush3.msra.mxu0 %v4689_v45  ;;  %v7422_v45 = vunpack.c.l.b16 %v3543_v32  ;;  %v3607_v57 = vrot.slane %v7420_v44, 2  ;;  %v3776_v32 = vrot.slane %v7397_v9, 7 }
0x17c6   :  { %5757 = vmatprep.subr.mxu0 %v5962_v4 }
0x17c7   :  { %5758 = vmatpush3.msra.mxu0 %v4688_v46  ;;  %v3684_v46 = vrot.slane %v7392_v2, 6  ;;  %v3614_v58 = vrot.slane %v7422_v45, 6  ;;  %v3700_v10 = vrot.slane %v7422_v45, 5  ;;  %v3790_v40 = vrot.slane %v7422_v45, 7 }
0x17c8   :  { %5759 = vmatprep.subr.mxu0 %v5962_v4 }
0x17c9   :  { %5760 = vmatpush3.msra.mxu0 %v4687_v47  ;;  %v7425_v47 = vunpack.c.l.b16 %v3544_v34  ;;  %v3880_v34 = vsel %vm3590_vm3, %v3879_v16, %v3878_v15  ;;  %v3782_v16 = vrot.slane %v7412_v35, 4 }
0x17ca   :  { %5761 = vmatprep.subr.mxu0 %v5962_v4 }
0x17cb   :  { %5762 = vmatpush3.msra.mxu0 %v4686_v48  ;;  %v3604_v48 = vrot.slane %v7412_v35, 3  ;;  %v3616_v63 = vrot.slane %v7425_v47, 5 }
0x17cc   :  { %5763 = vmatprep.subr.mxu0 %v5962_v4 }
0x17cd   :  { %5764 = vmatpush3.msra.mxu0 %v4685_v49  ;;  %v3612_v49 = vrot.slane %v7414_v36, 7 }
0x17ce   :  { %5776 = vmatprep.subr.bf16.mxu0 %v5962_v4 }
0x17cf   :  { %v3613_v61 = vsel %vm3593_vm4, %v3612_v49, %v3611_v52  ;;  %v3778_v49 = vrot.slane %v7402_v17, 6 }
0x17d0   :  { %v3615_v23 = vsel %vm3596_vm5, %v3614_v58, %v3613_v61 }
0x186e   :  { %v3423_v50 = vpop.f32.mrf.mxu0 }
0x186f   :  { %5766 = vmatmul.mubr.f32.vlgmr.msra.gmra.mxu0 %v3423_v50  ;;  %v3683_v50 = vsel %vm3590_vm3, %v3682_v37, %v7390_v62  ;;  %v3617_v37 = vsel %vm3599_vm6, %v3616_v63, %v3615_v23 }
0x1870   :  { %v5732_v51 = vpop.f32.mrf.mxu0  ;;  %5780 = vmatprep.mubr.msk.bf16.mxu0 %vm5963_vm0, %v5962_v4  ;;  %5777 = vmatpush3.bf16.msra.mxu0 %v5848_v53  ;;  %v3696_v53 = vrot.slane %v3582_v38, 7  ;;  %v3685_v59 = vsel %vm3593_vm4, %v3684_v46, %v3683_v50  ;;  %v3692_v38 = vrot.slane %v7412_v35, 2  ;;  %v3789_v46 = vsel %vm3593_vm4, %v7414_v36, %v3788_v28 }
0x1871   :  { %5778 = vmatprep.subr.bf16.mxu0 %v5962_v4  ;;  %v3603_v51 = vsel %vm3602_vm7, %v3601_v39, %v3600_v43  ;;  %v3687_v7 = vsel %vm3596_vm5, %v3686_v56, %v3685_v59  ;;  %v3775_v39 = vsel %vm3593_vm4, %v7392_v2, %v3774_v24  ;;  %v3704_v43 = vrot.slane %v7433_v54, 3 }
0x1872   :  { %v3606_v60 = vsel %vm3605_vm8, %v3604_v48, %v3603_v51  ;;  %v3697_v3 = vsel %vm3590_vm3, %v3696_v53, %v7408_v27  ;;  %v3689_v62 = vsel %vm3599_vm6, %v3688_v1, %v3687_v7  ;;  %v3702_v27 = vrot.slane %v7425_v47, 4 }
0x1873   :  { %v7457_v19 = vsel %vm3608_vm9, %v3607_v57, %v3606_v60  ;;  %v3699_v22 = vsel %vm3593_vm4, %v3698_v0, %v3697_v3  ;;  %v3691_v41 = vsel %vm3602_vm7, %v3690_v8, %v3689_v62  ;;  %v3868_v50 = vsel %vm3593_vm4, %v3867_v29, %v3866_v33  ;;  %v5851_v62 = vld [vmem:[%s7643_s4 + $0x28] sm:$0xff]   ;;  %v5852_v8 = vld [vmem:[%s7643_s4 + $0x38] sm:$0xff]  }
0x1874   :  { %5779 = vmatpush3.bf16.msra.mxu0 %v5850_v55  ;;  %v7435_v55 = vunpack.c.l.b16 %v3546_v42  ;;  %v3701_v31 = vsel %vm3596_vm5, %v3700_v10, %v3699_v22  ;;  %v3694_v42 = vrot.slane %v7420_v44, 1  ;;  %v3882_v51 = vsel %vm3593_vm4, %v3881_v30, %v3880_v34 }
0x1875   :  { %5792 = vmatprep.subr.bf16.mxu0 %v5962_v4  ;;  %v3703_v48 = vsel %vm3599_vm6, %v3702_v27, %v3701_v31  ;;  %v3619_v2 = vsel %vm3602_vm7, %v3618_v20, %v3617_v37  ;;  %v3777_v53 = vsel %vm3596_vm5, %v3776_v32, %v3775_v39  ;;  %v3792_v56 = vrot.slane %v7425_v47, 6 }
0x1876   :  { %v3620_v21 = vrot.slane %v7435_v55, 3  ;;  %v3706_v52 = vrot.slane %v7435_v55, 2  ;;  %v3693_v36 = vsel %vm3605_vm8, %v3692_v38, %v3691_v41  ;;  %v3791_v58 = vsel %vm3596_vm5, %v3790_v40, %v3789_v46  ;;  %v5855_v41 = vld [vmem:[%s7645_s6 + $0x38] sm:$0xff]   ;;  %v5856_v46 = vld [vmem:[%s7645_s6 + $0x30] sm:$0xff]  }
0x1877   :  { %v3870_v59 = vrot.slane %v7402_v17, 7  ;;  %v3884_v60 = vrot.slane %v7425_v47, 7  ;;  %v3705_v63 = vsel %vm3602_vm7, %v3704_v43, %v3703_v48  ;;  %v3869_v0 = vsel %vm3596_vm5, %v7397_v9, %v3868_v50  ;;  %v5857_v48 = vld [vmem:[%s7645_s6 + $0x28] sm:$0xff]   ;;  %v5859_v50 = vld [vmem:[%s7645_s6 + $0x18] sm:$0xff]  }
0x1878   :  { %v3883_v1 = vsel %vm3596_vm5, %v7422_v45, %v3882_v51  ;;  %v3621_v3 = vsel %vm3605_vm8, %v3620_v21, %v3619_v2  ;;  %v3779_v5 = vsel %vm3599_vm6, %v3778_v49, %v3777_v53  ;;  %v3794_v7 = vrot.slane %v7433_v54, 5  ;;  %v5858_v49 = vld [vmem:[%s7645_s6 + $0x20] sm:$0xff]   ;;  %v5860_v51 = vld [vmem:[%s7645_s6 + $0x10] sm:$0xff]   ;;  %v5861_v2 = vld [vmem:[%s7645_s6 + $0x8] sm:$0xff]  }
0x1879   :  { %v3793_v47 = vsel %vm3599_vm6, %v3792_v56, %v3791_v58  ;;  %v3872_v10 = vrot.slane %v7406_v26, 6  ;;  %v3695_v9 = vsel %vm3608_vm9, %v3694_v42, %v3693_v36  ;;  %v3707_v12 = vsel %vm3605_vm8, %v3706_v52, %v3705_v63  ;;  %v5862_v52 = vld [vmem:[%s7645_s6] sm:$0xff]   ;;  %v5863_v53 = vld [vmem:[%s7647_s8 + $0x38] sm:$0xff]   ;;  %v5864_v56 = vld [vmem:[%s7647_s8 + $0x30] sm:$0xff]  }
0x187a   :  { %v3871_v45 = vsel %vm3599_vm6, %v3870_v59, %v3869_v0  ;;  %v3885_v13 = vsel %vm3599_vm6, %v3884_v60, %v3883_v1  ;;  %v3781_v20 = vsel %vm3602_vm7, %v3780_v6, %v3779_v5  ;;  %v3795_v26 = vsel %vm3602_vm7, %v3794_v7, %v3793_v47  ;;  %v5866_v36 = vld [vmem:[%s7647_s8 + $0x20] sm:$0xff]   ;;  %v5867_v58 = vld [vmem:[%s7647_s8 + $0x18] sm:$0xff]  }
0x187b   :  { %v3874_v54 = vrot.slane %v7412_v35, 5  ;;  %v3888_v21 = vrot.slane %v7435_v55, 5  ;;  %v3873_v24 = vsel %vm3602_vm7, %v3872_v10, %v3871_v45  ;;  %v3783_v28 = vsel %vm3605_vm8, %v3782_v16, %v3781_v20  ;;  %v4725_v45 = vld [vmem:[%s7644_s5] ss:$0 sm:$0xff] }
0x187c   :  { %v3876_v30 = vrot.slane %v7420_v44, 4 }
0x187d   :  { %v3875_v33 = vsel %vm3605_vm8, %v3874_v54, %v3873_v24  ;;  %v5870_v24 = vld [vmem:[%s7647_s8] sm:$0xff]  }
0x187e   :  { %v3877_v39 = vsel %vm3608_vm9, %v3876_v30, %v3875_v33 }
0x192f   :  { %v3510_v18 = vpop.f32.mrf.mxu0 }
0x1930   :  { %3515 = vst.msk [vmem:[#allocation4 + $0x3c] sm:$0xf] %vm308_vm2, %v3510_v18  ;;  %v3796_v18 = vrot.slane %v7435_v55, 4  ;;  %v3784_v55 = vrot.slane %v7420_v44, 3  ;;  %v5854_v44 = vld [vmem:[%s7643_s4 + $0x30] sm:$0xff]  }
0x1931   :  { %v5767_v25 = vpop.f32.mrf.mxu0 }
0x1932   :  { %v3887_v25 = vsel %vm3602_vm7, %v3886_v11, %v3885_v13  ;;  %v3797_v32 = vsel %vm3605_vm8, %v3796_v18, %v3795_v26  ;;  %v3785_v37 = vsel %vm3608_vm9, %v3784_v55, %v3783_v28 }
0x1933   :  { %v3889_v34 = vsel %vm3605_vm8, %v3888_v21, %v3887_v25  ;;  %v4726_v25 = vld [vmem:[%s7646_s7] ss:$0 sm:$0xff] }
0x1937   :  { %v3531_v57 = vld [vmem:[#allocation4 + $0x3c] sm:$0xf] }
0x1938   :  { %v3547_v61 = vpack.c.bf16 %v3531_v57, %v3531_v57  ;;  %v5865_v57 = vld [vmem:[%s7647_s8 + $0x28] sm:$0xff]  }
0x193a   :  { %v3588_v17 = vunpack.c.l.b16 %v3547_v61 }
0x193c   :  { %v3622_v14 = vrot.slane %v3588_v17, 2  ;;  %v3708_v15 = vrot.slane %v3588_v17, 1  ;;  %v3798_v29 = vrot.slane %v3588_v17, 3  ;;  %v3890_v31 = vrot.slane %v3588_v17, 4 }
0x193e   :  { %v3623_v22 = vsel %vm3608_vm9, %v3622_v14, %v3621_v3  ;;  %v3709_v23 = vsel %vm3608_vm9, %v3708_v15, %v3707_v12  ;;  %v3799_v38 = vsel %vm3608_vm9, %v3798_v29, %v3797_v32  ;;  %v3891_v40 = vsel %vm3608_vm9, %v3890_v31, %v3889_v34 }
0x193f   :  { %v3624_v35 = vpack.c.b16 %v3623_v22, %v7457_v19  ;;  %v3710_v27 = vpack.c.b16 %v3709_v23, %v3695_v9  ;;  %v5853_v19 = vld [vmem:[%s7643_s4 + $0x20] sm:$0xff]   ;;  %v3800_v42 = vpack.c.b16 %v3799_v38, %v3785_v37  ;;  %v3892_v43 = vpack.c.b16 %v3891_v40, %v3877_v39 }
0x1941   :  { %5773 = vmatmul.mubr.msk.bf16.vlgmr.msra.gmra.mxu1 %vm3637_vm10, %v3624_v35  ;;  %5781 = vmatmul.mubr.msk.bf16.vlgmr.msra.gmra.mxu0 %vm3637_vm10, %v3710_v27 }
0x1942   :  { %5785 = vmatpush3.bf16.msra.mxu1 %v5851_v62  ;;  %5793 = vmatpush3.bf16.msra.mxu0 %v5852_v8  ;;  %v5868_v62 = vld [vmem:[%s7647_s8 + $0x10] sm:$0xff]   ;;  %v5869_v8 = vld [vmem:[%s7647_s8 + $0x8] sm:$0xff]   ;;  %s5883_s8 = scalar_lea.vmem %s4200_s23, 256 }
0x1943   :  { %5786 = vmatprep.subr.bf16.mxu1 %v5962_v4  ;;  %5794 = vmatprep.subr.bf16.mxu0 %v5962_v4  ;;  %p5884_p5 = scmp.ne.s32.totalorder %s4200_s23, %s5883_s8  ;;  %p5889_p7 = scmp.lt.s32.totalorder %s5883_s8, %s5883_s8 }
0x1944   :  { %5788 = vmatprep.mubr.msk.bf16.mxu1 %vm5963_vm0, %v5962_v4  ;;  %5796 = vmatprep.mubr.msk.bf16.mxu0 %vm5963_vm0, %v5962_v4 }
0x1945   :  { %p5890_p8 = por %p5889_p7, %p5888_p6 }
0x1946   :  { %5787 = vmatpush3.bf16.msra.mxu1 %v5853_v19  ;;  %5795 = vmatpush3.bf16.msra.mxu0 %v5854_v44 }
0x1947   :  { %5800 = vmatprep.subr.bf16.mxu1 %v5962_v4  ;;  %5820 = vmatprep.subr.bf16.mxu0 %v5962_v4  ;;  %p5891_p9 = pnand %p5890_p8, %p5884_p5 }
0x1949   :  { %5789 = vmatmul.mubr.msk.bf16.vlgmr.msra.gmra.mxu1 %vm3637_vm10, %v3800_v42  ;;  %5797 = vmatmul.mubr.msk.bf16.vlgmr.msra.gmra.mxu0 %vm3637_vm10, %v3892_v43 }
0x194a   :  { %5801 = vmatpush3.bf16.msra.mxu1 %v5855_v41  ;;  %5816 = vmatprep.mubr.msk.bf16.mxu1 %vm5963_vm0, %v5962_v4 }
0x194b   :  { %5802 = vmatprep.subr.bf16.mxu1 %v5962_v4  ;;  %5836 = vmatprep.mubr.msk.bf16.mxu0 %vm5963_vm0, %v5962_v4 }
0x194c   :  { %5821 = vmatpush3.bf16.msra.mxu0 %v5863_v53 }
0x194d   :  { %5822 = vmatprep.subr.bf16.mxu0 %v5962_v4 }
0x194e   :  { %5803 = vmatpush3.bf16.msra.mxu1 %v5856_v46 }
0x194f   :  { %5804 = vmatprep.subr.bf16.mxu1 %v5962_v4 }
0x1950   :  { %5823 = vmatpush3.bf16.msra.mxu0 %v5864_v56 }
0x1951   :  { %5824 = vmatprep.subr.bf16.mxu0 %v5962_v4 }
0x1952   :  { %5805 = vmatpush3.bf16.msra.mxu1 %v5857_v48 }
0x1953   :  { %5806 = vmatprep.subr.bf16.mxu1 %v5962_v4 }
0x1954   :  { %5825 = vmatpush3.bf16.msra.mxu0 %v5865_v57 }
0x1955   :  { %5826 = vmatprep.subr.bf16.mxu0 %v5962_v4 }
0x1956   :  { %5807 = vmatpush3.bf16.msra.mxu1 %v5858_v49 }
0x1957   :  { %5808 = vmatprep.subr.bf16.mxu1 %v5962_v4 }
0x1958   :  { %5827 = vmatpush3.bf16.msra.mxu0 %v5866_v36 }
0x1959   :  { %5828 = vmatprep.subr.bf16.mxu0 %v5962_v4 }
0x195a   :  { %5809 = vmatpush3.bf16.msra.mxu1 %v5859_v50 }
0x195b   :  { %5810 = vmatprep.subr.bf16.mxu1 %v5962_v4 }
0x195c   :  { %5829 = vmatpush3.bf16.msra.mxu0 %v5867_v58 }
0x195d   :  { %5830 = vmatprep.subr.bf16.mxu0 %v5962_v4 }
0x195e   :  { %5811 = vmatpush3.bf16.msra.mxu1 %v5860_v51 }
0x195f   :  { %5812 = vmatprep.subr.bf16.mxu1 %v5962_v4 }
0x1960   :  { %5831 = vmatpush3.bf16.msra.mxu0 %v5868_v62 }
0x1961   :  { %5832 = vmatprep.subr.bf16.mxu0 %v5962_v4 }
0x1962   :  { %5813 = vmatpush3.bf16.msra.mxu1 %v5861_v2 }
0x1963   :  { %5814 = vmatprep.subr.bf16.mxu1 %v5962_v4 }
0x1964   :  { %5833 = vmatpush3.bf16.msra.mxu0 %v5869_v8 }
0x1965   :  { %5834 = vmatprep.subr.bf16.mxu0 %v5962_v4 }
0x1966   :  { %5815 = vmatpush3.bf16.msra.mxu1 %v5862_v52 }
0x1968   :  { %5835 = vmatpush3.bf16.msra.mxu0 %v5870_v24 }
0x1a01   :  { %v3675_v59 = vpop.f32.mrf.mxu1  ;;  %v3760_v60 = vpop.f32.mrf.mxu0 }
0x1a02   :  { %v3761_v6 = vadd.f32 %v3760_v60, %v3675_v59 }
0x1a03   :  { %v5774_v61 = vpop.f32.mrf.mxu1  ;;  %v5782_v63 = vpop.f32.mrf.mxu0 }
0x1a05   :  { %v3678_v0 = vpop.f32.mrf.mxu1  ;;  %v3763_v1 = vpop.f32.mrf.mxu0 }
0x1a06   :  { %v3764_v9 = vadd.f32 %v3763_v1, %v3678_v0 }
0x1a07   :  { %v5775_v3 = vpop.f32.mrf.mxu1  ;;  %v5783_v5 = vpop.f32.mrf.mxu0 }
0x1a09   :  { %v3850_v7 = vpop.f32.mrf.mxu1  ;;  %v3942_v17 = vpop.f32.mrf.mxu0 }
0x1a0a   :  { %v3857_v47 = vadd.f32 %v3850_v7, %v3761_v6 }
0x1a0b   :  { %v5790_v10 = vpop.f32.mrf.mxu1  ;;  %v5798_v11 = vpop.f32.mrf.mxu0 }
0x1a0c   :  { %v3949_v12 = vadd.f32 %v3942_v17, %v3857_v47 }
0x1a0d   :  { %v3853_v13 = vpop.f32.mrf.mxu1  ;;  %v3945_v14 = vpop.f32.mrf.mxu0 }
0x1a0e   :  { %v3858_v15 = vadd.f32 %v3853_v13, %v3764_v9  ;;  %v3958_v20 = vadd.f32 %v4725_v45, %v3949_v12 }
0x1a0f   :  { %v5791_v16 = vpop.f32.mrf.mxu1  ;;  %v5799_v18 = vpop.f32.mrf.mxu0 }
0x1a10   :  { %v3950_v26 = vadd.f32 %v3945_v14, %v3858_v15  ;;  %v3960_v21 = vmax.f32 %v3958_v20, 0.0 }
0x1a12   :  { %v3959_v54 = vadd.f32 %v4725_v45, %v3950_v26 }
0x1a14   :  { %v3961_v22 = vmax.f32 %v3959_v54, 0.0 }
0x1a16   :  { %v3962_v23 = vpack.c.bf16 %v3961_v22, %v3960_v21 }
0x1a18   :  { %5817 = vmatmul.mubr.bf16.vlgmr.msra.gmra.mxu1 %v3962_v23 }
0x1ad8   :  { %v4068_v35 = vpop.f32.mrf.mxu1 }
0x1ad9   :  { %v4069_v27 = vadd.f32 %v4726_v25, %v4068_v35 }
0x1ada   :  { %v5818_v55 = vpop.f32.mrf.mxu1 }
0x1adb   :  { %v4075_v28 = vmax.f32 %v4069_v27, 0.0 }
0x1adc   :  { %v4071_v29 = vpop.f32.mrf.mxu1 }
0x1add   :  { %4077 = vst [vmem:[#allocation7] sm:$0xff] %v4075_v28  ;;  %v4072_v30 = vadd.f32 %v4726_v25, %v4071_v29 }
0x1ade   :  { %v5819_v31 = vpop.f32.mrf.mxu1 }
0x1adf   :  { %v4076_v32 = vmax.f32 %v4072_v30, 0.0 }
0x1ae1   :  { %4078 = vst [vmem:[#allocation7 + $0x8] sm:$0xff] %v4076_v32  ;;  %v4079_v4 = vpack.c.bf16 %v4076_v32, %v4075_v28 }
0x1ae3   :  { %5837 = vmatmul.mubr.bf16.vlgmr.msra.gmra.mxu0 %v4079_v4 }
0x1ae4   :  { %5894 = shalt.err (!%p5891_p9)
}
0x1ae5   :  { %s5965_s7 = smov 128   ;;  %s5966_s2 = smov 8   ;;  %v4735_v33 = vld [vmem:[%s7648_s9] ss:$0 sm:$0xff] }
0x1ae6   :  { %4205 = dma.vmem_to_hbm [thread:$0]  %s4200_s23, 256, %s7649_s10, [#allocation8], %s5965_s7, %s5965_s7, %s5966_s2  }
0x1ae7   :  { %s5967_s27 = smov [#allocation9]  }
0x1ae8   :  { %s4211_s28 = sshll.u32 %s5967_s27, 4  ;;  %s4212_s28 = int_to_ptr.vmem [resolvable:$true] %s4211_s28 }
0x1ae9   :  { %s5903_s29 = scalar_lea.vmem %s4212_s28, 256  ;;  %p5908_p11 = scmp.lt.s32.totalorder %s4212_s28, %s4212_s28 }
0x1aea   :  { %p5904_p10 = scmp.ne.s32.totalorder %s4212_s28, %s5903_s29  ;;  %p5909_p12 = scmp.lt.s32.totalorder %s5903_s29, %s5903_s29 }
0x1aec   :  { %p5910_p13 = por %p5909_p12, %p5908_p11 }
0x1aee   :  { %p5911_p0 = pnand %p5910_p13, %p5904_p10 }
0x1ba3   :  { %v4185_v34 = vpop.f32.mrf.mxu0 }
0x1ba4   :  { %v4186_v19 = vadd.f32 %v4735_v33, %v4185_v34 }
0x1ba5   :  { %v5838_v44 = vpop.f32.mrf.mxu0 }
0x1ba6   :  { %4192 = vst [vmem:[#allocation9] sm:$0xff] %v4186_v19 }
0x1ba7   :  { %v4188_v37 = vpop.f32.mrf.mxu0 }
0x1ba8   :  { %v4189_v38 = vadd.f32 %v4735_v33, %v4188_v37 }
0x1ba9   :  { %v5839_v39 = vpop.f32.mrf.mxu0 }
0x1baa   :  { %4193 = vst [vmem:[#allocation9 + $0x8] sm:$0xff] %v4189_v38 }
0x1bab   :  { %5914 = shalt.err (!%p5911_p0)
}
0x1bac   :  { %4217 = dma.vmem_to_hbm [thread:$0]  %s4212_s28, 256, %s7650_s11, [#allocation10], %s5965_s7, %s5965_s7, %s5966_s2  }
0x1bad   :  { %5957 = dma.done.wait [#allocation8], 256  }
0x1bae   :  { %5958 = vsyncadd [#allocation8], 4294967040 }
0x1baf   :  { %5959 = dma.done.wait [#allocation10], 256  }
0x1bb0   :  { %5960 = vsyncadd [#allocation10], 4294967040 }
0x1bb1   :  { %4224 = vsyncpa [#allocation8], 1 }
0x1bb2   :  { %4225 = vsyncpa [#allocation10], 1 }
0x1bb3   :  { %4226 = vsyncmov [#allocation3] }
0x1bb6   :  { %s4227_s30 = vpop.sfrf %4226 }
0x1bb7   :  { %p4744_p1 = scmp.ne.s32.totalorder %s4227_s30, 0 }
0x1bb9   :  { %4231 = shalt.err (%p4744_p1)  }
0x1bba   :  { %4233 = vsyncmov [#allocation3 + $0x1] }
0x1bbd   :  { %s4234_s12 = vpop.sfrf %4233 }
0x1bbe   :  { %p4745_p2 = scmp.ne.s32.totalorder %s4234_s12, 0 }
0x1bc0   :  { %4238 = shalt.err (%p4745_p2)  }

// kernel: tpu_custom_call.1
= control target key start
LH: loop header
LB: loop body
LE: loop exit
PB: predicated region body
PF: predicated region fallthrough
CT: control target
= control target key end

     0   :  { %s7639_s0 = inlined_call_operand.vmem [shape: s32[16], index: 0, kind: input, shape index: {}]   ;;  %s7640_s1 = inlined_call_operand.vmem [shape: f32[16,4,16], index: 1, kind: input, shape index: {}]   ;;  %s7641_s2 = inlined_call_operand.vmem [shape: f32[16,128,32], index: 2, kind: input, shape index: {}]   ;;  %s7642_s3 = inlined_call_operand.vmem [shape: f32[2,16,128], index: 3, kind: input, shape index: {}]   ;;  %s7643_s4 = inlined_call_operand.vmem [shape: bf16[4,32,128], index: 4, kind: input, shape index: {}]   ;;  %s7644_s5 = inlined_call_operand.vmem [shape: f32[1,128], index: 5, kind: input, shape index: {}]   ;;  %s7645_s6 = inlined_call_operand.vmem [shape: bf16[128,128], index: 6, kind: input, shape index: {}]   ;;  %s7646_s7 = inlined_call_operand.vmem [shape: f32[1,128], index: 7, kind: input, shape index: {}]   ;;  %s7647_s8 = inlined_call_operand.vmem [shape: bf16[128,128], index: 8, kind: input, shape index: {}]   ;;  %s7648_s9 = inlined_call_operand.vmem [shape: f32[1,128], index: 9, kind: input, shape index: {}]   ;;  %s7649_s10 = inlined_call_operand.hbm [shape: f32[16,128], index: 10, kind: output, shape index: {0}]   ;;  %s7650_s11 = inlined_call_operand.hbm [shape: f32[16,128], index: 11, kind: output, shape index: {1}]  }
   0x1   :  { %s17_s19 = sshll.u32 %s7639_s0, 4  ;;  %s18_s19 = int_to_ptr.vmem [resolvable:$true] %s17_s19 }
   0x2   :  { %s5871_s20 = scalar_lea.vmem %s18_s19, 16  ;;  %p5876_p1 = scmp.lt.s32.totalorder %s18_s19, %s18_s19 }
   0x3   :  { %p5872_p0 = scmp.ne.s32.totalorder %s18_s19, %s5871_s20  ;;  %p5877_p2 = scmp.lt.s32.totalorder %s5871_s20, %s5871_s20 }
   0x5   :  { %p5878_p3 = por %p5877_p2, %p5876_p1 }
   0x7   :  { %p5879_p4 = pnand %p5878_p3, %p5872_p0 }
   0x9   :  { %5882 = shalt.err (!%p5879_p4)  }
   0xa   :  { %s5961_s21 = smov [#allocation6]  }
   0xb   :  { %20 = dma.vmem_to_smem %s18_s19, 16, %s5961_s21, [#allocation5] }
   0xc   :  { %5923 = dma.done.wait [#allocation5], 16 }
   0xd   :  { %5924 = vsyncadd [#allocation5], 4294967280 }
   0xe   :  { %22 = sfence }
   0xf   :  { %23 = vsyncpa [#allocation8], 0 }
  0x10   :  { %24 = vsyncpa [#allocation10], 0  ;;  %s43_s22 = sld [smem:[#allocation6]] }
  0x16   :  { %s4399_s23 = sshll.u32 %s43_s22, 4 }
  0x17   :  { %s45_s0 = scalar_lea.vmem %s7642_s3, %s4399_s23 }
  0x18   :  { %v79_v0 = vld [vmem:[%s45_s0] sm:$0xff]  ;;  %v81_v1 = vld [vmem:[%s45_s0 + $0x8] sm:$0xff] }
  0x19   :  { %90 = vsyncadd [#allocation3], 256 }
  0x1a   :  { %5925 = dma.done.wait [#allocation3], 256 }
  0x1b   :  { %5926 = vsyncadd [#allocation3], 4294967040  ;;  %s4400_s26 = sld [smem:[#allocation6 + $0x1]] }
  0x21   :  { %s4401_s27 = sshll.u32 %s4400_s26, 4 }
  0x22   :  { %s97_s30 = scalar_lea.vmem %s7642_s3, %s4401_s27 }
  0x23   :  { %v6037_v2 = vld [vmem:[%s97_s30] sm:$0xff]  ;;  %v6039_v3 = vld [vmem:[%s97_s30 + $0x8] sm:$0xff] }
  0x24   :  { %144 = vsyncadd [#allocation3 + $0x1], 256  ;;  %v5962_v4 = vmov 0.0   ;;  %vm5963_vm0 = vmmov 0   ;;  %v145_v5 = vld [vmem:[%s7640_s1] sm:$0xf] }
  0x25   :  { %5096 = vmatprep.subr.mxu1 %v5962_v4  ;;  %5100 = vmatprep.mubr.msk.f32.mxu1 %vm5963_vm0, %v5962_v4  ;;  %vm148_vm1 = vcmask 130048   ;;  %v237_v6 = vld [vmem:[%s7641_s2 + $0x78] sm:$0xff]  ;;  %v236_v7 = vld [vmem:[%s7641_s2 + $0x70] sm:$0xff]  ;;  %v235_v8 = vld [vmem:[%s7641_s2 + $0x68] sm:$0xff]  ;;  %vm308_vm2 = vcmask 257024  }
  0x26   :  { %5097 = vmatpush3.msra.mxu1 %v81_v1  ;;  %v234_v9 = vld [vmem:[%s7641_s2 + $0x60] sm:$0xff]  ;;  %v233_v10 = vld [vmem:[%s7641_s2 + $0x58] sm:$0xff]  ;;  %v232_v11 = vld [vmem:[%s7641_s2 + $0x50] sm:$0xff] }
  0x27   :  { %5098 = vmatprep.subr.mxu1 %v5962_v4  ;;  %v231_v12 = vld [vmem:[%s7641_s2 + $0x48] sm:$0xff]  ;;  %v230_v13 = vld [vmem:[%s7641_s2 + $0x40] sm:$0xff]  ;;  %v229_v14 = vld [vmem:[%s7641_s2 + $0x38] sm:$0xff] }
  0x28   :  { %5099 = vmatpush3.msra.mxu1 %v79_v0  ;;  %v228_v15 = vld [vmem:[%s7641_s2 + $0x30] sm:$0xff]  ;;  %v227_v16 = vld [vmem:[%s7641_s2 + $0x28] sm:$0xff]  ;;  %v226_v17 = vld [vmem:[%s7641_s2 + $0x20] sm:$0xff] }
  0x29   :  { %5101 = vmatmul.mubr.msk.f32.vlgmr.msra.gmra.mxu1 %vm148_vm1, %v145_v5  ;;  %5103 = vmatprep.subr.mxu1 %v5962_v4  ;;  %v225_v18 = vld [vmem:[%s7641_s2 + $0x18] sm:$0xff]  ;;  %v224_v19 = vld [vmem:[%s7641_s2 + $0x10] sm:$0xff]  ;;  %v223_v20 = vld [vmem:[%s7641_s2 + $0x8] sm:$0xff] }
  0x2a   :  { %5104 = vmatpush3.msra.mxu1 %v237_v6  ;;  %5135 = vmatprep.mubr.msk.f32.mxu1 %vm5963_vm0, %v5962_v4  ;;  %v222_v21 = vld [vmem:[%s7641_s2] sm:$0xff] }
  0x2b   :  { %5105 = vmatprep.subr.mxu1 %v5962_v4 }
  0x2c   :  { %5106 = vmatpush3.msra.mxu1 %v236_v7 }
  0x2d   :  { %5107 = vmatprep.subr.mxu1 %v5962_v4 }
  0x2e   :  { %5108 = vmatpush3.msra.mxu1 %v235_v8 }
  0x2f   :  { %5109 = vmatprep.subr.mxu1 %v5962_v4 }
  0x30   :  { %5110 = vmatpush3.msra.mxu1 %v234_v9 }
  0x31   :  { %5111 = vmatprep.subr.mxu1 %v5962_v4 }
  0x32   :  { %5112 = vmatpush3.msra.mxu1 %v233_v10 }
  0x33   :  { %5113 = vmatprep.subr.mxu1 %v5962_v4 }
  0x34   :  { %5114 = vmatpush3.msra.mxu1 %v232_v11 }
  0x35   :  { %5115 = vmatprep.subr.mxu1 %v5962_v4 }
  0x36   :  { %5116 = vmatpush3.msra.mxu1 %v231_v12 }
  0x37   :  { %5117 = vmatprep.subr.mxu1 %v5962_v4 }
  0x38   :  { %5118 = vmatpush3.msra.mxu1 %v230_v13 }
  0x39   :  { %5119 = vmatprep.subr.mxu1 %v5962_v4 }
  0x3a   :  { %5120 = vmatpush3.msra.mxu1 %v229_v14 }
  0x3b   :  { %5121 = vmatprep.subr.mxu1 %v5962_v4 }
  0x3c   :  { %5122 = vmatpush3.msra.mxu1 %v228_v15 }
  0x3d   :  { %5123 = vmatprep.subr.mxu1 %v5962_v4 }
  0x3e   :  { %5124 = vmatpush3.msra.mxu1 %v227_v16 }
  0x3f   :  { %5125 = vmatprep.subr.mxu1 %v5962_v4 }
  0x40   :  { %5126 = vmatpush3.msra.mxu1 %v226_v17 }
  0x41   :  { %5127 = vmatprep.subr.mxu1 %v5962_v4 }
  0x42   :  { %5128 = vmatpush3.msra.mxu1 %v225_v18 }
  0x43   :  { %5129 = vmatprep.subr.mxu1 %v5962_v4 }
  0x44   :  { %5130 = vmatpush3.msra.mxu1 %v224_v19 }
  0x45   :  { %5131 = vmatprep.subr.mxu1 %v5962_v4 }
  0x46   :  { %5132 = vmatpush3.msra.mxu1 %v223_v20 }
  0x47   :  { %5133 = vmatprep.subr.mxu1 %v5962_v4 }
  0x48   :  { %5134 = vmatpush3.msra.mxu1 %v222_v21 }
  0xe9   :  { %v218_v22 = vpop.f32.mrf.mxu1 }
  0xea   :  { %5136 = vmatmul.mubr.f32.vlgmr.msra.gmra.mxu1 %v218_v22 }
  0xeb   :  { %v5102_v23 = vpop.f32.mrf.mxu1 }
 0x1aa   :  { %v304_v24 = vpop.f32.mrf.mxu1 }
 0x1ab   :  { %309 = vst.msk [vmem:[#allocation4] sm:$0xf] %vm308_vm2, %v304_v24 }
 0x1ac   :  { %v5137_v25 = vpop.f32.mrf.mxu1 }
 0x1ad   :  { %5927 = dma.done.wait [#allocation3 + $0x1], 256 }
 0x1ae   :  { %5928 = vsyncadd [#allocation3 + $0x1], 4294967040  ;;  %s4403_s0 = sld [smem:[#allocation6 + $0x2]] }
 0x1b4   :  { %s4404_s26 = sshll.u32 %s4403_s0, 4 }
 0x1b5   :  { %s315_s29 = scalar_lea.vmem %s7642_s3, %s4404_s26 }
 0x1b6   :  { %v6119_v26 = vld [vmem:[%s315_s29] sm:$0xff]  ;;  %v6121_v27 = vld [vmem:[%s315_s29 + $0x8] sm:$0xff] }
 0x1b7   :  { %360 = vsyncadd [#allocation3], 256  ;;  %5138 = vmatprep.subr.mxu0 %v5962_v4  ;;  %5142 = vmatprep.mubr.msk.f32.mxu0 %vm5963_vm0, %v5962_v4  ;;  %v4405_v28 = vld [vmem:[%s7640_s1 + $0x4] sm:$0xf]  ;;  %v4422_v29 = vld [vmem:[%s7641_s2 + $0xf8] sm:$0xff] }
 0x1b8   :  { %5139 = vmatpush3.msra.mxu0 %v6039_v3  ;;  %v4421_v30 = vld [vmem:[%s7641_s2 + $0xf0] sm:$0xff]  ;;  %v4420_v31 = vld [vmem:[%s7641_s2 + $0xe8] sm:$0xff]  ;;  %v4419_v32 = vld [vmem:[%s7641_s2 + $0xe0] sm:$0xff] }
 0x1b9   :  { %5140 = vmatprep.subr.mxu0 %v5962_v4  ;;  %v4418_v33 = vld [vmem:[%s7641_s2 + $0xd8] sm:$0xff]  ;;  %v4417_v34 = vld [vmem:[%s7641_s2 + $0xd0] sm:$0xff]  ;;  %v4416_v35 = vld [vmem:[%s7641_s2 + $0xc8] sm:$0xff] }
 0x1ba   :  { %5141 = vmatpush3.msra.mxu0 %v6037_v2  ;;  %v4415_v36 = vld [vmem:[%s7641_s2 + $0xc0] sm:$0xff]  ;;  %v4414_v37 = vld [vmem:[%s7641_s2 + $0xb8] sm:$0xff]  ;;  %v4413_v38 = vld [vmem:[%s7641_s2 + $0xb0] sm:$0xff] }
 0x1bb   :  { %5143 = vmatmul.mubr.msk.f32.vlgmr.msra.gmra.mxu0 %vm148_vm1, %v4405_v28  ;;  %5145 = vmatprep.subr.mxu0 %v5962_v4  ;;  %v4412_v39 = vld [vmem:[%s7641_s2 + $0xa8] sm:$0xff]  ;;  %v4411_v40 = vld [vmem:[%s7641_s2 + $0xa0] sm:$0xff]  ;;  %v4410_v41 = vld [vmem:[%s7641_s2 + $0x98] sm:$0xff] }
 0x1bc   :  { %5146 = vmatpush3.msra.mxu0 %v4422_v29  ;;  %5177 = vmatprep.mubr.msk.f32.mxu0 %vm5963_vm0, %v5962_v4  ;;  %v4409_v42 = vld [vmem:[%s7641_s2 + $0x90] sm:$0xff]  ;;  %v4408_v43 = vld [vmem:[%s7641_s2 + $0x88] sm:$0xff]  ;;  %v4407_v44 = vld [vmem:[%s7641_s2 + $0x80] sm:$0xff] }
 0x1bd   :  { %5147 = vmatprep.subr.mxu0 %v5962_v4 }
 0x1be   :  { %5148 = vmatpush3.msra.mxu0 %v4421_v30 }
 0x1bf   :  { %5149 = vmatprep.subr.mxu0 %v5962_v4 }
 0x1c0   :  { %5150 = vmatpush3.msra.mxu0 %v4420_v31 }
 0x1c1   :  { %5151 = vmatprep.subr.mxu0 %v5962_v4 }
 0x1c2   :  { %5152 = vmatpush3.msra.mxu0 %v4419_v32 }
 0x1c3   :  { %5153 = vmatprep.subr.mxu0 %v5962_v4 }
 0x1c4   :  { %5154 = vmatpush3.msra.mxu0 %v4418_v33 }
 0x1c5   :  { %5155 = vmatprep.subr.mxu0 %v5962_v4 }
 0x1c6   :  { %5156 = vmatpush3.msra.mxu0 %v4417_v34 }
 0x1c7   :  { %5157 = vmatprep.subr.mxu0 %v5962_v4 }
 0x1c8   :  { %5158 = vmatpush3.msra.mxu0 %v4416_v35 }
 0x1c9   :  { %5159 = vmatprep.subr.mxu0 %v5962_v4 }
 0x1ca   :  { %5160 = vmatpush3.msra.mxu0 %v4415_v36 }
 0x1cb   :  { %5161 = vmatprep.subr.mxu0 %v5962_v4 }
 0x1cc   :  { %5162 = vmatpush3.msra.mxu0 %v4414_v37 }
 0x1cd   :  { %5163 = vmatprep.subr.mxu0 %v5962_v4 }
 0x1ce   :  { %5164 = vmatpush3.msra.mxu0 %v4413_v38 }
 0x1cf   :  { %5165 = vmatprep.subr.mxu0 %v5962_v4 }
 0x1d0   :  { %5166 = vmatpush3.msra.mxu0 %v4412_v39 }
 0x1d1   :  { %5167 = vmatprep.subr.mxu0 %v5962_v4 }
 0x1d2   :  { %5168 = vmatpush3.msra.mxu0 %v4411_v40 }
 0x1d3   :  { %5169 = vmatprep.subr.mxu0 %v5962_v4 }
 0x1d4   :  { %5170 = vmatpush3.msra.mxu0 %v4410_v41 }
 0x1d5   :  { %5171 = vmatprep.subr.mxu0 %v5962_v4 }
 0x1d6   :  { %5172 = vmatpush3.msra.mxu0 %v4409_v42 }
 0x1d7   :  { %5173 = vmatprep.subr.mxu0 %v5962_v4 }
 0x1d8   :  { %5174 = vmatpush3.msra.mxu0 %v4408_v43 }
 0x1d9   :  { %5175 = vmatprep.subr.mxu0 %v5962_v4 }
 0x1da   :  { %5176 = vmatpush3.msra.mxu0 %v4407_v44 }
 0x27b   :  { %v434_v45 = vpop.f32.mrf.mxu0 }
 0x27c   :  { %5178 = vmatmul.mubr.f32.vlgmr.msra.gmra.mxu0 %v434_v45 }
 0x27d   :  { %v5144_v46 = vpop.f32.mrf.mxu0 }
 0x33c   :  { %v521_v47 = vpop.f32.mrf.mxu0 }
 0x33d   :  { %526 = vst.msk [vmem:[#allocation4 + $0x4] sm:$0xf] %vm308_vm2, %v521_v47 }
 0x33e   :  { %v5179_v48 = vpop.f32.mrf.mxu0 }
 0x33f   :  { %5929 = dma.done.wait [#allocation3], 256 }
 0x340   :  { %5930 = vsyncadd [#allocation3], 4294967040  ;;  %s4423_s25 = sld [smem:[#allocation6 + $0x3]] }
 0x346   :  { %s4424_s0 = sshll.u32 %s4423_s25, 4 }
 0x347   :  { %s532_s28 = scalar_lea.vmem %s7642_s3, %s4424_s0 }
 0x348   :  { %v6203_v49 = vld [vmem:[%s532_s28] sm:$0xff]  ;;  %v6205_v50 = vld [vmem:[%s532_s28 + $0x8] sm:$0xff] }
 0x349   :  { %577 = vsyncadd [#allocation3 + $0x1], 256  ;;  %5180 = vmatprep.subr.mxu1 %v5962_v4  ;;  %5184 = vmatprep.mubr.msk.f32.mxu1 %vm5963_vm0, %v5962_v4  ;;  %v4425_v51 = vld [vmem:[%s7640_s1 + $0x8] sm:$0xf]  ;;  %v4442_v52 = vld [vmem:[%s7641_s2 + $0x178] sm:$0xff] }
 0x34a   :  { %5181 = vmatpush3.msra.mxu1 %v6121_v27  ;;  %v4441_v53 = vld [vmem:[%s7641_s2 + $0x170] sm:$0xff]  ;;  %v4440_v54 = vld [vmem:[%s7641_s2 + $0x168] sm:$0xff]  ;;  %v4439_v55 = vld [vmem:[%s7641_s2 + $0x160] sm:$0xff] }
 0x34b   :  { %5182 = vmatprep.subr.mxu1 %v5962_v4  ;;  %v4438_v56 = vld [vmem:[%s7641_s2 + $0x158] sm:$0xff]  ;;  %v4437_v57 = vld [vmem:[%s7641_s2 + $0x150] sm:$0xff]  ;;  %v4436_v58 = vld [vmem:[%s7641_s2 + $0x148] sm:$0xff] }
 0x34c   :  { %5183 = vmatpush3.msra.mxu1 %v6119_v26  ;;  %v4435_v59 = vld [vmem:[%s7641_s2 + $0x140] sm:$0xff]  ;;  %v4434_v60 = vld [vmem:[%s7641_s2 + $0x138] sm:$0xff]  ;;  %v4433_v61 = vld [vmem:[%s7641_s2 + $0x130] sm:$0xff] }
 0x34d   :  { %5185 = vmatmul.mubr.msk.f32.vlgmr.msra.gmra.mxu1 %vm148_vm1, %v4425_v51  ;;  %5187 = vmatprep.subr.mxu1 %v5962_v4  ;;  %v4432_v62 = vld [vmem:[%s7641_s2 + $0x128] sm:$0xff]  ;;  %v4431_v63 = vld [vmem:[%s7641_s2 + $0x120] sm:$0xff]  ;;  %v4430_v0 = vld [vmem:[%s7641_s2 + $0x118] sm:$0xff] }
 0x34e   :  { %5188 = vmatpush3.msra.mxu1 %v4442_v52  ;;  %5219 = vmatprep.mubr.msk.f32.mxu1 %vm5963_vm0, %v5962_v4  ;;  %v4429_v1 = vld [vmem:[%s7641_s2 + $0x110] sm:$0xff]  ;;  %v4428_v2 = vld [vmem:[%s7641_s2 + $0x108] sm:$0xff]  ;;  %v4427_v3 = vld [vmem:[%s7641_s2 + $0x100] sm:$0xff] }
 0x34f   :  { %5189 = vmatprep.subr.mxu1 %v5962_v4 }
 0x350   :  { %5190 = vmatpush3.msra.mxu1 %v4441_v53 }
 0x351   :  { %5191 = vmatprep.subr.mxu1 %v5962_v4 }
 0x352   :  { %5192 = vmatpush3.msra.mxu1 %v4440_v54 }
 0x353   :  { %5193 = vmatprep.subr.mxu1 %v5962_v4 }
 0x354   :  { %5194 = vmatpush3.msra.mxu1 %v4439_v55 }
 0x355   :  { %5195 = vmatprep.subr.mxu1 %v5962_v4 }
 0x356   :  { %5196 = vmatpush3.msra.mxu1 %v4438_v56 }
 0x357   :  { %5197 = vmatprep.subr.mxu1 %v5962_v4 }
 0x358   :  { %5198 = vmatpush3.msra.mxu1 %v4437_v57 }
 0x359   :  { %5199 = vmatprep.subr.mxu1 %v5962_v4 }
 0x35a   :  { %5200 = vmatpush3.msra.mxu1 %v4436_v58 }
 0x35b   :  { %5201 = vmatprep.subr.mxu1 %v5962_v4 }
 0x35c   :  { %5202 = vmatpush3.msra.mxu1 %v4435_v59 }
 0x35d   :  { %5203 = vmatprep.subr.mxu1 %v5962_v4 }
 0x35e   :  { %5204 = vmatpush3.msra.mxu1 %v4434_v60 }
 0x35f   :  { %5205 = vmatprep.subr.mxu1 %v5962_v4 }
 0x360   :  { %5206 = vmatpush3.msra.mxu1 %v4433_v61 }
 0x361   :  { %5207 = vmatprep.subr.mxu1 %v5962_v4 }
 0x362   :  { %5208 = vmatpush3.msra.mxu1 %v4432_v62 }
 0x363   :  { %5209 = vmatprep.subr.mxu1 %v5962_v4 }
 0x364   :  { %5210 = vmatpush3.msra.mxu1 %v4431_v63 }
 0x365   :  { %5211 = vmatprep.subr.mxu1 %v5962_v4 }
 0x366   :  { %5212 = vmatpush3.msra.mxu1 %v4430_v0 }
 0x367   :  { %5213 = vmatprep.subr.mxu1 %v5962_v4 }
 0x368   :  { %5214 = vmatpush3.msra.mxu1 %v4429_v1 }
 0x369   :  { %5215 = vmatprep.subr.mxu1 %v5962_v4 }
 0x36a   :  { %5216 = vmatpush3.msra.mxu1 %v4428_v2 }
 0x36b   :  { %5217 = vmatprep.subr.mxu1 %v5962_v4 }
 0x36c   :  { %5218 = vmatpush3.msra.mxu1 %v4427_v3 }
 0x40d   :  { %v651_v5 = vpop.f32.mrf.mxu1 }
 0x40e   :  { %5220 = vmatmul.mubr.f32.vlgmr.msra.gmra.mxu1 %v651_v5 }
 0x40f   :  { %v5186_v6 = vpop.f32.mrf.mxu1 }
 0x4ce   :  { %v738_v7 = vpop.f32.mrf.mxu1 }
 0x4cf   :  { %743 = vst.msk [vmem:[#allocation4 + $0x8] sm:$0xf] %vm308_vm2, %v738_v7 }
 0x4d0   :  { %v5221_v8 = vpop.f32.mrf.mxu1 }
 0x4d1   :  { %5931 = dma.done.wait [#allocation3 + $0x1], 256 }
 0x4d2   :  { %5932 = vsyncadd [#allocation3 + $0x1], 4294967040  ;;  %s4443_s24 = sld [smem:[#allocation6 + $0x4]] }
 0x4d8   :  { %s4444_s25 = sshll.u32 %s4443_s24, 4 }
 0x4d9   :  { %s749_s27 = scalar_lea.vmem %s7642_s3, %s4444_s25 }
 0x4da   :  { %v6287_v9 = vld [vmem:[%s749_s27] sm:$0xff]  ;;  %v6289_v10 = vld [vmem:[%s749_s27 + $0x8] sm:$0xff] }
 0x4db   :  { %794 = vsyncadd [#allocation3], 256  ;;  %5222 = vmatprep.subr.mxu0 %v5962_v4  ;;  %5226 = vmatprep.mubr.msk.f32.mxu0 %vm5963_vm0, %v5962_v4  ;;  %v4445_v11 = vld [vmem:[%s7640_s1 + $0xc] sm:$0xf]  ;;  %v4462_v12 = vld [vmem:[%s7641_s2 + $0x1f8] sm:$0xff] }
 0x4dc   :  { %5223 = vmatpush3.msra.mxu0 %v6205_v50  ;;  %v4461_v13 = vld [vmem:[%s7641_s2 + $0x1f0] sm:$0xff]  ;;  %v4460_v14 = vld [vmem:[%s7641_s2 + $0x1e8] sm:$0xff]  ;;  %v4459_v15 = vld [vmem:[%s7641_s2 + $0x1e0] sm:$0xff] }
 0x4dd   :  { %5224 = vmatprep.subr.mxu0 %v5962_v4  ;;  %v4458_v16 = vld [vmem:[%s7641_s2 + $0x1d8] sm:$0xff]  ;;  %v4457_v17 = vld [vmem:[%s7641_s2 + $0x1d0] sm:$0xff]  ;;  %v4456_v18 = vld [vmem:[%s7641_s2 + $0x1c8] sm:$0xff] }
 0x4de   :  { %5225 = vmatpush3.msra.mxu0 %v6203_v49  ;;  %v4455_v19 = vld [vmem:[%s7641_s2 + $0x1c0] sm:$0xff]  ;;  %v4454_v20 = vld [vmem:[%s7641_s2 + $0x1b8] sm:$0xff]  ;;  %v4453_v21 = vld [vmem:[%s7641_s2 + $0x1b0] sm:$0xff] }
 0x4df   :  { %5227 = vmatmul.mubr.msk.f32.vlgmr.msra.gmra.mxu0 %vm148_vm1, %v4445_v11  ;;  %5229 = vmatprep.subr.mxu0 %v5962_v4  ;;  %v4452_v22 = vld [vmem:[%s7641_s2 + $0x1a8] sm:$0xff]  ;;  %v4451_v23 = vld [vmem:[%s7641_s2 + $0x1a0] sm:$0xff]  ;;  %v4450_v24 = vld [vmem:[%s7641_s2 + $0x198] sm:$0xff] }
 0x4e0   :  { %5230 = vmatpush3.msra.mxu0 %v4462_v12  ;;  %5261 = vmatprep.mubr.msk.f32.mxu0 %vm5963_vm0, %v5962_v4  ;;  %v4449_v25 = vld [vmem:[%s7641_s2 + $0x190] sm:$0xff]  ;;  %v4448_v26 = vld [vmem:[%s7641_s2 + $0x188] sm:$0xff]  ;;  %v4447_v27 = vld [vmem:[%s7641_s2 + $0x180] sm:$0xff] }
 0x4e1   :  { %5231 = vmatprep.subr.mxu0 %v5962_v4 }
 0x4e2   :  { %5232 = vmatpush3.msra.mxu0 %v4461_v13 }
 0x4e3   :  { %5233 = vmatprep.subr.mxu0 %v5962_v4 }
 0x4e4   :  { %5234 = vmatpush3.msra.mxu0 %v4460_v14 }
 0x4e5   :  { %5235 = vmatprep.subr.mxu0 %v5962_v4 }
 0x4e6   :  { %5236 = vmatpush3.msra.mxu0 %v4459_v15 }
 0x4e7   :  { %5237 = vmatprep.subr.mxu0 %v5962_v4 }
 0x4e8   :  { %5238 = vmatpush3.msra.mxu0 %v4458_v16 }
 0x4e9   :  { %5239 = vmatprep.subr.mxu0 %v5962_v4 }
 0x4ea   :  { %5240 = vmatpush3.msra.mxu0 %v4457_v17 }
 0x4eb   :  { %5241 = vmatprep.subr.mxu0 %v5962_v4 }
 0x4ec   :  { %5242 = vmatpush3.msra.mxu0 %v4456_v18 }
 0x4ed   :  { %5243 = vmatprep.subr.mxu0 %v5962_v4 }
 0x4ee   :  { %5244 = vmatpush3.msra.mxu0 %v4455_v19 }
 0x4ef   :  { %5245 = vmatprep.subr.mxu0 %v5962_v4 }
 0x4f0   :  { %5246 = vmatpush3.msra.mxu0 %v4454_v20 }
 0x4f1   :  { %5247 = vmatprep.subr.mxu0 %v5962_v4 }
 0x4f2   :  { %5248 = vmatpush3.msra.mxu0 %v4453_v21 }
 0x4f3   :  { %5249 = vmatprep.subr.mxu0 %v5962_v4 }
 0x4f4   :  { %5250 = vmatpush3.msra.mxu0 %v4452_v22 }
 0x4f5   :  { %5251 = vmatprep.subr.mxu0 %v5962_v4 }
 0x4f6   :  { %5252 = vmatpush3.msra.mxu0 %v4451_v23 }
 0x4f7   :  { %5253 = vmatprep.subr.mxu0 %v5962_v4 }
 0x4f8   :  { %5254 = vmatpush3.msra.mxu0 %v4450_v24 }
 0x4f9   :  { %5255 = vmatprep.subr.mxu0 %v5962_v4 }
 0x4fa   :  { %5256 = vmatpush3.msra.mxu0 %v4449_v25 }
 0x4fb   :  { %5257 = vmatprep.subr.mxu0 %v5962_v4 }
 0x4fc   :  { %5258 = vmatpush3.msra.mxu0 %v4448_v26 }
 0x4fd   :  { %5259 = vmatprep.subr.mxu0 %v5962_v4 }
 0x4fe   :  { %5260 = vmatpush3.msra.mxu0 %v4447_v27 }
 0x59f   :  { %v868_v28 = vpop.f32.mrf.mxu0 }
 0x5a0   :  { %5262 = vmatmul.mubr.f32.vlgmr.msra.gmra.mxu0 %v868_v28 }
 0x5a1   :  { %v5228_v29 = vpop.f32.mrf.mxu0 }
 0x660   :  { %v955_v30 = vpop.f32.mrf.mxu0 }
 0x661   :  { %960 = vst.msk [vmem:[#allocation4 + $0xc] sm:$0xf] %vm308_vm2, %v955_v30 }
 0x662   :  { %v5263_v31 = vpop.f32.mrf.mxu0 }
 0x663   :  { %5933 = dma.done.wait [#allocation3], 256 }
 0x664   :  { %5934 = vsyncadd [#allocation3], 4294967040  ;;  %s4463_s23 = sld [smem:[#allocation6 + $0x5]] }
 0x66a   :  { %s4464_s24 = sshll.u32 %s4463_s23, 4 }
 0x66b   :  { %s966_s26 = scalar_lea.vmem %s7642_s3, %s4464_s24 }
 0x66c   :  { %v6371_v32 = vld [vmem:[%s966_s26] sm:$0xff]  ;;  %v6373_v33 = vld [vmem:[%s966_s26 + $0x8] sm:$0xff] }
 0x66d   :  { %1011 = vsyncadd [#allocation3 + $0x1], 256  ;;  %5264 = vmatprep.subr.mxu1 %v5962_v4  ;;  %5268 = vmatprep.mubr.msk.f32.mxu1 %vm5963_vm0, %v5962_v4  ;;  %v4465_v34 = vld [vmem:[%s7640_s1 + $0x10] sm:$0xf]  ;;  %v4482_v35 = vld [vmem:[%s7641_s2 + $0x278] sm:$0xff] }
 0x66e   :  { %5265 = vmatpush3.msra.mxu1 %v6289_v10  ;;  %v4481_v36 = vld [vmem:[%s7641_s2 + $0x270] sm:$0xff]  ;;  %v4480_v37 = vld [vmem:[%s7641_s2 + $0x268] sm:$0xff]  ;;  %v4479_v38 = vld [vmem:[%s7641_s2 + $0x260] sm:$0xff] }
 0x66f   :  { %5266 = vmatprep.subr.mxu1 %v5962_v4  ;;  %v4478_v39 = vld [vmem:[%s7641_s2 + $0x258] sm:$0xff]  ;;  %v4477_v40 = vld [vmem:[%s7641_s2 + $0x250] sm:$0xff]  ;;  %v4476_v41 = vld [vmem:[%s7641_s2 + $0x248] sm:$0xff] }
 0x670   :  { %5267 = vmatpush3.msra.mxu1 %v6287_v9  ;;  %v4475_v42 = vld [vmem:[%s7641_s2 + $0x240] sm:$0xff]  ;;  %v4474_v43 = vld [vmem:[%s7641_s2 + $0x238] sm:$0xff]  ;;  %v4473_v44 = vld [vmem:[%s7641_s2 + $0x230] sm:$0xff] }
 0x671   :  { %5269 = vmatmul.mubr.msk.f32.vlgmr.msra.gmra.mxu1 %vm148_vm1, %v4465_v34  ;;  %5271 = vmatprep.subr.mxu1 %v5962_v4  ;;  %v4472_v45 = vld [vmem:[%s7641_s2 + $0x228] sm:$0xff]  ;;  %v4471_v46 = vld [vmem:[%s7641_s2 + $0x220] sm:$0xff]  ;;  %v4470_v47 = vld [vmem:[%s7641_s2 + $0x218] sm:$0xff] }
 0x672   :  { %5272 = vmatpush3.msra.mxu1 %v4482_v35  ;;  %5303 = vmatprep.mubr.msk.f32.mxu1 %vm5963_vm0, %v5962_v4  ;;  %v4469_v48 = vld [vmem:[%s7641_s2 + $0x210] sm:$0xff]  ;;  %v4468_v49 = vld [vmem:[%s7641_s2 + $0x208] sm:$0xff]  ;;  %v4467_v50 = vld [vmem:[%s7641_s2 + $0x200] sm:$0xff] }
 0x673   :  { %5273 = vmatprep.subr.mxu1 %v5962_v4 }
 0x674   :  { %5274 = vmatpush3.msra.mxu1 %v4481_v36 }
 0x675   :  { %5275 = vmatprep.subr.mxu1 %v5962_v4 }
 0x676   :  { %5276 = vmatpush3.msra.mxu1 %v4480_v37 }
 0x677   :  { %5277 = vmatprep.subr.mxu1 %v5962_v4 }
 0x678   :  { %5278 = vmatpush3.msra.mxu1 %v4479_v38 }
 0x679   :  { %5279 = vmatprep.subr.mxu1 %v5962_v4 }
 0x67a   :  { %5280 = vmatpush3.msra.mxu1 %v4478_v39 }
 0x67b   :  { %5281 = vmatprep.subr.mxu1 %v5962_v4 }
 0x67c   :  { %5282 = vmatpush3.msra.mxu1 %v4477_v40 }
 0x67d   :  { %5283 = vmatprep.subr.mxu1 %v5962_v4 }
 0x67e   :  { %5284 = vmatpush3.msra.mxu1 %v4476_v41 }
 0x67f   :  { %5285 = vmatprep.subr.mxu1 %v5962_v4 }
 0x680   :  { %5286 = vmatpush3.msra.mxu1 %v4475_v42 }
 0x681   :  { %5287 = vmatprep.subr.mxu1 %v5962_v4 }
 0x682   :  { %5288 = vmatpush3.msra.mxu1 %v4474_v43 }
 0x683   :  { %5289 = vmatprep.subr.mxu1 %v5962_v4 }
 0x684   :  { %5290 = vmatpush3.msra.mxu1 %v4473_v44 }
 0x685   :  { %5291 = vmatprep.subr.mxu1 %v5962_v4 }
 0x686   :  { %5292 = vmatpush3.msra.mxu1 %v4472_v45 }
 0x687   :  { %5293 = vmatprep.subr.mxu1 %v5962_v4 }
 0x688   :  { %5294 = vmatpush3.msra.mxu1 %v4471_v46 }
 0x689   :  { %5295 = vmatprep.subr.mxu1 %v5962_v4 }
 0x68a   :  { %5296 = vmatpush3.msra.mxu1 %v4470_v47 }
 0x68b   :  { %5297 = vmatprep.subr.mxu1 %v5962_v4 }
 0x68c   :  { %5298 = vmatpush3.msra.mxu1 %v4469_v48 }
 0x68d   :  { %5299 = vmatprep.subr.mxu1 %v5962_v4 }
 0x68e   :  { %5300 = vmatpush3.msra.mxu1 %v4468_v49 }
 0x68f   :  { %5301 = vmatprep.subr.mxu1 %v5962_v4 }
 0x690   :  { %5302 = vmatpush3.msra.mxu1 %v4467_v50 }
 0x731   :  { %v1085_v51 = vpop.f32.mrf.mxu1 }
 0x732   :  { %5304 = vmatmul.mubr.f32.vlgmr.msra.gmra.mxu1 %v1085_v51 }
 0x733   :  { %v5270_v52 = vpop.f32.mrf.mxu1 }
 0x7f2   :  { %v1172_v53 = vpop.f32.mrf.mxu1 }
 0x7f3   :  { %1177 = vst.msk [vmem:[#allocation4 + $0x10] sm:$0xf] %vm308_vm2, %v1172_v53 }
 0x7f4   :  { %v5305_v54 = vpop.f32.mrf.mxu1 }
 0x7f5   :  { %5935 = dma.done.wait [#allocation3 + $0x1], 256 }
 0x7f6   :  { %5936 = vsyncadd [#allocation3 + $0x1], 4294967040  ;;  %s4483_s22 = sld [smem:[#allocation6 + $0x6]] }
 0x7fc   :  { %s4484_s23 = sshll.u32 %s4483_s22, 4 }
 0x7fd   :  { %s1183_s0 = scalar_lea.vmem %s7642_s3, %s4484_s23 }
 0x7fe   :  { %v6455_v55 = vld [vmem:[%s1183_s0] sm:$0xff]  ;;  %v6457_v56 = vld [vmem:[%s1183_s0 + $0x8] sm:$0xff] }
 0x7ff   :  { %1228 = vsyncadd [#allocation3], 256  ;;  %5306 = vmatprep.subr.mxu0 %v5962_v4  ;;  %5310 = vmatprep.mubr.msk.f32.mxu0 %vm5963_vm0, %v5962_v4  ;;  %v4485_v57 = vld [vmem:[%s7640_s1 + $0x14] sm:$0xf]  ;;  %v4502_v58 = vld [vmem:[%s7641_s2 + $0x2f8] sm:$0xff] }
 0x800   :  { %5307 = vmatpush3.msra.mxu0 %v6373_v33  ;;  %v4501_v59 = vld [vmem:[%s7641_s2 + $0x2f0] sm:$0xff]  ;;  %v4500_v60 = vld [vmem:[%s7641_s2 + $0x2e8] sm:$0xff]  ;;  %v4499_v61 = vld [vmem:[%s7641_s2 + $0x2e0] sm:$0xff] }
 0x801   :  { %5308 = vmatprep.subr.mxu0 %v5962_v4  ;;  %v4498_v62 = vld [vmem:[%s7641_s2 + $0x2d8] sm:$0xff]  ;;  %v4497_v63 = vld [vmem:[%s7641_s2 + $0x2d0] sm:$0xff]  ;;  %v4496_v0 = vld [vmem:[%s7641_s2 + $0x2c8] sm:$0xff] }
 0x802   :  { %5309 = vmatpush3.msra.mxu0 %v6371_v32  ;;  %v4495_v1 = vld [vmem:[%s7641_s2 + $0x2c0] sm:$0xff]  ;;  %v4494_v2 = vld [vmem:[%s7641_s2 + $0x2b8] sm:$0xff]  ;;  %v4493_v3 = vld [vmem:[%s7641_s2 + $0x2b0] sm:$0xff] }
 0x803   :  { %5311 = vmatmul.mubr.msk.f32.vlgmr.msra.gmra.mxu0 %vm148_vm1, %v4485_v57  ;;  %5313 = vmatprep.subr.mxu0 %v5962_v4  ;;  %v4492_v5 = vld [vmem:[%s7641_s2 + $0x2a8] sm:$0xff]  ;;  %v4491_v6 = vld [vmem:[%s7641_s2 + $0x2a0] sm:$0xff]  ;;  %v4490_v7 = vld [vmem:[%s7641_s2 + $0x298] sm:$0xff] }
 0x804   :  { %5314 = vmatpush3.msra.mxu0 %v4502_v58  ;;  %5345 = vmatprep.mubr.msk.f32.mxu0 %vm5963_vm0, %v5962_v4  ;;  %v4489_v8 = vld [vmem:[%s7641_s2 + $0x290] sm:$0xff]  ;;  %v4488_v9 = vld [vmem:[%s7641_s2 + $0x288] sm:$0xff]  ;;  %v4487_v10 = vld [vmem:[%s7641_s2 + $0x280] sm:$0xff] }
 0x805   :  { %5315 = vmatprep.subr.mxu0 %v5962_v4 }
 0x806   :  { %5316 = vmatpush3.msra.mxu0 %v4501_v59 }
 0x807   :  { %5317 = vmatprep.subr.mxu0 %v5962_v4 }
 0x808   :  { %5318 = vmatpush3.msra.mxu0 %v4500_v60 }
 0x809   :  { %5319 = vmatprep.subr.mxu0 %v5962_v4 }
 0x80a   :  { %5320 = vmatpush3.msra.mxu0 %v4499_v61 }
 0x80b   :  { %5321 = vmatprep.subr.mxu0 %v5962_v4 }
 0x80c   :  { %5322 = vmatpush3.msra.mxu0 %v4498_v62 }
 0x80d   :  { %5323 = vmatprep.subr.mxu0 %v5962_v4 }
 0x80e   :  { %5324 = vmatpush3.msra.mxu0 %v4497_v63 }
 0x80f   :  { %5325 = vmatprep.subr.mxu0 %v5962_v4 }
 0x810   :  { %5326 = vmatpush3.msra.mxu0 %v4496_v0 }
 0x811   :  { %5327 = vmatprep.subr.mxu0 %v5962_v4 }
 0x812   :  { %5328 = vmatpush3.msra.mxu0 %v4495_v1 }
 0x813   :  { %5329 = vmatprep.subr.mxu0 %v5962_v4 }
 0x814   :  { %5330 = vmatpush3.msra.mxu0 %v4494_v2 }
 0x815   :  { %5331 = vmatprep.subr.mxu0 %v5962_v4 }
 0x816   :  { %5332 = vmatpush3.msra.mxu0 %v4493_v3 }
 0x817   :  { %5333 = vmatprep.subr.mxu0 %v5962_v4 }
 0x818   :  { %5334 = vmatpush3.msra.mxu0 %v4492_v5 }
 0x819   :  { %5335 = vmatprep.subr.mxu0 %v5962_v4 }
 0x81a   :  { %5336 = vmatpush3.msra.mxu0 %v4491_v6 }
 0x81b   :  { %5337 = vmatprep.subr.mxu0 %v5962_v4 }
 0x81c   :  { %5338 = vmatpush3.msra.mxu0 %v4490_v7 }
 0x81d   :  { %5339 = vmatprep.subr.mxu0 %v5962_v4 }
 0x81e   :  { %5340 = vmatpush3.msra.mxu0 %v4489_v8 }
 0x81f   :  { %5341 = vmatprep.subr.mxu0 %v5962_v4 }
 0x820   :  { %5342 = vmatpush3.msra.mxu0 %v4488_v9 }
 0x821   :  { %5343 = vmatprep.subr.mxu0 %v5962_v4 }
 0x822   :  { %5344 = vmatpush3.msra.mxu0 %v4487_v10 }
 0x8c3   :  { %v1302_v11 = vpop.f32.mrf.mxu0 }
 0x8c4   :  { %5346 = vmatmul.mubr.f32.vlgmr.msra.gmra.mxu0 %v1302_v11 }
 0x8c5   :  { %v5312_v12 = vpop.f32.mrf.mxu0 }
 0x984   :  { %v1389_v13 = vpop.f32.mrf.mxu0 }
 0x985   :  { %1394 = vst.msk [vmem:[#allocation4 + $0x14] sm:$0xf] %vm308_vm2, %v1389_v13 }
 0x986   :  { %v5347_v14 = vpop.f32.mrf.mxu0 }
 0x987   :  { %5937 = dma.done.wait [#allocation3], 256 }
 0x988   :  { %5938 = vsyncadd [#allocation3], 4294967040  ;;  %s4503_s21 = sld [smem:[#allocation6 + $0x7]] }
 0x98e   :  { %s4504_s22 = sshll.u32 %s4503_s21, 4 }
 0x98f   :  { %s1400_s25 = scalar_lea.vmem %s7642_s3, %s4504_s22 }
 0x990   :  { %v6539_v15 = vld [vmem:[%s1400_s25] sm:$0xff]  ;;  %v6541_v16 = vld [vmem:[%s1400_s25 + $0x8] sm:$0xff] }
 0x991   :  { %1445 = vsyncadd [#allocation3 + $0x1], 256  ;;  %5348 = vmatprep.subr.mxu1 %v5962_v4  ;;  %5352 = vmatprep.mubr.msk.f32.mxu1 %vm5963_vm0, %v5962_v4  ;;  %v4505_v17 = vld [vmem:[%s7640_s1 + $0x18] sm:$0xf]  ;;  %v4521_v19 = vld [vmem:[%s7641_s2 + $0x370] sm:$0xff] }
 0x992   :  { %5349 = vmatpush3.msra.mxu1 %v6457_v56  ;;  %v4522_v18 = vld [vmem:[%s7641_s2 + $0x378] sm:$0xff]  ;;  %v4520_v20 = vld [vmem:[%s7641_s2 + $0x368] sm:$0xff]  ;;  %v4519_v21 = vld [vmem:[%s7641_s2 + $0x360] sm:$0xff] }
 0x993   :  { %5350 = vmatprep.subr.mxu1 %v5962_v4  ;;  %v4518_v22 = vld [vmem:[%s7641_s2 + $0x358] sm:$0xff]  ;;  %v4517_v23 = vld [vmem:[%s7641_s2 + $0x350] sm:$0xff]  ;;  %v4516_v24 = vld [vmem:[%s7641_s2 + $0x348] sm:$0xff] }
 0x994   :  { %5351 = vmatpush3.msra.mxu1 %v6455_v55  ;;  %v4515_v25 = vld [vmem:[%s7641_s2 + $0x340] sm:$0xff]  ;;  %v4514_v26 = vld [vmem:[%s7641_s2 + $0x338] sm:$0xff]  ;;  %v4513_v27 = vld [vmem:[%s7641_s2 + $0x330] sm:$0xff] }
 0x995   :  { %5353 = vmatmul.mubr.msk.f32.vlgmr.msra.gmra.mxu1 %vm148_vm1, %v4505_v17  ;;  %5355 = vmatprep.subr.mxu1 %v5962_v4  ;;  %v4512_v28 = vld [vmem:[%s7641_s2 + $0x328] sm:$0xff]  ;;  %v4511_v29 = vld [vmem:[%s7641_s2 + $0x320] sm:$0xff]  ;;  %v4510_v30 = vld [vmem:[%s7641_s2 + $0x318] sm:$0xff] }
 0x996   :  { %5356 = vmatpush3.msra.mxu1 %v4522_v18  ;;  %5387 = vmatprep.mubr.msk.f32.mxu1 %vm5963_vm0, %v5962_v4  ;;  %v4509_v31 = vld [vmem:[%s7641_s2 + $0x310] sm:$0xff]  ;;  %v4508_v32 = vld [vmem:[%s7641_s2 + $0x308] sm:$0xff]  ;;  %v4507_v33 = vld [vmem:[%s7641_s2 + $0x300] sm:$0xff] }
 0x997   :  { %5357 = vmatprep.subr.mxu1 %v5962_v4 }
 0x998   :  { %5358 = vmatpush3.msra.mxu1 %v4521_v19 }
 0x999   :  { %5359 = vmatprep.subr.mxu1 %v5962_v4 }
 0x99a   :  { %5360 = vmatpush3.msra.mxu1 %v4520_v20 }
 0x99b   :  { %5361 = vmatprep.subr.mxu1 %v5962_v4 }
 0x99c   :  { %5362 = vmatpush3.msra.mxu1 %v4519_v21 }
 0x99d   :  { %5363 = vmatprep.subr.mxu1 %v5962_v4 }
 0x99e   :  { %5364 = vmatpush3.msra.mxu1 %v4518_v22 }
 0x99f   :  { %5365 = vmatprep.subr.mxu1 %v5962_v4 }
 0x9a0   :  { %5366 = vmatpush3.msra.mxu1 %v4517_v23 }
 0x9a1   :  { %5367 = vmatprep.subr.mxu1 %v5962_v4 }
 0x9a2   :  { %5368 = vmatpush3.msra.mxu1 %v4516_v24 }
 0x9a3   :  { %5369 = vmatprep.subr.mxu1 %v5962_v4 }
 0x9a4   :  { %5370 = vmatpush3.msra.mxu1 %v4515_v25 }
 0x9a5   :  { %5371 = vmatprep.subr.mxu1 %v5962_v4 }
 0x9a6   :  { %5372 = vmatpush3.msra.mxu1 %v4514_v26 }
 0x9a7   :  { %5373 = vmatprep.subr.mxu1 %v5962_v4 }
 0x9a8   :  { %5374 = vmatpush3.msra.mxu1 %v4513_v27 }
 0x9a9   :  { %5375 = vmatprep.subr.mxu1 %v5962_v4 }
 0x9aa   :  { %5376 = vmatpush3.msra.mxu1 %v4512_v28 }
 0x9ab   :  { %5377 = vmatprep.subr.mxu1 %v5962_v4 }
 0x9ac   :  { %5378 = vmatpush3.msra.mxu1 %v4511_v29 }
 0x9ad   :  { %5379 = vmatprep.subr.mxu1 %v5962_v4 }
 0x9ae   :  { %5380 = vmatpush3.msra.mxu1 %v4510_v30 }
 0x9af   :  { %5381 = vmatprep.subr.mxu1 %v5962_v4 }
 0x9b0   :  { %5382 = vmatpush3.msra.mxu1 %v4509_v31 }
 0x9b1   :  { %5383 = vmatprep.subr.mxu1 %v5962_v4 }
 0x9b2   :  { %5384 = vmatpush3.msra.mxu1 %v4508_v32 }
 0x9b3   :  { %5385 = vmatprep.subr.mxu1 %v5962_v4 }
 0x9b4   :  { %5386 = vmatpush3.msra.mxu1 %v4507_v33 }
 0xa55   :  { %v1519_v34 = vpop.f32.mrf.mxu1 }
 0xa56   :  { %5388 = vmatmul.mubr.f32.vlgmr.msra.gmra.mxu1 %v1519_v34 }
 0xa57   :  { %v5354_v35 = vpop.f32.mrf.mxu1 }
 0xb16   :  { %v1606_v36 = vpop.f32.mrf.mxu1 }
 0xb17   :  { %1611 = vst.msk [vmem:[#allocation4 + $0x18] sm:$0xf] %vm308_vm2, %v1606_v36 }
 0xb18   :  { %v5389_v37 = vpop.f32.mrf.mxu1 }
 0xb19   :  { %5939 = dma.done.wait [#allocation3 + $0x1], 256 }
 0xb1a   :  { %5940 = vsyncadd [#allocation3 + $0x1], 4294967040  ;;  %s4523_s20 = sld [smem:[#allocation6 + $0x8]] }
 0xb20   :  { %s4524_s21 = sshll.u32 %s4523_s20, 4 }
 0xb21   :  { %s1617_s24 = scalar_lea.vmem %s7642_s3, %s4524_s21 }
 0xb22   :  { %v6623_v38 = vld [vmem:[%s1617_s24] sm:$0xff]  ;;  %v6625_v39 = vld [vmem:[%s1617_s24 + $0x8] sm:$0xff] }
 0xb23   :  { %1662 = vsyncadd [#allocation3], 256  ;;  %5390 = vmatprep.subr.mxu0 %v5962_v4  ;;  %5394 = vmatprep.mubr.msk.f32.mxu0 %vm5963_vm0, %v5962_v4  ;;  %v4525_v40 = vld [vmem:[%s7640_s1 + $0x1c] sm:$0xf]  ;;  %v4541_v42 = vld [vmem:[%s7641_s2 + $0x3f0] sm:$0xff] }
 0xb24   :  { %5391 = vmatpush3.msra.mxu0 %v6541_v16  ;;  %v4542_v41 = vld [vmem:[%s7641_s2 + $0x3f8] sm:$0xff]  ;;  %v4540_v43 = vld [vmem:[%s7641_s2 + $0x3e8] sm:$0xff]  ;;  %v4539_v44 = vld [vmem:[%s7641_s2 + $0x3e0] sm:$0xff] }
 0xb25   :  { %5392 = vmatprep.subr.mxu0 %v5962_v4  ;;  %v4538_v45 = vld [vmem:[%s7641_s2 + $0x3d8] sm:$0xff]  ;;  %v4537_v46 = vld [vmem:[%s7641_s2 + $0x3d0] sm:$0xff]  ;;  %v4536_v47 = vld [vmem:[%s7641_s2 + $0x3c8] sm:$0xff] }
 0xb26   :  { %5393 = vmatpush3.msra.mxu0 %v6539_v15  ;;  %v4535_v48 = vld [vmem:[%s7641_s2 + $0x3c0] sm:$0xff]  ;;  %v4534_v49 = vld [vmem:[%s7641_s2 + $0x3b8] sm:$0xff]  ;;  %v4533_v50 = vld [vmem:[%s7641_s2 + $0x3b0] sm:$0xff] }
 0xb27   :  { %5395 = vmatmul.mubr.msk.f32.vlgmr.msra.gmra.mxu0 %vm148_vm1, %v4525_v40  ;;  %5397 = vmatprep.subr.mxu0 %v5962_v4  ;;  %v4532_v51 = vld [vmem:[%s7641_s2 + $0x3a8] sm:$0xff]  ;;  %v4531_v52 = vld [vmem:[%s7641_s2 + $0x3a0] sm:$0xff]  ;;  %v4530_v53 = vld [vmem:[%s7641_s2 + $0x398] sm:$0xff] }
 0xb28   :  { %5398 = vmatpush3.msra.mxu0 %v4542_v41  ;;  %5429 = vmatprep.mubr.msk.f32.mxu0 %vm5963_vm0, %v5962_v4  ;;  %v4529_v54 = vld [vmem:[%s7641_s2 + $0x390] sm:$0xff]  ;;  %v4528_v55 = vld [vmem:[%s7641_s2 + $0x388] sm:$0xff]  ;;  %v4527_v56 = vld [vmem:[%s7641_s2 + $0x380] sm:$0xff] }
 0xb29   :  { %5399 = vmatprep.subr.mxu0 %v5962_v4 }
 0xb2a   :  { %5400 = vmatpush3.msra.mxu0 %v4541_v42 }
 0xb2b   :  { %5401 = vmatprep.subr.mxu0 %v5962_v4 }
 0xb2c   :  { %5402 = vmatpush3.msra.mxu0 %v4540_v43 }
 0xb2d   :  { %5403 = vmatprep.subr.mxu0 %v5962_v4 }
 0xb2e   :  { %5404 = vmatpush3.msra.mxu0 %v4539_v44 }
 0xb2f   :  { %5405 = vmatprep.subr.mxu0 %v5962_v4 }
 0xb30   :  { %5406 = vmatpush3.msra.mxu0 %v4538_v45 }
 0xb31   :  { %5407 = vmatprep.subr.mxu0 %v5962_v4 }
 0xb32   :  { %5408 = vmatpush3.msra.mxu0 %v4537_v46 }
 0xb33   :  { %5409 = vmatprep.subr.mxu0 %v5962_v4 }
 0xb34   :  { %5410 = vmatpush3.msra.mxu0 %v4536_v47 }
 0xb35   :  { %5411 = vmatprep.subr.mxu0 %v5962_v4 }
 0xb36   :  { %5412 = vmatpush3.msra.mxu0 %v4535_v48 }
 0xb37   :  { %5413 = vmatprep.subr.mxu0 %v5962_v4 }
 0xb38   :  { %5414 = vmatpush3.msra.mxu0 %v4534_v49 }
 0xb39   :  { %5415 = vmatprep.subr.mxu0 %v5962_v4 }
 0xb3a   :  { %5416 = vmatpush3.msra.mxu0 %v4533_v50 }
 0xb3b   :  { %5417 = vmatprep.subr.mxu0 %v5962_v4 }
 0xb3c   :  { %5418 = vmatpush3.msra.mxu0 %v4532_v51 }
 0xb3d   :  { %5419 = vmatprep.subr.mxu0 %v5962_v4 }
 0xb3e   :  { %5420 = vmatpush3.msra.mxu0 %v4531_v52 }
 0xb3f   :  { %5421 = vmatprep.subr.mxu0 %v5962_v4 }
 0xb40   :  { %5422 = vmatpush3.msra.mxu0 %v4530_v53 }
 0xb41   :  { %5423 = vmatprep.subr.mxu0 %v5962_v4 }
 0xb42   :  { %5424 = vmatpush3.msra.mxu0 %v4529_v54 }
 0xb43   :  { %5425 = vmatprep.subr.mxu0 %v5962_v4 }
 0xb44   :  { %5426 = vmatpush3.msra.mxu0 %v4528_v55 }
 0xb45   :  { %5427 = vmatprep.subr.mxu0 %v5962_v4 }
 0xb46   :  { %5428 = vmatpush3.msra.mxu0 %v4527_v56 }
 0xbe7   :  { %v1736_v57 = vpop.f32.mrf.mxu0 }
 0xbe8   :  { %5430 = vmatmul.mubr.f32.vlgmr.msra.gmra.mxu0 %v1736_v57 }
 0xbe9   :  { %v5396_v58 = vpop.f32.mrf.mxu0 }
 0xca8   :  { %v1823_v59 = vpop.f32.mrf.mxu0 }
 0xca9   :  { %1828 = vst.msk [vmem:[#allocation4 + $0x1c] sm:$0xf] %vm308_vm2, %v1823_v59 }
 0xcaa   :  { %v5431_v60 = vpop.f32.mrf.mxu0 }
 0xcab   :  { %5941 = dma.done.wait [#allocation3], 256 }
 0xcac   :  { %5942 = vsyncadd [#allocation3], 4294967040  ;;  %s4543_s19 = sld [smem:[#allocation6 + $0x9]] }
 0xcb2   :  { %s4544_s20 = sshll.u32 %s4543_s19, 4 }
 0xcb3   :  { %s1834_s23 = scalar_lea.vmem %s7642_s3, %s4544_s20 }
 0xcb4   :  { %v6707_v61 = vld [vmem:[%s1834_s23] sm:$0xff]  ;;  %v6709_v62 = vld [vmem:[%s1834_s23 + $0x8] sm:$0xff] }
 0xcb5   :  { %1879 = vsyncadd [#allocation3 + $0x1], 256  ;;  %5432 = vmatprep.subr.mxu1 %v5962_v4  ;;  %5436 = vmatprep.mubr.msk.f32.mxu1 %vm5963_vm0, %v5962_v4  ;;  %v4545_v63 = vld [vmem:[%s7640_s1 + $0x20] sm:$0xf]  ;;  %v4562_v0 = vld [vmem:[%s7641_s2 + $0x478] sm:$0xff] }
 0xcb6   :  { %5433 = vmatpush3.msra.mxu1 %v6625_v39  ;;  %v4561_v1 = vld [vmem:[%s7641_s2 + $0x470] sm:$0xff]  ;;  %v4560_v2 = vld [vmem:[%s7641_s2 + $0x468] sm:$0xff]  ;;  %v4559_v3 = vld [vmem:[%s7641_s2 + $0x460] sm:$0xff] }
 0xcb7   :  { %5434 = vmatprep.subr.mxu1 %v5962_v4  ;;  %v4558_v5 = vld [vmem:[%s7641_s2 + $0x458] sm:$0xff]  ;;  %v4557_v6 = vld [vmem:[%s7641_s2 + $0x450] sm:$0xff]  ;;  %v4556_v7 = vld [vmem:[%s7641_s2 + $0x448] sm:$0xff] }
 0xcb8   :  { %5435 = vmatpush3.msra.mxu1 %v6623_v38  ;;  %v4555_v8 = vld [vmem:[%s7641_s2 + $0x440] sm:$0xff]  ;;  %v4554_v9 = vld [vmem:[%s7641_s2 + $0x438] sm:$0xff]  ;;  %v4553_v10 = vld [vmem:[%s7641_s2 + $0x430] sm:$0xff] }
 0xcb9   :  { %5437 = vmatmul.mubr.msk.f32.vlgmr.msra.gmra.mxu1 %vm148_vm1, %v4545_v63  ;;  %5439 = vmatprep.subr.mxu1 %v5962_v4  ;;  %v4552_v11 = vld [vmem:[%s7641_s2 + $0x428] sm:$0xff]  ;;  %v4551_v12 = vld [vmem:[%s7641_s2 + $0x420] sm:$0xff]  ;;  %v4550_v13 = vld [vmem:[%s7641_s2 + $0x418] sm:$0xff] }
 0xcba   :  { %5440 = vmatpush3.msra.mxu1 %v4562_v0  ;;  %5471 = vmatprep.mubr.msk.f32.mxu1 %vm5963_vm0, %v5962_v4  ;;  %v4549_v14 = vld [vmem:[%s7641_s2 + $0x410] sm:$0xff]  ;;  %v4548_v15 = vld [vmem:[%s7641_s2 + $0x408] sm:$0xff]  ;;  %v4547_v16 = vld [vmem:[%s7641_s2 + $0x400] sm:$0xff] }
 0xcbb   :  { %5441 = vmatprep.subr.mxu1 %v5962_v4 }
 0xcbc   :  { %5442 = vmatpush3.msra.mxu1 %v4561_v1 }
 0xcbd   :  { %5443 = vmatprep.subr.mxu1 %v5962_v4 }
 0xcbe   :  { %5444 = vmatpush3.msra.mxu1 %v4560_v2 }
 0xcbf   :  { %5445 = vmatprep.subr.mxu1 %v5962_v4 }
 0xcc0   :  { %5446 = vmatpush3.msra.mxu1 %v4559_v3 }
 0xcc1   :  { %5447 = vmatprep.subr.mxu1 %v5962_v4 }
 0xcc2   :  { %5448 = vmatpush3.msra.mxu1 %v4558_v5 }
 0xcc3   :  { %5449 = vmatprep.subr.mxu1 %v5962_v4 }
 0xcc4   :  { %5450 = vmatpush3.msra.mxu1 %v4557_v6 }
 0xcc5   :  { %5451 = vmatprep.subr.mxu1 %v5962_v4 }
 0xcc6   :  { %5452 = vmatpush3.msra.mxu1 %v4556_v7 }
 0xcc7   :  { %5453 = vmatprep.subr.mxu1 %v5962_v4 }
 0xcc8   :  { %5454 = vmatpush3.msra.mxu1 %v4555_v8 }
 0xcc9   :  { %5455 = vmatprep.subr.mxu1 %v5962_v4 }
 0xcca   :  { %5456 = vmatpush3.msra.mxu1 %v4554_v9 }
 0xccb   :  { %5457 = vmatprep.subr.mxu1 %v5962_v4 }
 0xccc   :  { %5458 = vmatpush3.msra.mxu1 %v4553_v10 }
 0xccd   :  { %5459 = vmatprep.subr.mxu1 %v5962_v4 }
 0xcce   :  { %5460 = vmatpush3.msra.mxu1 %v4552_v11 }
 0xccf   :  { %5461 = vmatprep.subr.mxu1 %v5962_v4 }
 0xcd0   :  { %5462 = vmatpush3.msra.mxu1 %v4551_v12 }
 0xcd1   :  { %5463 = vmatprep.subr.mxu1 %v5962_v4 }
 0xcd2   :  { %5464 = vmatpush3.msra.mxu1 %v4550_v13 }
 0xcd3   :  { %5465 = vmatprep.subr.mxu1 %v5962_v4 }
 0xcd4   :  { %5466 = vmatpush3.msra.mxu1 %v4549_v14 }
 0xcd5   :  { %5467 = vmatprep.subr.mxu1 %v5962_v4 }
 0xcd6   :  { %5468 = vmatpush3.msra.mxu1 %v4548_v15 }
 0xcd7   :  { %5469 = vmatprep.subr.mxu1 %v5962_v4 }
 0xcd8   :  { %5470 = vmatpush3.msra.mxu1 %v4547_v16 }
 0xd79   :  { %v1953_v17 = vpop.f32.mrf.mxu1 }
 0xd7a   :  { %5472 = vmatmul.mubr.f32.vlgmr.msra.gmra.mxu1 %v1953_v17 }
 0xd7b   :  { %v5438_v18 = vpop.f32.mrf.mxu1 }
 0xe3a   :  { %v2040_v19 = vpop.f32.mrf.mxu1 }
 0xe3b   :  { %2045 = vst.msk [vmem:[#allocation4 + $0x20] sm:$0xf] %vm308_vm2, %v2040_v19 }
 0xe3c   :  { %v5473_v20 = vpop.f32.mrf.mxu1 }
 0xe3d   :  { %5943 = dma.done.wait [#allocation3 + $0x1], 256 }
 0xe3e   :  { %5944 = vsyncadd [#allocation3 + $0x1], 4294967040  ;;  %s4563_s18 = sld [smem:[#allocation6 + $0xa]] }
 0xe44   :  { %s4564_s19 = sshll.u32 %s4563_s18, 4 }
 0xe45   :  { %s2051_s22 = scalar_lea.vmem %s7642_s3, %s4564_s19 }
 0xe46   :  { %v6791_v21 = vld [vmem:[%s2051_s22] sm:$0xff]  ;;  %v6793_v22 = vld [vmem:[%s2051_s22 + $0x8] sm:$0xff] }
 0xe47   :  { %2096 = vsyncadd [#allocation3], 256  ;;  %5474 = vmatprep.subr.mxu0 %v5962_v4  ;;  %5478 = vmatprep.mubr.msk.f32.mxu0 %vm5963_vm0, %v5962_v4  ;;  %v4565_v23 = vld [vmem:[%s7640_s1 + $0x24] sm:$0xf]  ;;  %v4582_v24 = vld [vmem:[%s7641_s2 + $0x4f8] sm:$0xff] }
 0xe48   :  { %5475 = vmatpush3.msra.mxu0 %v6709_v62  ;;  %v4581_v25 = vld [vmem:[%s7641_s2 + $0x4f0] sm:$0xff]  ;;  %v4580_v26 = vld [vmem:[%s7641_s2 + $0x4e8] sm:$0xff]  ;;  %v4579_v27 = vld [vmem:[%s7641_s2 + $0x4e0] sm:$0xff] }
 0xe49   :  { %5476 = vmatprep.subr.mxu0 %v5962_v4  ;;  %v4578_v28 = vld [vmem:[%s7641_s2 + $0x4d8] sm:$0xff]  ;;  %v4577_v29 = vld [vmem:[%s7641_s2 + $0x4d0] sm:$0xff]  ;;  %v4576_v30 = vld [vmem:[%s7641_s2 + $0x4c8] sm:$0xff] }
 0xe4a   :  { %5477 = vmatpush3.msra.mxu0 %v6707_v61  ;;  %v4575_v31 = vld [vmem:[%s7641_s2 + $0x4c0] sm:$0xff]  ;;  %v4574_v32 = vld [vmem:[%s7641_s2 + $0x4b8] sm:$0xff]  ;;  %v4573_v33 = vld [vmem:[%s7641_s2 + $0x4b0] sm:$0xff] }
 0xe4b   :  { %5479 = vmatmul.mubr.msk.f32.vlgmr.msra.gmra.mxu0 %vm148_vm1, %v4565_v23  ;;  %5481 = vmatprep.subr.mxu0 %v5962_v4  ;;  %v4572_v34 = vld [vmem:[%s7641_s2 + $0x4a8] sm:$0xff]  ;;  %v4571_v35 = vld [vmem:[%s7641_s2 + $0x4a0] sm:$0xff]  ;;  %v4570_v36 = vld [vmem:[%s7641_s2 + $0x498] sm:$0xff] }
 0xe4c   :  { %5482 = vmatpush3.msra.mxu0 %v4582_v24  ;;  %5513 = vmatprep.mubr.msk.f32.mxu0 %vm5963_vm0, %v5962_v4  ;;  %v4569_v37 = vld [vmem:[%s7641_s2 + $0x490] sm:$0xff]  ;;  %v4568_v38 = vld [vmem:[%s7641_s2 + $0x488] sm:$0xff]  ;;  %v4567_v39 = vld [vmem:[%s7641_s2 + $0x480] sm:$0xff] }
 0xe4d   :  { %5483 = vmatprep.subr.mxu0 %v5962_v4 }
 0xe4e   :  { %5484 = vmatpush3.msra.mxu0 %v4581_v25 }
 0xe4f   :  { %5485 = vmatprep.subr.mxu0 %v5962_v4 }
 0xe50   :  { %5486 = vmatpush3.msra.mxu0 %v4580_v26 }
 0xe51   :  { %5487 = vmatprep.subr.mxu0 %v5962_v4 }
 0xe52   :  { %5488 = vmatpush3.msra.mxu0 %v4579_v27 }
 0xe53   :  { %5489 = vmatprep.subr.mxu0 %v5962_v4 }
 0xe54   :  { %5490 = vmatpush3.msra.mxu0 %v4578_v28 }
 0xe55   :  { %5491 = vmatprep.subr.mxu0 %v5962_v4 }
 0xe56   :  { %5492 = vmatpush3.msra.mxu0 %v4577_v29 }
 0xe57   :  { %5493 = vmatprep.subr.mxu0 %v5962_v4 }
 0xe58   :  { %5494 = vmatpush3.msra.mxu0 %v4576_v30 }
 0xe59   :  { %5495 = vmatprep.subr.mxu0 %v5962_v4 }
 0xe5a   :  { %5496 = vmatpush3.msra.mxu0 %v4575_v31 }
 0xe5b   :  { %5497 = vmatprep.subr.mxu0 %v5962_v4 }
 0xe5c   :  { %5498 = vmatpush3.msra.mxu0 %v4574_v32 }
 0xe5d   :  { %5499 = vmatprep.subr.mxu0 %v5962_v4 }
 0xe5e   :  { %5500 = vmatpush3.msra.mxu0 %v4573_v33 }
 0xe5f   :  { %5501 = vmatprep.subr.mxu0 %v5962_v4 }
 0xe60   :  { %5502 = vmatpush3.msra.mxu0 %v4572_v34 }
 0xe61   :  { %5503 = vmatprep.subr.mxu0 %v5962_v4 }
 0xe62   :  { %5504 = vmatpush3.msra.mxu0 %v4571_v35 }
 0xe63   :  { %5505 = vmatprep.subr.mxu0 %v5962_v4 }
 0xe64   :  { %5506 = vmatpush3.msra.mxu0 %v4570_v36 }
 0xe65   :  { %5507 = vmatprep.subr.mxu0 %v5962_v4 }
 0xe66   :  { %5508 = vmatpush3.msra.mxu0 %v4569_v37 }
 0xe67   :  { %5509 = vmatprep.subr.mxu0 %v5962_v4 }
 0xe68   :  { %5510 = vmatpush3.msra.mxu0 %v4568_v38 }
 0xe69   :  { %5511 = vmatprep.subr.mxu0 %v5962_v4 }
 0xe6a   :  { %5512 = vmatpush3.msra.mxu0 %v4567_v39 }
 0xf0b   :  { %v2170_v40 = vpop.f32.mrf.mxu0 }
 0xf0c   :  { %5514 = vmatmul.mubr.f32.vlgmr.msra.gmra.mxu0 %v2170_v40 }
 0xf0d   :  { %v5480_v41 = vpop.f32.mrf.mxu0 }
 0xfcc   :  { %v2257_v42 = vpop.f32.mrf.mxu0 }
 0xfcd   :  { %2262 = vst.msk [vmem:[#allocation4 + $0x24] sm:$0xf] %vm308_vm2, %v2257_v42 }
 0xfce   :  { %v5515_v43 = vpop.f32.mrf.mxu0 }
 0xfcf   :  { %5945 = dma.done.wait [#allocation3], 256 }
 0xfd0   :  { %5946 = vsyncadd [#allocation3], 4294967040  ;;  %s4583_s17 = sld [smem:[#allocation6 + $0xb]] }
 0xfd6   :  { %s4584_s18 = sshll.u32 %s4583_s17, 4 }
 0xfd7   :  { %s2268_s21 = scalar_lea.vmem %s7642_s3, %s4584_s18 }
 0xfd8   :  { %v6875_v44 = vld [vmem:[%s2268_s21] sm:$0xff]  ;;  %v6877_v45 = vld [vmem:[%s2268_s21 + $0x8] sm:$0xff] }
 0xfd9   :  { %2313 = vsyncadd [#allocation3 + $0x1], 256  ;;  %5516 = vmatprep.subr.mxu1 %v5962_v4  ;;  %5520 = vmatprep.mubr.msk.f32.mxu1 %vm5963_vm0, %v5962_v4  ;;  %v4585_v46 = vld [vmem:[%s7640_s1 + $0x28] sm:$0xf]  ;;  %v4602_v47 = vld [vmem:[%s7641_s2 + $0x578] sm:$0xff] }
 0xfda   :  { %5517 = vmatpush3.msra.mxu1 %v6793_v22  ;;  %v4601_v48 = vld [vmem:[%s7641_s2 + $0x570] sm:$0xff]  ;;  %v4600_v49 = vld [vmem:[%s7641_s2 + $0x568] sm:$0xff]  ;;  %v4599_v50 = vld [vmem:[%s7641_s2 + $0x560] sm:$0xff] }
 0xfdb   :  { %5518 = vmatprep.subr.mxu1 %v5962_v4  ;;  %v4598_v51 = vld [vmem:[%s7641_s2 + $0x558] sm:$0xff]  ;;  %v4597_v52 = vld [vmem:[%s7641_s2 + $0x550] sm:$0xff]  ;;  %v4596_v53 = vld [vmem:[%s7641_s2 + $0x548] sm:$0xff] }
 0xfdc   :  { %5519 = vmatpush3.msra.mxu1 %v6791_v21  ;;  %v4595_v54 = vld [vmem:[%s7641_s2 + $0x540] sm:$0xff]  ;;  %v4594_v55 = vld [vmem:[%s7641_s2 + $0x538] sm:$0xff]  ;;  %v4593_v56 = vld [vmem:[%s7641_s2 + $0x530] sm:$0xff] }
 0xfdd   :  { %5521 = vmatmul.mubr.msk.f32.vlgmr.msra.gmra.mxu1 %vm148_vm1, %v4585_v46  ;;  %5523 = vmatprep.subr.mxu1 %v5962_v4  ;;  %v4592_v57 = vld [vmem:[%s7641_s2 + $0x528] sm:$0xff]  ;;  %v4591_v58 = vld [vmem:[%s7641_s2 + $0x520] sm:$0xff]  ;;  %v4590_v59 = vld [vmem:[%s7641_s2 + $0x518] sm:$0xff] }
 0xfde   :  { %5524 = vmatpush3.msra.mxu1 %v4602_v47  ;;  %5555 = vmatprep.mubr.msk.f32.mxu1 %vm5963_vm0, %v5962_v4  ;;  %v4589_v60 = vld [vmem:[%s7641_s2 + $0x510] sm:$0xff]  ;;  %v4588_v61 = vld [vmem:[%s7641_s2 + $0x508] sm:$0xff]  ;;  %v4587_v62 = vld [vmem:[%s7641_s2 + $0x500] sm:$0xff] }
 0xfdf   :  { %5525 = vmatprep.subr.mxu1 %v5962_v4 }
 0xfe0   :  { %5526 = vmatpush3.msra.mxu1 %v4601_v48 }
 0xfe1   :  { %5527 = vmatprep.subr.mxu1 %v5962_v4 }
 0xfe2   :  { %5528 = vmatpush3.msra.mxu1 %v4600_v49 }
 0xfe3   :  { %5529 = vmatprep.subr.mxu1 %v5962_v4 }
 0xfe4   :  { %5530 = vmatpush3.msra.mxu1 %v4599_v50 }
 0xfe5   :  { %5531 = vmatprep.subr.mxu1 %v5962_v4 }
 0xfe6   :  { %5532 = vmatpush3.msra.mxu1 %v4598_v51 }
 0xfe7   :  { %5533 = vmatprep.subr.mxu1 %v5962_v4 }
 0xfe8   :  { %5534 = vmatpush3.msra.mxu1 %v4597_v52 }
 0xfe9   :  { %5535 = vmatprep.subr.mxu1 %v5962_v4 }
 0xfea   :  { %5536 = vmatpush3.msra.mxu1 %v4596_v53 }
 0xfeb   :  { %5537 = vmatprep.subr.mxu1 %v5962_v4 }
 0xfec   :  { %5538 = vmatpush3.msra.mxu1 %v4595_v54 }
 0xfed   :  { %5539 = vmatprep.subr.mxu1 %v5962_v4 }
 0xfee   :  { %5540 = vmatpush3.msra.mxu1 %v4594_v55 }
 0xfef   :  { %5541 = vmatprep.subr.mxu1 %v5962_v4 }
 0xff0   :  { %5542 = vmatpush3.msra.mxu1 %v4593_v56 }
 0xff1   :  { %5543 = vmatprep.subr.mxu1 %v5962_v4 }
 0xff2   :  { %5544 = vmatpush3.msra.mxu1 %v4592_v57 }
 0xff3   :  { %5545 = vmatprep.subr.mxu1 %v5962_v4 }
 0xff4   :  { %5546 = vmatpush3.msra.mxu1 %v4591_v58 }
 0xff5   :  { %5547 = vmatprep.subr.mxu1 %v5962_v4 }
 0xff6   :  { %5548 = vmatpush3.msra.mxu1 %v4590_v59 }
 0xff7   :  { %5549 = vmatprep.subr.mxu1 %v5962_v4 }
 0xff8   :  { %5550 = vmatpush3.msra.mxu1 %v4589_v60 }
 0xff9   :  { %5551 = vmatprep.subr.mxu1 %v5962_v4 }
 0xffa   :  { %5552 = vmatpush3.msra.mxu1 %v4588_v61 }
 0xffb   :  { %5553 = vmatprep.subr.mxu1 %v5962_v4 }
 0xffc   :  { %5554 = vmatpush3.msra.mxu1 %v4587_v62 }
0x109d   :  { %v2387_v63 = vpop.f32.mrf.mxu1 }
0x109e   :  { %5556 = vmatmul.mubr.f32.vlgmr.msra.gmra.mxu1 %v2387_v63 }
0x109f   :  { %v5522_v0 = vpop.f32.mrf.mxu1 }
0x115e   :  { %v2474_v1 = vpop.f32.mrf.mxu1 }
0x115f   :  { %2479 = vst.msk [vmem:[#allocation4 + $0x28] sm:$0xf] %vm308_vm2, %v2474_v1 }
0x1160   :  { %v5557_v2 = vpop.f32.mrf.mxu1 }
0x1161   :  { %5947 = dma.done.wait [#allocation3 + $0x1], 256 }
0x1162   :  { %5948 = vsyncadd [#allocation3 + $0x1], 4294967040  ;;  %s4603_s16 = sld [smem:[#allocation6 + $0xc]] }
0x1168   :  { %s4604_s17 = sshll.u32 %s4603_s16, 4 }
0x1169   :  { %s2485_s20 = scalar_lea.vmem %s7642_s3, %s4604_s17 }
0x116a   :  { %v6959_v3 = vld [vmem:[%s2485_s20] sm:$0xff]  ;;  %v6961_v5 = vld [vmem:[%s2485_s20 + $0x8] sm:$0xff] }
0x116b   :  { %2530 = vsyncadd [#allocation3], 256  ;;  %5558 = vmatprep.subr.mxu0 %v5962_v4  ;;  %5562 = vmatprep.mubr.msk.f32.mxu0 %vm5963_vm0, %v5962_v4  ;;  %v4605_v6 = vld [vmem:[%s7640_s1 + $0x2c] sm:$0xf]  ;;  %v4622_v7 = vld [vmem:[%s7641_s2 + $0x5f8] sm:$0xff] }
0x116c   :  { %5559 = vmatpush3.msra.mxu0 %v6877_v45  ;;  %v4621_v8 = vld [vmem:[%s7641_s2 + $0x5f0] sm:$0xff]  ;;  %v4620_v9 = vld [vmem:[%s7641_s2 + $0x5e8] sm:$0xff]  ;;  %v4619_v10 = vld [vmem:[%s7641_s2 + $0x5e0] sm:$0xff] }
0x116d   :  { %5560 = vmatprep.subr.mxu0 %v5962_v4  ;;  %v4618_v11 = vld [vmem:[%s7641_s2 + $0x5d8] sm:$0xff]  ;;  %v4617_v12 = vld [vmem:[%s7641_s2 + $0x5d0] sm:$0xff]  ;;  %v4616_v13 = vld [vmem:[%s7641_s2 + $0x5c8] sm:$0xff] }
0x116e   :  { %5561 = vmatpush3.msra.mxu0 %v6875_v44  ;;  %v4615_v14 = vld [vmem:[%s7641_s2 + $0x5c0] sm:$0xff]  ;;  %v4614_v15 = vld [vmem:[%s7641_s2 + $0x5b8] sm:$0xff]  ;;  %v4613_v16 = vld [vmem:[%s7641_s2 + $0x5b0] sm:$0xff] }
0x116f   :  { %5563 = vmatmul.mubr.msk.f32.vlgmr.msra.gmra.mxu0 %vm148_vm1, %v4605_v6  ;;  %5565 = vmatprep.subr.mxu0 %v5962_v4  ;;  %v4612_v17 = vld [vmem:[%s7641_s2 + $0x5a8] sm:$0xff]  ;;  %v4611_v18 = vld [vmem:[%s7641_s2 + $0x5a0] sm:$0xff]  ;;  %v4610_v19 = vld [vmem:[%s7641_s2 + $0x598] sm:$0xff] }
0x1170   :  { %5566 = vmatpush3.msra.mxu0 %v4622_v7  ;;  %5597 = vmatprep.mubr.msk.f32.mxu0 %vm5963_vm0, %v5962_v4  ;;  %v4609_v20 = vld [vmem:[%s7641_s2 + $0x590] sm:$0xff]  ;;  %v4608_v21 = vld [vmem:[%s7641_s2 + $0x588] sm:$0xff]  ;;  %v4607_v22 = vld [vmem:[%s7641_s2 + $0x580] sm:$0xff] }
0x1171   :  { %5567 = vmatprep.subr.mxu0 %v5962_v4 }
0x1172   :  { %5568 = vmatpush3.msra.mxu0 %v4621_v8 }
0x1173   :  { %5569 = vmatprep.subr.mxu0 %v5962_v4 }
0x1174   :  { %5570 = vmatpush3.msra.mxu0 %v4620_v9 }
0x1175   :  { %5571 = vmatprep.subr.mxu0 %v5962_v4 }
0x1176   :  { %5572 = vmatpush3.msra.mxu0 %v4619_v10 }
0x1177   :  { %5573 = vmatprep.subr.mxu0 %v5962_v4 }
0x1178   :  { %5574 = vmatpush3.msra.mxu0 %v4618_v11 }
0x1179   :  { %5575 = vmatprep.subr.mxu0 %v5962_v4 }
0x117a   :  { %5576 = vmatpush3.msra.mxu0 %v4617_v12 }
0x117b   :  { %5577 = vmatprep.subr.mxu0 %v5962_v4 }
0x117c   :  { %5578 = vmatpush3.msra.mxu0 %v4616_v13 }
0x117d   :  { %5579 = vmatprep.subr.mxu0 %v5962_v4 }
0x117e   :  { %5580 = vmatpush3.msra.mxu0 %v4615_v14 }
0x117f   :  { %5581 = vmatprep.subr.mxu0 %v5962_v4 }
0x1180   :  { %5582 = vmatpush3.msra.mxu0 %v4614_v15 }
0x1181   :  { %5583 = vmatprep.subr.mxu0 %v5962_v4 }
0x1182   :  { %5584 = vmatpush3.msra.mxu0 %v4613_v16 }
0x1183   :  { %5585 = vmatprep.subr.mxu0 %v5962_v4 }
0x1184   :  { %5586 = vmatpush3.msra.mxu0 %v4612_v17 }
0x1185   :  { %5587 = vmatprep.subr.mxu0 %v5962_v4 }
0x1186   :  { %5588 = vmatpush3.msra.mxu0 %v4611_v18 }
0x1187   :  { %5589 = vmatprep.subr.mxu0 %v5962_v4 }
0x1188   :  { %5590 = vmatpush3.msra.mxu0 %v4610_v19 }
0x1189   :  { %5591 = vmatprep.subr.mxu0 %v5962_v4 }
0x118a   :  { %5592 = vmatpush3.msra.mxu0 %v4609_v20 }
0x118b   :  { %5593 = vmatprep.subr.mxu0 %v5962_v4 }
0x118c   :  { %5594 = vmatpush3.msra.mxu0 %v4608_v21 }
0x118d   :  { %5595 = vmatprep.subr.mxu0 %v5962_v4 }
0x118e   :  { %5596 = vmatpush3.msra.mxu0 %v4607_v22 }
0x122f   :  { %v2604_v23 = vpop.f32.mrf.mxu0 }
0x1230   :  { %5598 = vmatmul.mubr.f32.vlgmr.msra.gmra.mxu0 %v2604_v23 }
0x1231   :  { %v5564_v24 = vpop.f32.mrf.mxu0 }
0x12f0   :  { %v2691_v25 = vpop.f32.mrf.mxu0 }
0x12f1   :  { %2696 = vst.msk [vmem:[#allocation4 + $0x2c] sm:$0xf] %vm308_vm2, %v2691_v25 }
0x12f2   :  { %v5599_v26 = vpop.f32.mrf.mxu0 }
0x12f3   :  { %5949 = dma.done.wait [#allocation3], 256 }
0x12f4   :  { %5950 = vsyncadd [#allocation3], 4294967040  ;;  %s4623_s15 = sld [smem:[#allocation6 + $0xd]] }
0x12fa   :  { %s4624_s16 = sshll.u32 %s4623_s15, 4 }
0x12fb   :  { %s2702_s19 = scalar_lea.vmem %s7642_s3, %s4624_s16 }
0x12fc   :  { %v7043_v27 = vld [vmem:[%s2702_s19] sm:$0xff]  ;;  %v7045_v28 = vld [vmem:[%s2702_s19 + $0x8] sm:$0xff] }
0x12fd   :  { %2747 = vsyncadd [#allocation3 + $0x1], 256  ;;  %5600 = vmatprep.subr.mxu1 %v5962_v4  ;;  %5604 = vmatprep.mubr.msk.f32.mxu1 %vm5963_vm0, %v5962_v4  ;;  %v4625_v29 = vld [vmem:[%s7640_s1 + $0x30] sm:$0xf]  ;;  %v4642_v30 = vld [vmem:[%s7641_s2 + $0x678] sm:$0xff] }
0x12fe   :  { %5601 = vmatpush3.msra.mxu1 %v6961_v5  ;;  %v4641_v31 = vld [vmem:[%s7641_s2 + $0x670] sm:$0xff]  ;;  %v4640_v32 = vld [vmem:[%s7641_s2 + $0x668] sm:$0xff]  ;;  %v4639_v33 = vld [vmem:[%s7641_s2 + $0x660] sm:$0xff] }
0x12ff   :  { %5602 = vmatprep.subr.mxu1 %v5962_v4  ;;  %v4638_v34 = vld [vmem:[%s7641_s2 + $0x658] sm:$0xff]  ;;  %v4637_v35 = vld [vmem:[%s7641_s2 + $0x650] sm:$0xff]  ;;  %v4636_v36 = vld [vmem:[%s7641_s2 + $0x648] sm:$0xff] }
0x1300   :  { %5603 = vmatpush3.msra.mxu1 %v6959_v3  ;;  %v4635_v37 = vld [vmem:[%s7641_s2 + $0x640] sm:$0xff]  ;;  %v4634_v38 = vld [vmem:[%s7641_s2 + $0x638] sm:$0xff]  ;;  %v4633_v39 = vld [vmem:[%s7641_s2 + $0x630] sm:$0xff] }
0x1301   :  { %5605 = vmatmul.mubr.msk.f32.vlgmr.msra.gmra.mxu1 %vm148_vm1, %v4625_v29  ;;  %5607 = vmatprep.subr.mxu1 %v5962_v4  ;;  %v4632_v40 = vld [vmem:[%s7641_s2 + $0x628] sm:$0xff]  ;;  %v4631_v41 = vld [vmem:[%s7641_s2 + $0x620] sm:$0xff]  ;;  %v4630_v42 = vld [vmem:[%s7641_s2 + $0x618] sm:$0xff] }
0x1302   :  { %5608 = vmatpush3.msra.mxu1 %v4642_v30  ;;  %5639 = vmatprep.mubr.msk.f32.mxu1 %vm5963_vm0, %v5962_v4  ;;  %v4629_v43 = vld [vmem:[%s7641_s2 + $0x610] sm:$0xff]  ;;  %v4628_v44 = vld [vmem:[%s7641_s2 + $0x608] sm:$0xff]  ;;  %v4627_v45 = vld [vmem:[%s7641_s2 + $0x600] sm:$0xff] }
0x1303   :  { %5609 = vmatprep.subr.mxu1 %v5962_v4 }
0x1304   :  { %5610 = vmatpush3.msra.mxu1 %v4641_v31 }
0x1305   :  { %5611 = vmatprep.subr.mxu1 %v5962_v4 }
0x1306   :  { %5612 = vmatpush3.msra.mxu1 %v4640_v32 }
0x1307   :  { %5613 = vmatprep.subr.mxu1 %v5962_v4 }
0x1308   :  { %5614 = vmatpush3.msra.mxu1 %v4639_v33 }
0x1309   :  { %5615 = vmatprep.subr.mxu1 %v5962_v4 }
0x130a   :  { %5616 = vmatpush3.msra.mxu1 %v4638_v34 }
0x130b   :  { %5617 = vmatprep.subr.mxu1 %v5962_v4 }
0x130c   :  { %5618 = vmatpush3.msra.mxu1 %v4637_v35 }
0x130d   :  { %5619 = vmatprep.subr.mxu1 %v5962_v4 }
0x130e   :  { %5620 = vmatpush3.msra.mxu1 %v4636_v36 }
0x130f   :  { %5621 = vmatprep.subr.mxu1 %v5962_v4 }
0x1310   :  { %5622 = vmatpush3.msra.mxu1 %v4635_v37 }
0x1311   :  { %5623 = vmatprep.subr.mxu1 %v5962_v4 }
0x1312   :  { %5624 = vmatpush3.msra.mxu1 %v4634_v38 }
0x1313   :  { %5625 = vmatprep.subr.mxu1 %v5962_v4 }
0x1314   :  { %5626 = vmatpush3.msra.mxu1 %v4633_v39 }
0x1315   :  { %5627 = vmatprep.subr.mxu1 %v5962_v4 }
0x1316   :  { %5628 = vmatpush3.msra.mxu1 %v4632_v40 }
0x1317   :  { %5629 = vmatprep.subr.mxu1 %v5962_v4 }
0x1318   :  { %5630 = vmatpush3.msra.mxu1 %v4631_v41 }
0x1319   :  { %5631 = vmatprep.subr.mxu1 %v5962_v4 }
0x131a   :  { %5632 = vmatpush3.msra.mxu1 %v4630_v42 }
0x131b   :  { %5633 = vmatprep.subr.mxu1 %v5962_v4 }
0x131c   :  { %5634 = vmatpush3.msra.mxu1 %v4629_v43 }
0x131d   :  { %5635 = vmatprep.subr.mxu1 %v5962_v4 }
0x131e   :  { %5636 = vmatpush3.msra.mxu1 %v4628_v44 }
0x131f   :  { %5637 = vmatprep.subr.mxu1 %v5962_v4 }
0x1320   :  { %5638 = vmatpush3.msra.mxu1 %v4627_v45 }
0x13c1   :  { %v2821_v46 = vpop.f32.mrf.mxu1 }
0x13c2   :  { %5640 = vmatmul.mubr.f32.vlgmr.msra.gmra.mxu1 %v2821_v46 }
0x13c3   :  { %v5606_v47 = vpop.f32.mrf.mxu1 }
0x1482   :  { %v2908_v48 = vpop.f32.mrf.mxu1 }
0x1483   :  { %2913 = vst.msk [vmem:[#allocation4 + $0x30] sm:$0xf] %vm308_vm2, %v2908_v48 }
0x1484   :  { %v5641_v49 = vpop.f32.mrf.mxu1 }
0x1485   :  { %5951 = dma.done.wait [#allocation3 + $0x1], 256 }
0x1486   :  { %5952 = vsyncadd [#allocation3 + $0x1], 4294967040  ;;  %s4643_s14 = sld [smem:[#allocation6 + $0xe]] }
0x148c   :  { %s4644_s15 = sshll.u32 %s4643_s14, 4 }
0x148d   :  { %s2919_s18 = scalar_lea.vmem %s7642_s3, %s4644_s15 }
0x148e   :  { %v7127_v50 = vld [vmem:[%s2919_s18] sm:$0xff]  ;;  %v7129_v51 = vld [vmem:[%s2919_s18 + $0x8] sm:$0xff] }
0x148f   :  { %2964 = vsyncadd [#allocation3], 256  ;;  %5642 = vmatprep.subr.mxu0 %v5962_v4  ;;  %5646 = vmatprep.mubr.msk.f32.mxu0 %vm5963_vm0, %v5962_v4  ;;  %v4645_v52 = vld [vmem:[%s7640_s1 + $0x34] sm:$0xf]  ;;  %v4662_v53 = vld [vmem:[%s7641_s2 + $0x6f8] sm:$0xff] }
0x1490   :  { %5643 = vmatpush3.msra.mxu0 %v7045_v28  ;;  %v4661_v54 = vld [vmem:[%s7641_s2 + $0x6f0] sm:$0xff]  ;;  %v4660_v55 = vld [vmem:[%s7641_s2 + $0x6e8] sm:$0xff]  ;;  %v4659_v56 = vld [vmem:[%s7641_s2 + $0x6e0] sm:$0xff] }
0x1491   :  { %5644 = vmatprep.subr.mxu0 %v5962_v4  ;;  %v4658_v57 = vld [vmem:[%s7641_s2 + $0x6d8] sm:$0xff]  ;;  %v4657_v58 = vld [vmem:[%s7641_s2 + $0x6d0] sm:$0xff]  ;;  %v4656_v59 = vld [vmem:[%s7641_s2 + $0x6c8] sm:$0xff] }
0x1492   :  { %5645 = vmatpush3.msra.mxu0 %v7043_v27  ;;  %v4655_v60 = vld [vmem:[%s7641_s2 + $0x6c0] sm:$0xff]  ;;  %v4654_v61 = vld [vmem:[%s7641_s2 + $0x6b8] sm:$0xff]  ;;  %v4653_v62 = vld [vmem:[%s7641_s2 + $0x6b0] sm:$0xff] }
0x1493   :  { %5647 = vmatmul.mubr.msk.f32.vlgmr.msra.gmra.mxu0 %vm148_vm1, %v4645_v52  ;;  %5649 = vmatprep.subr.mxu0 %v5962_v4  ;;  %v4652_v63 = vld [vmem:[%s7641_s2 + $0x6a8] sm:$0xff]  ;;  %v4651_v0 = vld [vmem:[%s7641_s2 + $0x6a0] sm:$0xff]  ;;  %v4650_v1 = vld [vmem:[%s7641_s2 + $0x698] sm:$0xff] }
0x1494   :  { %5650 = vmatpush3.msra.mxu0 %v4662_v53  ;;  %5681 = vmatprep.mubr.msk.f32.mxu0 %vm5963_vm0, %v5962_v4  ;;  %v4649_v2 = vld [vmem:[%s7641_s2 + $0x690] sm:$0xff]  ;;  %v4648_v3 = vld [vmem:[%s7641_s2 + $0x688] sm:$0xff]  ;;  %v4647_v5 = vld [vmem:[%s7641_s2 + $0x680] sm:$0xff] }
0x1495   :  { %5651 = vmatprep.subr.mxu0 %v5962_v4 }
0x1496   :  { %5652 = vmatpush3.msra.mxu0 %v4661_v54 }
0x1497   :  { %5653 = vmatprep.subr.mxu0 %v5962_v4 }
0x1498   :  { %5654 = vmatpush3.msra.mxu0 %v4660_v55 }
0x1499   :  { %5655 = vmatprep.subr.mxu0 %v5962_v4 }
0x149a   :  { %5656 = vmatpush3.msra.mxu0 %v4659_v56 }
0x149b   :  { %5657 = vmatprep.subr.mxu0 %v5962_v4 }
0x149c   :  { %5658 = vmatpush3.msra.mxu0 %v4658_v57 }
0x149d   :  { %5659 = vmatprep.subr.mxu0 %v5962_v4 }
0x149e   :  { %5660 = vmatpush3.msra.mxu0 %v4657_v58 }
0x149f   :  { %5661 = vmatprep.subr.mxu0 %v5962_v4 }
0x14a0   :  { %5662 = vmatpush3.msra.mxu0 %v4656_v59 }
0x14a1   :  { %5663 = vmatprep.subr.mxu0 %v5962_v4 }
0x14a2   :  { %5664 = vmatpush3.msra.mxu0 %v4655_v60 }
0x14a3   :  { %5665 = vmatprep.subr.mxu0 %v5962_v4 }
0x14a4   :  { %5666 = vmatpush3.msra.mxu0 %v4654_v61 }
0x14a5   :  { %5667 = vmatprep.subr.mxu0 %v5962_v4 }
0x14a6   :  { %5668 = vmatpush3.msra.mxu0 %v4653_v62 }
0x14a7   :  { %5669 = vmatprep.subr.mxu0 %v5962_v4 }
0x14a8   :  { %5670 = vmatpush3.msra.mxu0 %v4652_v63 }
0x14a9   :  { %5671 = vmatprep.subr.mxu0 %v5962_v4 }
0x14aa   :  { %5672 = vmatpush3.msra.mxu0 %v4651_v0 }
0x14ab   :  { %5673 = vmatprep.subr.mxu0 %v5962_v4 }
0x14ac   :  { %5674 = vmatpush3.msra.mxu0 %v4650_v1 }
0x14ad   :  { %5675 = vmatprep.subr.mxu0 %v5962_v4 }
0x14ae   :  { %5676 = vmatpush3.msra.mxu0 %v4649_v2 }
0x14af   :  { %5677 = vmatprep.subr.mxu0 %v5962_v4 }
0x14b0   :  { %5678 = vmatpush3.msra.mxu0 %v4648_v3 }
0x14b1   :  { %5679 = vmatprep.subr.mxu0 %v5962_v4 }
0x14b2   :  { %5680 = vmatpush3.msra.mxu0 %v4647_v5 }
0x1553   :  { %v3038_v6 = vpop.f32.mrf.mxu0 }
0x1554   :  { %5682 = vmatmul.mubr.f32.vlgmr.msra.gmra.mxu0 %v3038_v6 }
0x1555   :  { %v5648_v7 = vpop.f32.mrf.mxu0 }
0x1614   :  { %v3125_v8 = vpop.f32.mrf.mxu0 }
0x1615   :  { %3130 = vst.msk [vmem:[#allocation4 + $0x34] sm:$0xf] %vm308_vm2, %v3125_v8 }
0x1616   :  { %v5683_v9 = vpop.f32.mrf.mxu0 }
0x1617   :  { %5953 = dma.done.wait [#allocation3], 256 }
0x1618   :  { %5954 = vsyncadd [#allocation3], 4294967040  ;;  %s4663_s13 = sld [smem:[#allocation6 + $0xf]] }
0x161e   :  { %s4664_s14 = sshll.u32 %s4663_s13, 4 }
0x161f   :  { %s3136_s17 = scalar_lea.vmem %s7642_s3, %s4664_s14 }
0x1620   :  { %v7211_v10 = vld [vmem:[%s3136_s17] sm:$0xff]  ;;  %v7213_v11 = vld [vmem:[%s3136_s17 + $0x8] sm:$0xff] }
0x1621   :  { %3181 = vsyncadd [#allocation3 + $0x1], 256  ;;  %5684 = vmatprep.subr.mxu1 %v5962_v4  ;;  %5688 = vmatprep.mubr.msk.f32.mxu1 %vm5963_vm0, %v5962_v4  ;;  %v4665_v12 = vld [vmem:[%s7640_s1 + $0x38] sm:$0xf]  ;;  %v4681_v14 = vld [vmem:[%s7641_s2 + $0x770] sm:$0xff] }
0x1622   :  { %5685 = vmatpush3.msra.mxu1 %v7129_v51  ;;  %v4682_v13 = vld [vmem:[%s7641_s2 + $0x778] sm:$0xff]  ;;  %v4680_v15 = vld [vmem:[%s7641_s2 + $0x768] sm:$0xff]  ;;  %v4679_v16 = vld [vmem:[%s7641_s2 + $0x760] sm:$0xff] }
0x1623   :  { %5686 = vmatprep.subr.mxu1 %v5962_v4  ;;  %v4678_v17 = vld [vmem:[%s7641_s2 + $0x758] sm:$0xff]  ;;  %v4677_v18 = vld [vmem:[%s7641_s2 + $0x750] sm:$0xff]  ;;  %v4676_v19 = vld [vmem:[%s7641_s2 + $0x748] sm:$0xff] }
0x1624   :  { %5687 = vmatpush3.msra.mxu1 %v7127_v50  ;;  %v4675_v20 = vld [vmem:[%s7641_s2 + $0x740] sm:$0xff]  ;;  %v4674_v21 = vld [vmem:[%s7641_s2 + $0x738] sm:$0xff]  ;;  %v4673_v22 = vld [vmem:[%s7641_s2 + $0x730] sm:$0xff] }
0x1625   :  { %5689 = vmatmul.mubr.msk.f32.vlgmr.msra.gmra.mxu1 %vm148_vm1, %v4665_v12  ;;  %5691 = vmatprep.subr.mxu1 %v5962_v4  ;;  %v4672_v23 = vld [vmem:[%s7641_s2 + $0x728] sm:$0xff]  ;;  %v4671_v24 = vld [vmem:[%s7641_s2 + $0x720] sm:$0xff]  ;;  %v4670_v25 = vld [vmem:[%s7641_s2 + $0x718] sm:$0xff] }
0x1626   :  { %5692 = vmatpush3.msra.mxu1 %v4682_v13  ;;  %5723 = vmatprep.mubr.msk.f32.mxu1 %vm5963_vm0, %v5962_v4  ;;  %v4669_v26 = vld [vmem:[%s7641_s2 + $0x710] sm:$0xff]  ;;  %v4668_v27 = vld [vmem:[%s7641_s2 + $0x708] sm:$0xff]  ;;  %v4667_v28 = vld [vmem:[%s7641_s2 + $0x700] sm:$0xff] }
0x1627   :  { %5693 = vmatprep.subr.mxu1 %v5962_v4 }
0x1628   :  { %5694 = vmatpush3.msra.mxu1 %v4681_v14 }
0x1629   :  { %5695 = vmatprep.subr.mxu1 %v5962_v4 }
0x162a   :  { %5696 = vmatpush3.msra.mxu1 %v4680_v15 }
0x162b   :  { %5697 = vmatprep.subr.mxu1 %v5962_v4 }
0x162c   :  { %5698 = vmatpush3.msra.mxu1 %v4679_v16 }
0x162d   :  { %5699 = vmatprep.subr.mxu1 %v5962_v4 }
0x162e   :  { %5700 = vmatpush3.msra.mxu1 %v4678_v17 }
0x162f   :  { %5701 = vmatprep.subr.mxu1 %v5962_v4 }
0x1630   :  { %5702 = vmatpush3.msra.mxu1 %v4677_v18 }
0x1631   :  { %5703 = vmatprep.subr.mxu1 %v5962_v4 }
0x1632   :  { %5704 = vmatpush3.msra.mxu1 %v4676_v19 }
0x1633   :  { %5705 = vmatprep.subr.mxu1 %v5962_v4 }
0x1634   :  { %5706 = vmatpush3.msra.mxu1 %v4675_v20 }
0x1635   :  { %5707 = vmatprep.subr.mxu1 %v5962_v4 }
0x1636   :  { %5708 = vmatpush3.msra.mxu1 %v4674_v21 }
0x1637   :  { %5709 = vmatprep.subr.mxu1 %v5962_v4 }
0x1638   :  { %5710 = vmatpush3.msra.mxu1 %v4673_v22 }
0x1639   :  { %5711 = vmatprep.subr.mxu1 %v5962_v4 }
0x163a   :  { %5712 = vmatpush3.msra.mxu1 %v4672_v23 }
0x163b   :  { %5713 = vmatprep.subr.mxu1 %v5962_v4 }
0x163c   :  { %5714 = vmatpush3.msra.mxu1 %v4671_v24 }
0x163d   :  { %5715 = vmatprep.subr.mxu1 %v5962_v4 }
0x163e   :  { %5716 = vmatpush3.msra.mxu1 %v4670_v25 }
0x163f   :  { %5717 = vmatprep.subr.mxu1 %v5962_v4 }
0x1640   :  { %5718 = vmatpush3.msra.mxu1 %v4669_v26 }
0x1641   :  { %5719 = vmatprep.subr.mxu1 %v5962_v4 }
0x1642   :  { %5720 = vmatpush3.msra.mxu1 %v4668_v27 }
0x1643   :  { %5721 = vmatprep.subr.mxu1 %v5962_v4 }
0x1644   :  { %5722 = vmatpush3.msra.mxu1 %v4667_v28 }
0x16e5   :  { %v3255_v29 = vpop.f32.mrf.mxu1 }
0x16e6   :  { %5724 = vmatmul.mubr.f32.vlgmr.msra.gmra.mxu1 %v3255_v29 }
0x16e7   :  { %v5690_v30 = vpop.f32.mrf.mxu1 }
0x17a6   :  { %v3342_v31 = vpop.f32.mrf.mxu1 }
0x17a7   :  { %3347 = vst.msk [vmem:[#allocation4 + $0x38] sm:$0xf] %vm308_vm2, %v3342_v31 }
0x17a8   :  { %v5725_v32 = vpop.f32.mrf.mxu1 }
0x17a9   :  { %5955 = dma.done.wait [#allocation3 + $0x1], 256 }
0x17aa   :  { %5956 = vsyncadd [#allocation3 + $0x1], 4294967040  ;;  %5726 = vmatprep.subr.mxu0 %v5962_v4  ;;  %5730 = vmatprep.mubr.msk.f32.mxu0 %vm5963_vm0, %v5962_v4  ;;  %v4683_v33 = vld [vmem:[%s7640_s1 + $0x3c] sm:$0xf]  ;;  %v4699_v35 = vld [vmem:[%s7641_s2 + $0x7f0] sm:$0xff]  ;;  %vm3590_vm3 = vcmask 1041409  }
0x17ab   :  { %5727 = vmatpush3.msra.mxu0 %v7213_v11  ;;  %5768 = vmatprep.subr.bf16.mxu1 %v5962_v4  ;;  %v4700_v34 = vld [vmem:[%s7641_s2 + $0x7f8] sm:$0xff]  ;;  %v4698_v36 = vld [vmem:[%s7641_s2 + $0x7e8] sm:$0xff]  ;;  %v4697_v37 = vld [vmem:[%s7641_s2 + $0x7e0] sm:$0xff]  ;;  %vm3593_vm4 = vcmask 1042434   ;;  %vm3596_vm5 = vcmask 1043459   ;;  %vm3599_vm6 = vcmask 1044484  }
0x17ac   :  { %5728 = vmatprep.subr.mxu0 %v5962_v4  ;;  %5772 = vmatprep.mubr.msk.bf16.mxu1 %vm5963_vm0, %v5962_v4  ;;  %v4696_v38 = vld [vmem:[%s7641_s2 + $0x7d8] sm:$0xff]  ;;  %v4695_v39 = vld [vmem:[%s7641_s2 + $0x7d0] sm:$0xff]  ;;  %v4694_v40 = vld [vmem:[%s7641_s2 + $0x7c8] sm:$0xff]  ;;  %vm3602_vm7 = vcmask 1045509   ;;  %vm3605_vm8 = vcmask 1046534   ;;  %vm3608_vm9 = vcmask 1047559  }
0x17ad   :  { %5729 = vmatpush3.msra.mxu0 %v7211_v10  ;;  %v4693_v41 = vld [vmem:[%s7641_s2 + $0x7c0] sm:$0xff]  ;;  %v4692_v42 = vld [vmem:[%s7641_s2 + $0x7b8] sm:$0xff]  ;;  %v4691_v43 = vld [vmem:[%s7641_s2 + $0x7b0] sm:$0xff]  ;;  %vm3637_vm10 = vcmask 261120   ;;  %s5964_s22 = smov [#allocation7]  }
0x17ae   :  { %5733 = vmatprep.subr.mxu0 %v5962_v4  ;;  %5731 = vmatmul.mubr.msk.f32.vlgmr.msra.gmra.mxu0 %vm148_vm1, %v4683_v33  ;;  %v4690_v44 = vld [vmem:[%s7641_s2 + $0x7a8] sm:$0xff]  ;;  %v4689_v45 = vld [vmem:[%s7641_s2 + $0x7a0] sm:$0xff]  ;;  %v4688_v46 = vld [vmem:[%s7641_s2 + $0x798] sm:$0xff]  ;;  %s4199_s23 = sshll.u32 %s5964_s22, 4  ;;  %s4200_s23 = int_to_ptr.vmem [resolvable:$true] %s4199_s23 }
0x17af   :  { %5734 = vmatpush3.msra.mxu0 %v4700_v34  ;;  %5765 = vmatprep.mubr.msk.f32.mxu0 %vm5963_vm0, %v5962_v4  ;;  %v4687_v47 = vld [vmem:[%s7641_s2 + $0x790] sm:$0xff]  ;;  %v4686_v48 = vld [vmem:[%s7641_s2 + $0x788] sm:$0xff]  ;;  %v4685_v49 = vld [vmem:[%s7641_s2 + $0x780] sm:$0xff]  ;;  %p5888_p6 = scmp.lt.s32.totalorder %s4200_s23, %s4200_s23 }
0x17b0   :  { %5735 = vmatprep.subr.mxu0 %v5962_v4  ;;  %v5847_v52 = vld [vmem:[%s7643_s4 + $0x18] sm:$0xff]   ;;  %v5848_v53 = vld [vmem:[%s7643_s4 + $0x8] sm:$0xff]   ;;  %v5849_v54 = vld [vmem:[%s7643_s4 + $0x10] sm:$0xff]  }
0x17b1   :  { %5736 = vmatpush3.msra.mxu0 %v4699_v35  ;;  %5769 = vmatpush3.bf16.msra.mxu1 %v5847_v52  ;;  %v5850_v55 = vld [vmem:[%s7643_s4] sm:$0xff]   ;;  %v3518_v57 = vld [vmem:[#allocation4 + $0x8] sm:$0xf]  ;;  %v3519_v60 = vld [vmem:[#allocation4 + $0xc] sm:$0xf] }
0x17b2   :  { %5737 = vmatprep.subr.mxu0 %v5962_v4  ;;  %5770 = vmatprep.subr.bf16.mxu1 %v5962_v4  ;;  %v3516_v56 = vld [vmem:[#allocation4] sm:$0xf]  ;;  %v3517_v59 = vld [vmem:[#allocation4 + $0x4] sm:$0xf]  ;;  %v3534_v61 = vpack.c.bf16 %v3518_v57, %v3518_v57  ;;  %v3520_v63 = vld [vmem:[#allocation4 + $0x10] sm:$0xf]  ;;  %v3535_v1 = vpack.c.bf16 %v3519_v60, %v3519_v60 }
0x17b3   :  { %5738 = vmatpush3.msra.mxu0 %v4698_v36  ;;  %v3532_v58 = vpack.c.bf16 %v3516_v56, %v3516_v56  ;;  %v3533_v0 = vpack.c.bf16 %v3517_v59, %v3517_v59  ;;  %v3521_v5 = vld [vmem:[#allocation4 + $0x14] sm:$0xf]  ;;  %v3524_v6 = vld [vmem:[#allocation4 + $0x20] sm:$0xf]  ;;  %v3536_v7 = vpack.c.bf16 %v3520_v63, %v3520_v63  ;;  %v3522_v11 = vld [vmem:[#allocation4 + $0x18] sm:$0xf] }
0x17b4   :  { %5739 = vmatprep.subr.mxu0 %v5962_v4  ;;  %v7392_v2 = vunpack.c.l.b16 %v3534_v61  ;;  %v7397_v9 = vunpack.c.l.b16 %v3535_v1  ;;  %v3526_v12 = vld [vmem:[#allocation4 + $0x28] sm:$0xf]  ;;  %v3537_v13 = vpack.c.bf16 %v3521_v5, %v3521_v5  ;;  %v3540_v14 = vpack.c.bf16 %v3524_v6, %v3524_v6  ;;  %v3525_v16 = vld [vmem:[#allocation4 + $0x24] sm:$0xf]  ;;  %v3523_v19 = vld [vmem:[#allocation4 + $0x1c] sm:$0xf] }
0x17b5   :  { %5740 = vmatpush3.msra.mxu0 %v4697_v37  ;;  %5771 = vmatpush3.bf16.msra.mxu1 %v5849_v54  ;;  %v7390_v62 = vunpack.c.l.b16 %v3532_v58  ;;  %v7395_v8 = vunpack.c.l.b16 %v3533_v0  ;;  %v7402_v17 = vunpack.c.l.b16 %v3536_v7  ;;  %v3527_v20 = vld [vmem:[#allocation4 + $0x2c] sm:$0xf]  ;;  %v3538_v21 = vpack.c.bf16 %v3522_v11, %v3522_v11  ;;  %v3528_v24 = vld [vmem:[#allocation4 + $0x30] sm:$0xf]  ;;  %v3529_v29 = vld [vmem:[#allocation4 + $0x34] sm:$0xf] }
0x17b6   :  { %5741 = vmatprep.subr.mxu0 %v5962_v4  ;;  %5784 = vmatprep.subr.bf16.mxu1 %v5962_v4  ;;  %v3592_v10 = vrot.slane %v7392_v2, 7  ;;  %v3595_v18 = vrot.slane %v7397_v9, 6  ;;  %v3542_v22 = vpack.c.bf16 %v3526_v12, %v3526_v12  ;;  %v3541_v25 = vpack.c.bf16 %v3525_v16, %v3525_v16  ;;  %v3530_v30 = vld [vmem:[#allocation4 + $0x38] sm:$0xf] }
0x17b7   :  { %5742 = vmatpush3.msra.mxu0 %v4696_v38  ;;  %v3589_v3 = vrot.slane %v7390_v62, 1  ;;  %v7406_v26 = vunpack.c.l.b16 %v3537_v13  ;;  %v7408_v27 = vunpack.c.l.b16 %v3540_v14  ;;  %v3598_v28 = vrot.slane %v7402_v17, 5 }
0x17b8   :  { %5743 = vmatprep.subr.mxu0 %v5962_v4  ;;  %v3539_v31 = vpack.c.bf16 %v3523_v19, %v3523_v19  ;;  %v3543_v32 = vpack.c.bf16 %v3527_v20, %v3527_v20  ;;  %v3544_v34 = vpack.c.bf16 %v3528_v24, %v3528_v24  ;;  %v7412_v35 = vunpack.c.l.b16 %v3538_v21 }
0x17b9   :  { %5744 = vmatpush3.msra.mxu0 %v4695_v39  ;;  %v3591_v15 = vsel %vm3590_vm3, %v7395_v8, %v3589_v3  ;;  %v7414_v36 = vunpack.c.l.b16 %v3542_v22  ;;  %v3682_v37 = vrot.slane %v7395_v8, 7  ;;  %v3582_v38 = vunpack.c.l.b16 %v3541_v25 }
0x17ba   :  { %5745 = vmatprep.subr.mxu0 %v5962_v4  ;;  %v3594_v23 = vsel %vm3593_vm4, %v3592_v10, %v3591_v15  ;;  %v3601_v39 = vrot.slane %v7406_v26, 4  ;;  %v3686_v56 = vrot.slane %v7397_v9, 5  ;;  %v3688_v1 = vrot.slane %v7402_v17, 4 }
0x17bb   :  { %5746 = vmatpush3.msra.mxu0 %v4694_v40  ;;  %v3597_v33 = vsel %vm3596_vm5, %v3595_v18, %v3594_v23  ;;  %v3610_v40 = vrot.slane %v7408_v27, 1  ;;  %v3698_v0 = vrot.slane %v7414_v36, 6  ;;  %v3772_v5 = vrot.slane %v7390_v62, 2 }
0x17bc   :  { %5747 = vmatprep.subr.mxu0 %v5962_v4  ;;  %v3773_v6 = vrot.slane %v7395_v8, 1  ;;  %v3786_v11 = vrot.slane %v7408_v27, 2  ;;  %v3787_v12 = vrot.slane %v3582_v38, 1  ;;  %v3864_v13 = vrot.slane %v7390_v62, 3 }
0x17bd   :  { %5748 = vmatpush3.msra.mxu0 %v4693_v41  ;;  %v3545_v41 = vpack.c.bf16 %v3529_v29, %v3529_v29  ;;  %v3611_v52 = vsel %vm3590_vm3, %v3582_v38, %v3610_v40  ;;  %v3865_v14 = vrot.slane %v7395_v8, 2  ;;  %v3878_v15 = vrot.slane %v7408_v27, 3 }
0x17be   :  { %5749 = vmatprep.subr.mxu0 %v5962_v4  ;;  %v3879_v16 = vrot.slane %v3582_v38, 2  ;;  %v3690_v8 = vrot.slane %v7406_v26, 3  ;;  %v3774_v24 = vsel %vm3590_vm3, %v3773_v6, %v3772_v5  ;;  %v3867_v29 = vrot.slane %v7392_v2, 1 }
0x17bf   :  { %5750 = vmatpush3.msra.mxu0 %v4692_v42  ;;  %v3546_v42 = vpack.c.bf16 %v3530_v30, %v3530_v30  ;;  %v7433_v54 = vunpack.c.l.b16 %v3545_v41  ;;  %v3881_v30 = vrot.slane %v7414_v36, 1  ;;  %v3780_v6 = vrot.slane %v7406_v26, 5 }
0x17c0   :  { %5751 = vmatprep.subr.mxu0 %v5962_v4 }
0x17c1   :  { %5752 = vmatpush3.msra.mxu0 %v4691_v43  ;;  %v3600_v43 = vsel %vm3599_vm6, %v3598_v28, %v3597_v33  ;;  %v3618_v20 = vrot.slane %v7433_v54, 4  ;;  %v3788_v28 = vsel %vm3590_vm3, %v3787_v12, %v3786_v11  ;;  %v3866_v33 = vsel %vm3590_vm3, %v3865_v14, %v3864_v13 }
0x17c2   :  { %5753 = vmatprep.subr.mxu0 %v5962_v4  ;;  %v3886_v11 = vrot.slane %v7433_v54, 6 }
0x17c3   :  { %5754 = vmatpush3.msra.mxu0 %v4690_v44  ;;  %v7420_v44 = vunpack.c.l.b16 %v3539_v31 }
0x17c4   :  { %5755 = vmatprep.subr.mxu0 %v5962_v4 }
0x17c5   :  { %5756 = vmatpush3.msra.mxu0 %v4689_v45  ;;  %v7422_v45 = vunpack.c.l.b16 %v3543_v32  ;;  %v3607_v57 = vrot.slane %v7420_v44, 2  ;;  %v3776_v32 = vrot.slane %v7397_v9, 7 }
0x17c6   :  { %5757 = vmatprep.subr.mxu0 %v5962_v4 }
0x17c7   :  { %5758 = vmatpush3.msra.mxu0 %v4688_v46  ;;  %v3684_v46 = vrot.slane %v7392_v2, 6  ;;  %v3614_v58 = vrot.slane %v7422_v45, 6  ;;  %v3700_v10 = vrot.slane %v7422_v45, 5  ;;  %v3790_v40 = vrot.slane %v7422_v45, 7 }
0x17c8   :  { %5759 = vmatprep.subr.mxu0 %v5962_v4 }
0x17c9   :  { %5760 = vmatpush3.msra.mxu0 %v4687_v47  ;;  %v7425_v47 = vunpack.c.l.b16 %v3544_v34  ;;  %v3880_v34 = vsel %vm3590_vm3, %v3879_v16, %v3878_v15  ;;  %v3782_v16 = vrot.slane %v7412_v35, 4 }
0x17ca   :  { %5761 = vmatprep.subr.mxu0 %v5962_v4 }
0x17cb   :  { %5762 = vmatpush3.msra.mxu0 %v4686_v48  ;;  %v3604_v48 = vrot.slane %v7412_v35, 3  ;;  %v3616_v63 = vrot.slane %v7425_v47, 5 }
0x17cc   :  { %5763 = vmatprep.subr.mxu0 %v5962_v4 }
0x17cd   :  { %5764 = vmatpush3.msra.mxu0 %v4685_v49  ;;  %v3612_v49 = vrot.slane %v7414_v36, 7 }
0x17ce   :  { %5776 = vmatprep.subr.bf16.mxu0 %v5962_v4 }
0x17cf   :  { %v3613_v61 = vsel %vm3593_vm4, %v3612_v49, %v3611_v52  ;;  %v3778_v49 = vrot.slane %v7402_v17, 6 }
0x17d0   :  { %v3615_v23 = vsel %vm3596_vm5, %v3614_v58, %v3613_v61 }
0x186e   :  { %v3423_v50 = vpop.f32.mrf.mxu0 }
0x186f   :  { %5766 = vmatmul.mubr.f32.vlgmr.msra.gmra.mxu0 %v3423_v50  ;;  %v3683_v50 = vsel %vm3590_vm3, %v3682_v37, %v7390_v62  ;;  %v3617_v37 = vsel %vm3599_vm6, %v3616_v63, %v3615_v23 }
0x1870   :  { %v5732_v51 = vpop.f32.mrf.mxu0  ;;  %5780 = vmatprep.mubr.msk.bf16.mxu0 %vm5963_vm0, %v5962_v4  ;;  %5777 = vmatpush3.bf16.msra.mxu0 %v5848_v53  ;;  %v3696_v53 = vrot.slane %v3582_v38, 7  ;;  %v3685_v59 = vsel %vm3593_vm4, %v3684_v46, %v3683_v50  ;;  %v3692_v38 = vrot.slane %v7412_v35, 2  ;;  %v3789_v46 = vsel %vm3593_vm4, %v7414_v36, %v3788_v28 }
0x1871   :  { %5778 = vmatprep.subr.bf16.mxu0 %v5962_v4  ;;  %v3603_v51 = vsel %vm3602_vm7, %v3601_v39, %v3600_v43  ;;  %v3687_v7 = vsel %vm3596_vm5, %v3686_v56, %v3685_v59  ;;  %v3775_v39 = vsel %vm3593_vm4, %v7392_v2, %v3774_v24  ;;  %v3704_v43 = vrot.slane %v7433_v54, 3 }
0x1872   :  { %v3606_v60 = vsel %vm3605_vm8, %v3604_v48, %v3603_v51  ;;  %v3697_v3 = vsel %vm3590_vm3, %v3696_v53, %v7408_v27  ;;  %v3689_v62 = vsel %vm3599_vm6, %v3688_v1, %v3687_v7  ;;  %v3702_v27 = vrot.slane %v7425_v47, 4 }
0x1873   :  { %v7457_v19 = vsel %vm3608_vm9, %v3607_v57, %v3606_v60  ;;  %v3699_v22 = vsel %vm3593_vm4, %v3698_v0, %v3697_v3  ;;  %v3691_v41 = vsel %vm3602_vm7, %v3690_v8, %v3689_v62  ;;  %v3868_v50 = vsel %vm3593_vm4, %v3867_v29, %v3866_v33  ;;  %v5851_v62 = vld [vmem:[%s7643_s4 + $0x28] sm:$0xff]   ;;  %v5852_v8 = vld [vmem:[%s7643_s4 + $0x38] sm:$0xff]  }
0x1874   :  { %5779 = vmatpush3.bf16.msra.mxu0 %v5850_v55  ;;  %v7435_v55 = vunpack.c.l.b16 %v3546_v42  ;;  %v3701_v31 = vsel %vm3596_vm5, %v3700_v10, %v3699_v22  ;;  %v3694_v42 = vrot.slane %v7420_v44, 1  ;;  %v3882_v51 = vsel %vm3593_vm4, %v3881_v30, %v3880_v34 }
0x1875   :  { %5792 = vmatprep.subr.bf16.mxu0 %v5962_v4  ;;  %v3703_v48 = vsel %vm3599_vm6, %v3702_v27, %v3701_v31  ;;  %v3619_v2 = vsel %vm3602_vm7, %v3618_v20, %v3617_v37  ;;  %v3777_v53 = vsel %vm3596_vm5, %v3776_v32, %v3775_v39  ;;  %v3792_v56 = vrot.slane %v7425_v47, 6 }
0x1876   :  { %v3620_v21 = vrot.slane %v7435_v55, 3  ;;  %v3706_v52 = vrot.slane %v7435_v55, 2  ;;  %v3693_v36 = vsel %vm3605_vm8, %v3692_v38, %v3691_v41  ;;  %v3791_v58 = vsel %vm3596_vm5, %v3790_v40, %v3789_v46  ;;  %v5855_v41 = vld [vmem:[%s7645_s6 + $0x38] sm:$0xff]   ;;  %v5856_v46 = vld [vmem:[%s7645_s6 + $0x30] sm:$0xff]  }
0x1877   :  { %v3870_v59 = vrot.slane %v7402_v17, 7  ;;  %v3884_v60 = vrot.slane %v7425_v47, 7  ;;  %v3705_v63 = vsel %vm3602_vm7, %v3704_v43, %v3703_v48  ;;  %v3869_v0 = vsel %vm3596_vm5, %v7397_v9, %v3868_v50  ;;  %v5857_v48 = vld [vmem:[%s7645_s6 + $0x28] sm:$0xff]   ;;  %v5859_v50 = vld [vmem:[%s7645_s6 + $0x18] sm:$0xff]  }
0x1878   :  { %v3883_v1 = vsel %vm3596_vm5, %v7422_v45, %v3882_v51  ;;  %v3621_v3 = vsel %vm3605_vm8, %v3620_v21, %v3619_v2  ;;  %v3779_v5 = vsel %vm3599_vm6, %v3778_v49, %v3777_v53  ;;  %v3794_v7 = vrot.slane %v7433_v54, 5  ;;  %v5858_v49 = vld [vmem:[%s7645_s6 + $0x20] sm:$0xff]   ;;  %v5860_v51 = vld [vmem:[%s7645_s6 + $0x10] sm:$0xff]   ;;  %v5861_v2 = vld [vmem:[%s7645_s6 + $0x8] sm:$0xff]  }
0x1879   :  { %v3793_v47 = vsel %vm3599_vm6, %v3792_v56, %v3791_v58  ;;  %v3872_v10 = vrot.slane %v7406_v26, 6  ;;  %v3695_v9 = vsel %vm3608_vm9, %v3694_v42, %v3693_v36  ;;  %v3707_v12 = vsel %vm3605_vm8, %v3706_v52, %v3705_v63  ;;  %v5862_v52 = vld [vmem:[%s7645_s6] sm:$0xff]   ;;  %v5863_v53 = vld [vmem:[%s7647_s8 + $0x38] sm:$0xff]   ;;  %v5864_v56 = vld [vmem:[%s7647_s8 + $0x30] sm:$0xff]  }
0x187a   :  { %v3871_v45 = vsel %vm3599_vm6, %v3870_v59, %v3869_v0  ;;  %v3885_v13 = vsel %vm3599_vm6, %v3884_v60, %v3883_v1  ;;  %v3781_v20 = vsel %vm3602_vm7, %v3780_v6, %v3779_v5  ;;  %v3795_v26 = vsel %vm3602_vm7, %v3794_v7, %v3793_v47  ;;  %v5866_v36 = vld [vmem:[%s7647_s8 + $0x20] sm:$0xff]   ;;  %v5867_v58 = vld [vmem:[%s7647_s8 + $0x18] sm:$0xff]  }
0x187b   :  { %v3874_v54 = vrot.slane %v7412_v35, 5  ;;  %v3888_v21 = vrot.slane %v7435_v55, 5  ;;  %v3873_v24 = vsel %vm3602_vm7, %v3872_v10, %v3871_v45  ;;  %v3783_v28 = vsel %vm3605_vm8, %v3782_v16, %v3781_v20  ;;  %v4725_v45 = vld [vmem:[%s7644_s5] ss:$0 sm:$0xff] }
0x187c   :  { %v3876_v30 = vrot.slane %v7420_v44, 4 }
0x187d   :  { %v3875_v33 = vsel %vm3605_vm8, %v3874_v54, %v3873_v24  ;;  %v5870_v24 = vld [vmem:[%s7647_s8] sm:$0xff]  }
0x187e   :  { %v3877_v39 = vsel %vm3608_vm9, %v3876_v30, %v3875_v33 }
0x192f   :  { %v3510_v18 = vpop.f32.mrf.mxu0 }
0x1930   :  { %3515 = vst.msk [vmem:[#allocation4 + $0x3c] sm:$0xf] %vm308_vm2, %v3510_v18  ;;  %v3796_v18 = vrot.slane %v7435_v55, 4  ;;  %v3784_v55 = vrot.slane %v7420_v44, 3  ;;  %v5854_v44 = vld [vmem:[%s7643_s4 + $0x30] sm:$0xff]  }
0x1931   :  { %v5767_v25 = vpop.f32.mrf.mxu0 }
0x1932   :  { %v3887_v25 = vsel %vm3602_vm7, %v3886_v11, %v3885_v13  ;;  %v3797_v32 = vsel %vm3605_vm8, %v3796_v18, %v3795_v26  ;;  %v3785_v37 = vsel %vm3608_vm9, %v3784_v55, %v3783_v28 }
0x1933   :  { %v3889_v34 = vsel %vm3605_vm8, %v3888_v21, %v3887_v25  ;;  %v4726_v25 = vld [vmem:[%s7646_s7] ss:$0 sm:$0xff] }
0x1937   :  { %v3531_v57 = vld [vmem:[#allocation4 + $0x3c] sm:$0xf] }
0x1938   :  { %v3547_v61 = vpack.c.bf16 %v3531_v57, %v3531_v57  ;;  %v5865_v57 = vld [vmem:[%s7647_s8 + $0x28] sm:$0xff]  }
0x193a   :  { %v3588_v17 = vunpack.c.l.b16 %v3547_v61 }
0x193c   :  { %v3622_v14 = vrot.slane %v3588_v17, 2  ;;  %v3708_v15 = vrot.slane %v3588_v17, 1  ;;  %v3798_v29 = vrot.slane %v3588_v17, 3  ;;  %v3890_v31 = vrot.slane %v3588_v17, 4 }
0x193e   :  { %v3623_v22 = vsel %vm3608_vm9, %v3622_v14, %v3621_v3  ;;  %v3709_v23 = vsel %vm3608_vm9, %v3708_v15, %v3707_v12  ;;  %v3799_v38 = vsel %vm3608_vm9, %v3798_v29, %v3797_v32  ;;  %v3891_v40 = vsel %vm3608_vm9, %v3890_v31, %v3889_v34 }
0x193f   :  { %v3624_v35 = vpack.c.b16 %v3623_v22, %v7457_v19  ;;  %v3710_v27 = vpack.c.b16 %v3709_v23, %v3695_v9  ;;  %v5853_v19 = vld [vmem:[%s7643_s4 + $0x20] sm:$0xff]   ;;  %v3800_v42 = vpack.c.b16 %v3799_v38, %v3785_v37  ;;  %v3892_v43 = vpack.c.b16 %v3891_v40, %v3877_v39 }
0x1941   :  { %5773 = vmatmul.mubr.msk.bf16.vlgmr.msra.gmra.mxu1 %vm3637_vm10, %v3624_v35  ;;  %5781 = vmatmul.mubr.msk.bf16.vlgmr.msra.gmra.mxu0 %vm3637_vm10, %v3710_v27 }
0x1942   :  { %5785 = vmatpush3.bf16.msra.mxu1 %v5851_v62  ;;  %5793 = vmatpush3.bf16.msra.mxu0 %v5852_v8  ;;  %v5868_v62 = vld [vmem:[%s7647_s8 + $0x10] sm:$0xff]   ;;  %v5869_v8 = vld [vmem:[%s7647_s8 + $0x8] sm:$0xff]   ;;  %s5883_s8 = scalar_lea.vmem %s4200_s23, 256 }
0x1943   :  { %5786 = vmatprep.subr.bf16.mxu1 %v5962_v4  ;;  %5794 = vmatprep.subr.bf16.mxu0 %v5962_v4  ;;  %p5884_p5 = scmp.ne.s32.totalorder %s4200_s23, %s5883_s8  ;;  %p5889_p7 = scmp.lt.s32.totalorder %s5883_s8, %s5883_s8 }
0x1944   :  { %5788 = vmatprep.mubr.msk.bf16.mxu1 %vm5963_vm0, %v5962_v4  ;;  %5796 = vmatprep.mubr.msk.bf16.mxu0 %vm5963_vm0, %v5962_v4 }
0x1945   :  { %p5890_p8 = por %p5889_p7, %p5888_p6 }
0x1946   :  { %5787 = vmatpush3.bf16.msra.mxu1 %v5853_v19  ;;  %5795 = vmatpush3.bf16.msra.mxu0 %v5854_v44 }
0x1947   :  { %5800 = vmatprep.subr.bf16.mxu1 %v5962_v4  ;;  %5820 = vmatprep.subr.bf16.mxu0 %v5962_v4  ;;  %p5891_p9 = pnand %p5890_p8, %p5884_p5 }
0x1949   :  { %5789 = vmatmul.mubr.msk.bf16.vlgmr.msra.gmra.mxu1 %vm3637_vm10, %v3800_v42  ;;  %5797 = vmatmul.mubr.msk.bf16.vlgmr.msra.gmra.mxu0 %vm3637_vm10, %v3892_v43 }
0x194a   :  { %5801 = vmatpush3.bf16.msra.mxu1 %v5855_v41  ;;  %5816 = vmatprep.mubr.msk.bf16.mxu1 %vm5963_vm0, %v5962_v4 }
0x194b   :  { %5802 = vmatprep.subr.bf16.mxu1 %v5962_v4  ;;  %5836 = vmatprep.mubr.msk.bf16.mxu0 %vm5963_vm0, %v5962_v4 }
0x194c   :  { %5821 = vmatpush3.bf16.msra.mxu0 %v5863_v53 }
0x194d   :  { %5822 = vmatprep.subr.bf16.mxu0 %v5962_v4 }
0x194e   :  { %5803 = vmatpush3.bf16.msra.mxu1 %v5856_v46 }
0x194f   :  { %5804 = vmatprep.subr.bf16.mxu1 %v5962_v4 }
0x1950   :  { %5823 = vmatpush3.bf16.msra.mxu0 %v5864_v56 }
0x1951   :  { %5824 = vmatprep.subr.bf16.mxu0 %v5962_v4 }
0x1952   :  { %5805 = vmatpush3.bf16.msra.mxu1 %v5857_v48 }
0x1953   :  { %5806 = vmatprep.subr.bf16.mxu1 %v5962_v4 }
0x1954   :  { %5825 = vmatpush3.bf16.msra.mxu0 %v5865_v57 }
0x1955   :  { %5826 = vmatprep.subr.bf16.mxu0 %v5962_v4 }
0x1956   :  { %5807 = vmatpush3.bf16.msra.mxu1 %v5858_v49 }
0x1957   :  { %5808 = vmatprep.subr.bf16.mxu1 %v5962_v4 }
0x1958   :  { %5827 = vmatpush3.bf16.msra.mxu0 %v5866_v36 }
0x1959   :  { %5828 = vmatprep.subr.bf16.mxu0 %v5962_v4 }
0x195a   :  { %5809 = vmatpush3.bf16.msra.mxu1 %v5859_v50 }
0x195b   :  { %5810 = vmatprep.subr.bf16.mxu1 %v5962_v4 }
0x195c   :  { %5829 = vmatpush3.bf16.msra.mxu0 %v5867_v58 }
0x195d   :  { %5830 = vmatprep.subr.bf16.mxu0 %v5962_v4 }
0x195e   :  { %5811 = vmatpush3.bf16.msra.mxu1 %v5860_v51 }
0x195f   :  { %5812 = vmatprep.subr.bf16.mxu1 %v5962_v4 }
0x1960   :  { %5831 = vmatpush3.bf16.msra.mxu0 %v5868_v62 }
0x1961   :  { %5832 = vmatprep.subr.bf16.mxu0 %v5962_v4 }
0x1962   :  { %5813 = vmatpush3.bf16.msra.mxu1 %v5861_v2 }
0x1963   :  { %5814 = vmatprep.subr.bf16.mxu1 %v5962_v4 }
0x1964   :  { %5833 = vmatpush3.bf16.msra.mxu0 %v5869_v8 }
0x1965   :  { %5834 = vmatprep.subr.bf16.mxu0 %v5962_v4 }
0x1966   :  { %5815 = vmatpush3.bf16.msra.mxu1 %v5862_v52 }
0x1968   :  { %5835 = vmatpush3.bf16.msra.mxu0 %v5870_v24 }
0x1a01   :  { %v3675_v59 = vpop.f32.mrf.mxu1  ;;  %v3760_v60 = vpop.f32.mrf.mxu0 }
0x1a02   :  { %v3761_v6 = vadd.f32 %v3760_v60, %v3675_v59 }
0x1a03   :  { %v5774_v61 = vpop.f32.mrf.mxu1  ;;  %v5782_v63 = vpop.f32.mrf.mxu0 }
0x1a05   :  { %v3678_v0 = vpop.f32.mrf.mxu1  ;;  %v3763_v1 = vpop.f32.mrf.mxu0 }
0x1a06   :  { %v3764_v9 = vadd.f32 %v3763_v1, %v3678_v0 }
0x1a07   :  { %v5775_v3 = vpop.f32.mrf.mxu1  ;;  %v5783_v5 = vpop.f32.mrf.mxu0 }
0x1a09   :  { %v3850_v7 = vpop.f32.mrf.mxu1  ;;  %v3942_v17 = vpop.f32.mrf.mxu0 }
0x1a0a   :  { %v3857_v47 = vadd.f32 %v3850_v7, %v3761_v6 }
0x1a0b   :  { %v5790_v10 = vpop.f32.mrf.mxu1  ;;  %v5798_v11 = vpop.f32.mrf.mxu0 }
0x1a0c   :  { %v3949_v12 = vadd.f32 %v3942_v17, %v3857_v47 }
0x1a0d   :  { %v3853_v13 = vpop.f32.mrf.mxu1  ;;  %v3945_v14 = vpop.f32.mrf.mxu0 }
0x1a0e   :  { %v3858_v15 = vadd.f32 %v3853_v13, %v3764_v9  ;;  %v3958_v20 = vadd.f32 %v4725_v45, %v3949_v12 }
0x1a0f   :  { %v5791_v16 = vpop.f32.mrf.mxu1  ;;  %v5799_v18 = vpop.f32.mrf.mxu0 }
0x1a10   :  { %v3950_v26 = vadd.f32 %v3945_v14, %v3858_v15  ;;  %v3960_v21 = vmax.f32 %v3958_v20, 0.0 }
0x1a12   :  { %v3959_v54 = vadd.f32 %v4725_v45, %v3950_v26 }
0x1a14   :  { %v3961_v22 = vmax.f32 %v3959_v54, 0.0 }
0x1a16   :  { %v3962_v23 = vpack.c.bf16 %v3961_v22, %v3960_v21 }
0x1a18   :  { %5817 = vmatmul.mubr.bf16.vlgmr.msra.gmra.mxu1 %v3962_v23 }
0x1ad8   :  { %v4068_v35 = vpop.f32.mrf.mxu1 }
0x1ad9   :  { %v4069_v27 = vadd.f32 %v4726_v25, %v4068_v35 }
0x1ada   :  { %v5818_v55 = vpop.f32.mrf.mxu1 }
0x1adb   :  { %v4075_v28 = vmax.f32 %v4069_v27, 0.0 }
0x1adc   :  { %v4071_v29 = vpop.f32.mrf.mxu1 }
0x1add   :  { %4077 = vst [vmem:[#allocation7] sm:$0xff] %v4075_v28  ;;  %v4072_v30 = vadd.f32 %v4726_v25, %v4071_v29 }
0x1ade   :  { %v5819_v31 = vpop.f32.mrf.mxu1 }
0x1adf   :  { %v4076_v32 = vmax.f32 %v4072_v30, 0.0 }
0x1ae1   :  { %4078 = vst [vmem:[#allocation7 + $0x8] sm:$0xff] %v4076_v32  ;;  %v4079_v4 = vpack.c.bf16 %v4076_v32, %v4075_v28 }
0x1ae3   :  { %5837 = vmatmul.mubr.bf16.vlgmr.msra.gmra.mxu0 %v4079_v4 }
0x1ae4   :  { %5894 = shalt.err (!%p5891_p9)
}
0x1ae5   :  { %s5965_s7 = smov 128   ;;  %s5966_s2 = smov 8   ;;  %v4735_v33 = vld [vmem:[%s7648_s9] ss:$0 sm:$0xff] }
0x1ae6   :  { %4205 = dma.vmem_to_hbm [thread:$0]  %s4200_s23, 256, %s7649_s10, [#allocation8], %s5965_s7, %s5965_s7, %s5966_s2  }
0x1ae7   :  { %s5967_s27 = smov [#allocation9]  }
0x1ae8   :  { %s4211_s28 = sshll.u32 %s5967_s27, 4  ;;  %s4212_s28 = int_to_ptr.vmem [resolvable:$true] %s4211_s28 }
0x1ae9   :  { %s5903_s29 = scalar_lea.vmem %s4212_s28, 256  ;;  %p5908_p11 = scmp.lt.s32.totalorder %s4212_s28, %s4212_s28 }
0x1aea   :  { %p5904_p10 = scmp.ne.s32.totalorder %s4212_s28, %s5903_s29  ;;  %p5909_p12 = scmp.lt.s32.totalorder %s5903_s29, %s5903_s29 }
0x1aec   :  { %p5910_p13 = por %p5909_p12, %p5908_p11 }
0x1aee   :  { %p5911_p0 = pnand %p5910_p13, %p5904_p10 }
0x1ba3   :  { %v4185_v34 = vpop.f32.mrf.mxu0 }
0x1ba4   :  { %v4186_v19 = vadd.f32 %v4735_v33, %v4185_v34 }
0x1ba5   :  { %v5838_v44 = vpop.f32.mrf.mxu0 }
0x1ba6   :  { %4192 = vst [vmem:[#allocation9] sm:$0xff] %v4186_v19 }
0x1ba7   :  { %v4188_v37 = vpop.f32.mrf.mxu0 }
0x1ba8   :  { %v4189_v38 = vadd.f32 %v4735_v33, %v4188_v37 }
0x1ba9   :  { %v5839_v39 = vpop.f32.mrf.mxu0 }
0x1baa   :  { %4193 = vst [vmem:[#allocation9 + $0x8] sm:$0xff] %v4189_v38 }
0x1bab   :  { %5914 = shalt.err (!%p5911_p0)
}
0x1bac   :  { %4217 = dma.vmem_to_hbm [thread:$0]  %s4212_s28, 256, %s7650_s11, [#allocation10], %s5965_s7, %s5965_s7, %s5966_s2  }
0x1bad   :  { %5957 = dma.done.wait [#allocation8], 256  }
0x1bae   :  { %5958 = vsyncadd [#allocation8], 4294967040 }
0x1baf   :  { %5959 = dma.done.wait [#allocation10], 256  }
0x1bb0   :  { %5960 = vsyncadd [#allocation10], 4294967040 }
0x1bb1   :  { %4224 = vsyncpa [#allocation8], 1 }
0x1bb2   :  { %4225 = vsyncpa [#allocation10], 1 }
0x1bb3   :  { %4226 = vsyncmov [#allocation3] }
0x1bb6   :  { %s4227_s30 = vpop.sfrf %4226 }
0x1bb7   :  { %p4744_p1 = scmp.ne.s32.totalorder %s4227_s30, 0 }
0x1bb9   :  { %4231 = shalt.err (%p4744_p1)  }
0x1bba   :  { %4233 = vsyncmov [#allocation3 + $0x1] }
0x1bbd   :  { %s4234_s12 = vpop.sfrf %4233 }
0x1bbe   :  { %p4745_p2 = scmp.ne.s32.totalorder %s4234_s12, 0 }
0x1bc0   :  { %4238 = shalt.err (%p4745_p2)  }

</bundles_post_ra>
